<compile_context>
chip_gen: v7x
topology: tpu7x:2x2x1
jax: 0.10.0
libtpu: 0.0.40
codegen_flags: <defaults>
</compile_context>

<pallas_src>
import jax
import jax.numpy as jnp
from jax import lax
from jax.experimental import pallas as pl
from jax.experimental.pallas import tpu as pltpu

HIDDEN = 32
INPUT = 5
SEQ = 27
FC_IN = SEQ * HIDDEN          # 864
FC_OUT = 96
NB = 12                       # packed recurrent blocks along the lane axis
LANES = NB * HIDDEN           # 384
WALL = SEQ + 3                # wavefront steps (pipeline depth 4)
FC_LANES = 2 * FC_OUT         # 192: [acc_v | acc_h]
BT_MAX = 64                   # batch tile cap (keeps per-tile VMEM small)

VL_id = [0, 3, 5, 6, 7, 8, 14, 15, 16, 17, 23, 24, 25, 26, 32, 33, 34, 35, 41, 42, 43, 44, 50, 51, 52, 58, 57]
VR_id = [2, 4, 13, 12, 11, 10, 22, 21, 20, 19, 31, 30, 29, 28, 40, 39, 38, 37, 49, 48, 47, 46, 56, 55, 54, 60, 61]
HL_id = [0, 5, 14, 23, 32, 41, 50, 57, 3, 6, 15, 24, 33, 42, 51, 58, 7, 16, 25, 34, 43, 52, 8, 17, 26, 35, 44]
HR_id = [2, 13, 22, 31, 40, 49, 56, 61, 4, 12, 21, 30, 39, 48, 55, 60, 11, 20, 29, 38, 47, 54, 10, 19, 28, 37, 46]

# Lane-block layout of the packed state h (each block = 32 lanes):
#  0 hV0_L  1 hV0_R  2 hH0_L  3 hH0_R      (stage-1 layer-0, delay 0)
#  4 hV1_L  5 hV1_R  6 hH1_L  7 hH1_R      (stage-1 layer-1, delay 1)
#  8 hS2V0  9 hS2H0                        (stage-2 layer-0, delay 2)
# 10 hS2V1 11 hS2H1                        (stage-2 layer-1, delay 3)


# --------------------------------------------------------------------------
# Fused wavefront kernel: 30 wall steps, one wide matmul + tanh per step.
# --------------------------------------------------------------------------
def _bihdm_kernel(drive_ref, wbig_ref, fcw_ref, bv_ref, bh_ref, out_ref):
    f32 = jnp.float32
    bt = out_ref.shape[0]
    W = wbig_ref[...]                                   # (384, 384), lives in VMEM
    lane = lax.broadcasted_iota(jnp.int32, (bt, LANES), 1)
    # valid-lane threshold after wall step 0 / 1 / 2 (stages ordered by delay)
    fill_thr = (4 * HIDDEN, 8 * HIDDEN, 10 * HIDDEN)

    h = jnp.zeros((bt, LANES), f32)
    acc = jnp.zeros((bt, FC_LANES), f32)

    for w in range(WALL):                               # fully unrolled
        pre = drive_ref[w]                              # (bt, 384): x-proj (lanes <128) + biases
        if w > 0:
            pre = pre + jnp.dot(h, W, preferred_element_type=f32)
        h = jnp.tanh(pre)
        if w < 3:
            # Pipeline not yet filled: keep downstream hidden states at their
            # zero initial value so the first valid update sees h_prev = 0.
            h = jnp.where(lane < fill_thr[w], h, 0.0)
        else:
            # Stage-2 layer-1 output for time t = w - 3 is now in lanes [320:384);
            # fold fc_v / fc_h into a per-step blockdiag accumulation (off the
            # recurrent critical path -> fills MXU slack).
            t = w - 3
            acc = acc + jnp.dot(h[:, 10 * HIDDEN:],
                                fcw_ref[t * 2 * HIDDEN:(t + 1) * 2 * HIDDEN, :],
                                preferred_element_type=f32)

    out_ref[...] = (jnp.maximum(acc[:, :FC_OUT] + bv_ref[...], 0.0)
                    + jnp.maximum(acc[:, FC_OUT:] + bh_ref[...], 0.0))


def _round_up(n, m):
    return (n + m - 1) // m * m


def _block_matrix(entries):
    W = jnp.zeros((LANES, LANES), jnp.float32)
    for r, c, blk in entries:
        W = W.at[r * HIDDEN:(r + 1) * HIDDEN, c * HIDDEN:(c + 1) * HIDDEN].set(blk)
    return W


def bihdm_forward(x, p_vl, p_hl, p_v, wv, bv, wh, bh):
    HI = lax.Precision.HIGHEST
    B = x.shape[0]
    BT = min(BT_MAX, _round_up(B, 8))      # sublane-aligned batch tile
    Bp = _round_up(B, BT)

    vl = jnp.asarray(VL_id)
    vr = jnp.asarray(VR_id)
    hl = jnp.asarray(HL_id)
    hr = jnp.asarray(HR_id)

    # ---- Layout plumbing (off the serial path): electrode gather + hoisted
    #      layer-0 input projection, packed 4-paths-wide along the lane axis.
    proj = lambda ids, w: jnp.einsum('bts,sh->bth', x[:, ids, :], w, precision=HI)
    xpart = jnp.concatenate([proj(vl, p_vl["wih0"]), proj(vr, p_vl["wih0"]),
                             proj(hl, p_hl["wih0"]), proj(hr, p_hl["wih0"])],
                            axis=-1)                                   # (B, 27, 128)
    xpart = jnp.transpose(xpart, (1, 0, 2))                            # (27, B, 128)
    xpart = jnp.pad(xpart, ((0, WALL - SEQ), (0, Bp - B), (0, LANES - 4 * HIDDEN)))
    bias = jnp.concatenate([p_vl["b0"], p_vl["b0"], p_hl["b0"], p_hl["b0"],
                            p_vl["b1"], p_vl["b1"], p_hl["b1"], p_hl["b1"],
                            p_v["b0"], p_v["b0"], p_v["b1"], p_v["b1"]], axis=-1)  # (1, 384)
    drive = xpart + bias                                               # (WALL, Bp, 384)

    # ---- Packed recurrence matrix: block-diagonal whh blocks plus off-diagonal
    #      routing blocks (wih1 hand-offs and the (right - left) stage-2 feed).
    entries = [
        # hidden -> hidden (diagonal)
        (0, 0, p_vl["whh0"]), (1, 1, p_vl["whh0"]), (2, 2, p_hl["whh0"]), (3, 3, p_hl["whh0"]),
        (4, 4, p_vl["whh1"]), (5, 5, p_vl["whh1"]), (6, 6, p_hl["whh1"]), (7, 7, p_hl["whh1"]),
        (8, 8, p_v["whh0"]), (9, 9, p_v["whh0"]), (10, 10, p_v["whh1"]), (11, 11, p_v["whh1"]),
        # layer-0 output -> layer-1 input (wih1)
        (0, 4, p_vl["wih1"]), (1, 5, p_vl["wih1"]), (2, 6, p_hl["wih1"]), (3, 7, p_hl["wih1"]),
        # stage-1 layer-1 output -> stage-2 layer-0 input: (right - left) @ v_wih0
        (4, 8, -p_v["wih0"]), (5, 8, p_v["wih0"]), (6, 9, -p_v["wih0"]), (7, 9, p_v["wih0"]),
        # stage-2 layer-0 output -> stage-2 layer-1 input (v_wih1)
        (8, 10, p_v["wih1"]), (9, 11, p_v["wih1"]),
    ]
    wbig = _block_matrix(entries)

    # ---- Packed per-step fc weight: rows [t*64:(t+1)*64) = blockdiag(wv_t, wh_t).
    wv3 = wv.reshape(SEQ, HIDDEN, FC_OUT)
    wh3 = wh.reshape(SEQ, HIDDEN, FC_OUT)
    z = jnp.zeros_like(wv3)
    fcw = jnp.concatenate([jnp.concatenate([wv3, z], axis=-1),
                           jnp.concatenate([z, wh3], axis=-1)], axis=1)  # (27, 64, 192)
    fcw = fcw.reshape(SEQ * 2 * HIDDEN, FC_LANES)

    out = pl.pallas_call(
        _bihdm_kernel,
        out_shape=jax.ShapeDtypeStruct((Bp, FC_OUT), jnp.float32),
        grid=(Bp // BT,),
        in_specs=[
            pl.BlockSpec((WALL, BT, LANES), lambda i: (0, i, 0)),      # drive (batch-tiled)
            pl.BlockSpec((LANES, LANES), lambda i: (0, 0)),            # W_big (resident)
            pl.BlockSpec((SEQ * 2 * HIDDEN, FC_LANES), lambda i: (0, 0)),  # packed fc weight
            pl.BlockSpec((1, FC_OUT), lambda i: (0, 0)),               # bv
            pl.BlockSpec((1, FC_OUT), lambda i: (0, 0)),               # bh
        ],
        out_specs=pl.BlockSpec((BT, FC_OUT), lambda i: (i, 0)),
        compiler_params=pltpu.CompilerParams(
            dimension_semantics=("parallel",)),   # batch tiles shard across v7x's 2 TCs
    )(drive, wbig, fcw, bv, bh)
    return out[:B]


# --------------------------------------------------------------------------
# Pure-JAX reference (mirrors the PyTorch forward exactly) for validation.
# --------------------------------------------------------------------------
def _rnn2_ref(x_seq, p):
    HI = lax.Precision.HIGHEST

    def layer(xs, wih, whh, b):
        def step(h, xt):
            h = jnp.tanh(jnp.dot(xt, wih, precision=HI)
                         + jnp.dot(h, whh, precision=HI) + b)
            return h, h
        h0 = jnp.zeros((xs.shape[1], HIDDEN), jnp.float32)
        _, ys = lax.scan(step, h0, xs)
        return ys

    y0 = layer(x_seq, p["wih0"], p["whh0"], p["b0"])
    return layer(y0, p["wih1"], p["whh1"], p["b1"])


def bihdm_reference(x, p_vl, p_hl, p_v, wv, bv, wh, bh):
    HI = lax.Precision.HIGHEST
    B = x.shape[0]
    vl = jnp.asarray(VL_id)
    vr = jnp.asarray(VR_id)
    hl = jnp.asarray(HL_id)
    hr = jnp.asarray(HR_id)

    x_vl = _rnn2_ref(jnp.transpose(x[:, vl], (1, 0, 2)), p_vl)
    x_vr = _rnn2_ref(jnp.transpose(x[:, vr], (1, 0, 2)), p_vl)
    x_v = _rnn2_ref(x_vr - x_vl, p_v)
    x_hl = _rnn2_ref(jnp.transpose(x[:, hl], (1, 0, 2)), p_hl)
    x_hr = _rnn2_ref(jnp.transpose(x[:, hr], (1, 0, 2)), p_hl)
    x_h = _rnn2_ref(x_hr - x_hl, p_v)

    xv_flat = jnp.transpose(x_v, (1, 0, 2)).reshape(B, FC_IN)
    xh_flat = jnp.transpose(x_h, (1, 0, 2)).reshape(B, FC_IN)
    return (jnp.maximum(jnp.dot(xv_flat, wv, precision=HI) + bv, 0.0)
            + jnp.maximum(jnp.dot(xh_flat, wh, precision=HI) + bh, 0.0))


# --------------------------------------------------------------------------
# Deterministic parameter construction (PyTorch-default-style uniform init)
# --------------------------------------------------------------------------
def init_rnn_params(key, din, h):
    ks = jax.random.split(key, 8)
    bound = 1.0 / jnp.sqrt(jnp.float32(h))
    u = lambda kk, shape: jax.random.uniform(kk, shape, jnp.float32, -bound, bound)
    return {
        "wih0": u(ks[0], (din, h)),                   # = torch weight_ih_l0.T
        "whh0": u(ks[1], (h, h)),                     # = torch weight_hh_l0.T
        "b0": u(ks[2], (1, h)) + u(ks[3], (1, h)),    # bias_ih_l0 + bias_hh_l0
        "wih1": u(ks[4], (h, h)),                     # = torch weight_ih_l1.T
        "whh1": u(ks[5], (h, h)),                     # = torch weight_hh_l1.T
        "b1": u(ks[6], (1, h)) + u(ks[7], (1, h)),    # bias_ih_l1 + bias_hh_l1
    }


def init_linear_params(key, din, dout):
    k1, k2 = jax.random.split(key)
    bound = 1.0 / jnp.sqrt(jnp.float32(din))
    w = jax.random.uniform(k1, (din, dout), jnp.float32, -bound, bound)
    b = jax.random.uniform(k2, (1, dout), jnp.float32, -bound, bound)
    return w, b


if __name__ == "__main__":
    key = jax.random.PRNGKey(0)
    kx, kvl, khl, kv, kfv, kfh = jax.random.split(key, 6)

    B = 4
    x = jax.random.normal(kx, (B, 62, INPUT), jnp.float32)

    p_vl = init_rnn_params(kvl, INPUT, HIDDEN)   # RNN_VL (also drives the VR path)
    p_hl = init_rnn_params(khl, INPUT, HIDDEN)   # RNN_HL (also drives the HR path)
    p_v = init_rnn_params(kv, HIDDEN, HIDDEN)    # RNN_V  (drives both x_v and x_h)
    wv, bv = init_linear_params(kfv, FC_IN, FC_OUT)   # fc_v
    wh, bh = init_linear_params(kfh, FC_IN, FC_OUT)   # fc_h

    fwd = jax.jit(bihdm_forward)
    out = fwd(x, p_vl, p_hl, p_v, wv, bv, wh, bh)
    jax.block_until_ready(out)

    assert out.shape == (B, FC_OUT), out.shape
    assert out.dtype == jnp.float32

    ref = jax.jit(bihdm_reference)(x, p_vl, p_hl, p_v, wv, bv, wh, bh)
    # Reference pins Precision.HIGHEST; kernel dots use default MXU precision,
    # so allow a documented (loose) tolerance over the 30-step tanh recurrence.
    max_err = float(jnp.max(jnp.abs(out - ref)))
    assert max_err < 1e-2, f"kernel/reference mismatch: max abs err = {max_err}"

    print("KERNEL_OK")
</pallas_src>

<mosaic_0001>
module attributes {stable_mosaic.version = 11 : i64} {
  func.func @_bihdm_kernel(%arg0: i32, %arg1: memref<30x8x384xf32, #tpu.memory_space<vmem>>, %arg2: memref<384x384xf32, #tpu.memory_space<vmem>>, %arg3: memref<1728x192xf32, #tpu.memory_space<vmem>>, %arg4: memref<1x96xf32, #tpu.memory_space<vmem>>, %arg5: memref<1x96xf32, #tpu.memory_space<vmem>>, %arg6: memref<8x96xf32, #tpu.memory_space<vmem>>) attributes {dimension_semantics = [#tpu.dimension_semantics<parallel>], iteration_bounds = array<i64: 1>, scalar_prefetch = 0 : i64, scratch_operands = 0 : i64, tpu.core_type = #tpu.core_type<tc>, window_params = [{transform_indices = @transform_0, window_bounds = array<i64: 30, 8, 384>}, {pipeline_mode = #tpu.pipeline_mode<synchronous>, transform_indices = @transform_1, window_bounds = array<i64: 384, 384>}, {pipeline_mode = #tpu.pipeline_mode<synchronous>, transform_indices = @transform_2, window_bounds = array<i64: 1728, 192>}, {pipeline_mode = #tpu.pipeline_mode<synchronous>, transform_indices = @transform_3, window_bounds = array<i64: 1, 96>}, {pipeline_mode = #tpu.pipeline_mode<synchronous>, transform_indices = @transform_4, window_bounds = array<i64: 1, 96>}, {transform_indices = @transform_5, window_bounds = array<i64: 8, 96>}]} {
    %c0 = arith.constant 0 : index
    %c0_0 = arith.constant 0 : index
    %0 = vector.load %arg2[%c0, %c0_0] : memref<384x384xf32, #tpu.memory_space<vmem>>, vector<384x384xf32>
    %1 = tpu.iota {dimensions = array<i32: 1>} : vector<8x384xi32>
    %cst = arith.constant 0.000000e+00 : f32
    %2 = vector.broadcast %cst : f32 to vector<8x192xf32>
    %c0_1 = arith.constant 0 : index
    %c0_2 = arith.constant 0 : index
    %c0_3 = arith.constant 0 : index
    %3 = vector.load %arg1[%c0_1, %c0_2, %c0_3] : memref<30x8x384xf32, #tpu.memory_space<vmem>>, vector<1x8x384xf32>
    %4 = vector.shape_cast %3 : vector<1x8x384xf32> to vector<8x384xf32>
    %5 = math.tanh %4 : vector<8x384xf32>
    %c128_i32 = arith.constant 128 : i32
    %6 = vector.broadcast %c128_i32 : i32 to vector<8x384xi32>
    %7 = arith.cmpi slt, %1, %6 : vector<8x384xi32>
    %cst_4 = arith.constant 0.000000e+00 : f32
    %8 = vector.broadcast %cst_4 : f32 to vector<8x384xf32>
    %9 = arith.select %7, %5, %8 : vector<8x384xi1>, vector<8x384xf32>
    %c1 = arith.constant 1 : index
    %c0_5 = arith.constant 0 : index
    %c0_6 = arith.constant 0 : index
    %10 = vector.load %arg1[%c1, %c0_5, %c0_6] : memref<30x8x384xf32, #tpu.memory_space<vmem>>, vector<1x8x384xf32>
    %11 = vector.shape_cast %10 : vector<1x8x384xf32> to vector<8x384xf32>
    %cst_7 = arith.constant dense<0.000000e+00> : vector<8x384xf32>
    %12 = tpu.matmul %9, %0, %cst_7 {dimension_numbers = #tpu.dot_dimension_numbers<[1], [0], [0], [1], [0, 0, 1, 1], [], []>} : vector<8x384xf32>, vector<384x384xf32>, vector<8x384xf32> -> vector<8x384xf32>
    %13 = arith.addf %11, %12 : vector<8x384xf32>
    %14 = math.tanh %13 : vector<8x384xf32>
    %c256_i32 = arith.constant 256 : i32
    %15 = vector.broadcast %c256_i32 : i32 to vector<8x384xi32>
    %16 = arith.cmpi slt, %1, %15 : vector<8x384xi32>
    %cst_8 = arith.constant 0.000000e+00 : f32
    %17 = vector.broadcast %cst_8 : f32 to vector<8x384xf32>
    %18 = arith.select %16, %14, %17 : vector<8x384xi1>, vector<8x384xf32>
    %c2 = arith.constant 2 : index
    %c0_9 = arith.constant 0 : index
    %c0_10 = arith.constant 0 : index
    %19 = vector.load %arg1[%c2, %c0_9, %c0_10] : memref<30x8x384xf32, #tpu.memory_space<vmem>>, vector<1x8x384xf32>
    %20 = vector.shape_cast %19 : vector<1x8x384xf32> to vector<8x384xf32>
    %cst_11 = arith.constant dense<0.000000e+00> : vector<8x384xf32>
    %21 = tpu.matmul %18, %0, %cst_11 {dimension_numbers = #tpu.dot_dimension_numbers<[1], [0], [0], [1], [0, 0, 1, 1], [], []>} : vector<8x384xf32>, vector<384x384xf32>, vector<8x384xf32> -> vector<8x384xf32>
    %22 = arith.addf %20, %21 : vector<8x384xf32>
    %23 = math.tanh %22 : vector<8x384xf32>
    %c320_i32 = arith.constant 320 : i32
    %24 = vector.broadcast %c320_i32 : i32 to vector<8x384xi32>
    %25 = arith.cmpi slt, %1, %24 : vector<8x384xi32>
    %cst_12 = arith.constant 0.000000e+00 : f32
    %26 = vector.broadcast %cst_12 : f32 to vector<8x384xf32>
    %27 = arith.select %25, %23, %26 : vector<8x384xi1>, vector<8x384xf32>
    %c3 = arith.constant 3 : index
    %c0_13 = arith.constant 0 : index
    %c0_14 = arith.constant 0 : index
    %28 = vector.load %arg1[%c3, %c0_13, %c0_14] : memref<30x8x384xf32, #tpu.memory_space<vmem>>, vector<1x8x384xf32>
    %29 = vector.shape_cast %28 : vector<1x8x384xf32> to vector<8x384xf32>
    %cst_15 = arith.constant dense<0.000000e+00> : vector<8x384xf32>
    %30 = tpu.matmul %27, %0, %cst_15 {dimension_numbers = #tpu.dot_dimension_numbers<[1], [0], [0], [1], [0, 0, 1, 1], [], []>} : vector<8x384xf32>, vector<384x384xf32>, vector<8x384xf32> -> vector<8x384xf32>
    %31 = arith.addf %29, %30 : vector<8x384xf32>
    %32 = math.tanh %31 : vector<8x384xf32>
    %33 = vector.extract_strided_slice %32 {offsets = [0, 320], sizes = [8, 64], strides = [1, 1]} : vector<8x384xf32> to vector<8x64xf32>
    %c0_16 = arith.constant 0 : index
    %c0_17 = arith.constant 0 : index
    %34 = vector.load %arg3[%c0_16, %c0_17] : memref<1728x192xf32, #tpu.memory_space<vmem>>, vector<64x192xf32>
    %cst_18 = arith.constant dense<0.000000e+00> : vector<8x192xf32>
    %35 = tpu.matmul %33, %34, %cst_18 {dimension_numbers = #tpu.dot_dimension_numbers<[1], [0], [0], [1], [0, 0, 1, 1], [], []>} : vector<8x64xf32>, vector<64x192xf32>, vector<8x192xf32> -> vector<8x192xf32>
    %36 = arith.addf %2, %35 : vector<8x192xf32>
    %c4 = arith.constant 4 : index
    %c0_19 = arith.constant 0 : index
    %c0_20 = arith.constant 0 : index
    %37 = vector.load %arg1[%c4, %c0_19, %c0_20] : memref<30x8x384xf32, #tpu.memory_space<vmem>>, vector<1x8x384xf32>
    %38 = vector.shape_cast %37 : vector<1x8x384xf32> to vector<8x384xf32>
    %cst_21 = arith.constant dense<0.000000e+00> : vector<8x384xf32>
    %39 = tpu.matmul %32, %0, %cst_21 {dimension_numbers = #tpu.dot_dimension_numbers<[1], [0], [0], [1], [0, 0, 1, 1], [], []>} : vector<8x384xf32>, vector<384x384xf32>, vector<8x384xf32> -> vector<8x384xf32>
    %40 = arith.addf %38, %39 : vector<8x384xf32>
    %41 = math.tanh %40 : vector<8x384xf32>
    %42 = vector.extract_strided_slice %41 {offsets = [0, 320], sizes = [8, 64], strides = [1, 1]} : vector<8x384xf32> to vector<8x64xf32>
    %c64 = arith.constant 64 : index
    %c0_22 = arith.constant 0 : index
    %43 = vector.load %arg3[%c64, %c0_22] : memref<1728x192xf32, #tpu.memory_space<vmem>>, vector<64x192xf32>
    %cst_23 = arith.constant dense<0.000000e+00> : vector<8x192xf32>
    %44 = tpu.matmul %42, %43, %cst_23 {dimension_numbers = #tpu.dot_dimension_numbers<[1], [0], [0], [1], [0, 0, 1, 1], [], []>} : vector<8x64xf32>, vector<64x192xf32>, vector<8x192xf32> -> vector<8x192xf32>
    %45 = arith.addf %36, %44 : vector<8x192xf32>
    %c5 = arith.constant 5 : index
    %c0_24 = arith.constant 0 : index
    %c0_25 = arith.constant 0 : index
    %46 = vector.load %arg1[%c5, %c0_24, %c0_25] : memref<30x8x384xf32, #tpu.memory_space<vmem>>, vector<1x8x384xf32>
    %47 = vector.shape_cast %46 : vector<1x8x384xf32> to vector<8x384xf32>
    %cst_26 = arith.constant dense<0.000000e+00> : vector<8x384xf32>
    %48 = tpu.matmul %41, %0, %cst_26 {dimension_numbers = #tpu.dot_dimension_numbers<[1], [0], [0], [1], [0, 0, 1, 1], [], []>} : vector<8x384xf32>, vector<384x384xf32>, vector<8x384xf32> -> vector<8x384xf32>
    %49 = arith.addf %47, %48 : vector<8x384xf32>
    %50 = math.tanh %49 : vector<8x384xf32>
    %51 = vector.extract_strided_slice %50 {offsets = [0, 320], sizes = [8, 64], strides = [1, 1]} : vector<8x384xf32> to vector<8x64xf32>
    %c128 = arith.constant 128 : index
    %c0_27 = arith.constant 0 : index
    %52 = vector.load %arg3[%c128, %c0_27] : memref<1728x192xf32, #tpu.memory_space<vmem>>, vector<64x192xf32>
    %cst_28 = arith.constant dense<0.000000e+00> : vector<8x192xf32>
    %53 = tpu.matmul %51, %52, %cst_28 {dimension_numbers = #tpu.dot_dimension_numbers<[1], [0], [0], [1], [0, 0, 1, 1], [], []>} : vector<8x64xf32>, vector<64x192xf32>, vector<8x192xf32> -> vector<8x192xf32>
    %54 = arith.addf %45, %53 : vector<8x192xf32>
    %c6 = arith.constant 6 : index
    %c0_29 = arith.constant 0 : index
    %c0_30 = arith.constant 0 : index
    %55 = vector.load %arg1[%c6, %c0_29, %c0_30] : memref<30x8x384xf32, #tpu.memory_space<vmem>>, vector<1x8x384xf32>
    %56 = vector.shape_cast %55 : vector<1x8x384xf32> to vector<8x384xf32>
    %cst_31 = arith.constant dense<0.000000e+00> : vector<8x384xf32>
    %57 = tpu.matmul %50, %0, %cst_31 {dimension_numbers = #tpu.dot_dimension_numbers<[1], [0], [0], [1], [0, 0, 1, 1], [], []>} : vector<8x384xf32>, vector<384x384xf32>, vector<8x384xf32> -> vector<8x384xf32>
    %58 = arith.addf %56, %57 : vector<8x384xf32>
    %59 = math.tanh %58 : vector<8x384xf32>
    %60 = vector.extract_strided_slice %59 {offsets = [0, 320], sizes = [8, 64], strides = [1, 1]} : vector<8x384xf32> to vector<8x64xf32>
    %c192 = arith.constant 192 : index
    %c0_32 = arith.constant 0 : index
    %61 = vector.load %arg3[%c192, %c0_32] : memref<1728x192xf32, #tpu.memory_space<vmem>>, vector<64x192xf32>
    %cst_33 = arith.constant dense<0.000000e+00> : vector<8x192xf32>
    %62 = tpu.matmul %60, %61, %cst_33 {dimension_numbers = #tpu.dot_dimension_numbers<[1], [0], [0], [1], [0, 0, 1, 1], [], []>} : vector<8x64xf32>, vector<64x192xf32>, vector<8x192xf32> -> vector<8x192xf32>
    %63 = arith.addf %54, %62 : vector<8x192xf32>
    %c7 = arith.constant 7 : index
    %c0_34 = arith.constant 0 : index
    %c0_35 = arith.constant 0 : index
    %64 = vector.load %arg1[%c7, %c0_34, %c0_35] : memref<30x8x384xf32, #tpu.memory_space<vmem>>, vector<1x8x384xf32>
    %65 = vector.shape_cast %64 : vector<1x8x384xf32> to vector<8x384xf32>
    %cst_36 = arith.constant dense<0.000000e+00> : vector<8x384xf32>
    %66 = tpu.matmul %59, %0, %cst_36 {dimension_numbers = #tpu.dot_dimension_numbers<[1], [0], [0], [1], [0, 0, 1, 1], [], []>} : vector<8x384xf32>, vector<384x384xf32>, vector<8x384xf32> -> vector<8x384xf32>
    %67 = arith.addf %65, %66 : vector<8x384xf32>
    %68 = math.tanh %67 : vector<8x384xf32>
    %69 = vector.extract_strided_slice %68 {offsets = [0, 320], sizes = [8, 64], strides = [1, 1]} : vector<8x384xf32> to vector<8x64xf32>
    %c256 = arith.constant 256 : index
    %c0_37 = arith.constant 0 : index
    %70 = vector.load %arg3[%c256, %c0_37] : memref<1728x192xf32, #tpu.memory_space<vmem>>, vector<64x192xf32>
    %cst_38 = arith.constant dense<0.000000e+00> : vector<8x192xf32>
    %71 = tpu.matmul %69, %70, %cst_38 {dimension_numbers = #tpu.dot_dimension_numbers<[1], [0], [0], [1], [0, 0, 1, 1], [], []>} : vector<8x64xf32>, vector<64x192xf32>, vector<8x192xf32> -> vector<8x192xf32>
    %72 = arith.addf %63, %71 : vector<8x192xf32>
    %c8 = arith.constant 8 : index
    %c0_39 = arith.constant 0 : index
    %c0_40 = arith.constant 0 : index
    %73 = vector.load %arg1[%c8, %c0_39, %c0_40] : memref<30x8x384xf32, #tpu.memory_space<vmem>>, vector<1x8x384xf32>
    %74 = vector.shape_cast %73 : vector<1x8x384xf32> to vector<8x384xf32>
    %cst_41 = arith.constant dense<0.000000e+00> : vector<8x384xf32>
    %75 = tpu.matmul %68, %0, %cst_41 {dimension_numbers = #tpu.dot_dimension_numbers<[1], [0], [0], [1], [0, 0, 1, 1], [], []>} : vector<8x384xf32>, vector<384x384xf32>, vector<8x384xf32> -> vector<8x384xf32>
    %76 = arith.addf %74, %75 : vector<8x384xf32>
    %77 = math.tanh %76 : vector<8x384xf32>
    %78 = vector.extract_strided_slice %77 {offsets = [0, 320], sizes = [8, 64], strides = [1, 1]} : vector<8x384xf32> to vector<8x64xf32>
    %c320 = arith.constant 320 : index
    %c0_42 = arith.constant 0 : index
    %79 = vector.load %arg3[%c320, %c0_42] : memref<1728x192xf32, #tpu.memory_space<vmem>>, vector<64x192xf32>
    %cst_43 = arith.constant dense<0.000000e+00> : vector<8x192xf32>
    %80 = tpu.matmul %78, %79, %cst_43 {dimension_numbers = #tpu.dot_dimension_numbers<[1], [0], [0], [1], [0, 0, 1, 1], [], []>} : vector<8x64xf32>, vector<64x192xf32>, vector<8x192xf32> -> vector<8x192xf32>
    %81 = arith.addf %72, %80 : vector<8x192xf32>
    %c9 = arith.constant 9 : index
    %c0_44 = arith.constant 0 : index
    %c0_45 = arith.constant 0 : index
    %82 = vector.load %arg1[%c9, %c0_44, %c0_45] : memref<30x8x384xf32, #tpu.memory_space<vmem>>, vector<1x8x384xf32>
    %83 = vector.shape_cast %82 : vector<1x8x384xf32> to vector<8x384xf32>
    %cst_46 = arith.constant dense<0.000000e+00> : vector<8x384xf32>
    %84 = tpu.matmul %77, %0, %cst_46 {dimension_numbers = #tpu.dot_dimension_numbers<[1], [0], [0], [1], [0, 0, 1, 1], [], []>} : vector<8x384xf32>, vector<384x384xf32>, vector<8x384xf32> -> vector<8x384xf32>
    %85 = arith.addf %83, %84 : vector<8x384xf32>
    %86 = math.tanh %85 : vector<8x384xf32>
    %87 = vector.extract_strided_slice %86 {offsets = [0, 320], sizes = [8, 64], strides = [1, 1]} : vector<8x384xf32> to vector<8x64xf32>
    %c384 = arith.constant 384 : index
    %c0_47 = arith.constant 0 : index
    %88 = vector.load %arg3[%c384, %c0_47] : memref<1728x192xf32, #tpu.memory_space<vmem>>, vector<64x192xf32>
    %cst_48 = arith.constant dense<0.000000e+00> : vector<8x192xf32>
    %89 = tpu.matmul %87, %88, %cst_48 {dimension_numbers = #tpu.dot_dimension_numbers<[1], [0], [0], [1], [0, 0, 1, 1], [], []>} : vector<8x64xf32>, vector<64x192xf32>, vector<8x192xf32> -> vector<8x192xf32>
    %90 = arith.addf %81, %89 : vector<8x192xf32>
    %c10 = arith.constant 10 : index
    %c0_49 = arith.constant 0 : index
    %c0_50 = arith.constant 0 : index
    %91 = vector.load %arg1[%c10, %c0_49, %c0_50] : memref<30x8x384xf32, #tpu.memory_space<vmem>>, vector<1x8x384xf32>
    %92 = vector.shape_cast %91 : vector<1x8x384xf32> to vector<8x384xf32>
    %cst_51 = arith.constant dense<0.000000e+00> : vector<8x384xf32>
    %93 = tpu.matmul %86, %0, %cst_51 {dimension_numbers = #tpu.dot_dimension_numbers<[1], [0], [0], [1], [0, 0, 1, 1], [], []>} : vector<8x384xf32>, vector<384x384xf32>, vector<8x384xf32> -> vector<8x384xf32>
    %94 = arith.addf %92, %93 : vector<8x384xf32>
    %95 = math.tanh %94 : vector<8x384xf32>
    %96 = vector.extract_strided_slice %95 {offsets = [0, 320], sizes = [8, 64], strides = [1, 1]} : vector<8x384xf32> to vector<8x64xf32>
    %c448 = arith.constant 448 : index
    %c0_52 = arith.constant 0 : index
    %97 = vector.load %arg3[%c448, %c0_52] : memref<1728x192xf32, #tpu.memory_space<vmem>>, vector<64x192xf32>
    %cst_53 = arith.constant dense<0.000000e+00> : vector<8x192xf32>
    %98 = tpu.matmul %96, %97, %cst_53 {dimension_numbers = #tpu.dot_dimension_numbers<[1], [0], [0], [1], [0, 0, 1, 1], [], []>} : vector<8x64xf32>, vector<64x192xf32>, vector<8x192xf32> -> vector<8x192xf32>
    %99 = arith.addf %90, %98 : vector<8x192xf32>
    %c11 = arith.constant 11 : index
    %c0_54 = arith.constant 0 : index
    %c0_55 = arith.constant 0 : index
    %100 = vector.load %arg1[%c11, %c0_54, %c0_55] : memref<30x8x384xf32, #tpu.memory_space<vmem>>, vector<1x8x384xf32>
    %101 = vector.shape_cast %100 : vector<1x8x384xf32> to vector<8x384xf32>
    %cst_56 = arith.constant dense<0.000000e+00> : vector<8x384xf32>
    %102 = tpu.matmul %95, %0, %cst_56 {dimension_numbers = #tpu.dot_dimension_numbers<[1], [0], [0], [1], [0, 0, 1, 1], [], []>} : vector<8x384xf32>, vector<384x384xf32>, vector<8x384xf32> -> vector<8x384xf32>
    %103 = arith.addf %101, %102 : vector<8x384xf32>
    %104 = math.tanh %103 : vector<8x384xf32>
    %105 = vector.extract_strided_slice %104 {offsets = [0, 320], sizes = [8, 64], strides = [1, 1]} : vector<8x384xf32> to vector<8x64xf32>
    %c512 = arith.constant 512 : index
    %c0_57 = arith.constant 0 : index
    %106 = vector.load %arg3[%c512, %c0_57] : memref<1728x192xf32, #tpu.memory_space<vmem>>, vector<64x192xf32>
    %cst_58 = arith.constant dense<0.000000e+00> : vector<8x192xf32>
    %107 = tpu.matmul %105, %106, %cst_58 {dimension_numbers = #tpu.dot_dimension_numbers<[1], [0], [0], [1], [0, 0, 1, 1], [], []>} : vector<8x64xf32>, vector<64x192xf32>, vector<8x192xf32> -> vector<8x192xf32>
    %108 = arith.addf %99, %107 : vector<8x192xf32>
    %c12 = arith.constant 12 : index
    %c0_59 = arith.constant 0 : index
    %c0_60 = arith.constant 0 : index
    %109 = vector.load %arg1[%c12, %c0_59, %c0_60] : memref<30x8x384xf32, #tpu.memory_space<vmem>>, vector<1x8x384xf32>
    %110 = vector.shape_cast %109 : vector<1x8x384xf32> to vector<8x384xf32>
    %cst_61 = arith.constant dense<0.000000e+00> : vector<8x384xf32>
    %111 = tpu.matmul %104, %0, %cst_61 {dimension_numbers = #tpu.dot_dimension_numbers<[1], [0], [0], [1], [0, 0, 1, 1], [], []>} : vector<8x384xf32>, vector<384x384xf32>, vector<8x384xf32> -> vector<8x384xf32>
    %112 = arith.addf %110, %111 : vector<8x384xf32>
    %113 = math.tanh %112 : vector<8x384xf32>
    %114 = vector.extract_strided_slice %113 {offsets = [0, 320], sizes = [8, 64], strides = [1, 1]} : vector<8x384xf32> to vector<8x64xf32>
    %c576 = arith.constant 576 : index
    %c0_62 = arith.constant 0 : index
    %115 = vector.load %arg3[%c576, %c0_62] : memref<1728x192xf32, #tpu.memory_space<vmem>>, vector<64x192xf32>
    %cst_63 = arith.constant dense<0.000000e+00> : vector<8x192xf32>
    %116 = tpu.matmul %114, %115, %cst_63 {dimension_numbers = #tpu.dot_dimension_numbers<[1], [0], [0], [1], [0, 0, 1, 1], [], []>} : vector<8x64xf32>, vector<64x192xf32>, vector<8x192xf32> -> vector<8x192xf32>
    %117 = arith.addf %108, %116 : vector<8x192xf32>
    %c13 = arith.constant 13 : index
    %c0_64 = arith.constant 0 : index
    %c0_65 = arith.constant 0 : index
    %118 = vector.load %arg1[%c13, %c0_64, %c0_65] : memref<30x8x384xf32, #tpu.memory_space<vmem>>, vector<1x8x384xf32>
    %119 = vector.shape_cast %118 : vector<1x8x384xf32> to vector<8x384xf32>
    %cst_66 = arith.constant dense<0.000000e+00> : vector<8x384xf32>
    %120 = tpu.matmul %113, %0, %cst_66 {dimension_numbers = #tpu.dot_dimension_numbers<[1], [0], [0], [1], [0, 0, 1, 1], [], []>} : vector<8x384xf32>, vector<384x384xf32>, vector<8x384xf32> -> vector<8x384xf32>
    %121 = arith.addf %119, %120 : vector<8x384xf32>
    %122 = math.tanh %121 : vector<8x384xf32>
    %123 = vector.extract_strided_slice %122 {offsets = [0, 320], sizes = [8, 64], strides = [1, 1]} : vector<8x384xf32> to vector<8x64xf32>
    %c640 = arith.constant 640 : index
    %c0_67 = arith.constant 0 : index
    %124 = vector.load %arg3[%c640, %c0_67] : memref<1728x192xf32, #tpu.memory_space<vmem>>, vector<64x192xf32>
    %cst_68 = arith.constant dense<0.000000e+00> : vector<8x192xf32>
    %125 = tpu.matmul %123, %124, %cst_68 {dimension_numbers = #tpu.dot_dimension_numbers<[1], [0], [0], [1], [0, 0, 1, 1], [], []>} : vector<8x64xf32>, vector<64x192xf32>, vector<8x192xf32> -> vector<8x192xf32>
    %126 = arith.addf %117, %125 : vector<8x192xf32>
    %c14 = arith.constant 14 : index
    %c0_69 = arith.constant 0 : index
    %c0_70 = arith.constant 0 : index
    %127 = vector.load %arg1[%c14, %c0_69, %c0_70] : memref<30x8x384xf32, #tpu.memory_space<vmem>>, vector<1x8x384xf32>
    %128 = vector.shape_cast %127 : vector<1x8x384xf32> to vector<8x384xf32>
    %cst_71 = arith.constant dense<0.000000e+00> : vector<8x384xf32>
    %129 = tpu.matmul %122, %0, %cst_71 {dimension_numbers = #tpu.dot_dimension_numbers<[1], [0], [0], [1], [0, 0, 1, 1], [], []>} : vector<8x384xf32>, vector<384x384xf32>, vector<8x384xf32> -> vector<8x384xf32>
    %130 = arith.addf %128, %129 : vector<8x384xf32>
    %131 = math.tanh %130 : vector<8x384xf32>
    %132 = vector.extract_strided_slice %131 {offsets = [0, 320], sizes = [8, 64], strides = [1, 1]} : vector<8x384xf32> to vector<8x64xf32>
    %c704 = arith.constant 704 : index
    %c0_72 = arith.constant 0 : index
    %133 = vector.load %arg3[%c704, %c0_72] : memref<1728x192xf32, #tpu.memory_space<vmem>>, vector<64x192xf32>
    %cst_73 = arith.constant dense<0.000000e+00> : vector<8x192xf32>
    %134 = tpu.matmul %132, %133, %cst_73 {dimension_numbers = #tpu.dot_dimension_numbers<[1], [0], [0], [1], [0, 0, 1, 1], [], []>} : vector<8x64xf32>, vector<64x192xf32>, vector<8x192xf32> -> vector<8x192xf32>
    %135 = arith.addf %126, %134 : vector<8x192xf32>
    %c15 = arith.constant 15 : index
    %c0_74 = arith.constant 0 : index
    %c0_75 = arith.constant 0 : index
    %136 = vector.load %arg1[%c15, %c0_74, %c0_75] : memref<30x8x384xf32, #tpu.memory_space<vmem>>, vector<1x8x384xf32>
    %137 = vector.shape_cast %136 : vector<1x8x384xf32> to vector<8x384xf32>
    %cst_76 = arith.constant dense<0.000000e+00> : vector<8x384xf32>
    %138 = tpu.matmul %131, %0, %cst_76 {dimension_numbers = #tpu.dot_dimension_numbers<[1], [0], [0], [1], [0, 0, 1, 1], [], []>} : vector<8x384xf32>, vector<384x384xf32>, vector<8x384xf32> -> vector<8x384xf32>
    %139 = arith.addf %137, %138 : vector<8x384xf32>
    %140 = math.tanh %139 : vector<8x384xf32>
    %141 = vector.extract_strided_slice %140 {offsets = [0, 320], sizes = [8, 64], strides = [1, 1]} : vector<8x384xf32> to vector<8x64xf32>
    %c768 = arith.constant 768 : index
    %c0_77 = arith.constant 0 : index
    %142 = vector.load %arg3[%c768, %c0_77] : memref<1728x192xf32, #tpu.memory_space<vmem>>, vector<64x192xf32>
    %cst_78 = arith.constant dense<0.000000e+00> : vector<8x192xf32>
    %143 = tpu.matmul %141, %142, %cst_78 {dimension_numbers = #tpu.dot_dimension_numbers<[1], [0], [0], [1], [0, 0, 1, 1], [], []>} : vector<8x64xf32>, vector<64x192xf32>, vector<8x192xf32> -> vector<8x192xf32>
    %144 = arith.addf %135, %143 : vector<8x192xf32>
    %c16 = arith.constant 16 : index
    %c0_79 = arith.constant 0 : index
    %c0_80 = arith.constant 0 : index
    %145 = vector.load %arg1[%c16, %c0_79, %c0_80] : memref<30x8x384xf32, #tpu.memory_space<vmem>>, vector<1x8x384xf32>
    %146 = vector.shape_cast %145 : vector<1x8x384xf32> to vector<8x384xf32>
    %cst_81 = arith.constant dense<0.000000e+00> : vector<8x384xf32>
    %147 = tpu.matmul %140, %0, %cst_81 {dimension_numbers = #tpu.dot_dimension_numbers<[1], [0], [0], [1], [0, 0, 1, 1], [], []>} : vector<8x384xf32>, vector<384x384xf32>, vector<8x384xf32> -> vector<8x384xf32>
    %148 = arith.addf %146, %147 : vector<8x384xf32>
    %149 = math.tanh %148 : vector<8x384xf32>
    %150 = vector.extract_strided_slice %149 {offsets = [0, 320], sizes = [8, 64], strides = [1, 1]} : vector<8x384xf32> to vector<8x64xf32>
    %c832 = arith.constant 832 : index
    %c0_82 = arith.constant 0 : index
    %151 = vector.load %arg3[%c832, %c0_82] : memref<1728x192xf32, #tpu.memory_space<vmem>>, vector<64x192xf32>
    %cst_83 = arith.constant dense<0.000000e+00> : vector<8x192xf32>
    %152 = tpu.matmul %150, %151, %cst_83 {dimension_numbers = #tpu.dot_dimension_numbers<[1], [0], [0], [1], [0, 0, 1, 1], [], []>} : vector<8x64xf32>, vector<64x192xf32>, vector<8x192xf32> -> vector<8x192xf32>
    %153 = arith.addf %144, %152 : vector<8x192xf32>
    %c17 = arith.constant 17 : index
    %c0_84 = arith.constant 0 : index
    %c0_85 = arith.constant 0 : index
    %154 = vector.load %arg1[%c17, %c0_84, %c0_85] : memref<30x8x384xf32, #tpu.memory_space<vmem>>, vector<1x8x384xf32>
    %155 = vector.shape_cast %154 : vector<1x8x384xf32> to vector<8x384xf32>
    %cst_86 = arith.constant dense<0.000000e+00> : vector<8x384xf32>
    %156 = tpu.matmul %149, %0, %cst_86 {dimension_numbers = #tpu.dot_dimension_numbers<[1], [0], [0], [1], [0, 0, 1, 1], [], []>} : vector<8x384xf32>, vector<384x384xf32>, vector<8x384xf32> -> vector<8x384xf32>
    %157 = arith.addf %155, %156 : vector<8x384xf32>
    %158 = math.tanh %157 : vector<8x384xf32>
    %159 = vector.extract_strided_slice %158 {offsets = [0, 320], sizes = [8, 64], strides = [1, 1]} : vector<8x384xf32> to vector<8x64xf32>
    %c896 = arith.constant 896 : index
    %c0_87 = arith.constant 0 : index
    %160 = vector.load %arg3[%c896, %c0_87] : memref<1728x192xf32, #tpu.memory_space<vmem>>, vector<64x192xf32>
    %cst_88 = arith.constant dense<0.000000e+00> : vector<8x192xf32>
    %161 = tpu.matmul %159, %160, %cst_88 {dimension_numbers = #tpu.dot_dimension_numbers<[1], [0], [0], [1], [0, 0, 1, 1], [], []>} : vector<8x64xf32>, vector<64x192xf32>, vector<8x192xf32> -> vector<8x192xf32>
    %162 = arith.addf %153, %161 : vector<8x192xf32>
    %c18 = arith.constant 18 : index
    %c0_89 = arith.constant 0 : index
    %c0_90 = arith.constant 0 : index
    %163 = vector.load %arg1[%c18, %c0_89, %c0_90] : memref<30x8x384xf32, #tpu.memory_space<vmem>>, vector<1x8x384xf32>
    %164 = vector.shape_cast %163 : vector<1x8x384xf32> to vector<8x384xf32>
    %cst_91 = arith.constant dense<0.000000e+00> : vector<8x384xf32>
    %165 = tpu.matmul %158, %0, %cst_91 {dimension_numbers = #tpu.dot_dimension_numbers<[1], [0], [0], [1], [0, 0, 1, 1], [], []>} : vector<8x384xf32>, vector<384x384xf32>, vector<8x384xf32> -> vector<8x384xf32>
    %166 = arith.addf %164, %165 : vector<8x384xf32>
    %167 = math.tanh %166 : vector<8x384xf32>
    %168 = vector.extract_strided_slice %167 {offsets = [0, 320], sizes = [8, 64], strides = [1, 1]} : vector<8x384xf32> to vector<8x64xf32>
    %c960 = arith.constant 960 : index
    %c0_92 = arith.constant 0 : index
    %169 = vector.load %arg3[%c960, %c0_92] : memref<1728x192xf32, #tpu.memory_space<vmem>>, vector<64x192xf32>
    %cst_93 = arith.constant dense<0.000000e+00> : vector<8x192xf32>
    %170 = tpu.matmul %168, %169, %cst_93 {dimension_numbers = #tpu.dot_dimension_numbers<[1], [0], [0], [1], [0, 0, 1, 1], [], []>} : vector<8x64xf32>, vector<64x192xf32>, vector<8x192xf32> -> vector<8x192xf32>
    %171 = arith.addf %162, %170 : vector<8x192xf32>
    %c19 = arith.constant 19 : index
    %c0_94 = arith.constant 0 : index
    %c0_95 = arith.constant 0 : index
    %172 = vector.load %arg1[%c19, %c0_94, %c0_95] : memref<30x8x384xf32, #tpu.memory_space<vmem>>, vector<1x8x384xf32>
    %173 = vector.shape_cast %172 : vector<1x8x384xf32> to vector<8x384xf32>
    %cst_96 = arith.constant dense<0.000000e+00> : vector<8x384xf32>
    %174 = tpu.matmul %167, %0, %cst_96 {dimension_numbers = #tpu.dot_dimension_numbers<[1], [0], [0], [1], [0, 0, 1, 1], [], []>} : vector<8x384xf32>, vector<384x384xf32>, vector<8x384xf32> -> vector<8x384xf32>
    %175 = arith.addf %173, %174 : vector<8x384xf32>
    %176 = math.tanh %175 : vector<8x384xf32>
    %177 = vector.extract_strided_slice %176 {offsets = [0, 320], sizes = [8, 64], strides = [1, 1]} : vector<8x384xf32> to vector<8x64xf32>
    %c1024 = arith.constant 1024 : index
    %c0_97 = arith.constant 0 : index
    %178 = vector.load %arg3[%c1024, %c0_97] : memref<1728x192xf32, #tpu.memory_space<vmem>>, vector<64x192xf32>
    %cst_98 = arith.constant dense<0.000000e+00> : vector<8x192xf32>
    %179 = tpu.matmul %177, %178, %cst_98 {dimension_numbers = #tpu.dot_dimension_numbers<[1], [0], [0], [1], [0, 0, 1, 1], [], []>} : vector<8x64xf32>, vector<64x192xf32>, vector<8x192xf32> -> vector<8x192xf32>
    %180 = arith.addf %171, %179 : vector<8x192xf32>
    %c20 = arith.constant 20 : index
    %c0_99 = arith.constant 0 : index
    %c0_100 = arith.constant 0 : index
    %181 = vector.load %arg1[%c20, %c0_99, %c0_100] : memref<30x8x384xf32, #tpu.memory_space<vmem>>, vector<1x8x384xf32>
    %182 = vector.shape_cast %181 : vector<1x8x384xf32> to vector<8x384xf32>
    %cst_101 = arith.constant dense<0.000000e+00> : vector<8x384xf32>
    %183 = tpu.matmul %176, %0, %cst_101 {dimension_numbers = #tpu.dot_dimension_numbers<[1], [0], [0], [1], [0, 0, 1, 1], [], []>} : vector<8x384xf32>, vector<384x384xf32>, vector<8x384xf32> -> vector<8x384xf32>
    %184 = arith.addf %182, %183 : vector<8x384xf32>
    %185 = math.tanh %184 : vector<8x384xf32>
    %186 = vector.extract_strided_slice %185 {offsets = [0, 320], sizes = [8, 64], strides = [1, 1]} : vector<8x384xf32> to vector<8x64xf32>
    %c1088 = arith.constant 1088 : index
    %c0_102 = arith.constant 0 : index
    %187 = vector.load %arg3[%c1088, %c0_102] : memref<1728x192xf32, #tpu.memory_space<vmem>>, vector<64x192xf32>
    %cst_103 = arith.constant dense<0.000000e+00> : vector<8x192xf32>
    %188 = tpu.matmul %186, %187, %cst_103 {dimension_numbers = #tpu.dot_dimension_numbers<[1], [0], [0], [1], [0, 0, 1, 1], [], []>} : vector<8x64xf32>, vector<64x192xf32>, vector<8x192xf32> -> vector<8x192xf32>
    %189 = arith.addf %180, %188 : vector<8x192xf32>
    %c21 = arith.constant 21 : index
    %c0_104 = arith.constant 0 : index
    %c0_105 = arith.constant 0 : index
    %190 = vector.load %arg1[%c21, %c0_104, %c0_105] : memref<30x8x384xf32, #tpu.memory_space<vmem>>, vector<1x8x384xf32>
    %191 = vector.shape_cast %190 : vector<1x8x384xf32> to vector<8x384xf32>
    %cst_106 = arith.constant dense<0.000000e+00> : vector<8x384xf32>
    %192 = tpu.matmul %185, %0, %cst_106 {dimension_numbers = #tpu.dot_dimension_numbers<[1], [0], [0], [1], [0, 0, 1, 1], [], []>} : vector<8x384xf32>, vector<384x384xf32>, vector<8x384xf32> -> vector<8x384xf32>
    %193 = arith.addf %191, %192 : vector<8x384xf32>
    %194 = math.tanh %193 : vector<8x384xf32>
    %195 = vector.extract_strided_slice %194 {offsets = [0, 320], sizes = [8, 64], strides = [1, 1]} : vector<8x384xf32> to vector<8x64xf32>
    %c1152 = arith.constant 1152 : index
    %c0_107 = arith.constant 0 : index
    %196 = vector.load %arg3[%c1152, %c0_107] : memref<1728x192xf32, #tpu.memory_space<vmem>>, vector<64x192xf32>
    %cst_108 = arith.constant dense<0.000000e+00> : vector<8x192xf32>
    %197 = tpu.matmul %195, %196, %cst_108 {dimension_numbers = #tpu.dot_dimension_numbers<[1], [0], [0], [1], [0, 0, 1, 1], [], []>} : vector<8x64xf32>, vector<64x192xf32>, vector<8x192xf32> -> vector<8x192xf32>
    %198 = arith.addf %189, %197 : vector<8x192xf32>
    %c22 = arith.constant 22 : index
    %c0_109 = arith.constant 0 : index
    %c0_110 = arith.constant 0 : index
    %199 = vector.load %arg1[%c22, %c0_109, %c0_110] : memref<30x8x384xf32, #tpu.memory_space<vmem>>, vector<1x8x384xf32>
    %200 = vector.shape_cast %199 : vector<1x8x384xf32> to vector<8x384xf32>
    %cst_111 = arith.constant dense<0.000000e+00> : vector<8x384xf32>
    %201 = tpu.matmul %194, %0, %cst_111 {dimension_numbers = #tpu.dot_dimension_numbers<[1], [0], [0], [1], [0, 0, 1, 1], [], []>} : vector<8x384xf32>, vector<384x384xf32>, vector<8x384xf32> -> vector<8x384xf32>
    %202 = arith.addf %200, %201 : vector<8x384xf32>
    %203 = math.tanh %202 : vector<8x384xf32>
    %204 = vector.extract_strided_slice %203 {offsets = [0, 320], sizes = [8, 64], strides = [1, 1]} : vector<8x384xf32> to vector<8x64xf32>
    %c1216 = arith.constant 1216 : index
    %c0_112 = arith.constant 0 : index
    %205 = vector.load %arg3[%c1216, %c0_112] : memref<1728x192xf32, #tpu.memory_space<vmem>>, vector<64x192xf32>
    %cst_113 = arith.constant dense<0.000000e+00> : vector<8x192xf32>
    %206 = tpu.matmul %204, %205, %cst_113 {dimension_numbers = #tpu.dot_dimension_numbers<[1], [0], [0], [1], [0, 0, 1, 1], [], []>} : vector<8x64xf32>, vector<64x192xf32>, vector<8x192xf32> -> vector<8x192xf32>
    %207 = arith.addf %198, %206 : vector<8x192xf32>
    %c23 = arith.constant 23 : index
    %c0_114 = arith.constant 0 : index
    %c0_115 = arith.constant 0 : index
    %208 = vector.load %arg1[%c23, %c0_114, %c0_115] : memref<30x8x384xf32, #tpu.memory_space<vmem>>, vector<1x8x384xf32>
    %209 = vector.shape_cast %208 : vector<1x8x384xf32> to vector<8x384xf32>
    %cst_116 = arith.constant dense<0.000000e+00> : vector<8x384xf32>
    %210 = tpu.matmul %203, %0, %cst_116 {dimension_numbers = #tpu.dot_dimension_numbers<[1], [0], [0], [1], [0, 0, 1, 1], [], []>} : vector<8x384xf32>, vector<384x384xf32>, vector<8x384xf32> -> vector<8x384xf32>
    %211 = arith.addf %209, %210 : vector<8x384xf32>
    %212 = math.tanh %211 : vector<8x384xf32>
    %213 = vector.extract_strided_slice %212 {offsets = [0, 320], sizes = [8, 64], strides = [1, 1]} : vector<8x384xf32> to vector<8x64xf32>
    %c1280 = arith.constant 1280 : index
    %c0_117 = arith.constant 0 : index
    %214 = vector.load %arg3[%c1280, %c0_117] : memref<1728x192xf32, #tpu.memory_space<vmem>>, vector<64x192xf32>
    %cst_118 = arith.constant dense<0.000000e+00> : vector<8x192xf32>
    %215 = tpu.matmul %213, %214, %cst_118 {dimension_numbers = #tpu.dot_dimension_numbers<[1], [0], [0], [1], [0, 0, 1, 1], [], []>} : vector<8x64xf32>, vector<64x192xf32>, vector<8x192xf32> -> vector<8x192xf32>
    %216 = arith.addf %207, %215 : vector<8x192xf32>
    %c24 = arith.constant 24 : index
    %c0_119 = arith.constant 0 : index
    %c0_120 = arith.constant 0 : index
    %217 = vector.load %arg1[%c24, %c0_119, %c0_120] : memref<30x8x384xf32, #tpu.memory_space<vmem>>, vector<1x8x384xf32>
    %218 = vector.shape_cast %217 : vector<1x8x384xf32> to vector<8x384xf32>
    %cst_121 = arith.constant dense<0.000000e+00> : vector<8x384xf32>
    %219 = tpu.matmul %212, %0, %cst_121 {dimension_numbers = #tpu.dot_dimension_numbers<[1], [0], [0], [1], [0, 0, 1, 1], [], []>} : vector<8x384xf32>, vector<384x384xf32>, vector<8x384xf32> -> vector<8x384xf32>
    %220 = arith.addf %218, %219 : vector<8x384xf32>
    %221 = math.tanh %220 : vector<8x384xf32>
    %222 = vector.extract_strided_slice %221 {offsets = [0, 320], sizes = [8, 64], strides = [1, 1]} : vector<8x384xf32> to vector<8x64xf32>
    %c1344 = arith.constant 1344 : index
    %c0_122 = arith.constant 0 : index
    %223 = vector.load %arg3[%c1344, %c0_122] : memref<1728x192xf32, #tpu.memory_space<vmem>>, vector<64x192xf32>
    %cst_123 = arith.constant dense<0.000000e+00> : vector<8x192xf32>
    %224 = tpu.matmul %222, %223, %cst_123 {dimension_numbers = #tpu.dot_dimension_numbers<[1], [0], [0], [1], [0, 0, 1, 1], [], []>} : vector<8x64xf32>, vector<64x192xf32>, vector<8x192xf32> -> vector<8x192xf32>
    %225 = arith.addf %216, %224 : vector<8x192xf32>
    %c25 = arith.constant 25 : index
    %c0_124 = arith.constant 0 : index
    %c0_125 = arith.constant 0 : index
    %226 = vector.load %arg1[%c25, %c0_124, %c0_125] : memref<30x8x384xf32, #tpu.memory_space<vmem>>, vector<1x8x384xf32>
    %227 = vector.shape_cast %226 : vector<1x8x384xf32> to vector<8x384xf32>
    %cst_126 = arith.constant dense<0.000000e+00> : vector<8x384xf32>
    %228 = tpu.matmul %221, %0, %cst_126 {dimension_numbers = #tpu.dot_dimension_numbers<[1], [0], [0], [1], [0, 0, 1, 1], [], []>} : vector<8x384xf32>, vector<384x384xf32>, vector<8x384xf32> -> vector<8x384xf32>
    %229 = arith.addf %227, %228 : vector<8x384xf32>
    %230 = math.tanh %229 : vector<8x384xf32>
    %231 = vector.extract_strided_slice %230 {offsets = [0, 320], sizes = [8, 64], strides = [1, 1]} : vector<8x384xf32> to vector<8x64xf32>
    %c1408 = arith.constant 1408 : index
    %c0_127 = arith.constant 0 : index
    %232 = vector.load %arg3[%c1408, %c0_127] : memref<1728x192xf32, #tpu.memory_space<vmem>>, vector<64x192xf32>
    %cst_128 = arith.constant dense<0.000000e+00> : vector<8x192xf32>
    %233 = tpu.matmul %231, %232, %cst_128 {dimension_numbers = #tpu.dot_dimension_numbers<[1], [0], [0], [1], [0, 0, 1, 1], [], []>} : vector<8x64xf32>, vector<64x192xf32>, vector<8x192xf32> -> vector<8x192xf32>
    %234 = arith.addf %225, %233 : vector<8x192xf32>
    %c26 = arith.constant 26 : index
    %c0_129 = arith.constant 0 : index
    %c0_130 = arith.constant 0 : index
    %235 = vector.load %arg1[%c26, %c0_129, %c0_130] : memref<30x8x384xf32, #tpu.memory_space<vmem>>, vector<1x8x384xf32>
    %236 = vector.shape_cast %235 : vector<1x8x384xf32> to vector<8x384xf32>
    %cst_131 = arith.constant dense<0.000000e+00> : vector<8x384xf32>
    %237 = tpu.matmul %230, %0, %cst_131 {dimension_numbers = #tpu.dot_dimension_numbers<[1], [0], [0], [1], [0, 0, 1, 1], [], []>} : vector<8x384xf32>, vector<384x384xf32>, vector<8x384xf32> -> vector<8x384xf32>
    %238 = arith.addf %236, %237 : vector<8x384xf32>
    %239 = math.tanh %238 : vector<8x384xf32>
    %240 = vector.extract_strided_slice %239 {offsets = [0, 320], sizes = [8, 64], strides = [1, 1]} : vector<8x384xf32> to vector<8x64xf32>
    %c1472 = arith.constant 1472 : index
    %c0_132 = arith.constant 0 : index
    %241 = vector.load %arg3[%c1472, %c0_132] : memref<1728x192xf32, #tpu.memory_space<vmem>>, vector<64x192xf32>
    %cst_133 = arith.constant dense<0.000000e+00> : vector<8x192xf32>
    %242 = tpu.matmul %240, %241, %cst_133 {dimension_numbers = #tpu.dot_dimension_numbers<[1], [0], [0], [1], [0, 0, 1, 1], [], []>} : vector<8x64xf32>, vector<64x192xf32>, vector<8x192xf32> -> vector<8x192xf32>
    %243 = arith.addf %234, %242 : vector<8x192xf32>
    %c27 = arith.constant 27 : index
    %c0_134 = arith.constant 0 : index
    %c0_135 = arith.constant 0 : index
    %244 = vector.load %arg1[%c27, %c0_134, %c0_135] : memref<30x8x384xf32, #tpu.memory_space<vmem>>, vector<1x8x384xf32>
    %245 = vector.shape_cast %244 : vector<1x8x384xf32> to vector<8x384xf32>
    %cst_136 = arith.constant dense<0.000000e+00> : vector<8x384xf32>
    %246 = tpu.matmul %239, %0, %cst_136 {dimension_numbers = #tpu.dot_dimension_numbers<[1], [0], [0], [1], [0, 0, 1, 1], [], []>} : vector<8x384xf32>, vector<384x384xf32>, vector<8x384xf32> -> vector<8x384xf32>
    %247 = arith.addf %245, %246 : vector<8x384xf32>
    %248 = math.tanh %247 : vector<8x384xf32>
    %249 = vector.extract_strided_slice %248 {offsets = [0, 320], sizes = [8, 64], strides = [1, 1]} : vector<8x384xf32> to vector<8x64xf32>
    %c1536 = arith.constant 1536 : index
    %c0_137 = arith.constant 0 : index
    %250 = vector.load %arg3[%c1536, %c0_137] : memref<1728x192xf32, #tpu.memory_space<vmem>>, vector<64x192xf32>
    %cst_138 = arith.constant dense<0.000000e+00> : vector<8x192xf32>
    %251 = tpu.matmul %249, %250, %cst_138 {dimension_numbers = #tpu.dot_dimension_numbers<[1], [0], [0], [1], [0, 0, 1, 1], [], []>} : vector<8x64xf32>, vector<64x192xf32>, vector<8x192xf32> -> vector<8x192xf32>
    %252 = arith.addf %243, %251 : vector<8x192xf32>
    %c28 = arith.constant 28 : index
    %c0_139 = arith.constant 0 : index
    %c0_140 = arith.constant 0 : index
    %253 = vector.load %arg1[%c28, %c0_139, %c0_140] : memref<30x8x384xf32, #tpu.memory_space<vmem>>, vector<1x8x384xf32>
    %254 = vector.shape_cast %253 : vector<1x8x384xf32> to vector<8x384xf32>
    %cst_141 = arith.constant dense<0.000000e+00> : vector<8x384xf32>
    %255 = tpu.matmul %248, %0, %cst_141 {dimension_numbers = #tpu.dot_dimension_numbers<[1], [0], [0], [1], [0, 0, 1, 1], [], []>} : vector<8x384xf32>, vector<384x384xf32>, vector<8x384xf32> -> vector<8x384xf32>
    %256 = arith.addf %254, %255 : vector<8x384xf32>
    %257 = math.tanh %256 : vector<8x384xf32>
    %258 = vector.extract_strided_slice %257 {offsets = [0, 320], sizes = [8, 64], strides = [1, 1]} : vector<8x384xf32> to vector<8x64xf32>
    %c1600 = arith.constant 1600 : index
    %c0_142 = arith.constant 0 : index
    %259 = vector.load %arg3[%c1600, %c0_142] : memref<1728x192xf32, #tpu.memory_space<vmem>>, vector<64x192xf32>
    %cst_143 = arith.constant dense<0.000000e+00> : vector<8x192xf32>
    %260 = tpu.matmul %258, %259, %cst_143 {dimension_numbers = #tpu.dot_dimension_numbers<[1], [0], [0], [1], [0, 0, 1, 1], [], []>} : vector<8x64xf32>, vector<64x192xf32>, vector<8x192xf32> -> vector<8x192xf32>
    %261 = arith.addf %252, %260 : vector<8x192xf32>
    %c29 = arith.constant 29 : index
    %c0_144 = arith.constant 0 : index
    %c0_145 = arith.constant 0 : index
    %262 = vector.load %arg1[%c29, %c0_144, %c0_145] : memref<30x8x384xf32, #tpu.memory_space<vmem>>, vector<1x8x384xf32>
    %263 = vector.shape_cast %262 : vector<1x8x384xf32> to vector<8x384xf32>
    %cst_146 = arith.constant dense<0.000000e+00> : vector<8x384xf32>
    %264 = tpu.matmul %257, %0, %cst_146 {dimension_numbers = #tpu.dot_dimension_numbers<[1], [0], [0], [1], [0, 0, 1, 1], [], []>} : vector<8x384xf32>, vector<384x384xf32>, vector<8x384xf32> -> vector<8x384xf32>
    %265 = arith.addf %263, %264 : vector<8x384xf32>
    %266 = math.tanh %265 : vector<8x384xf32>
    %267 = vector.extract_strided_slice %266 {offsets = [0, 320], sizes = [8, 64], strides = [1, 1]} : vector<8x384xf32> to vector<8x64xf32>
    %c1664 = arith.constant 1664 : index
    %c0_147 = arith.constant 0 : index
    %268 = vector.load %arg3[%c1664, %c0_147] : memref<1728x192xf32, #tpu.memory_space<vmem>>, vector<64x192xf32>
    %cst_148 = arith.constant dense<0.000000e+00> : vector<8x192xf32>
    %269 = tpu.matmul %267, %268, %cst_148 {dimension_numbers = #tpu.dot_dimension_numbers<[1], [0], [0], [1], [0, 0, 1, 1], [], []>} : vector<8x64xf32>, vector<64x192xf32>, vector<8x192xf32> -> vector<8x192xf32>
    %270 = arith.addf %261, %269 : vector<8x192xf32>
    %271 = vector.extract_strided_slice %270 {offsets = [0, 0], sizes = [8, 96], strides = [1, 1]} : vector<8x192xf32> to vector<8x96xf32>
    %c0_149 = arith.constant 0 : index
    %c0_150 = arith.constant 0 : index
    %272 = vector.load %arg4[%c0_149, %c0_150] : memref<1x96xf32, #tpu.memory_space<vmem>>, vector<1x96xf32>
    %273 = vector.broadcast %272 : vector<1x96xf32> to vector<8x96xf32>
    %274 = arith.addf %271, %273 : vector<8x96xf32>
    %cst_151 = arith.constant 0.000000e+00 : f32
    %275 = vector.broadcast %cst_151 : f32 to vector<8x96xf32>
    %276 = arith.maximumf %274, %275 : vector<8x96xf32>
    %277 = vector.extract_strided_slice %270 {offsets = [0, 96], sizes = [8, 96], strides = [1, 1]} : vector<8x192xf32> to vector<8x96xf32>
    %c0_152 = arith.constant 0 : index
    %c0_153 = arith.constant 0 : index
    %278 = vector.load %arg5[%c0_152, %c0_153] : memref<1x96xf32, #tpu.memory_space<vmem>>, vector<1x96xf32>
    %279 = vector.broadcast %278 : vector<1x96xf32> to vector<8x96xf32>
    %280 = arith.addf %277, %279 : vector<8x96xf32>
    %cst_154 = arith.constant 0.000000e+00 : f32
    %281 = vector.broadcast %cst_154 : f32 to vector<8x96xf32>
    %282 = arith.maximumf %280, %281 : vector<8x96xf32>
    %283 = arith.addf %276, %282 : vector<8x96xf32>
    %c0_155 = arith.constant 0 : index
    %c0_156 = arith.constant 0 : index
    %284 = vector.load %arg6[%c0_155, %c0_156] : memref<8x96xf32, #tpu.memory_space<vmem>>, vector<8x96xf32>
    tpu.vector_store %arg6[%c0_155, %c0_156], %283 {strides = array<i32>} : memref<8x96xf32, #tpu.memory_space<vmem>>, vector<8x96xf32>,
    return
  }
  func.func @transform_0(%arg0: i32) -> (i32, i32, i32) {
    %c0_i32 = arith.constant 0 : i32
    %c0_i32_0 = arith.constant 0 : i32
    %c0_i32_1 = arith.constant 0 : i32
    return %c0_i32, %arg0, %c0_i32_0 : i32, i32, i32
  }
  func.func @transform_1(%arg0: i32) -> (i32, i32) {
    %c0_i32 = arith.constant 0 : i32
    %c0_i32_0 = arith.constant 0 : i32
    %c0_i32_1 = arith.constant 0 : i32
    return %c0_i32, %c0_i32_0 : i32, i32
  }
  func.func @transform_2(%arg0: i32) -> (i32, i32) {
    %c0_i32 = arith.constant 0 : i32
    %c0_i32_0 = arith.constant 0 : i32
    %c0_i32_1 = arith.constant 0 : i32
    return %c0_i32, %c0_i32_0 : i32, i32
  }
  func.func @transform_3(%arg0: i32) -> (i32, i32) {
    %c0_i32 = arith.constant 0 : i32
    %c0_i32_0 = arith.constant 0 : i32
    %c0_i32_1 = arith.constant 0 : i32
    return %c0_i32, %c0_i32_0 : i32, i32
  }
  func.func @transform_4(%arg0: i32) -> (i32, i32) {
    %c0_i32 = arith.constant 0 : i32
    %c0_i32_0 = arith.constant 0 : i32
    %c0_i32_1 = arith.constant 0 : i32
    return %c0_i32, %c0_i32_0 : i32, i32
  }
  func.func @transform_5(%arg0: i32) -> (i32, i32) {
    %c0_i32 = arith.constant 0 : i32
    %c0_i32_0 = arith.constant 0 : i32
    return %arg0, %c0_i32 : i32, i32
  }
}

</mosaic_0001>

<bundles_post_ra>
// kernel: neg.2
= control target key start
LH: loop header
LB: loop body
LE: loop exit
PB: predicated region body
PF: predicated region fallthrough
CT: control target
= control target key end

     0   :  { %2 = vsyncpa [#allocation1], 0  ;;  %s75_s6 = smov [#allocation0]   ;;  %s112_s0 = inlined_call_operand.hbm [shape: f32[32,32], index: 0, kind: input, shape index: {}]   ;;  %s113_s1 = inlined_call_operand.vmem [shape: f32[32,32], index: 1, kind: output, shape index: {}]  }
   0x1   :  { %s6_s7 = sshll.u32 %s75_s6, 4  ;;  %s51_s10 = scalar_lea.hbm %s112_s0, 512  ;;  %s7_s7 = int_to_ptr.vmem [resolvable:$true] %s6_s7 }
   0x2   :  { %p52_p0 = scmp.ne.s32.totalorder %s112_s0, %s51_s10  ;;  %p55_p1 = scmp.lt.u32.totalorder %s51_s10, %s112_s0 }
   0x4   :  { %p57_p2 = pnand %p55_p1, %p52_p0 }
   0x6   :  { %60 = shalt.err (!%p57_p2)
}
   0x7   :  { %s61_s15 = scalar_lea.vmem %s7_s7, 512  ;;  %p66_p4 = scmp.lt.s32.totalorder %s7_s7, %s7_s7 }
   0x8   :  { %p62_p3 = scmp.ne.s32.totalorder %s7_s7, %s61_s15  ;;  %p67_p5 = scmp.lt.s32.totalorder %s61_s15, %s61_s15 }
   0xa   :  { %p68_p6 = por %p67_p5, %p66_p4 }
   0xc   :  { %p69_p7 = pnand %p68_p6, %p62_p3 }
   0xe   :  { %72 = shalt.err (!%p69_p7)
}
   0xf   :  { %s76_s16 = smov 128   ;;  %s77_s17 = smov 8  }
  0x10   :  { %12 = dma.hbm_to_vmem [thread:$0]  %s112_s0, 512, %s7_s7, [#allocation1], %s76_s16, %s76_s16, %s77_s17  }
  0x11   :  { %73 = dma.done.wait [#allocation1], 512  }
  0x12   :  { %74 = vsyncadd [#allocation1], 4294966784  ;;  %v14_v0 = vld [vmem:[#allocation0] sm:$0xff]  ;;  %v21_v1 = vld [vmem:[#allocation0 + $0x8] sm:$0xff] }
  0x13   :  { %v29_v2 = vld [vmem:[#allocation0 + $0x10] sm:$0xff]  ;;  %v17_v3 = vxor.u32 2147483648, %v14_v0  ;;  %v24_v4 = vxor.u32 2147483648, %v21_v1  ;;  %v37_v6 = vld [vmem:[#allocation0 + $0x18] sm:$0xff] }
  0x14   :  { %v32_v5 = vxor.u32 2147483648, %v29_v2  ;;  %v40_v7 = vxor.u32 2147483648, %v37_v6 }
  0x15   :  { %19 = vst [vmem:[%s113_s1] sm:$0xff] %v17_v3  ;;  %45 = vst [vmem:[%s113_s1 + $0x8] sm:$0xff] %v24_v4 }
  0x16   :  { %46 = vst [vmem:[%s113_s1 + $0x10] sm:$0xff] %v32_v5  ;;  %47 = vst [vmem:[%s113_s1 + $0x18] sm:$0xff] %v40_v7 }
  0x17   :  { %44 = vsyncpa [#allocation1], 1 }

// kernel: bihdm_forward.1
= control target key start
LH: loop header
LB: loop body
LE: loop exit
PB: predicated region body
PF: predicated region fallthrough
CT: control target
= control target key end

     0   :  { %v23612_v3 = vmov 0.0   ;;  %vm18754_vm0 = vmmov 0   ;;  %s18755_s13 = smov 64   ;;  %vm1395_vm2 = vcmask 523264   ;;  %s18756_s15 = smov 96   ;;  %vm11075_vm3 = vcmask 261120   ;;  %s23606_s1 = inlined_call_operand.vmem [shape: f32[384,384], index: 1, kind: input, shape index: {}]   ;;  %s23607_s0 = inlined_call_operand.vmem [shape: f32[30,8,384], index: 0, kind: input, shape index: {}]   ;;  %s23608_s2 = inlined_call_operand.vmem [shape: f32[1728,192], index: 2, kind: input, shape index: {}]   ;;  %s23609_s4 = inlined_call_operand.vmem [shape: f32[1,96], index: 4, kind: input, shape index: {}]   ;;  %s23610_s3 = inlined_call_operand.vmem [shape: f32[1,96], index: 3, kind: input, shape index: {}]   ;;  %s23611_s5 = inlined_call_operand.vmem [shape: f32[8,96], index: 5, kind: output, shape index: {}]  }
   0x1   :  { %v21_v0 = vld [vmem:[%s23606_s1 + $0x8] sm:$0xff]  ;;  %v24_v1 = vld [vmem:[%s23606_s1 + $0x20] sm:$0xff]  ;;  %319 = vmatprep.mubr.f32.mxu1 %v23612_v3  ;;  %248 = vmatprep.mubr.f32.mxu0 %v23612_v3  ;;  %v23_v5 = vld [vmem:[%s23606_s1 + $0x18] sm:$0xff]  ;;  %vm11079_vm4 = vcmask 785408  }
   0x2   :  { %v20_v2 = vld [vmem:[%s23606_s1] sm:$0xff]  ;;  %v18799_v4 = vpack.c.bf16 %v24_v1, %v21_v0  ;;  %v27_v6 = vld [vmem:[%s23606_s1 + $0x38] sm:$0xff]  ;;  %v30_v7 = vld [vmem:[%s23606_s1 + $0x50] sm:$0xff] }
   0x3   :  { %v18810_v8 = vpack.c.bf16 %v23_v5, %v20_v2  ;;  %v18812_v9 = vpack.c.bf16 %v30_v7, %v27_v6  ;;  %v26_v10 = vld [vmem:[%s23606_s1 + $0x30] sm:$0xff]  ;;  %v29_v11 = vld [vmem:[%s23606_s1 + $0x48] sm:$0xff]  ;;  %v36_v13 = vld [vmem:[%s23606_s1 + $0x80] sm:$0xff] }
   0x4   :  { %24113 = vst [vmem:[#allocation2_spill] sm:$0xff] %v18799_v4  ;;  %v33_v12 = vld [vmem:[%s23606_s1 + $0x68] sm:$0xff]  ;;  %13725 = vmatprep.subr.bf16.mxu0 %v18799_v4  ;;  %v18828_v14 = vpack.c.bf16 %v29_v11, %v26_v10  ;;  %v32_v16 = vld [vmem:[%s23606_s1 + $0x60] sm:$0xff]  ;;  %v35_v17 = vld [vmem:[%s23606_s1 + $0x78] sm:$0xff] }
   0x5   :  { %13727 = vmatpush1.bf16.msra.mxu0 %v18810_v8  ;;  %v18831_v15 = vpack.c.bf16 %v36_v13, %v33_v12  ;;  %v39_v18 = vld [vmem:[%s23606_s1 + $0x98] sm:$0xff]  ;;  %v42_v19 = vld [vmem:[%s23606_s1 + $0xb0] sm:$0xff]  ;;  %v18846_v20 = vpack.c.bf16 %v35_v17, %v32_v16  ;;  %v41_v23 = vld [vmem:[%s23606_s1 + $0xa8] sm:$0xff] }
   0x6   :  { %13729 = vmatprep.subr.bf16.mxu0 %v18812_v9  ;;  %v18849_v21 = vpack.c.bf16 %v42_v19, %v39_v18  ;;  %v38_v22 = vld [vmem:[%s23606_s1 + $0x90] sm:$0xff]  ;;  %v45_v24 = vld [vmem:[%s23606_s1 + $0xc8] sm:$0xff]  ;;  %v48_v25 = vld [vmem:[%s23606_s1 + $0xe0] sm:$0xff] }
   0x7   :  { %v117_v26 = vld [vmem:[%s23606_s1 + $0x308] sm:$0xff]  ;;  %v120_v27 = vld [vmem:[%s23606_s1 + $0x320] sm:$0xff]  ;;  %v18870_v28 = vpack.c.bf16 %v41_v23, %v38_v22  ;;  %v119_v32 = vld [vmem:[%s23606_s1 + $0x318] sm:$0xff]  ;;  %v18884_v33 = vpack.c.bf16 %v48_v25, %v45_v24 }
   0x8   :  { %v44_v29 = vld [vmem:[%s23606_s1 + $0xc0] sm:$0xff]  ;;  %v18875_v30 = vpack.c.bf16 %v120_v27, %v117_v26  ;;  %v47_v34 = vld [vmem:[%s23606_s1 + $0xd8] sm:$0xff]  ;;  %v126_v37 = vld [vmem:[%s23606_s1 + $0x350] sm:$0xff] }
   0x9   :  { %13731 = vmatpush1.bf16.msra.mxu0 %v18828_v14  ;;  %v116_v31 = vld [vmem:[%s23606_s1 + $0x300] sm:$0xff]  ;;  %v123_v36 = vld [vmem:[%s23606_s1 + $0x338] sm:$0xff]  ;;  %v54_v39 = vld [vmem:[%s23606_s1 + $0x110] sm:$0xff]  ;;  %v18914_v43 = vpack.c.bf16 %v47_v34, %v44_v29 }
   0xa   :  { %13733 = vmatprep.subr.bf16.mxu0 %v18831_v15  ;;  %24114 = vst [vmem:[#allocation3_spill] sm:$0xff] %v18875_v30  ;;  %v18889_v35 = vpack.c.bf16 %v119_v32, %v116_v31  ;;  %v51_v38 = vld [vmem:[%s23606_s1 + $0xf8] sm:$0xff]  ;;  %13789 = vmatprep.subr.bf16.mxu1 %v18875_v30  ;;  %v18904_v40 = vpack.c.bf16 %v126_v37, %v123_v36  ;;  %v122_v41 = vld [vmem:[%s23606_s1 + $0x330] sm:$0xff]  ;;  %v125_v42 = vld [vmem:[%s23606_s1 + $0x348] sm:$0xff] }
   0xb   :  { %24115 = vst [vmem:[#allocation4_spill] sm:$0xff] %v18914_v43  ;;  %v50_v44 = vld [vmem:[%s23606_s1 + $0xf0] sm:$0xff]  ;;  %v18920_v45 = vpack.c.bf16 %v125_v42, %v122_v41  ;;  %v129_v46 = vld [vmem:[%s23606_s1 + $0x368] sm:$0xff]  ;;  %v132_v47 = vld [vmem:[%s23606_s1 + $0x380] sm:$0xff]  ;;  %v18929_v48 = vpack.c.bf16 %v54_v39, %v51_v38 }
   0xc   :  { %13791 = vmatpush1.bf16.msra.mxu1 %v18889_v35  ;;  %v53_v49 = vld [vmem:[%s23606_s1 + $0x108] sm:$0xff]  ;;  %v18934_v50 = vpack.c.bf16 %v132_v47, %v129_v46  ;;  %v128_v51 = vld [vmem:[%s23606_s1 + $0x360] sm:$0xff]  ;;  %v131_v52 = vld [vmem:[%s23606_s1 + $0x378] sm:$0xff] }
   0xd   :  { %13735 = vmatpush1.bf16.msra.mxu0 %v18846_v20  ;;  %13793 = vmatprep.subr.bf16.mxu1 %v18904_v40  ;;  %v57_v53 = vld [vmem:[%s23606_s1 + $0x128] sm:$0xff]  ;;  %v60_v54 = vld [vmem:[%s23606_s1 + $0x140] sm:$0xff]  ;;  %v135_v55 = vld [vmem:[%s23606_s1 + $0x398] sm:$0xff]  ;;  %v18952_v56 = vpack.c.bf16 %v131_v52, %v128_v51  ;;  %v18958_v58 = vpack.c.bf16 %v53_v49, %v50_v44 }
   0xe   :  { %13737 = vmatprep.subr.bf16.mxu0 %v18849_v21  ;;  %v138_v57 = vld [vmem:[%s23606_s1 + $0x3b0] sm:$0xff]  ;;  %v56_v59 = vld [vmem:[%s23606_s1 + $0x120] sm:$0xff]  ;;  %v137_v62 = vld [vmem:[%s23606_s1 + $0x3a8] sm:$0xff]  ;;  %v18973_v63 = vpack.c.bf16 %v60_v54, %v57_v53 }
   0xf   :  { %v18964_v60 = vpack.c.bf16 %v138_v57, %v135_v55  ;;  %v134_v61 = vld [vmem:[%s23606_s1 + $0x390] sm:$0xff]  ;;  %v59_v0 = vld [vmem:[%s23606_s1 + $0x138] sm:$0xff]  ;;  %v141_v1 = vld [vmem:[%s23606_s1 + $0x3c8] sm:$0xff] }
  0x10   :  { %13795 = vmatpush1.bf16.msra.mxu1 %v18920_v45  ;;  %v144_v2 = vld [vmem:[%s23606_s1 + $0x3e0] sm:$0xff]  ;;  %v63_v5 = vld [vmem:[%s23606_s1 + $0x158] sm:$0xff]  ;;  %v66_v6 = vld [vmem:[%s23606_s1 + $0x170] sm:$0xff]  ;;  %v18991_v7 = vpack.c.bf16 %v137_v62, %v134_v61  ;;  %v18994_v10 = vpack.c.bf16 %v59_v0, %v56_v59 }
  0x11   :  { %13739 = vmatpush1.bf16.msra.mxu0 %v18870_v28  ;;  %13797 = vmatprep.subr.bf16.mxu1 %v18934_v50  ;;  %v62_v11 = vld [vmem:[%s23606_s1 + $0x150] sm:$0xff]  ;;  %v19000_v12 = vpack.c.bf16 %v144_v2, %v141_v1  ;;  %v140_v13 = vld [vmem:[%s23606_s1 + $0x3c0] sm:$0xff]  ;;  %v143_v16 = vld [vmem:[%s23606_s1 + $0x3d8] sm:$0xff]  ;;  %v19009_v17 = vpack.c.bf16 %v66_v6, %v63_v5 }
  0x12   :  { %13741 = vmatprep.subr.bf16.mxu0 %v18884_v33  ;;  %24116 = vst [vmem:[#allocation5_spill] sm:$0xff] %v18994_v10  ;;  %v65_v18 = vld [vmem:[%s23606_s1 + $0x168] sm:$0xff]  ;;  %v147_v19 = vld [vmem:[%s23606_s1 + $0x3f8] sm:$0xff]  ;;  %v150_v22 = vld [vmem:[%s23606_s1 + $0x410] sm:$0xff]  ;;  %v19027_v25 = vpack.c.bf16 %v143_v16, %v140_v13 }
  0x13   :  { %24117 = vst [vmem:[#allocation6_spill] sm:$0xff] %v19000_v12  ;;  %24118 = vst [vmem:[#allocation7_spill] sm:$0xff] %v19009_v17  ;;  %v69_v23 = vld [vmem:[%s23606_s1 + $0x188] sm:$0xff]  ;;  %v72_v24 = vld [vmem:[%s23606_s1 + $0x1a0] sm:$0xff]  ;;  %v19030_v26 = vpack.c.bf16 %v65_v18, %v62_v11  ;;  %v19036_v29 = vpack.c.bf16 %v150_v22, %v147_v19 }
  0x14   :  { %13799 = vmatpush1.bf16.msra.mxu1 %v18952_v56  ;;  %24119 = vst [vmem:[#allocation8_spill] sm:$0xff] %v19027_v25  ;;  %v68_v27 = vld [vmem:[%s23606_s1 + $0x180] sm:$0xff]  ;;  %v146_v31 = vld [vmem:[%s23606_s1 + $0x3f0] sm:$0xff]  ;;  %v149_v32 = vld [vmem:[%s23606_s1 + $0x408] sm:$0xff]  ;;  %v19045_v34 = vpack.c.bf16 %v72_v24, %v69_v23 }
  0x15   :  { %13743 = vmatpush1.bf16.msra.mxu0 %v18914_v43  ;;  %13801 = vmatprep.subr.bf16.mxu1 %v18964_v60  ;;  %24120 = vst [vmem:[#allocation9_spill] sm:$0xff] %v19030_v26  ;;  %24121 = vst [vmem:[#allocation10_spill] sm:$0xff] %v19036_v29  ;;  %v71_v36 = vld [vmem:[%s23606_s1 + $0x198] sm:$0xff]  ;;  %v153_v37 = vld [vmem:[%s23606_s1 + $0x428] sm:$0xff]  ;;  %v19063_v42 = vpack.c.bf16 %v149_v32, %v146_v31 }
  0x16   :  { %13745 = vmatprep.subr.bf16.mxu0 %v18929_v48  ;;  %24122 = vst [vmem:[#allocation11_spill] sm:$0xff] %v19045_v34  ;;  %v156_v38 = vld [vmem:[%s23606_s1 + $0x440] sm:$0xff]  ;;  %v75_v39 = vld [vmem:[%s23606_s1 + $0x1b8] sm:$0xff]  ;;  %v78_v41 = vld [vmem:[%s23606_s1 + $0x1d0] sm:$0xff]  ;;  %v19066_v44 = vpack.c.bf16 %v71_v36, %v68_v27 }
  0x17   :  { %24123 = vst [vmem:[#allocation12_spill] sm:$0xff] %v19063_v42  ;;  %v74_v46 = vld [vmem:[%s23606_s1 + $0x1b0] sm:$0xff]  ;;  %v19072_v47 = vpack.c.bf16 %v156_v38, %v153_v37  ;;  %v152_v49 = vld [vmem:[%s23606_s1 + $0x420] sm:$0xff]  ;;  %v155_v51 = vld [vmem:[%s23606_s1 + $0x438] sm:$0xff]  ;;  %v19081_v52 = vpack.c.bf16 %v78_v41, %v75_v39 }
  0x18   :  { %13803 = vmatpush1.bf16.msra.mxu1 %v18991_v7  ;;  %24124 = vst [vmem:[#allocation13_spill] sm:$0xff] %v19066_v44  ;;  %v77_v53 = vld [vmem:[%s23606_s1 + $0x1c8] sm:$0xff]  ;;  %v159_v54 = vld [vmem:[%s23606_s1 + $0x458] sm:$0xff]  ;;  %v162_v55 = vld [vmem:[%s23606_s1 + $0x470] sm:$0xff]  ;;  %v19099_v61 = vpack.c.bf16 %v155_v51, %v152_v49 }
  0x19   :  { %13747 = vmatpush1.bf16.msra.mxu0 %v18958_v58  ;;  %13805 = vmatprep.subr.bf16.mxu1 %v19000_v12  ;;  %24125 = vst [vmem:[#allocation14_spill] sm:$0xff] %v19072_v47  ;;  %24126 = vst [vmem:[#allocation15_spill] sm:$0xff] %v19081_v52  ;;  %v81_v57 = vld [vmem:[%s23606_s1 + $0x1e8] sm:$0xff]  ;;  %v84_v59 = vld [vmem:[%s23606_s1 + $0x200] sm:$0xff]  ;;  %v19102_v62 = vpack.c.bf16 %v77_v53, %v74_v46  ;;  %v19108_v1 = vpack.c.bf16 %v162_v55, %v159_v54 }
  0x1a   :  { %13749 = vmatprep.subr.bf16.mxu0 %v18973_v63  ;;  %24127 = vst [vmem:[#allocation16_spill] sm:$0xff] %v19099_v61  ;;  %v80_v0 = vld [vmem:[%s23606_s1 + $0x1e0] sm:$0xff]  ;;  %v158_v2 = vld [vmem:[%s23606_s1 + $0x450] sm:$0xff]  ;;  %v161_v5 = vld [vmem:[%s23606_s1 + $0x468] sm:$0xff]  ;;  %v19117_v6 = vpack.c.bf16 %v84_v59, %v81_v57 }
  0x1b   :  { %24128 = vst [vmem:[#allocation17_spill] sm:$0xff] %v19102_v62  ;;  %24129 = vst [vmem:[#allocation18_spill] sm:$0xff] %v19108_v1  ;;  %v83_v11 = vld [vmem:[%s23606_s1 + $0x1f8] sm:$0xff]  ;;  %v70_v13 = vld [vmem:[%s23606_s1 + $0x190] sm:$0xff]  ;;  %v19135_v22 = vpack.c.bf16 %v161_v5, %v158_v2 }
  0x1c   :  { %13807 = vmatpush1.bf16.msra.mxu1 %v19027_v25  ;;  %24130 = vst [vmem:[#allocation19_spill] sm:$0xff] %v19117_v6  ;;  %v73_v16 = vld [vmem:[%s23606_s1 + $0x1a8] sm:$0xff]  ;;  %v87_v18 = vld [vmem:[%s23606_s1 + $0x218] sm:$0xff]  ;;  %v90_v19 = vld [vmem:[%s23606_s1 + $0x230] sm:$0xff]  ;;  %v19138_v23 = vpack.c.bf16 %v83_v11, %v80_v0 }
  0x1d   :  { %13751 = vmatpush1.bf16.msra.mxu0 %v18994_v10  ;;  %13809 = vmatprep.subr.bf16.mxu1 %v19036_v29  ;;  %24131 = vst [vmem:[#allocation20_spill] sm:$0xff] %v19135_v22  ;;  %v86_v24 = vld [vmem:[%s23606_s1 + $0x210] sm:$0xff]  ;;  %v19144_v27 = vpack.c.bf16 %v73_v16, %v70_v13  ;;  %v25_v32 = vld [vmem:[%s23606_s1 + $0x28] sm:$0xff]  ;;  %v19153_v36 = vpack.c.bf16 %v90_v19, %v87_v18  ;;  %v76_v38 = vld [vmem:[%s23606_s1 + $0x1c0] sm:$0xff] }
  0x1e   :  { %13753 = vmatprep.subr.bf16.mxu0 %v19009_v17  ;;  %24132 = vst [vmem:[#allocation21_spill] sm:$0xff] %v19138_v23  ;;  %v22_v31 = vld [vmem:[%s23606_s1 + $0x10] sm:$0xff]  ;;  %v89_v37 = vld [vmem:[%s23606_s1 + $0x228] sm:$0xff]  ;;  %v79_v39 = vld [vmem:[%s23606_s1 + $0x1d8] sm:$0xff] }
  0x1f   :  { %24133 = vst [vmem:[#allocation22_spill] sm:$0xff] %v19144_v27  ;;  %24134 = vst [vmem:[#allocation23_spill] sm:$0xff] %v19153_v36  ;;  %v93_v41 = vld [vmem:[%s23606_s1 + $0x248] sm:$0xff]  ;;  %v96_v46 = vld [vmem:[%s23606_s1 + $0x260] sm:$0xff]  ;;  %v19171_v49 = vpack.c.bf16 %v25_v32, %v22_v31  ;;  %v19174_v51 = vpack.c.bf16 %v89_v37, %v86_v24  ;;  %v19180_v54 = vpack.c.bf16 %v79_v39, %v76_v38 }
  0x20   :  { %13811 = vmatpush1.bf16.msra.mxu1 %v19063_v42  ;;  %v92_v53 = vld [vmem:[%s23606_s1 + $0x240] sm:$0xff]  ;;  %v31_v57 = vld [vmem:[%s23606_s1 + $0x58] sm:$0xff]  ;;  %v19189_v59 = vpack.c.bf16 %v96_v46, %v93_v41  ;;  %v82_v2 = vld [vmem:[%s23606_s1 + $0x1f0] sm:$0xff] }
  0x21   :  { %13755 = vmatpush1.bf16.msra.mxu0 %v19030_v26  ;;  %13813 = vmatprep.subr.bf16.mxu1 %v19072_v47  ;;  %24135 = vst [vmem:[#allocation24_spill] sm:$0xff] %v19171_v49  ;;  %24136 = vst [vmem:[#allocation25_spill] sm:$0xff] %v19174_v51  ;;  %v28_v55 = vld [vmem:[%s23606_s1 + $0x40] sm:$0xff]  ;;  %v95_v0 = vld [vmem:[%s23606_s1 + $0x258] sm:$0xff] }
  0x22   :  { %13757 = vmatprep.subr.bf16.mxu0 %v19045_v34  ;;  %24137 = vst [vmem:[#allocation26_spill] sm:$0xff] %v19180_v54  ;;  %24138 = vst [vmem:[#allocation27_spill] sm:$0xff] %v19189_v59  ;;  %v85_v5 = vld [vmem:[%s23606_s1 + $0x208] sm:$0xff]  ;;  %v99_v11 = vld [vmem:[%s23606_s1 + $0x278] sm:$0xff]  ;;  %v19208_v16 = vpack.c.bf16 %v31_v57, %v28_v55  ;;  %v19212_v18 = vpack.c.bf16 %v95_v0, %v92_v53 }
  0x23   :  { %v102_v13 = vld [vmem:[%s23606_s1 + $0x290] sm:$0xff]  ;;  %v19218_v24 = vpack.c.bf16 %v85_v5, %v82_v2  ;;  %v37_v32 = vld [vmem:[%s23606_s1 + $0x88] sm:$0xff]  ;;  %v88_v39 = vld [vmem:[%s23606_s1 + $0x220] sm:$0xff] }
  0x24   :  { %13815 = vmatpush1.bf16.msra.mxu1 %v19099_v61  ;;  %24139 = vst [vmem:[#allocation28_spill] sm:$0xff] %v19208_v16  ;;  %24140 = vst [vmem:[#allocation29_spill] sm:$0xff] %v19212_v18  ;;  %v98_v19 = vld [vmem:[%s23606_s1 + $0x270] sm:$0xff]  ;;  %v19227_v37 = vpack.c.bf16 %v102_v13, %v99_v11  ;;  %v101_v38 = vld [vmem:[%s23606_s1 + $0x288] sm:$0xff] }
  0x25   :  { %13759 = vmatpush1.bf16.msra.mxu0 %v19066_v44  ;;  %13817 = vmatprep.subr.bf16.mxu1 %v19108_v1  ;;  %24141 = vst [vmem:[#allocation30_spill] sm:$0xff] %v19218_v24  ;;  %v34_v31 = vld [vmem:[%s23606_s1 + $0x70] sm:$0xff]  ;;  %v91_v41 = vld [vmem:[%s23606_s1 + $0x238] sm:$0xff]  ;;  %v105_v46 = vld [vmem:[%s23606_s1 + $0x2a8] sm:$0xff]  ;;  %v19251_v0 = vpack.c.bf16 %v101_v38, %v98_v19 }
  0x26   :  { %13761 = vmatprep.subr.bf16.mxu0 %v19081_v52  ;;  %24142 = vst [vmem:[#allocation31_spill] sm:$0xff] %v19227_v37  ;;  %v108_v53 = vld [vmem:[%s23606_s1 + $0x2c0] sm:$0xff]  ;;  %v19248_v57 = vpack.c.bf16 %v37_v32, %v34_v31  ;;  %v19257_v5 = vpack.c.bf16 %v91_v41, %v88_v39  ;;  %v43_v13 = vld [vmem:[%s23606_s1 + $0xb8] sm:$0xff]  ;;  %v94_v32 = vld [vmem:[%s23606_s1 + $0x250] sm:$0xff] }
  0x27   :  { %v168_v55 = vld [vmem:[%s23607_s0] sm:$0xff]  ;;  %24144 = vst [vmem:[#allocation33_spill] sm:$0xff] %v19251_v0  ;;  %v19266_v19 = vpack.c.bf16 %v108_v53, %v105_v46  ;;  %v107_v31 = vld [vmem:[%s23606_s1 + $0x2b8] sm:$0xff]  ;;  %v97_v38 = vld [vmem:[%s23606_s1 + $0x268] sm:$0xff] }
  0x28   :  { %13819 = vmatpush1.bf16.msra.mxu1 %v19135_v22  ;;  %24143 = vst [vmem:[#allocation32_spill] sm:$0xff] %v19248_v57  ;;  %v104_v2 = vld [vmem:[%s23606_s1 + $0x2a0] sm:$0xff]  ;;  %24145 = vst [vmem:[#allocation34_spill] sm:$0xff] %v19257_v5  ;;  %v111_v39 = vld [vmem:[%s23606_s1 + $0x2d8] sm:$0xff]  ;;  %18582 = vtanh.f32 %v168_v55  ;;  %v19293_v22 = vpack.c.bf16 %v97_v38, %v94_v32 }
  0x29   :  { %13763 = vmatpush1.bf16.msra.mxu0 %v19102_v62  ;;  %13821 = vmatprep.subr.bf16.mxu1 %v19144_v27  ;;  %v40_v11 = vld [vmem:[%s23606_s1 + $0xa0] sm:$0xff]  ;;  %24146 = vst [vmem:[#allocation35_spill] sm:$0xff] %v19266_v19  ;;  %v114_v41 = vld [vmem:[%s23606_s1 + $0x2f0] sm:$0xff]  ;;  %v19287_v53 = vpack.c.bf16 %v107_v31, %v104_v2  ;;  %v103_v32 = vld [vmem:[%s23606_s1 + $0x298] sm:$0xff] }
  0x2a   :  { %13765 = vmatprep.subr.bf16.mxu0 %v19117_v6  ;;  %v19284_v46 = vpack.c.bf16 %v43_v13, %v40_v11  ;;  %24149 = vst [vmem:[#allocation38_spill] sm:$0xff] %v19293_v22  ;;  %v46_v55 = vld [vmem:[%s23606_s1 + $0xd0] sm:$0xff]  ;;  %v49_v11 = vld [vmem:[%s23606_s1 + $0xe8] sm:$0xff]  ;;  %v19302_v2 = vpack.c.bf16 %v114_v41, %v111_v39  ;;  %v100_v31 = vld [vmem:[%s23606_s1 + $0x280] sm:$0xff] }
  0x2b   :  { %320 = vmatmul.mubr.f32.vlgmr.msra.gmra.mrb[0].mxu1 %v23612_v3  ;;  %24148 = vst [vmem:[#allocation37_spill] sm:$0xff] %v19287_v53  ;;  %v113_v13 = vld [vmem:[%s23606_s1 + $0x2e8] sm:$0xff]  ;;  %v19314_v38 = vpack.c.bf16 %v49_v11, %v46_v55  ;;  %v19320_v41 = vpack.c.bf16 %v103_v32, %v100_v31  ;;  %v52_v1 = vld [vmem:[%s23606_s1 + $0x100] sm:$0xff]  ;;  %v55_v61 = vld [vmem:[%s23606_s1 + $0x118] sm:$0xff] }
  0x2c   :  { %13823 = vmatpush3.bf16.msra.mxu1 %v19171_v49  ;;  %390 = vmatprep.mubr.f32.mxu1 %v23612_v3  ;;  %24147 = vst [vmem:[#allocation36_spill] sm:$0xff] %v19284_v46  ;;  %v110_v3 = vld [vmem:[%s23606_s1 + $0x2d0] sm:$0xff]  ;;  %24150 = vst [vmem:[#allocation39_spill] sm:$0xff] %v19302_v2  ;;  %v19336_v11 = vpack.c.bf16 %v55_v61, %v52_v1  ;;  %v61_v47 = vld [vmem:[%s23606_s1 + $0x148] sm:$0xff] }
  0x2d   :  { %13767 = vmatpush1.bf16.msra.mxu0 %v19138_v23  ;;  %13825 = vmatprep.subr.bf16.mxu1 %v19180_v54  ;;  %24151 = vst [vmem:[#allocation40_spill] sm:$0xff] %v19314_v38  ;;  %v19317_v39 = vpack.c.bf16 %v113_v13, %v110_v3  ;;  %24153 = vst [vmem:[#allocation42_spill] sm:$0xff] %v19320_v41  ;;  %v106_v55 = vld [vmem:[%s23606_s1 + $0x2b0] sm:$0xff]  ;;  %v109_v3 = vld [vmem:[%s23606_s1 + $0x2c8] sm:$0xff] }
  0x2e   :  { %13769 = vmatprep.subr.bf16.mxu0 %v19153_v36  ;;  %24154 = vst [vmem:[#allocation43_spill] sm:$0xff] %v19336_v11  ;;  %v19340_v31 = vpack.c.bf16 %v109_v3, %v106_v55  ;;  %v58_v32 = vld [vmem:[%s23606_s1 + $0x130] sm:$0xff]  ;;  %v112_v61 = vld [vmem:[%s23606_s1 + $0x2e0] sm:$0xff]  ;;  %v115_v1 = vld [vmem:[%s23606_s1 + $0x2f8] sm:$0xff] }
  0x2f   :  { %24152 = vst [vmem:[#allocation41_spill] sm:$0xff] %v19317_v39  ;;  %v19356_v55 = vpack.c.bf16 %v61_v47, %v58_v32  ;;  %v19359_v3 = vpack.c.bf16 %v115_v1, %v112_v61  ;;  %v64_v42 = vld [vmem:[%s23606_s1 + $0x160] sm:$0xff]  ;;  %v67_v29 = vld [vmem:[%s23606_s1 + $0x178] sm:$0xff]  ;;  %v118_v32 = vld [vmem:[%s23606_s1 + $0x310] sm:$0xff] }
  0x30   :  { %13827 = vmatpush3.bf16.msra.mxu1 %v19208_v16  ;;  %24155 = vst [vmem:[#allocation44_spill] sm:$0xff] %v19340_v31  ;;  %v19370_v47 = vpack.c.bf16 %v67_v29, %v64_v42  ;;  %v121_v61 = vld [vmem:[%s23606_s1 + $0x328] sm:$0xff]  ;;  %v23642_v29 = vmov 0.0|0.0   ;;  %v124_v42 = vld [vmem:[%s23606_s1 + $0x340] sm:$0xff] }
  0x31   :  { %13771 = vmatpush1.bf16.msra.mxu0 %v19174_v51  ;;  %13829 = vmatprep.subr.bf16.mxu1 %v19218_v24  ;;  %24156 = vst [vmem:[#allocation45_spill] sm:$0xff] %v19356_v55  ;;  %24157 = vst [vmem:[#allocation46_spill] sm:$0xff] %v19359_v3  ;;  %v19382_v1 = vpack.c.bf16 %v121_v61, %v118_v32  ;;  %v24161_v61 = vmov 0.0  }
  0x32   :  { %13773 = vmatprep.subr.bf16.mxu0 %v19189_v59  ;;  %v18583_v13 = vpop.eup %18582  ;;  %24158 = vst [vmem:[#allocation47_spill] sm:$0xff] %v19370_v47 }
  0x33   :  { %24159 = vst [vmem:[#allocation48_spill] sm:$0xff] %v19382_v1 }
  0x34   :  { %13831 = vmatpush3.bf16.msra.mxu1 %v19248_v57 }
  0x35   :  { %13775 = vmatpush1.bf16.msra.mxu0 %v19212_v18  ;;  %13833 = vmatprep.subr.bf16.mxu1 %v19257_v5 }
  0x36   :  { %13777 = vmatprep.subr.bf16.mxu0 %v19227_v37 }
  0x38   :  { %13835 = vmatpush3.bf16.msra.mxu1 %v19284_v46 }
  0x39   :  { %13779 = vmatpush1.bf16.msra.mxu0 %v19251_v0  ;;  %13837 = vmatprep.subr.bf16.mxu1 %v19293_v22 }
  0x3a   :  { %13781 = vmatprep.subr.bf16.mxu0 %v19266_v19 }
  0x3c   :  { %13839 = vmatpush3.bf16.msra.mxu1 %v19314_v38 }
  0x3d   :  { %13783 = vmatpush1.bf16.msra.mxu0 %v19287_v53  ;;  %13841 = vmatprep.subr.bf16.mxu1 %v19320_v41 }
  0x3e   :  { %13785 = vmatprep.subr.bf16.mxu0 %v19302_v2 }
  0x40   :  { %13843 = vmatpush3.bf16.msra.mxu1 %v19336_v11 }
  0x41   :  { %13787 = vmatpush1.bf16.msra.mxu0 %v19317_v39  ;;  %13845 = vmatprep.subr.bf16.mxu1 %v19340_v31 }
  0x42   :  { %13973 = vmatprep.subr.bf16.mxu0 %v19144_v27 }
  0x44   :  { %249 = vmatmul.mubr.f32.vlgmr.msra.gmra.mrb[0].mxu0 %v18583_v13  ;;  %13847 = vmatpush3.bf16.msra.mxu1 %v19356_v55 }
  0x45   :  { %13975 = vmatpush3.bf16.msra.mxu0 %v19171_v49  ;;  %13849 = vmatprep.subr.bf16.mxu1 %v19359_v3 }
  0x46   :  { %13977 = vmatprep.subr.bf16.mxu0 %v19180_v54  ;;  %v127_v54 = vld [vmem:[%s23606_s1 + $0x358] sm:$0xff] }
  0x47   :  { %v19394_v32 = vpack.c.bf16 %v127_v54, %v124_v42  ;;  %v139_v42 = vld [vmem:[%s23606_s1 + $0x3b8] sm:$0xff] }
  0x48   :  { %13851 = vmatpush3.bf16.msra.mxu1 %v19370_v47 }
  0x49   :  { %13979 = vmatpush3.bf16.msra.mxu0 %v19208_v16  ;;  %13852 = vmatprep.subr.bf16.mxu1 %v23642_v29  ;;  %24160 = vst [vmem:[#allocation49_spill] sm:$0xff] %v19394_v32 }
  0x4a   :  { %13981 = vmatprep.subr.bf16.mxu0 %v19218_v24  ;;  %v130_v24 = vld [vmem:[%s23606_s1 + $0x370] sm:$0xff] }
  0x4b   :  { %391 = vmatmul.mubr.f32.vlgmr.msra.gmra.mrb[2].mxu1 %v18583_v13  ;;  %v136_v13 = vld [vmem:[%s23606_s1 + $0x3a0] sm:$0xff] }
  0x4c   :  { %13854 = vmatpush3.bf16.msra.mxu1 %v19382_v1  ;;  %12741 = vmatprep.mubr.msk.f32.mxu1 %vm18754_vm0, %v24161_v61 }
  0x4d   :  { %13983 = vmatpush3.bf16.msra.mxu0 %v19248_v57  ;;  %13855 = vmatprep.subr.bf16.mxu1 %v23642_v29  ;;  %v133_v57 = vld [vmem:[%s23606_s1 + $0x388] sm:$0xff] }
  0x4e   :  { %13985 = vmatprep.subr.bf16.mxu0 %v19257_v5  ;;  %v19408_v54 = vpack.c.bf16 %v133_v57, %v130_v24  ;;  %v142_v24 = vld [vmem:[%s23606_s1 + $0x3d0] sm:$0xff]  ;;  %v145_v57 = vld [vmem:[%s23606_s1 + $0x3e8] sm:$0xff] }
  0x50   :  { %13857 = vmatpush3.bf16.msra.mxu1 %v19394_v32  ;;  %24162 = vst [vmem:[#allocation50_spill] sm:$0xff] %v19408_v54 }
  0x51   :  { %13987 = vmatpush3.bf16.msra.mxu0 %v19284_v46  ;;  %13858 = vmatprep.subr.bf16.mxu1 %v23642_v29 }
  0x52   :  { %13989 = vmatprep.subr.bf16.mxu0 %v19293_v22  ;;  %v19420_v22 = vpack.c.bf16 %v139_v42, %v136_v13  ;;  %v148_v13 = vld [vmem:[%s23606_s1 + $0x400] sm:$0xff]  ;;  %v151_v42 = vld [vmem:[%s23606_s1 + $0x418] sm:$0xff] }
  0x54   :  { %13860 = vmatpush3.bf16.msra.mxu1 %v19408_v54  ;;  %24163 = vst [vmem:[#allocation51_spill] sm:$0xff] %v19420_v22 }
  0x55   :  { %13991 = vmatpush3.bf16.msra.mxu0 %v19314_v38  ;;  %13861 = vmatprep.subr.bf16.mxu1 %v23642_v29 }
  0x56   :  { %13993 = vmatprep.subr.bf16.mxu0 %v19320_v41  ;;  %v19432_v41 = vpack.c.bf16 %v145_v57, %v142_v24  ;;  %v154_v24 = vld [vmem:[%s23606_s1 + $0x430] sm:$0xff]  ;;  %v157_v57 = vld [vmem:[%s23606_s1 + $0x448] sm:$0xff] }
  0x58   :  { %13863 = vmatpush3.bf16.msra.mxu1 %v19420_v22  ;;  %24164 = vst [vmem:[#allocation52_spill] sm:$0xff] %v19432_v41 }
  0x59   :  { %13995 = vmatpush3.bf16.msra.mxu0 %v19336_v11  ;;  %13864 = vmatprep.subr.bf16.mxu1 %v23642_v29 }
  0x5a   :  { %13997 = vmatprep.subr.bf16.mxu0 %v19340_v31  ;;  %v19444_v31 = vpack.c.bf16 %v151_v42, %v148_v13  ;;  %v160_v13 = vld [vmem:[%s23606_s1 + $0x460] sm:$0xff]  ;;  %v163_v42 = vld [vmem:[%s23606_s1 + $0x478] sm:$0xff] }
  0x5c   :  { %13866 = vmatpush3.bf16.msra.mxu1 %v19432_v41  ;;  %24165 = vst [vmem:[#allocation53_spill] sm:$0xff] %v19444_v31 }
  0x5d   :  { %13999 = vmatpush3.bf16.msra.mxu0 %v19356_v55  ;;  %13867 = vmatprep.subr.bf16.mxu1 %v23642_v29  ;;  %v19466_v55 = vpack.c.bf16 %v163_v42, %v160_v13  ;;  %v11085_v13 = vld [vmem:[%s23607_s0 + $0x18] sm:$0xff] }
  0x5e   :  { %14001 = vmatprep.subr.bf16.mxu0 %v19359_v3  ;;  %v19456_v3 = vpack.c.bf16 %v157_v57, %v154_v24 }
  0x5f   :  { %24167 = vst [vmem:[#allocation55_spill] sm:$0xff] %v19466_v55 }
  0x60   :  { %13869 = vmatpush3.bf16.msra.mxu1 %v19444_v31  ;;  %24166 = vst [vmem:[#allocation54_spill] sm:$0xff] %v19456_v3 }
  0x61   :  { %14003 = vmatpush3.bf16.msra.mxu0 %v19370_v47  ;;  %13870 = vmatprep.subr.bf16.mxu1 %v23642_v29 }
  0x62   :  { %14004 = vmatprep.subr.bf16.mxu0 %v23642_v29 }
  0x64   :  { %13872 = vmatpush3.bf16.msra.mxu1 %v19456_v3 }
  0x65   :  { %13873 = vmatprep.subr.bf16.mxu1 %v23642_v29 }
  0x68   :  { %13875 = vmatpush3.bf16.msra.mxu1 %v19466_v55 }
  0x69   :  { %13877 = vmatprep.subr.bf16.mxu1 %v18799_v4 }
  0x6b   :  { %12742 = vmatmul.mubr.f32.vlgmr.msra.gmra.mrb[4].mxu1 %v24161_v61 }
  0x6c   :  { %13879 = vmatpush1.bf16.msra.mxu1 %v18810_v8 }
  0x6d   :  { %13881 = vmatprep.subr.bf16.mxu1 %v18812_v9 }
  0x70   :  { %13883 = vmatpush1.bf16.msra.mxu1 %v18828_v14 }
  0x71   :  { %13885 = vmatprep.subr.bf16.mxu1 %v18831_v15 }
  0x74   :  { %13887 = vmatpush1.bf16.msra.mxu1 %v18846_v20 }
  0x75   :  { %13889 = vmatprep.subr.bf16.mxu1 %v18849_v21 }
  0x78   :  { %13891 = vmatpush1.bf16.msra.mxu1 %v18870_v28 }
  0x79   :  { %13893 = vmatprep.subr.bf16.mxu1 %v18884_v33 }
  0x7c   :  { %13895 = vmatpush1.bf16.msra.mxu1 %v18914_v43 }
  0x7d   :  { %13897 = vmatprep.subr.bf16.mxu1 %v18929_v48 }
  0x80   :  { %13899 = vmatpush1.bf16.msra.mxu1 %v18958_v58 }
  0x81   :  { %13901 = vmatprep.subr.bf16.mxu1 %v18973_v63 }
  0x84   :  { %13903 = vmatpush1.bf16.msra.mxu1 %v18994_v10 }
  0x85   :  { %13905 = vmatprep.subr.bf16.mxu1 %v19009_v17 }
  0x88   :  { %13907 = vmatpush1.bf16.msra.mxu1 %v19030_v26 }
  0x89   :  { %13909 = vmatprep.subr.bf16.mxu1 %v19045_v34 }
  0x8c   :  { %13911 = vmatpush1.bf16.msra.mxu1 %v19066_v44 }
  0x8d   :  { %13913 = vmatprep.subr.bf16.mxu1 %v19081_v52 }
  0x90   :  { %13915 = vmatpush1.bf16.msra.mxu1 %v19102_v62 }
  0x91   :  { %13917 = vmatprep.subr.bf16.mxu1 %v19117_v6 }
  0x94   :  { %13919 = vmatpush1.bf16.msra.mxu1 %v19138_v23 }
  0x95   :  { %13921 = vmatprep.subr.bf16.mxu1 %v19153_v36 }
  0x98   :  { %13923 = vmatpush1.bf16.msra.mxu1 %v19174_v51 }
  0x99   :  { %13925 = vmatprep.subr.bf16.mxu1 %v19189_v59 }
  0x9c   :  { %13927 = vmatpush1.bf16.msra.mxu1 %v19212_v18 }
  0x9d   :  { %13929 = vmatprep.subr.bf16.mxu1 %v19227_v37 }
  0xa0   :  { %13931 = vmatpush1.bf16.msra.mxu1 %v19251_v0 }
  0xa1   :  { %13933 = vmatprep.subr.bf16.mxu1 %v19266_v19  ;;  %v11086_v19 = vld [vmem:[%s23607_s0 + $0x20] sm:$0xff] }
  0xa4   :  { %13935 = vmatpush1.bf16.msra.mxu1 %v19287_v53 }
  0xa5   :  { %13937 = vmatprep.subr.bf16.mxu1 %v19302_v2 }
  0xa8   :  { %13939 = vmatpush1.bf16.msra.mxu1 %v19317_v39 }
  0xa9   :  { %13941 = vmatprep.subr.bf16.mxu1 %v18875_v30 }
  0xfe   :  { %v321_v24 = vpop.f32.mrb[0].mxu1 }
  0xff   :  { %v323_v57 = vpop.f32.mrb[1].mxu1 }
 0x117   :  { %v250_v42 = vpop.f32.mrb[0].mxu0 }
 0x118   :  { %v322_v29 = vadd.f32 %v321_v24, %v250_v42  ;;  %v252_v0 = vpop.f32.mrb[1].mxu0  ;;  %v24168_v24 = vmov 0.0|0.0   ;;  %v24179_v42 = vld [vmem:[#allocation42_spill] sm:$0xff] }
 0x119   :  { %v324_v53 = vadd.f32 %v323_v57, %v252_v0  ;;  %v24177_v57 = vld [vmem:[#allocation32_spill] sm:$0xff] }
 0x11a   :  { %v466_v37 = vadd.f32 %v11085_v13, %v322_v29  ;;  %v24176_v29 = vld [vmem:[#allocation30_spill] sm:$0xff] }
 0x11b   :  { %v467_v2 = vadd.f32 %v11086_v19, %v324_v53  ;;  %v24173_v19 = vld [vmem:[#allocation18_spill] sm:$0xff] }
 0x11c   :  { %v24178_v13 = vld [vmem:[#allocation38_spill] sm:$0xff] }
 0x11d   :  { %18584 = vtanh.f32 %v467_v2  ;;  %v24174_v2 = vld [vmem:[#allocation20_spill] sm:$0xff] }
 0x11e   :  { %18586 = vtanh.f32 %v466_v37  ;;  %v11233_v39 = vpop.f32.mrb[2].mxu1  ;;  %v24172_v37 = vld [vmem:[#allocation16_spill] sm:$0xff] }
 0x11f   :  { %v11234_v30 = vpop.f32.mrb[3].mxu1  ;;  %v24175_v39 = vld [vmem:[#allocation26_spill] sm:$0xff] }
 0x120   :  { %v24169_v30 = vld [vmem:[#allocation10_spill] sm:$0xff] }
 0x127   :  { %v18585_v18 = vpop.eup %18584 }
 0x128   :  { %v18587_v59 = vpop.eup %18586  ;;  %546 = vmatprep.mubr.f32.mxu1 %v18585_v18  ;;  %688 = vmatprep.mubr.f32.mxu0 %v18585_v18  ;;  %v24171_v18 = vld [vmem:[#allocation14_spill] sm:$0xff] }
 0x129   :  { %547 = vmatmul.mubr.f32.vlgmr.msra.gmra.mrb[6].mxu1 %v18587_v59  ;;  %689 = vmatmul.mubr.f32.vlgmr.msra.gmra.mrb[2].mxu0 %v18587_v59  ;;  %v24170_v59 = vld [vmem:[#allocation12_spill] sm:$0xff] }
 0x12a   :  { %13943 = vmatpush1.bf16.msra.mxu1 %v18889_v35  ;;  %14006 = vmatpush3.bf16.msra.mxu0 %v19382_v1 }
 0x12b   :  { %13945 = vmatprep.subr.bf16.mxu1 %v18904_v40  ;;  %14007 = vmatprep.subr.bf16.mxu0 %v24168_v24 }
 0x12c   :  { %617 = vmatprep.mubr.f32.mxu1 %v24161_v61  ;;  %12776 = vmatprep.mubr.msk.f32.mxu0 %vm18754_vm0, %v24161_v61 }
 0x12e   :  { %13947 = vmatpush1.bf16.msra.mxu1 %v18920_v45  ;;  %14009 = vmatpush3.bf16.msra.mxu0 %v19394_v32 }
 0x12f   :  { %13949 = vmatprep.subr.bf16.mxu1 %v18934_v50  ;;  %14010 = vmatprep.subr.bf16.mxu0 %v24168_v24 }
 0x132   :  { %13951 = vmatpush1.bf16.msra.mxu1 %v18952_v56  ;;  %14012 = vmatpush3.bf16.msra.mxu0 %v19408_v54 }
 0x133   :  { %13953 = vmatprep.subr.bf16.mxu1 %v18964_v60  ;;  %14013 = vmatprep.subr.bf16.mxu0 %v24168_v24 }
 0x136   :  { %13955 = vmatpush1.bf16.msra.mxu1 %v18991_v7  ;;  %14015 = vmatpush3.bf16.msra.mxu0 %v19420_v22 }
 0x137   :  { %13957 = vmatprep.subr.bf16.mxu1 %v19000_v12  ;;  %14016 = vmatprep.subr.bf16.mxu0 %v24168_v24 }
 0x13a   :  { %13959 = vmatpush1.bf16.msra.mxu1 %v19027_v25  ;;  %14018 = vmatpush3.bf16.msra.mxu0 %v19432_v41 }
 0x13b   :  { %13961 = vmatprep.subr.bf16.mxu1 %v24169_v30  ;;  %14019 = vmatprep.subr.bf16.mxu0 %v24168_v24 }
 0x13e   :  { %13963 = vmatpush1.bf16.msra.mxu1 %v24170_v59  ;;  %14021 = vmatpush3.bf16.msra.mxu0 %v19444_v31  ;;  %v462_v0 = vpop.f32.mrb[4].mxu1 }
 0x13f   :  { %13965 = vmatprep.subr.bf16.mxu1 %v24171_v18  ;;  %14022 = vmatprep.subr.bf16.mxu0 %v24168_v24  ;;  %v12743_v53 = vpop.f32.mrb[5].mxu1  ;;  %v24180_v0 = vld [vmem:[#allocation44_spill] sm:$0xff] }
 0x140   :  { %v24181_v53 = vld [vmem:[#allocation45_spill] sm:$0xff] }
 0x142   :  { %13967 = vmatpush1.bf16.msra.mxu1 %v24172_v37  ;;  %14024 = vmatpush3.bf16.msra.mxu0 %v19456_v3 }
 0x143   :  { %13969 = vmatprep.subr.bf16.mxu1 %v24173_v19  ;;  %14025 = vmatprep.subr.bf16.mxu0 %v24168_v24 }
 0x146   :  { %13971 = vmatpush1.bf16.msra.mxu1 %v24174_v2  ;;  %14027 = vmatpush3.bf16.msra.mxu0 %v19466_v55 }
 0x147   :  { %14029 = vmatprep.subr.bf16.mxu0 %v18799_v4  ;;  %14125 = vmatprep.subr.bf16.mxu1 %v19144_v27 }
 0x149   :  { %618 = vmatmul.mubr.f32.vlgmr.msra.gmra.mrb[6].mxu1 %v24161_v61  ;;  %12777 = vmatmul.mubr.f32.vlgmr.msra.gmra.mrb[4].mxu0 %v24161_v61 }
 0x14a   :  { %14031 = vmatpush1.bf16.msra.mxu0 %v18810_v8  ;;  %14127 = vmatpush3.bf16.msra.mxu1 %v19171_v49 }
 0x14b   :  { %14033 = vmatprep.subr.bf16.mxu0 %v18812_v9  ;;  %14129 = vmatprep.subr.bf16.mxu1 %v24175_v39 }
 0x14e   :  { %14035 = vmatpush1.bf16.msra.mxu0 %v18828_v14  ;;  %14131 = vmatpush3.bf16.msra.mxu1 %v19208_v16 }
 0x14f   :  { %14037 = vmatprep.subr.bf16.mxu0 %v18831_v15  ;;  %14133 = vmatprep.subr.bf16.mxu1 %v24176_v29 }
 0x152   :  { %14039 = vmatpush1.bf16.msra.mxu0 %v18846_v20  ;;  %14135 = vmatpush3.bf16.msra.mxu1 %v24177_v57 }
 0x153   :  { %14041 = vmatprep.subr.bf16.mxu0 %v18849_v21  ;;  %14137 = vmatprep.subr.bf16.mxu1 %v19257_v5 }
 0x156   :  { %14043 = vmatpush1.bf16.msra.mxu0 %v18870_v28  ;;  %14139 = vmatpush3.bf16.msra.mxu1 %v19284_v46 }
 0x157   :  { %14045 = vmatprep.subr.bf16.mxu0 %v18884_v33  ;;  %14141 = vmatprep.subr.bf16.mxu1 %v24178_v13 }
 0x15a   :  { %14047 = vmatpush1.bf16.msra.mxu0 %v18914_v43  ;;  %14143 = vmatpush3.bf16.msra.mxu1 %v19314_v38  ;;  %v24182_v43 = vld [vmem:[#allocation46_spill] sm:$0xff] }
 0x15b   :  { %14049 = vmatprep.subr.bf16.mxu0 %v18929_v48  ;;  %14145 = vmatprep.subr.bf16.mxu1 %v24179_v42 }
 0x15e   :  { %14051 = vmatpush1.bf16.msra.mxu0 %v18958_v58  ;;  %14147 = vmatpush3.bf16.msra.mxu1 %v19336_v11 }
 0x15f   :  { %14053 = vmatprep.subr.bf16.mxu0 %v18973_v63  ;;  %14149 = vmatprep.subr.bf16.mxu1 %v24180_v0 }
 0x162   :  { %14055 = vmatpush1.bf16.msra.mxu0 %v18994_v10  ;;  %14151 = vmatpush3.bf16.msra.mxu1 %v24181_v53 }
 0x163   :  { %14057 = vmatprep.subr.bf16.mxu0 %v19009_v17  ;;  %14153 = vmatprep.subr.bf16.mxu1 %v24182_v43  ;;  %v24186_v43 = vld [vmem:[#allocation33_spill] sm:$0xff] }
 0x166   :  { %14059 = vmatpush1.bf16.msra.mxu0 %v19030_v26  ;;  %14155 = vmatpush3.bf16.msra.mxu1 %v19370_v47  ;;  %v24183_v26 = vld [vmem:[#allocation27_spill] sm:$0xff]  ;;  %v24184_v47 = vld [vmem:[#allocation29_spill] sm:$0xff] }
 0x167   :  { %14061 = vmatprep.subr.bf16.mxu0 %v19045_v34  ;;  %14156 = vmatprep.subr.bf16.mxu1 %v24168_v24  ;;  %v24185_v34 = vld [vmem:[#allocation31_spill] sm:$0xff] }
 0x16a   :  { %14063 = vmatpush1.bf16.msra.mxu0 %v19066_v44  ;;  %v24187_v44 = vld [vmem:[#allocation35_spill] sm:$0xff] }
 0x16b   :  { %14065 = vmatprep.subr.bf16.mxu0 %v19081_v52  ;;  %v24188_v52 = vld [vmem:[#allocation37_spill] sm:$0xff] }
 0x16e   :  { %14067 = vmatpush1.bf16.msra.mxu0 %v19102_v62  ;;  %v24189_v62 = vld [vmem:[#allocation39_spill] sm:$0xff] }
 0x16f   :  { %14069 = vmatprep.subr.bf16.mxu0 %v19117_v6  ;;  %v24190_v6 = vld [vmem:[#allocation41_spill] sm:$0xff] }
 0x172   :  { %14071 = vmatpush1.bf16.msra.mxu0 %v19138_v23  ;;  %v24191_v23 = vld [vmem:[#allocation3_spill] sm:$0xff] }
 0x173   :  { %14073 = vmatprep.subr.bf16.mxu0 %v19153_v36 }
 0x176   :  { %14075 = vmatpush1.bf16.msra.mxu0 %v19174_v51 }
 0x177   :  { %14077 = vmatprep.subr.bf16.mxu0 %v24183_v26 }
 0x17a   :  { %14079 = vmatpush1.bf16.msra.mxu0 %v24184_v47  ;;  %v11088_v47 = vld [vmem:[%s23607_s0 + $0x30] sm:$0xff] }
 0x17b   :  { %14081 = vmatprep.subr.bf16.mxu0 %v24185_v34 }
 0x17e   :  { %14083 = vmatpush1.bf16.msra.mxu0 %v24186_v43  ;;  %v11089_v43 = vld [vmem:[%s23607_s0 + $0x38] sm:$0xff] }
 0x17f   :  { %14085 = vmatprep.subr.bf16.mxu0 %v24187_v44 }
 0x182   :  { %14087 = vmatpush1.bf16.msra.mxu0 %v24188_v52 }
 0x183   :  { %14089 = vmatprep.subr.bf16.mxu0 %v24189_v62 }
 0x186   :  { %14091 = vmatpush1.bf16.msra.mxu0 %v24190_v6 }
 0x187   :  { %14093 = vmatprep.subr.bf16.mxu0 %v24191_v23 }
 0x1fc   :  { %v11285_v36 = vpop.f32.mrb[2].mxu0 }
 0x1fd   :  { %v11286_v51 = vpop.f32.mrb[3].mxu0 }
 0x1fe   :  { %v11287_v17 = vadd.f32 %v11286_v51, %v11285_v36  ;;  %v24196_v36 = vld [vmem:[#allocation46_spill] sm:$0xff]  ;;  %v24197_v51 = vld [vmem:[#allocation9_spill] sm:$0xff] }
 0x21c   :  { %v619_v44 = vpop.f32.mrb[6].mxu1  ;;  %v760_v34 = vpop.f32.mrb[4].mxu0 }
 0x21d   :  { %v764_v52 = vadd.f32 %v11088_v47, %v619_v44  ;;  %v761_v26 = vadd.f32 %v11287_v17, %v760_v34  ;;  %v621_v62 = vpop.f32.mrb[7].mxu1  ;;  %v12778_v53 = vpop.f32.mrb[5].mxu0  ;;  %v164_v17 = vlaneseq  ;;  %v24198_v47 = vld [vmem:[#allocation47_spill] sm:$0xff] }
 0x21e   :  { %v765_v6 = vadd.f32 %v11089_v43, %v621_v62  ;;  %v11090_v43 = vld [vmem:[%s23607_s0 + $0x40] sm:$0xff]  ;;  %v24193_v62 = vld [vmem:[#allocation5_spill] sm:$0xff]  ;;  %v24199_v53 = vld [vmem:[#allocation11_spill] sm:$0xff] }
 0x21f   :  { %v165_v34 = vand.u32 127, %v164_v17  ;;  %v24202_v17 = vld [vmem:[#allocation17_spill] sm:$0xff] }
 0x220   :  { %18588 = vtanh.f32 %v765_v6  ;;  %v24194_v6 = vld [vmem:[#allocation45_spill] sm:$0xff] }
 0x221   :  { %18590 = vtanh.f32 %v764_v52  ;;  %v24192_v52 = vld [vmem:[#allocation4_spill] sm:$0xff] }
 0x22a   :  { %v18589_v23 = vpop.eup %18588 }
 0x22b   :  { %v18591_v10 = vpop.eup %18590  ;;  %844 = vmatprep.mubr.f32.mxu0 %v18589_v23  ;;  %986 = vmatprep.mubr.f32.mxu1 %v18589_v23  ;;  %v24195_v23 = vld [vmem:[#allocation7_spill] sm:$0xff] }
 0x22c   :  { %845 = vmatmul.mubr.f32.vlgmr.msra.gmra.mrb[6].mxu0 %v18591_v10  ;;  %987 = vmatmul.mubr.f32.vlgmr.msra.gmra.mrb[8].mxu1 %v18591_v10  ;;  %v766_v10 = vadd.f32 %v11090_v43, %v761_v26  ;;  %v167_v26 = vadd.s32 256, %v165_v34  ;;  %v24200_v43 = vld [vmem:[#allocation13_spill] sm:$0xff]  ;;  %v24203_v34 = vld [vmem:[#allocation19_spill] sm:$0xff] }
 0x22d   :  { %14095 = vmatpush1.bf16.msra.mxu0 %v18889_v35  ;;  %14158 = vmatpush3.bf16.msra.mxu1 %v19382_v1 }
 0x22e   :  { %14097 = vmatprep.subr.bf16.mxu0 %v18904_v40  ;;  %14159 = vmatprep.subr.bf16.mxu1 %v24168_v24  ;;  %18592 = vtanh.f32 %v766_v10  ;;  %vm772_vm1 = vcmp.lt.s32.totalorder %v167_v26, 320  ;;  %v24201_v10 = vld [vmem:[#allocation15_spill] sm:$0xff]  ;;  %v24204_v26 = vld [vmem:[#allocation21_spill] sm:$0xff] }
 0x22f   :  { %915 = vmatprep.mubr.f32.mxu0 %v24161_v61  ;;  %12811 = vmatprep.mubr.msk.f32.mxu1 %vm18754_vm0, %v24161_v61 }
 0x231   :  { %14099 = vmatpush1.bf16.msra.mxu0 %v18920_v45  ;;  %14161 = vmatpush3.bf16.msra.mxu1 %v19394_v32 }
 0x232   :  { %14101 = vmatprep.subr.bf16.mxu0 %v18934_v50  ;;  %14162 = vmatprep.subr.bf16.mxu1 %v24168_v24 }
 0x235   :  { %14103 = vmatpush1.bf16.msra.mxu0 %v18952_v56  ;;  %14164 = vmatpush3.bf16.msra.mxu1 %v19408_v54 }
 0x236   :  { %14105 = vmatprep.subr.bf16.mxu0 %v18964_v60  ;;  %14165 = vmatprep.subr.bf16.mxu1 %v24168_v24 }
 0x238   :  { %v18593_v44 = vpop.eup %18592 }
 0x239   :  { %14107 = vmatpush1.bf16.msra.mxu0 %v18991_v7  ;;  %14167 = vmatpush3.bf16.msra.mxu1 %v19420_v22 }
 0x23a   :  { %14109 = vmatprep.subr.bf16.mxu0 %v19000_v12  ;;  %14168 = vmatprep.subr.bf16.mxu1 %v24168_v24 }
 0x23d   :  { %14111 = vmatpush1.bf16.msra.mxu0 %v19027_v25  ;;  %14170 = vmatpush3.bf16.msra.mxu1 %v19432_v41 }
 0x23e   :  { %14113 = vmatprep.subr.bf16.mxu0 %v24169_v30  ;;  %14171 = vmatprep.subr.bf16.mxu1 %v24168_v24 }
 0x241   :  { %14115 = vmatpush1.bf16.msra.mxu0 %v24170_v59  ;;  %14173 = vmatpush3.bf16.msra.mxu1 %v19444_v31 }
 0x242   :  { %14117 = vmatprep.subr.bf16.mxu0 %v24171_v18  ;;  %14174 = vmatprep.subr.bf16.mxu1 %v24168_v24 }
 0x245   :  { %14119 = vmatpush1.bf16.msra.mxu0 %v24172_v37  ;;  %14176 = vmatpush3.bf16.msra.mxu1 %v19456_v3 }
 0x246   :  { %14121 = vmatprep.subr.bf16.mxu0 %v24173_v19  ;;  %14177 = vmatprep.subr.bf16.mxu1 %v24168_v24 }
 0x249   :  { %14123 = vmatpush1.bf16.msra.mxu0 %v24174_v2  ;;  %14179 = vmatpush3.bf16.msra.mxu1 %v19466_v55 }
 0x24a   :  { %14181 = vmatprep.subr.bf16.mxu1 %v18799_v4  ;;  %14277 = vmatprep.subr.bf16.mxu0 %v19144_v27 }
 0x24c   :  { %11094 = vmatmul.mubr.msk.f32.vlgmr.msra.gmra.mrb[6].mxu0 %vm772_vm1, %v18593_v44  ;;  %12812 = vmatmul.mubr.msk.f32.vlgmr.msra.gmra.mrb[10].mxu1 %vm772_vm1, %v18593_v44  ;;  %v24205_v44 = vld [vmem:[#allocation23_spill] sm:$0xff] }
 0x24d   :  { %14183 = vmatpush1.bf16.msra.mxu1 %v18810_v8  ;;  %14279 = vmatpush3.bf16.msra.mxu0 %v19171_v49  ;;  %v11092_v49 = vld [vmem:[%s23607_s0 + $0x50] sm:$0xff] }
 0x24e   :  { %14185 = vmatprep.subr.bf16.mxu1 %v18812_v9  ;;  %14281 = vmatprep.subr.bf16.mxu0 %v24175_v39  ;;  %v11091_v39 = vld [vmem:[%s23607_s0 + $0x48] sm:$0xff] }
 0x251   :  { %14187 = vmatpush1.bf16.msra.mxu1 %v18828_v14  ;;  %14283 = vmatpush3.bf16.msra.mxu0 %v19208_v16 }
 0x252   :  { %14189 = vmatprep.subr.bf16.mxu1 %v18831_v15  ;;  %14285 = vmatprep.subr.bf16.mxu0 %v24176_v29 }
 0x255   :  { %14191 = vmatpush1.bf16.msra.mxu1 %v18846_v20  ;;  %14287 = vmatpush3.bf16.msra.mxu0 %v24177_v57 }
 0x256   :  { %14193 = vmatprep.subr.bf16.mxu1 %v18849_v21  ;;  %14289 = vmatprep.subr.bf16.mxu0 %v19257_v5  ;;  %v24215_v5 = vld [vmem:[#allocation3_spill] sm:$0xff] }
 0x259   :  { %14195 = vmatpush1.bf16.msra.mxu1 %v18870_v28  ;;  %14291 = vmatpush3.bf16.msra.mxu0 %v19284_v46  ;;  %v24214_v46 = vld [vmem:[#allocation41_spill] sm:$0xff] }
 0x25a   :  { %14197 = vmatprep.subr.bf16.mxu1 %v18884_v33  ;;  %14293 = vmatprep.subr.bf16.mxu0 %v24178_v13  ;;  %v24213_v13 = vld [vmem:[#allocation39_spill] sm:$0xff] }
 0x25d   :  { %14199 = vmatpush1.bf16.msra.mxu1 %v24192_v52  ;;  %14295 = vmatpush3.bf16.msra.mxu0 %v19314_v38  ;;  %v24212_v38 = vld [vmem:[#allocation37_spill] sm:$0xff] }
 0x25e   :  { %14201 = vmatprep.subr.bf16.mxu1 %v18929_v48  ;;  %14297 = vmatprep.subr.bf16.mxu0 %v24179_v42  ;;  %v24211_v42 = vld [vmem:[#allocation35_spill] sm:$0xff] }
 0x261   :  { %14203 = vmatpush1.bf16.msra.mxu1 %v18958_v58  ;;  %14299 = vmatpush3.bf16.msra.mxu0 %v19336_v11  ;;  %v24210_v11 = vld [vmem:[#allocation33_spill] sm:$0xff] }
 0x262   :  { %14205 = vmatprep.subr.bf16.mxu1 %v18973_v63  ;;  %14301 = vmatprep.subr.bf16.mxu0 %v24180_v0  ;;  %v24209_v0 = vld [vmem:[#allocation31_spill] sm:$0xff] }
 0x265   :  { %14207 = vmatpush1.bf16.msra.mxu1 %v24193_v62  ;;  %14303 = vmatpush3.bf16.msra.mxu0 %v24194_v6  ;;  %v24207_v6 = vld [vmem:[#allocation27_spill] sm:$0xff] }
 0x266   :  { %14209 = vmatprep.subr.bf16.mxu1 %v24195_v23  ;;  %14305 = vmatprep.subr.bf16.mxu0 %v24196_v36  ;;  %v24206_v36 = vld [vmem:[#allocation25_spill] sm:$0xff] }
 0x269   :  { %14211 = vmatpush1.bf16.msra.mxu1 %v24197_v51  ;;  %14307 = vmatpush3.bf16.msra.mxu0 %v24198_v47  ;;  %v24208_v47 = vld [vmem:[#allocation29_spill] sm:$0xff] }
 0x26a   :  { %14213 = vmatprep.subr.bf16.mxu1 %v24199_v53  ;;  %14308 = vmatprep.subr.bf16.mxu0 %v24168_v24 }
 0x26d   :  { %14215 = vmatpush1.bf16.msra.mxu1 %v24200_v43 }
 0x26e   :  { %14217 = vmatprep.subr.bf16.mxu1 %v24201_v10 }
 0x271   :  { %14219 = vmatpush1.bf16.msra.mxu1 %v24202_v17 }
 0x272   :  { %14221 = vmatprep.subr.bf16.mxu1 %v24203_v34 }
 0x275   :  { %14223 = vmatpush1.bf16.msra.mxu1 %v24204_v26 }
 0x276   :  { %14225 = vmatprep.subr.bf16.mxu1 %v24205_v44 }
 0x279   :  { %14227 = vmatpush1.bf16.msra.mxu1 %v24206_v36 }
 0x27a   :  { %14229 = vmatprep.subr.bf16.mxu1 %v24207_v6 }
 0x27d   :  { %14231 = vmatpush1.bf16.msra.mxu1 %v24208_v47 }
 0x27e   :  { %14233 = vmatprep.subr.bf16.mxu1 %v24209_v0 }
 0x281   :  { %14235 = vmatpush1.bf16.msra.mxu1 %v24210_v11 }
 0x282   :  { %14237 = vmatprep.subr.bf16.mxu1 %v24211_v42 }
 0x285   :  { %14239 = vmatpush1.bf16.msra.mxu1 %v24212_v38 }
 0x286   :  { %14241 = vmatprep.subr.bf16.mxu1 %v24213_v13 }
 0x289   :  { %14243 = vmatpush1.bf16.msra.mxu1 %v24214_v46 }
 0x28a   :  { %14245 = vmatprep.subr.bf16.mxu1 %v24215_v5 }
 0x2ff   :  { %v11337_v57 = vpop.f32.mrb[8].mxu1 }
 0x300   :  { %v11338_v29 = vpop.f32.mrb[9].mxu1 }
 0x301   :  { %v11339_v16 = vadd.f32 %v11338_v29, %v11337_v57  ;;  %v24221_v29 = vld [vmem:[#allocation39_spill] sm:$0xff]  ;;  %v24222_v57 = vld [vmem:[#allocation41_spill] sm:$0xff] }
 0x31f   :  { %v917_v27 = vpop.f32.mrb[6].mxu0  ;;  %v1058_v42 = vpop.f32.mrb[10].mxu1 }
 0x320   :  { %v1062_v38 = vadd.f32 %v11091_v39, %v917_v27  ;;  %v1059_v11 = vadd.f32 %v11339_v16, %v1058_v42  ;;  %v919_v13 = vpop.f32.mrb[7].mxu0  ;;  %v12813_v0 = vpop.f32.mrb[11].mxu1  ;;  %v11093_v27 = vld [vmem:[%s23607_s0 + $0x58] sm:$0xff]  ;;  %v1377_v42 = vld [vmem:[%s23608_s2 + $0x88] sm:$0xff] }
 0x321   :  { %v1063_v46 = vadd.f32 %v11092_v49, %v919_v13  ;;  %v24220_v39 = vld [vmem:[#allocation37_spill] sm:$0xff]  ;;  %v24223_v13 = vld [vmem:[#allocation3_spill] sm:$0xff] }
 0x322   :  { %v1064_v49 = vadd.f32 %v11093_v27, %v1059_v11  ;;  %v24219_v11 = vld [vmem:[#allocation35_spill] sm:$0xff]  ;;  %v1379_v0 = vld [vmem:[%s23608_s2 + $0x98] sm:$0xff] }
 0x323   :  { %18594 = vtanh.f32 %v1063_v46  ;;  %v24217_v46 = vld [vmem:[#allocation31_spill] sm:$0xff]  ;;  %v14332_v27 = vpack.c.bf16 %v1379_v0, %v1377_v42  ;;  %v1382_v42 = vld [vmem:[%s23608_s2 + $0xb0] sm:$0xff] }
 0x324   :  { %18596 = vtanh.f32 %v1062_v38  ;;  %v24218_v38 = vld [vmem:[#allocation33_spill] sm:$0xff]  ;;  %v1385_v0 = vld [vmem:[%s23608_s2 + $0xc8] sm:$0xff] }
 0x325   :  { %18598 = vtanh.f32 %v1064_v49  ;;  %v1378_v49 = vld [vmem:[%s23608_s2 + $0x90] sm:$0xff] }
 0x32d   :  { %v18595_v5 = vpop.eup %18594 }
 0x32e   :  { %v18597_v47 = vpop.eup %18596  ;;  %1152 = vmatprep.mubr.f32.mxu1 %v18595_v5  ;;  %1294 = vmatprep.mubr.f32.mxu0 %v18595_v5  ;;  %v24216_v5 = vld [vmem:[#allocation29_spill] sm:$0xff] }
 0x32f   :  { %1153 = vmatmul.mubr.f32.vlgmr.msra.gmra.mrb[12].mxu1 %v18597_v47  ;;  %1295 = vmatmul.mubr.f32.vlgmr.msra.gmra.mrb[8].mxu0 %v18597_v47  ;;  %v19730_v16 = vpop.eup %18598  ;;  %v1376_v47 = vld [vmem:[%s23608_s2 + $0x80] sm:$0xff] }
 0x330   :  { %14247 = vmatpush1.bf16.msra.mxu1 %v18889_v35  ;;  %14310 = vmatpush3.bf16.msra.mxu0 %v19382_v1  ;;  %v11097_v1 = vld [vmem:[%s23607_s0 + $0x68] sm:$0xff] }
 0x331   :  { %14249 = vmatprep.subr.bf16.mxu1 %v18904_v40  ;;  %14311 = vmatprep.subr.bf16.mxu0 %v24168_v24 }
 0x332   :  { %1223 = vmatprep.mubr.f32.mxu1 %v24161_v61  ;;  %12846 = vmatprep.mubr.msk.f32.mxu0 %vm18754_vm0, %v24161_v61 }
 0x334   :  { %14251 = vmatpush1.bf16.msra.mxu1 %v18920_v45  ;;  %14313 = vmatpush3.bf16.msra.mxu0 %v19394_v32  ;;  %v1391_v32 = vld [vmem:[%s23608_s2 + $0xf8] sm:$0xff] }
 0x335   :  { %14253 = vmatprep.subr.bf16.mxu1 %v18934_v50  ;;  %14314 = vmatprep.subr.bf16.mxu0 %v24168_v24 }
 0x338   :  { %14255 = vmatpush1.bf16.msra.mxu1 %v18952_v56  ;;  %14316 = vmatpush3.bf16.msra.mxu0 %v19408_v54  ;;  %v1387_v54 = vld [vmem:[%s23608_s2 + $0xd8] sm:$0xff] }
 0x339   :  { %14257 = vmatprep.subr.bf16.mxu1 %v18964_v60  ;;  %14317 = vmatprep.subr.bf16.mxu0 %v24168_v24 }
 0x33c   :  { %14259 = vmatpush1.bf16.msra.mxu1 %v18991_v7  ;;  %14319 = vmatpush3.bf16.msra.mxu0 %v19420_v22  ;;  %v1380_v22 = vld [vmem:[%s23608_s2 + $0xa0] sm:$0xff] }
 0x33d   :  { %14261 = vmatprep.subr.bf16.mxu1 %v19000_v12  ;;  %14320 = vmatprep.subr.bf16.mxu0 %v24168_v24 }
 0x340   :  { %14263 = vmatpush1.bf16.msra.mxu1 %v19027_v25  ;;  %14322 = vmatpush3.bf16.msra.mxu0 %v19432_v41 }
 0x341   :  { %14265 = vmatprep.subr.bf16.mxu1 %v24169_v30  ;;  %14323 = vmatprep.subr.bf16.mxu0 %v24168_v24 }
 0x344   :  { %14267 = vmatpush1.bf16.msra.mxu1 %v24170_v59  ;;  %14325 = vmatpush3.bf16.msra.mxu0 %v19444_v31  ;;  %v14334_v31 = vpack.c.bf16 %v1378_v49, %v1376_v47  ;;  %v14338_v47 = vpack.c.bf16 %v1382_v42, %v1380_v22  ;;  %v1386_v49 = vld [vmem:[%s23608_s2 + $0xd0] sm:$0xff]  ;;  %v1069_v42 = vld [vmem:[%s23608_s2 + $0x8] sm:$0xff] }
 0x345   :  { %14269 = vmatprep.subr.bf16.mxu1 %v24171_v18  ;;  %14326 = vmatprep.subr.bf16.mxu0 %v24168_v24 }
 0x348   :  { %14271 = vmatpush1.bf16.msra.mxu1 %v24172_v37  ;;  %14328 = vmatpush3.bf16.msra.mxu0 %v19456_v3  ;;  %v1383_v3 = vld [vmem:[%s23608_s2 + $0xb8] sm:$0xff] }
 0x349   :  { %14273 = vmatprep.subr.bf16.mxu1 %v24173_v19  ;;  %14329 = vmatprep.subr.bf16.mxu0 %v24168_v24 }
 0x34c   :  { %14275 = vmatpush1.bf16.msra.mxu1 %v24174_v2  ;;  %14331 = vmatpush3.bf16.msra.mxu0 %v19466_v55  ;;  %v1381_v55 = vld [vmem:[%s23608_s2 + $0xa8] sm:$0xff] }
 0x34d   :  { %14365 = vmatprep.subr.bf16.mxu1 %v18799_v4  ;;  %v14336_v41 = vpack.c.bf16 %v1383_v3, %v1381_v55  ;;  %14333 = vmatprep.subr.bf16.mxu0 %v14332_v27  ;;  %v14340_v55 = vpack.c.bf16 %v1387_v54, %v1385_v0  ;;  %v1384_v3 = vld [vmem:[%s23608_s2 + $0xc0] sm:$0xff]  ;;  %v1389_v27 = vld [vmem:[%s23608_s2 + $0xe8] sm:$0xff]  ;;  %v1390_v54 = vld [vmem:[%s23608_s2 + $0xf0] sm:$0xff] }
 0x34e   :  { %v14342_v22 = vpack.c.bf16 %v1386_v49, %v1384_v3  ;;  %v1071_v0 = vld [vmem:[%s23608_s2 + $0x18] sm:$0xff] }
 0x34f   :  { %1224 = vmatmul.mubr.f32.vlgmr.msra.gmra.mrb[12].mxu1 %v19730_v16  ;;  %12847 = vmatmul.mubr.f32.vlgmr.msra.gmra.mrb[10].mxu0 %v19730_v16 }
 0x350   :  { %14367 = vmatpush1.bf16.msra.mxu1 %v18810_v8  ;;  %1462 = vmatprep.mubr.f32.mxu0 %v24161_v61 }
 0x351   :  { %14369 = vmatprep.subr.bf16.mxu1 %v18812_v9  ;;  %14335 = vmatpush1.bf16.msra.mxu0 %v14334_v31  ;;  %v1388_v31 = vld [vmem:[%s23608_s2 + $0xe0] sm:$0xff] }
 0x352   :  { %14337 = vmatprep.subr.bf16.mxu0 %v14336_v41  ;;  %v14344_v41 = vpack.c.bf16 %v1391_v32, %v1389_v27  ;;  %v14348_v32 = vpack.c.bf16 %v1071_v0, %v1069_v42  ;;  %v11096_v27 = vld [vmem:[%s23607_s0 + $0x60] sm:$0xff] }
 0x354   :  { %14371 = vmatpush1.bf16.msra.mxu1 %v18828_v14 }
 0x355   :  { %14373 = vmatprep.subr.bf16.mxu1 %v18831_v15  ;;  %14339 = vmatpush1.bf16.msra.mxu0 %v14338_v47  ;;  %v14346_v47 = vpack.c.bf16 %v1390_v54, %v1388_v31 }
 0x356   :  { %14341 = vmatprep.subr.bf16.mxu0 %v14340_v55 }
 0x358   :  { %14375 = vmatpush1.bf16.msra.mxu1 %v18846_v20 }
 0x359   :  { %14377 = vmatprep.subr.bf16.mxu1 %v18849_v21  ;;  %14343 = vmatpush1.bf16.msra.mxu0 %v14342_v22  ;;  %v11098_v22 = vld [vmem:[%s23607_s0 + $0x70] sm:$0xff] }
 0x35a   :  { %14345 = vmatprep.subr.bf16.mxu0 %v14344_v41 }
 0x35c   :  { %14379 = vmatpush1.bf16.msra.mxu1 %v18870_v28 }
 0x35d   :  { %14381 = vmatprep.subr.bf16.mxu1 %v18884_v33  ;;  %14347 = vmatpush1.bf16.msra.mxu0 %v14346_v47 }
 0x35e   :  { %14349 = vmatprep.subr.bf16.mxu0 %v14348_v32 }
 0x360   :  { %14383 = vmatpush1.bf16.msra.mxu1 %v24192_v52 }
 0x361   :  { %14385 = vmatprep.subr.bf16.mxu1 %v18929_v48 }
 0x364   :  { %14387 = vmatpush1.bf16.msra.mxu1 %v18958_v58 }
 0x365   :  { %14389 = vmatprep.subr.bf16.mxu1 %v18973_v63 }
 0x368   :  { %14391 = vmatpush1.bf16.msra.mxu1 %v24193_v62 }
 0x369   :  { %14393 = vmatprep.subr.bf16.mxu1 %v24195_v23 }
 0x36c   :  { %14395 = vmatpush1.bf16.msra.mxu1 %v24197_v51 }
 0x36d   :  { %14397 = vmatprep.subr.bf16.mxu1 %v24199_v53 }
 0x370   :  { %14399 = vmatpush1.bf16.msra.mxu1 %v24200_v43 }
 0x371   :  { %14401 = vmatprep.subr.bf16.mxu1 %v24201_v10 }
 0x374   :  { %14403 = vmatpush1.bf16.msra.mxu1 %v24202_v17 }
 0x375   :  { %14405 = vmatprep.subr.bf16.mxu1 %v24203_v34 }
 0x378   :  { %14407 = vmatpush1.bf16.msra.mxu1 %v24204_v26 }
 0x379   :  { %14409 = vmatprep.subr.bf16.mxu1 %v24205_v44 }
 0x37c   :  { %14411 = vmatpush1.bf16.msra.mxu1 %v24206_v36 }
 0x37d   :  { %14413 = vmatprep.subr.bf16.mxu1 %v24207_v6 }
 0x380   :  { %14415 = vmatpush1.bf16.msra.mxu1 %v24216_v5 }
 0x381   :  { %14417 = vmatprep.subr.bf16.mxu1 %v24217_v46 }
 0x384   :  { %14419 = vmatpush1.bf16.msra.mxu1 %v24218_v38 }
 0x385   :  { %14421 = vmatprep.subr.bf16.mxu1 %v24219_v11 }
 0x388   :  { %14423 = vmatpush1.bf16.msra.mxu1 %v24220_v39 }
 0x389   :  { %14425 = vmatprep.subr.bf16.mxu1 %v24221_v29 }
 0x38c   :  { %14427 = vmatpush1.bf16.msra.mxu1 %v24222_v57 }
 0x38d   :  { %14429 = vmatprep.subr.bf16.mxu1 %v24223_v13 }
 0x402   :  { %v11389_v55 = vpop.f32.mrb[8].mxu0 }
 0x403   :  { %v11390_v3 = vpop.f32.mrb[9].mxu0 }
 0x404   :  { %v11391_v49 = vadd.f32 %v11390_v3, %v11389_v55 }
 0x422   :  { %v1225_v24 = vpop.f32.mrb[12].mxu1  ;;  %v1366_v41 = vpop.f32.mrb[10].mxu0 }
 0x423   :  { %v1370_v31 = vadd.f32 %v11096_v27, %v1225_v24  ;;  %v1367_v54 = vadd.f32 %v11391_v49, %v1366_v41  ;;  %v1227_v42 = vpop.f32.mrb[13].mxu1  ;;  %v12848_v0 = vpop.f32.mrb[11].mxu0  ;;  %v1068_v24 = vld [vmem:[%s23608_s2] sm:$0xff]  ;;  %v1073_v49 = vld [vmem:[%s23608_s2 + $0x28] sm:$0xff]  ;;  %v1075_v27 = vld [vmem:[%s23608_s2 + $0x38] sm:$0xff] }
 0x424   :  { %v1371_v47 = vadd.f32 %v11097_v1, %v1227_v42  ;;  %v24224_v1 = vld [vmem:[#allocation3_spill] sm:$0xff]  ;;  %v14352_v41 = vpack.c.bf16 %v1075_v27, %v1073_v49  ;;  %v1078_v49 = vld [vmem:[%s23608_s2 + $0x50] sm:$0xff] }
 0x425   :  { %18600 = vtanh.f32 %v1370_v31  ;;  %v1372_v32 = vadd.f32 %v11098_v22, %v1367_v54  ;;  %v1072_v31 = vld [vmem:[%s23608_s2 + $0x20] sm:$0xff]  ;;  %v1074_v54 = vld [vmem:[%s23608_s2 + $0x30] sm:$0xff]  ;;  %v1077_v0 = vld [vmem:[%s23608_s2 + $0x48] sm:$0xff] }
 0x426   :  { %18602 = vtanh.f32 %v1371_v47  ;;  %v1079_v47 = vld [vmem:[%s23608_s2 + $0x58] sm:$0xff]  ;;  %v1081_v27 = vld [vmem:[%s23608_s2 + $0x68] sm:$0xff] }
 0x427   :  { %18604 = vtanh.f32 %v1372_v32  ;;  %v14354_v32 = vpack.c.bf16 %v1074_v54, %v1072_v31  ;;  %v1080_v54 = vld [vmem:[%s23608_s2 + $0x60] sm:$0xff] }
 0x42f   :  { %v19830_v55 = vpop.eup %18600 }
 0x430   :  { %v19832_v3 = vpop.eup %18602 }
 0x431   :  { %v19834_v13 = vpop.eup %18604  ;;  %1613 = vmatprep.mubr.f32.mxu1 %v19832_v3 }
 0x432   :  { %1393 = vrot.lane.b32.xlu0 %v19834_v13, %s18755_s13  ;;  %1614 = vmatmul.mubr.f32.vlgmr.msra.gmra.mrb[14].mxu1 %v19830_v55 }
 0x433   :  { %14431 = vmatpush1.bf16.msra.mxu1 %v18889_v35  ;;  %1684 = vmatprep.mubr.f32.mxu1 %v24161_v61 }
 0x434   :  { %14433 = vmatprep.subr.bf16.mxu1 %v18904_v40 }
 0x436   :  { %1470 = vrot.lane.b32.xlu0 %v19730_v16, %s18755_s13  ;;  %v1070_v16 = vld [vmem:[%s23608_s2 + $0x10] sm:$0xff] }
 0x437   :  { %14435 = vmatpush1.bf16.msra.mxu1 %v18920_v45  ;;  %v14350_v22 = vpack.c.bf16 %v1070_v16, %v1068_v24  ;;  %v14356_v24 = vpack.c.bf16 %v1079_v47, %v1077_v0  ;;  %v1076_v16 = vld [vmem:[%s23608_s2 + $0x40] sm:$0xff] }
 0x438   :  { %14437 = vmatprep.subr.bf16.mxu1 %v18934_v50  ;;  %v14358_v31 = vpack.c.bf16 %v1078_v49, %v1076_v16  ;;  %v24225_v47 = vld [vmem:[#allocation22_spill] sm:$0xff]  ;;  %v24228_v16 = vld [vmem:[#allocation28_spill] sm:$0xff] }
 0x439   :  { %v24229_v49 = vld [vmem:[#allocation30_spill] sm:$0xff] }
 0x43b   :  { %14439 = vmatpush1.bf16.msra.mxu1 %v18952_v56 }
 0x43c   :  { %14441 = vmatprep.subr.bf16.mxu1 %v18964_v60 }
 0x43f   :  { %14443 = vmatpush1.bf16.msra.mxu1 %v18991_v7 }
 0x440   :  { %14445 = vmatprep.subr.bf16.mxu1 %v19000_v12 }
 0x443   :  { %14447 = vmatpush1.bf16.msra.mxu1 %v19027_v25 }
 0x444   :  { %14449 = vmatprep.subr.bf16.mxu1 %v24169_v30 }
 0x447   :  { %14451 = vmatpush1.bf16.msra.mxu1 %v24170_v59 }
 0x448   :  { %14453 = vmatprep.subr.bf16.mxu1 %v24171_v18 }
 0x44b   :  { %14455 = vmatpush1.bf16.msra.mxu1 %v24172_v37 }
 0x44c   :  { %14457 = vmatprep.subr.bf16.mxu1 %v24173_v19 }
 0x44f   :  { %14459 = vmatpush1.bf16.msra.mxu1 %v24174_v2 }
 0x450   :  { %14533 = vmatprep.subr.bf16.mxu1 %v18799_v4 }
 0x452   :  { %1685 = vmatmul.mubr.f32.vlgmr.msra.gmra.mrb[14].mxu1 %v19834_v13 }
 0x453   :  { %14535 = vmatpush1.bf16.msra.mxu1 %v18810_v8 }
 0x454   :  { %14537 = vmatprep.subr.bf16.mxu1 %v18812_v9 }
 0x457   :  { %14539 = vmatpush1.bf16.msra.mxu1 %v18828_v14 }
 0x458   :  { %14541 = vmatprep.subr.bf16.mxu1 %v18831_v15 }
 0x45b   :  { %14543 = vmatpush1.bf16.msra.mxu1 %v18846_v20 }
 0x45c   :  { %14545 = vmatprep.subr.bf16.mxu1 %v18849_v21 }
 0x45f   :  { %14547 = vmatpush1.bf16.msra.mxu1 %v18870_v28 }
 0x460   :  { %14549 = vmatprep.subr.bf16.mxu1 %v18884_v33 }
 0x463   :  { %14551 = vmatpush1.bf16.msra.mxu1 %v24192_v52 }
 0x464   :  { %14553 = vmatprep.subr.bf16.mxu1 %v18929_v48 }
 0x467   :  { %14555 = vmatpush1.bf16.msra.mxu1 %v18958_v58 }
 0x468   :  { %14557 = vmatprep.subr.bf16.mxu1 %v18973_v63 }
 0x46b   :  { %14559 = vmatpush1.bf16.msra.mxu1 %v24193_v62 }
 0x46c   :  { %14561 = vmatprep.subr.bf16.mxu1 %v24195_v23 }
 0x46f   :  { %14563 = vmatpush1.bf16.msra.mxu1 %v24197_v51 }
 0x470   :  { %14565 = vmatprep.subr.bf16.mxu1 %v24199_v53 }
 0x473   :  { %14567 = vmatpush1.bf16.msra.mxu1 %v24200_v43 }
 0x474   :  { %14569 = vmatprep.subr.bf16.mxu1 %v24201_v10 }
 0x477   :  { %14571 = vmatpush1.bf16.msra.mxu1 %v24202_v17 }
 0x478   :  { %14573 = vmatprep.subr.bf16.mxu1 %v24203_v34  ;;  %v11102_v34 = vld [vmem:[%s23607_s0 + $0x80] sm:$0xff] }
 0x47b   :  { %14575 = vmatpush1.bf16.msra.mxu1 %v24204_v26  ;;  %v11101_v26 = vld [vmem:[%s23607_s0 + $0x78] sm:$0xff] }
 0x47c   :  { %14577 = vmatprep.subr.bf16.mxu1 %v24205_v44  ;;  %v24249_v44 = vld [vmem:[#allocation55_spill] sm:$0xff] }
 0x47f   :  { %14579 = vmatpush1.bf16.msra.mxu1 %v24206_v36  ;;  %v24248_v36 = vld [vmem:[#allocation54_spill] sm:$0xff] }
 0x480   :  { %14581 = vmatprep.subr.bf16.mxu1 %v24207_v6  ;;  %v24247_v6 = vld [vmem:[#allocation53_spill] sm:$0xff] }
 0x483   :  { %14583 = vmatpush1.bf16.msra.mxu1 %v24216_v5  ;;  %v24245_v5 = vld [vmem:[#allocation51_spill] sm:$0xff] }
 0x484   :  { %14585 = vmatprep.subr.bf16.mxu1 %v24217_v46  ;;  %v24244_v46 = vld [vmem:[#allocation50_spill] sm:$0xff] }
 0x487   :  { %14587 = vmatpush1.bf16.msra.mxu1 %v24218_v38  ;;  %v24243_v38 = vld [vmem:[#allocation49_spill] sm:$0xff] }
 0x488   :  { %14589 = vmatprep.subr.bf16.mxu1 %v24219_v11  ;;  %v24242_v11 = vld [vmem:[#allocation48_spill] sm:$0xff] }
 0x48b   :  { %14591 = vmatpush1.bf16.msra.mxu1 %v24220_v39  ;;  %v24241_v39 = vmov 0.0|0.0  }
 0x48c   :  { %14593 = vmatprep.subr.bf16.mxu1 %v24221_v29  ;;  %v24240_v29 = vld [vmem:[#allocation47_spill] sm:$0xff] }
 0x48f   :  { %14595 = vmatpush1.bf16.msra.mxu1 %v24222_v57  ;;  %v24239_v57 = vld [vmem:[#allocation46_spill] sm:$0xff] }
 0x490   :  { %14597 = vmatprep.subr.bf16.mxu1 %v24224_v1 }
 0x4a4   :  { %v1394_v42 = vpop.permute.xlu0 %1393 }
 0x4a5   :  { %11099 = vmatmul.mubr.msk.f32.vlgmr.msra.gmra.mrb[12].mxu0 %vm1395_vm2, %v1394_v42  ;;  %v1082_v42 = vld [vmem:[%s23608_s2 + $0x70] sm:$0xff] }
 0x4a6   :  { %14351 = vmatpush1.bf16.msra.mxu0 %v14350_v22  ;;  %1538 = vmatprep.mubr.f32.mxu0 %v24161_v61  ;;  %v1083_v22 = vld [vmem:[%s23608_s2 + $0x78] sm:$0xff]  ;;  %v14362_v0 = vpack.c.bf16 %v1082_v42, %v1080_v54  ;;  %v24234_v54 = vld [vmem:[#allocation40_spill] sm:$0xff]  ;;  %v24236_v42 = vld [vmem:[#allocation43_spill] sm:$0xff] }
 0x4a7   :  { %14353 = vmatprep.subr.bf16.mxu0 %v14352_v41  ;;  %v14360_v41 = vpack.c.bf16 %v1083_v22, %v1081_v27  ;;  %v24230_v27 = vld [vmem:[#allocation32_spill] sm:$0xff]  ;;  %v24231_v22 = vld [vmem:[#allocation34_spill] sm:$0xff] }
 0x4a8   :  { %v1471_v1 = vpop.permute.xlu0 %1470 }
 0x4aa   :  { %14355 = vmatpush1.bf16.msra.mxu0 %v14354_v32  ;;  %v24226_v32 = vld [vmem:[#allocation24_spill] sm:$0xff] }
 0x4ab   :  { %14357 = vmatprep.subr.bf16.mxu0 %v14356_v24  ;;  %v24227_v24 = vld [vmem:[#allocation26_spill] sm:$0xff] }
 0x4ae   :  { %14359 = vmatpush1.bf16.msra.mxu0 %v14358_v31  ;;  %v24232_v31 = vld [vmem:[#allocation36_spill] sm:$0xff] }
 0x4af   :  { %14361 = vmatprep.subr.bf16.mxu0 %v14360_v41  ;;  %v24233_v41 = vld [vmem:[#allocation38_spill] sm:$0xff] }
 0x4b2   :  { %14363 = vmatpush1.bf16.msra.mxu0 %v14362_v0  ;;  %v24238_v0 = vld [vmem:[#allocation45_spill] sm:$0xff] }
 0x4b3   :  { %14461 = vmatprep.subr.bf16.mxu0 %v24225_v47 }
 0x4b5   :  { %11100 = vmatmul.mubr.msk.f32.vlgmr.msra.gmra.mrb[12].mxu0 %vm1395_vm2, %v1471_v1  ;;  %v24235_v1 = vld [vmem:[#allocation42_spill] sm:$0xff] }
 0x4b6   :  { %14463 = vmatpush3.bf16.msra.mxu0 %v24226_v32  ;;  %1755 = vmatprep.mubr.f32.mxu0 %v19832_v3  ;;  %v24237_v3 = vld [vmem:[#allocation44_spill] sm:$0xff] }
 0x4b7   :  { %14465 = vmatprep.subr.bf16.mxu0 %v24227_v24 }
 0x4ba   :  { %14467 = vmatpush3.bf16.msra.mxu0 %v24228_v16 }
 0x4bb   :  { %14469 = vmatprep.subr.bf16.mxu0 %v24229_v49 }
 0x4be   :  { %14471 = vmatpush3.bf16.msra.mxu0 %v24230_v27 }
 0x4bf   :  { %14473 = vmatprep.subr.bf16.mxu0 %v24231_v22 }
 0x4c2   :  { %14475 = vmatpush3.bf16.msra.mxu0 %v24232_v31 }
 0x4c3   :  { %14477 = vmatprep.subr.bf16.mxu0 %v24233_v41 }
 0x4c6   :  { %14479 = vmatpush3.bf16.msra.mxu0 %v24234_v54 }
 0x4c7   :  { %14481 = vmatprep.subr.bf16.mxu0 %v24235_v1 }
 0x4ca   :  { %14483 = vmatpush3.bf16.msra.mxu0 %v24236_v42 }
 0x4cb   :  { %14485 = vmatprep.subr.bf16.mxu0 %v24237_v3 }
 0x4ce   :  { %14487 = vmatpush3.bf16.msra.mxu0 %v24238_v0 }
 0x4cf   :  { %14489 = vmatprep.subr.bf16.mxu0 %v24239_v57 }
 0x4d2   :  { %14491 = vmatpush3.bf16.msra.mxu0 %v24240_v29 }
 0x4d3   :  { %14492 = vmatprep.subr.bf16.mxu0 %v24241_v39 }
 0x4d5   :  { %1756 = vmatmul.mubr.f32.vlgmr.msra.gmra.mrb[14].mxu0 %v19830_v55  ;;  %v24246_v55 = vld [vmem:[#allocation52_spill] sm:$0xff] }
 0x4d6   :  { %14494 = vmatpush3.bf16.msra.mxu0 %v24242_v11  ;;  %12881 = vmatprep.mubr.msk.f32.mxu0 %vm18754_vm0, %v24161_v61 }
 0x4d7   :  { %14495 = vmatprep.subr.bf16.mxu0 %v24241_v39 }
 0x4da   :  { %14497 = vmatpush3.bf16.msra.mxu0 %v24243_v38 }
 0x4db   :  { %14498 = vmatprep.subr.bf16.mxu0 %v24241_v39 }
 0x4de   :  { %14500 = vmatpush3.bf16.msra.mxu0 %v24244_v46 }
 0x4df   :  { %14501 = vmatprep.subr.bf16.mxu0 %v24241_v39 }
 0x4e2   :  { %14503 = vmatpush3.bf16.msra.mxu0 %v24245_v5 }
 0x4e3   :  { %14504 = vmatprep.subr.bf16.mxu0 %v24241_v39 }
 0x4e6   :  { %14506 = vmatpush3.bf16.msra.mxu0 %v24246_v55 }
 0x4e7   :  { %14507 = vmatprep.subr.bf16.mxu0 %v24241_v39 }
 0x4ea   :  { %14509 = vmatpush3.bf16.msra.mxu0 %v24247_v6 }
 0x4eb   :  { %14510 = vmatprep.subr.bf16.mxu0 %v24241_v39 }
 0x4ee   :  { %14512 = vmatpush3.bf16.msra.mxu0 %v24248_v36 }
 0x4ef   :  { %14513 = vmatprep.subr.bf16.mxu0 %v24241_v39 }
 0x4f2   :  { %14515 = vmatpush3.bf16.msra.mxu0 %v24249_v44 }
 0x4f5   :  { %12882 = vmatmul.mubr.f32.vlgmr.msra.gmra.mrb[16].mxu0 %v19834_v13  ;;  %v1844_v13 = vld [vmem:[%s23608_s2 + $0x138] sm:$0xff] }
 0x4f6   :  { %1922 = vmatprep.mubr.f32.mxu0 %v24161_v61 }
 0x525   :  { %v1686_v17 = vpop.f32.mrb[14].mxu1 }
 0x526   :  { %v1831_v10 = vadd.f32 %v11101_v26, %v1686_v17  ;;  %v1688_v43 = vpop.f32.mrb[15].mxu1  ;;  %v1842_v26 = vld [vmem:[%s23608_s2 + $0x128] sm:$0xff] }
 0x527   :  { %v1832_v53 = vadd.f32 %v11102_v34, %v1688_v43  ;;  %v1840_v43 = vld [vmem:[%s23608_s2 + $0x118] sm:$0xff]  ;;  %v1839_v34 = vld [vmem:[%s23608_s2 + $0x110] sm:$0xff] }
 0x529   :  { %18606 = vtanh.f32 %v1832_v53  ;;  %v1838_v53 = vld [vmem:[%s23608_s2 + $0x108] sm:$0xff] }
 0x52a   :  { %18608 = vtanh.f32 %v1831_v10  ;;  %v1837_v10 = vld [vmem:[%s23608_s2 + $0x100] sm:$0xff]  ;;  %v14516_v17 = vpack.c.bf16 %v1840_v43, %v1838_v53  ;;  %v1843_v53 = vld [vmem:[%s23608_s2 + $0x130] sm:$0xff]  ;;  %v1846_v43 = vld [vmem:[%s23608_s2 + $0x148] sm:$0xff] }
 0x52c   :  { %14517 = vmatprep.subr.bf16.mxu0 %v14516_v17  ;;  %v1850_v17 = vld [vmem:[%s23608_s2 + $0x168] sm:$0xff] }
 0x533   :  { %v19981_v51 = vpop.eup %18606 }
 0x534   :  { %v19983_v23 = vpop.eup %18608  ;;  %1999 = vmatprep.mubr.f32.mxu1 %v19981_v51 }
 0x535   :  { %2000 = vmatmul.mubr.f32.vlgmr.msra.gmra.mrb[16].mxu1 %v19983_v23 }
 0x536   :  { %14599 = vmatpush1.bf16.msra.mxu1 %v18889_v35  ;;  %2070 = vmatprep.mubr.f32.mxu1 %v24161_v61 }
 0x537   :  { %14601 = vmatprep.subr.bf16.mxu1 %v18904_v40 }
 0x53a   :  { %14603 = vmatpush1.bf16.msra.mxu1 %v18920_v45 }
 0x53b   :  { %14605 = vmatprep.subr.bf16.mxu1 %v18934_v50 }
 0x53e   :  { %14607 = vmatpush1.bf16.msra.mxu1 %v18952_v56 }
 0x53f   :  { %14609 = vmatprep.subr.bf16.mxu1 %v18964_v60 }
 0x542   :  { %14611 = vmatpush1.bf16.msra.mxu1 %v18991_v7 }
 0x543   :  { %14613 = vmatprep.subr.bf16.mxu1 %v19000_v12 }
 0x546   :  { %14615 = vmatpush1.bf16.msra.mxu1 %v19027_v25 }
 0x547   :  { %14617 = vmatprep.subr.bf16.mxu1 %v24169_v30 }
 0x54a   :  { %14619 = vmatpush1.bf16.msra.mxu1 %v24170_v59  ;;  %v1852_v59 = vld [vmem:[%s23608_s2 + $0x178] sm:$0xff] }
 0x54b   :  { %14621 = vmatprep.subr.bf16.mxu1 %v24171_v18  ;;  %v1848_v18 = vld [vmem:[%s23608_s2 + $0x158] sm:$0xff] }
 0x54e   :  { %14623 = vmatpush1.bf16.msra.mxu1 %v24172_v37  ;;  %v1841_v37 = vld [vmem:[%s23608_s2 + $0x120] sm:$0xff] }
 0x54f   :  { %14625 = vmatprep.subr.bf16.mxu1 %v24173_v19  ;;  %v14520_v19 = vpack.c.bf16 %v1844_v13, %v1842_v26  ;;  %v1845_v26 = vld [vmem:[%s23608_s2 + $0x140] sm:$0xff]  ;;  %v1847_v13 = vld [vmem:[%s23608_s2 + $0x150] sm:$0xff] }
 0x552   :  { %14627 = vmatpush1.bf16.msra.mxu1 %v24174_v2  ;;  %v14518_v2 = vpack.c.bf16 %v1839_v34, %v1837_v10  ;;  %v14522_v10 = vpack.c.bf16 %v1843_v53, %v1841_v37  ;;  %v14524_v34 = vpack.c.bf16 %v1848_v18, %v1846_v43  ;;  %v14526_v37 = vpack.c.bf16 %v1847_v13, %v1845_v26 }
 0x553   :  { %14797 = vmatprep.subr.bf16.mxu1 %v24225_v47  ;;  %v14528_v18 = vpack.c.bf16 %v1852_v59, %v1850_v17  ;;  %v11103_v59 = vld [vmem:[%s23607_s0 + $0x88] sm:$0xff] }
 0x554   :  { %14519 = vmatpush1.bf16.msra.mxu0 %v14518_v2  ;;  %v1851_v2 = vld [vmem:[%s23608_s2 + $0x170] sm:$0xff] }
 0x555   :  { %14521 = vmatprep.subr.bf16.mxu0 %v14520_v19  ;;  %v1849_v19 = vld [vmem:[%s23608_s2 + $0x160] sm:$0xff] }
 0x556   :  { %v14530_v53 = vpack.c.bf16 %v1851_v2, %v1849_v19 }
 0x558   :  { %14523 = vmatpush1.bf16.msra.mxu0 %v14522_v10 }
 0x559   :  { %14525 = vmatprep.subr.bf16.mxu0 %v14524_v34 }
 0x55c   :  { %14527 = vmatpush1.bf16.msra.mxu0 %v14526_v37 }
 0x55d   :  { %14529 = vmatprep.subr.bf16.mxu0 %v14528_v18 }
 0x560   :  { %14531 = vmatpush1.bf16.msra.mxu0 %v14530_v53 }
 0x561   :  { %14629 = vmatprep.subr.bf16.mxu0 %v24225_v47 }
 0x5a8   :  { %v11441_v43 = vpop.f32.mrb[14].mxu0 }
 0x5a9   :  { %v11442_v30 = vpop.f32.mrb[15].mxu0 }
 0x5aa   :  { %v11443_v10 = vadd.f32 %v11442_v30, %v11441_v43 }
 0x5c8   :  { %v1827_v34 = vpop.f32.mrb[16].mxu0 }
 0x5c9   :  { %v1828_v26 = vadd.f32 %v11443_v10, %v1827_v34  ;;  %v12883_v13 = vpop.f32.mrb[17].mxu0  ;;  %v2226_v10 = vld [vmem:[%s23608_s2 + $0x198] sm:$0xff] }
 0x5ca   :  { %v2228_v13 = vld [vmem:[%s23608_s2 + $0x1a8] sm:$0xff] }
 0x5cb   :  { %v1833_v17 = vadd.f32 %v11103_v59, %v1828_v26  ;;  %v2223_v59 = vld [vmem:[%s23608_s2 + $0x180] sm:$0xff]  ;;  %v2225_v26 = vld [vmem:[%s23608_s2 + $0x190] sm:$0xff] }
 0x5cd   :  { %18610 = vtanh.f32 %v1833_v17  ;;  %v2230_v17 = vld [vmem:[%s23608_s2 + $0x1b8] sm:$0xff] }
 0x5d7   :  { %v18611_v25 = vpop.eup %18610 }
 0x5d8   :  { %1854 = vrot.lane.b32.xlu1 %v18611_v25, %s18755_s13  ;;  %2071 = vmatmul.mubr.f32.vlgmr.msra.gmra.mrb[16].mxu1 %v18611_v25 }
 0x5d9   :  { %14799 = vmatpush3.bf16.msra.mxu1 %v24226_v32 }
 0x5da   :  { %14801 = vmatprep.subr.bf16.mxu1 %v24227_v24 }
 0x5dd   :  { %14803 = vmatpush3.bf16.msra.mxu1 %v24228_v16 }
 0x5de   :  { %14805 = vmatprep.subr.bf16.mxu1 %v24229_v49 }
 0x5e1   :  { %14807 = vmatpush3.bf16.msra.mxu1 %v24230_v27 }
 0x5e2   :  { %14809 = vmatprep.subr.bf16.mxu1 %v24231_v22 }
 0x5e5   :  { %14811 = vmatpush3.bf16.msra.mxu1 %v24232_v31 }
 0x5e6   :  { %14813 = vmatprep.subr.bf16.mxu1 %v24233_v41 }
 0x5e9   :  { %14815 = vmatpush3.bf16.msra.mxu1 %v24234_v54 }
 0x5ea   :  { %14817 = vmatprep.subr.bf16.mxu1 %v24235_v1 }
 0x5ed   :  { %14819 = vmatpush3.bf16.msra.mxu1 %v24236_v42 }
 0x5ee   :  { %14821 = vmatprep.subr.bf16.mxu1 %v24237_v3 }
 0x5f1   :  { %14823 = vmatpush3.bf16.msra.mxu1 %v24238_v0 }
 0x5f2   :  { %14825 = vmatprep.subr.bf16.mxu1 %v24239_v57 }
 0x5f5   :  { %14827 = vmatpush3.bf16.msra.mxu1 %v24240_v29 }
 0x5f6   :  { %14828 = vmatprep.subr.bf16.mxu1 %v24241_v39 }
 0x64a   :  { %v1855_v30 = vpop.permute.xlu1 %1854 }
 0x64b   :  { %11104 = vmatmul.mubr.msk.f32.vlgmr.msra.gmra.mrb[12].mxu0 %vm1395_vm2, %v1855_v30  ;;  %v14686_v30 = vpack.c.bf16 %v2225_v26, %v2223_v59  ;;  %v2233_v59 = vld [vmem:[%s23608_s2 + $0x1d0] sm:$0xff]  ;;  %v2238_v26 = vld [vmem:[%s23608_s2 + $0x1f8] sm:$0xff] }
 0x64c   :  { %14631 = vmatpush3.bf16.msra.mxu0 %v24226_v32  ;;  %2141 = vmatprep.mubr.f32.mxu0 %v19981_v51  ;;  %v11106_v51 = vld [vmem:[%s23607_s0 + $0x98] sm:$0xff] }
 0x64d   :  { %14633 = vmatprep.subr.bf16.mxu0 %v24227_v24 }
 0x650   :  { %14635 = vmatpush3.bf16.msra.mxu0 %v24228_v16 }
 0x651   :  { %14637 = vmatprep.subr.bf16.mxu0 %v24229_v49 }
 0x654   :  { %14639 = vmatpush3.bf16.msra.mxu0 %v24230_v27 }
 0x655   :  { %14641 = vmatprep.subr.bf16.mxu0 %v24231_v22 }
 0x658   :  { %14643 = vmatpush3.bf16.msra.mxu0 %v24232_v31 }
 0x659   :  { %14645 = vmatprep.subr.bf16.mxu0 %v24233_v41 }
 0x65c   :  { %14647 = vmatpush3.bf16.msra.mxu0 %v24234_v54 }
 0x65d   :  { %14649 = vmatprep.subr.bf16.mxu0 %v24235_v1 }
 0x660   :  { %14651 = vmatpush3.bf16.msra.mxu0 %v24236_v42 }
 0x661   :  { %14653 = vmatprep.subr.bf16.mxu0 %v24237_v3 }
 0x664   :  { %14655 = vmatpush3.bf16.msra.mxu0 %v24238_v0 }
 0x665   :  { %14657 = vmatprep.subr.bf16.mxu0 %v24239_v57 }
 0x668   :  { %14659 = vmatpush3.bf16.msra.mxu0 %v24240_v29 }
 0x669   :  { %14660 = vmatprep.subr.bf16.mxu0 %v24241_v39 }
 0x66b   :  { %2142 = vmatmul.mubr.f32.vlgmr.msra.gmra.mrb[18].mxu0 %v19983_v23  ;;  %v11105_v23 = vld [vmem:[%s23607_s0 + $0x90] sm:$0xff] }
 0x66c   :  { %14662 = vmatpush3.bf16.msra.mxu0 %v24242_v11  ;;  %12916 = vmatprep.mubr.msk.f32.mxu0 %vm18754_vm0, %v24161_v61 }
 0x66d   :  { %14663 = vmatprep.subr.bf16.mxu0 %v24241_v39 }
 0x670   :  { %14665 = vmatpush3.bf16.msra.mxu0 %v24243_v38 }
 0x671   :  { %14666 = vmatprep.subr.bf16.mxu0 %v24241_v39 }
 0x674   :  { %14668 = vmatpush3.bf16.msra.mxu0 %v24244_v46 }
 0x675   :  { %14669 = vmatprep.subr.bf16.mxu0 %v24241_v39 }
 0x678   :  { %14671 = vmatpush3.bf16.msra.mxu0 %v24245_v5 }
 0x679   :  { %14672 = vmatprep.subr.bf16.mxu0 %v24241_v39 }
 0x67c   :  { %14674 = vmatpush3.bf16.msra.mxu0 %v24246_v55 }
 0x67d   :  { %14675 = vmatprep.subr.bf16.mxu0 %v24241_v39 }
 0x680   :  { %14677 = vmatpush3.bf16.msra.mxu0 %v24247_v6 }
 0x681   :  { %14678 = vmatprep.subr.bf16.mxu0 %v24241_v39 }
 0x684   :  { %14680 = vmatpush3.bf16.msra.mxu0 %v24248_v36 }
 0x685   :  { %14681 = vmatprep.subr.bf16.mxu0 %v24241_v39 }
 0x688   :  { %14683 = vmatpush3.bf16.msra.mxu0 %v24249_v44 }
 0x68b   :  { %12917 = vmatmul.mubr.f32.vlgmr.msra.gmra.mrb[20].mxu0 %v18611_v25  ;;  %v2224_v25 = vld [vmem:[%s23608_s2 + $0x188] sm:$0xff] }
 0x68c   :  { %2308 = vmatprep.mubr.f32.mxu0 %v24161_v61  ;;  %v14684_v34 = vpack.c.bf16 %v2226_v10, %v2224_v25  ;;  %v2231_v10 = vld [vmem:[%s23608_s2 + $0x1c0] sm:$0xff] }
 0x68e   :  { %14685 = vmatprep.subr.bf16.mxu0 %v14684_v34  ;;  %v2236_v34 = vld [vmem:[%s23608_s2 + $0x1e8] sm:$0xff] }
 0x68f   :  { %14687 = vmatpush1.bf16.msra.mxu0 %v14686_v30  ;;  %v2235_v30 = vld [vmem:[%s23608_s2 + $0x1e0] sm:$0xff] }
 0x6ab   :  { %v2072_v37 = vpop.f32.mrb[16].mxu1 }
 0x6ac   :  { %v2217_v18 = vadd.f32 %v11105_v23, %v2072_v37  ;;  %v2074_v19 = vpop.f32.mrb[17].mxu1  ;;  %v14688_v23 = vpack.c.bf16 %v2230_v17, %v2228_v13  ;;  %v2229_v37 = vld [vmem:[%s23608_s2 + $0x1b0] sm:$0xff]  ;;  %v14694_v13 = vpack.c.bf16 %v2233_v59, %v2231_v10  ;;  %v14696_v17 = vpack.c.bf16 %v2238_v26, %v2236_v34 }
 0x6ad   :  { %v2218_v2 = vadd.f32 %v11106_v51, %v2074_v19  ;;  %v2227_v51 = vld [vmem:[%s23608_s2 + $0x1a0] sm:$0xff]  ;;  %v2234_v19 = vld [vmem:[%s23608_s2 + $0x1d8] sm:$0xff] }
 0x6ae   :  { %14689 = vmatprep.subr.bf16.mxu0 %v14688_v23  ;;  %v2237_v23 = vld [vmem:[%s23608_s2 + $0x1f0] sm:$0xff] }
 0x6af   :  { %18612 = vtanh.f32 %v2218_v2  ;;  %v14690_v2 = vpack.c.bf16 %v2229_v37, %v2227_v51  ;;  %v14698_v51 = vpack.c.bf16 %v2237_v23, %v2235_v30  ;;  %v24252_v30 = vld [vmem:[#allocation11_spill] sm:$0xff] }
 0x6b0   :  { %18614 = vtanh.f32 %v2217_v18  ;;  %v2232_v18 = vld [vmem:[%s23608_s2 + $0x1c8] sm:$0xff] }
 0x6b1   :  { %v14692_v25 = vpack.c.bf16 %v2234_v19, %v2232_v18  ;;  %14691 = vmatpush1.bf16.msra.mxu0 %v14690_v2  ;;  %v11107_v2 = vld [vmem:[%s23607_s0 + $0xa0] sm:$0xff] }
 0x6b3   :  { %14693 = vmatprep.subr.bf16.mxu0 %v14692_v25 }
 0x6b5   :  { %14695 = vmatpush1.bf16.msra.mxu0 %v14694_v13  ;;  %v24250_v13 = vld [vmem:[#allocation7_spill] sm:$0xff] }
 0x6b6   :  { %14697 = vmatprep.subr.bf16.mxu0 %v14696_v17  ;;  %v24251_v17 = vld [vmem:[#allocation9_spill] sm:$0xff] }
 0x6b9   :  { %v20116_v53 = vpop.eup %18612  ;;  %14699 = vmatpush1.bf16.msra.mxu0 %v14698_v51 }
 0x6ba   :  { %v20118_v43 = vpop.eup %18614  ;;  %2527 = vmatprep.mubr.f32.mxu1 %v20116_v53  ;;  %14701 = vmatprep.subr.bf16.mxu0 %v18799_v4 }
 0x6bb   :  { %2528 = vmatmul.mubr.f32.vlgmr.msra.gmra.mrb[18].mxu1 %v20118_v43 }
 0x6bc   :  { %14830 = vmatpush3.bf16.msra.mxu1 %v24242_v11  ;;  %12951 = vmatprep.mubr.msk.f32.mxu1 %vm18754_vm0, %v24161_v61 }
 0x6bd   :  { %14831 = vmatprep.subr.bf16.mxu1 %v24241_v39 }
 0x6c0   :  { %14833 = vmatpush3.bf16.msra.mxu1 %v24243_v38 }
 0x6c1   :  { %14834 = vmatprep.subr.bf16.mxu1 %v24241_v39 }
 0x6c4   :  { %14836 = vmatpush3.bf16.msra.mxu1 %v24244_v46  ;;  %v24268_v46 = vld [vmem:[#allocation3_spill] sm:$0xff] }
 0x6c5   :  { %14837 = vmatprep.subr.bf16.mxu1 %v24241_v39 }
 0x6c8   :  { %14839 = vmatpush3.bf16.msra.mxu1 %v24245_v5  ;;  %v24267_v5 = vld [vmem:[#allocation41_spill] sm:$0xff] }
 0x6c9   :  { %14840 = vmatprep.subr.bf16.mxu1 %v24241_v39 }
 0x6cc   :  { %14842 = vmatpush3.bf16.msra.mxu1 %v24246_v55  ;;  %v24266_v55 = vld [vmem:[#allocation39_spill] sm:$0xff] }
 0x6cd   :  { %14843 = vmatprep.subr.bf16.mxu1 %v24241_v39 }
 0x6d0   :  { %14845 = vmatpush3.bf16.msra.mxu1 %v24247_v6  ;;  %v24265_v6 = vld [vmem:[#allocation37_spill] sm:$0xff] }
 0x6d1   :  { %14846 = vmatprep.subr.bf16.mxu1 %v24241_v39 }
 0x6d4   :  { %14848 = vmatpush3.bf16.msra.mxu1 %v24248_v36  ;;  %v24262_v36 = vld [vmem:[#allocation31_spill] sm:$0xff] }
 0x6d5   :  { %14849 = vmatprep.subr.bf16.mxu1 %v24241_v39 }
 0x6d8   :  { %14851 = vmatpush3.bf16.msra.mxu1 %v24249_v44  ;;  %v24261_v44 = vld [vmem:[#allocation29_spill] sm:$0xff] }
 0x6d9   :  { %14869 = vmatprep.subr.bf16.mxu1 %v18799_v4  ;;  %v24260_v4 = vld [vmem:[#allocation27_spill] sm:$0xff] }
 0x73e   :  { %v11493_v37 = vpop.f32.mrb[18].mxu0 }
 0x73f   :  { %v11494_v18 = vpop.f32.mrb[19].mxu0 }
 0x740   :  { %v11495_v19 = vadd.f32 %v11494_v18, %v11493_v37  ;;  %v24253_v37 = vld [vmem:[#allocation13_spill] sm:$0xff] }
 0x75e   :  { %v2213_v25 = vpop.f32.mrb[20].mxu0 }
 0x75f   :  { %v2214_v10 = vadd.f32 %v11495_v19, %v2213_v25  ;;  %v12918_v59 = vpop.f32.mrb[21].mxu0  ;;  %v24254_v19 = vld [vmem:[#allocation15_spill] sm:$0xff] }
 0x760   :  { %v24256_v25 = vld [vmem:[#allocation19_spill] sm:$0xff] }
 0x761   :  { %v2219_v34 = vadd.f32 %v11107_v2, %v2214_v10  ;;  %v24255_v2 = vld [vmem:[#allocation17_spill] sm:$0xff]  ;;  %v24258_v59 = vld [vmem:[#allocation23_spill] sm:$0xff] }
 0x762   :  { %v24257_v10 = vld [vmem:[#allocation21_spill] sm:$0xff] }
 0x763   :  { %18616 = vtanh.f32 %v2219_v34  ;;  %v24259_v34 = vld [vmem:[#allocation25_spill] sm:$0xff] }
 0x76d   :  { %v20192_v26 = vpop.eup %18616 }
 0x76e   :  { %2240 = vrot.lane.b32.xlu1 %v20192_v26, %s18755_s13  ;;  %12952 = vmatmul.mubr.f32.vlgmr.msra.gmra.mrb[20].mxu1 %v20192_v26 }
 0x76f   :  { %14871 = vmatpush1.bf16.msra.mxu1 %v18810_v8 }
 0x770   :  { %14873 = vmatprep.subr.bf16.mxu1 %v18812_v9 }
 0x773   :  { %14875 = vmatpush1.bf16.msra.mxu1 %v18828_v14 }
 0x774   :  { %14877 = vmatprep.subr.bf16.mxu1 %v18831_v15 }
 0x777   :  { %14879 = vmatpush1.bf16.msra.mxu1 %v18846_v20 }
 0x778   :  { %14881 = vmatprep.subr.bf16.mxu1 %v18849_v21 }
 0x77b   :  { %14883 = vmatpush1.bf16.msra.mxu1 %v18870_v28 }
 0x77c   :  { %14885 = vmatprep.subr.bf16.mxu1 %v18884_v33 }
 0x77f   :  { %14887 = vmatpush1.bf16.msra.mxu1 %v24192_v52 }
 0x780   :  { %14889 = vmatprep.subr.bf16.mxu1 %v18929_v48 }
 0x783   :  { %14891 = vmatpush1.bf16.msra.mxu1 %v18958_v58 }
 0x784   :  { %14893 = vmatprep.subr.bf16.mxu1 %v18973_v63 }
 0x787   :  { %14895 = vmatpush1.bf16.msra.mxu1 %v24193_v62 }
 0x788   :  { %14897 = vmatprep.subr.bf16.mxu1 %v24250_v13 }
 0x78b   :  { %14899 = vmatpush1.bf16.msra.mxu1 %v24251_v17 }
 0x78c   :  { %14901 = vmatprep.subr.bf16.mxu1 %v24252_v30 }
 0x78e   :  { %v11545_v23 = vpop.f32.mrb[18].mxu1 }
 0x78f   :  { %v11546_v51 = vpop.f32.mrb[19].mxu1  ;;  %14903 = vmatpush1.bf16.msra.mxu1 %v24253_v37 }
 0x790   :  { %v20214_v18 = vadd.f32 %v11546_v51, %v11545_v23  ;;  %14905 = vmatprep.subr.bf16.mxu1 %v24254_v19  ;;  %v24263_v23 = vld [vmem:[#allocation33_spill] sm:$0xff]  ;;  %v24264_v51 = vld [vmem:[#allocation35_spill] sm:$0xff] }
 0x793   :  { %14907 = vmatpush1.bf16.msra.mxu1 %v24255_v2 }
 0x794   :  { %14909 = vmatprep.subr.bf16.mxu1 %v24256_v25 }
 0x797   :  { %14911 = vmatpush1.bf16.msra.mxu1 %v24257_v10 }
 0x798   :  { %14913 = vmatprep.subr.bf16.mxu1 %v24258_v59 }
 0x79b   :  { %14915 = vmatpush1.bf16.msra.mxu1 %v24259_v34 }
 0x79c   :  { %14917 = vmatprep.subr.bf16.mxu1 %v24260_v4 }
 0x79f   :  { %14919 = vmatpush1.bf16.msra.mxu1 %v24261_v44 }
 0x7a0   :  { %14921 = vmatprep.subr.bf16.mxu1 %v24262_v36 }
 0x7a3   :  { %14923 = vmatpush1.bf16.msra.mxu1 %v24263_v23 }
 0x7a4   :  { %14925 = vmatprep.subr.bf16.mxu1 %v24264_v51 }
 0x7a7   :  { %14927 = vmatpush1.bf16.msra.mxu1 %v24265_v6 }
 0x7a8   :  { %14929 = vmatprep.subr.bf16.mxu1 %v24266_v55 }
 0x7ab   :  { %14931 = vmatpush1.bf16.msra.mxu1 %v24267_v5 }
 0x7ac   :  { %14933 = vmatprep.subr.bf16.mxu1 %v24268_v46 }
 0x7e0   :  { %v2241_v38 = vpop.permute.xlu1 %2240 }
 0x7e1   :  { %11108 = vmatmul.mubr.msk.f32.vlgmr.msra.gmra.mrb[12].mxu0 %vm1395_vm2, %v2241_v38  ;;  %v24269_v38 = vld [vmem:[#allocation8_spill] sm:$0xff] }
 0x7e2   :  { %14703 = vmatpush1.bf16.msra.mxu0 %v18810_v8  ;;  %2385 = vmatprep.mubr.f32.mxu0 %v20116_v53  ;;  %v24270_v53 = vld [vmem:[#allocation10_spill] sm:$0xff] }
 0x7e3   :  { %14705 = vmatprep.subr.bf16.mxu0 %v18812_v9 }
 0x7e6   :  { %14707 = vmatpush1.bf16.msra.mxu0 %v18828_v14 }
 0x7e7   :  { %14709 = vmatprep.subr.bf16.mxu0 %v18831_v15 }
 0x7ea   :  { %14711 = vmatpush1.bf16.msra.mxu0 %v18846_v20 }
 0x7eb   :  { %14713 = vmatprep.subr.bf16.mxu0 %v18849_v21 }
 0x7ee   :  { %14715 = vmatpush1.bf16.msra.mxu0 %v18870_v28 }
 0x7ef   :  { %14717 = vmatprep.subr.bf16.mxu0 %v18884_v33 }
 0x7f2   :  { %14719 = vmatpush1.bf16.msra.mxu0 %v24192_v52 }
 0x7f3   :  { %14721 = vmatprep.subr.bf16.mxu0 %v18929_v48 }
 0x7f6   :  { %14723 = vmatpush1.bf16.msra.mxu0 %v18958_v58 }
 0x7f7   :  { %14725 = vmatprep.subr.bf16.mxu0 %v18973_v63 }
 0x7fa   :  { %14727 = vmatpush1.bf16.msra.mxu0 %v24193_v62 }
 0x7fb   :  { %14729 = vmatprep.subr.bf16.mxu0 %v24250_v13 }
 0x7fe   :  { %14731 = vmatpush1.bf16.msra.mxu0 %v24251_v17 }
 0x7ff   :  { %14733 = vmatprep.subr.bf16.mxu0 %v24252_v30  ;;  %v2617_v30 = vld [vmem:[%s23608_s2 + $0x240] sm:$0xff] }
 0x802   :  { %14735 = vmatpush1.bf16.msra.mxu0 %v24253_v37 }
 0x803   :  { %14737 = vmatprep.subr.bf16.mxu0 %v24254_v19  ;;  %v2620_v19 = vld [vmem:[%s23608_s2 + $0x258] sm:$0xff] }
 0x806   :  { %14739 = vmatpush1.bf16.msra.mxu0 %v24255_v2  ;;  %v2618_v2 = vld [vmem:[%s23608_s2 + $0x248] sm:$0xff] }
 0x807   :  { %14741 = vmatprep.subr.bf16.mxu0 %v24256_v25  ;;  %v2615_v25 = vld [vmem:[%s23608_s2 + $0x230] sm:$0xff]  ;;  %v14860_v37 = vpack.c.bf16 %v2620_v19, %v2618_v2 }
 0x80a   :  { %14743 = vmatpush1.bf16.msra.mxu0 %v24257_v10 }
 0x80b   :  { %14745 = vmatprep.subr.bf16.mxu0 %v24258_v59  ;;  %v24275_v59 = vld [vmem:[#allocation20_spill] sm:$0xff] }
 0x80e   :  { %14747 = vmatpush1.bf16.msra.mxu0 %v24259_v34  ;;  %v2616_v34 = vld [vmem:[%s23608_s2 + $0x238] sm:$0xff] }
 0x80f   :  { %14749 = vmatprep.subr.bf16.mxu0 %v24260_v4  ;;  %v2614_v4 = vld [vmem:[%s23608_s2 + $0x228] sm:$0xff] }
 0x812   :  { %14751 = vmatpush1.bf16.msra.mxu0 %v24261_v44  ;;  %v2611_v44 = vld [vmem:[%s23608_s2 + $0x210] sm:$0xff] }
 0x813   :  { %14753 = vmatprep.subr.bf16.mxu0 %v24262_v36  ;;  %v2609_v36 = vld [vmem:[%s23608_s2 + $0x200] sm:$0xff] }
 0x814   :  { %v14854_v10 = vpack.c.bf16 %v2611_v44, %v2609_v36 }
 0x816   :  { %14755 = vmatpush1.bf16.msra.mxu0 %v24263_v23 }
 0x817   :  { %14757 = vmatprep.subr.bf16.mxu0 %v24264_v51  ;;  %v24274_v51 = vld [vmem:[#allocation18_spill] sm:$0xff] }
 0x81a   :  { %14759 = vmatpush1.bf16.msra.mxu0 %v24265_v6  ;;  %v24273_v6 = vld [vmem:[#allocation16_spill] sm:$0xff] }
 0x81b   :  { %14761 = vmatprep.subr.bf16.mxu0 %v24266_v55  ;;  %v2612_v55 = vld [vmem:[%s23608_s2 + $0x218] sm:$0xff] }
 0x81e   :  { %14763 = vmatpush1.bf16.msra.mxu0 %v24267_v5  ;;  %v2610_v5 = vld [vmem:[%s23608_s2 + $0x208] sm:$0xff] }
 0x81f   :  { %14765 = vmatprep.subr.bf16.mxu0 %v24268_v46  ;;  %v24272_v46 = vld [vmem:[#allocation14_spill] sm:$0xff]  ;;  %v14852_v23 = vpack.c.bf16 %v2612_v55, %v2610_v5  ;;  %v14856_v5 = vpack.c.bf16 %v2616_v34, %v2614_v4  ;;  %v11111_v4 = vld [vmem:[%s23607_s0 + $0xb8] sm:$0xff] }
 0x820   :  { %v2613_v55 = vld [vmem:[%s23608_s2 + $0x220] sm:$0xff] }
 0x821   :  { %2386 = vmatmul.mubr.f32.vlgmr.msra.gmra.mrb[22].mxu0 %v20118_v43  ;;  %v24271_v43 = vld [vmem:[#allocation12_spill] sm:$0xff] }
 0x822   :  { %14767 = vmatpush1.bf16.msra.mxu0 %v18889_v35  ;;  %2456 = vmatprep.mubr.f32.mxu0 %v24161_v61 }
 0x823   :  { %14769 = vmatprep.subr.bf16.mxu0 %v18904_v40 }
 0x826   :  { %14771 = vmatpush1.bf16.msra.mxu0 %v18920_v45 }
 0x827   :  { %14773 = vmatprep.subr.bf16.mxu0 %v18934_v50 }
 0x82a   :  { %14775 = vmatpush1.bf16.msra.mxu0 %v18952_v56 }
 0x82b   :  { %14777 = vmatprep.subr.bf16.mxu0 %v18964_v60 }
 0x82e   :  { %14779 = vmatpush1.bf16.msra.mxu0 %v18991_v7 }
 0x82f   :  { %14781 = vmatprep.subr.bf16.mxu0 %v19000_v12 }
 0x832   :  { %14783 = vmatpush1.bf16.msra.mxu0 %v24269_v38 }
 0x833   :  { %14785 = vmatprep.subr.bf16.mxu0 %v24270_v53 }
 0x836   :  { %14787 = vmatpush1.bf16.msra.mxu0 %v24271_v43 }
 0x837   :  { %14789 = vmatprep.subr.bf16.mxu0 %v24272_v46 }
 0x83a   :  { %14791 = vmatpush1.bf16.msra.mxu0 %v24273_v6 }
 0x83b   :  { %14793 = vmatprep.subr.bf16.mxu0 %v24274_v51 }
 0x83e   :  { %14795 = vmatpush1.bf16.msra.mxu0 %v24275_v59 }
 0x83f   :  { %14853 = vmatprep.subr.bf16.mxu0 %v14852_v23  ;;  %v14858_v23 = vpack.c.bf16 %v2615_v25, %v2613_v55  ;;  %v2624_v25 = vld [vmem:[%s23608_s2 + $0x278] sm:$0xff] }
 0x841   :  { %2457 = vmatmul.mubr.f32.vlgmr.msra.gmra.mrb[22].mxu0 %v20192_v26  ;;  %v2599_v36 = vpop.f32.mrb[20].mxu1  ;;  %v2619_v26 = vld [vmem:[%s23608_s2 + $0x250] sm:$0xff] }
 0x842   :  { %v2600_v44 = vadd.f32 %v20214_v18, %v2599_v36  ;;  %v12953_v34 = vpop.f32.mrb[21].mxu1  ;;  %14855 = vmatpush1.bf16.msra.mxu0 %v14854_v10  ;;  %2694 = vmatprep.mubr.f32.mxu0 %v24161_v61  ;;  %v2622_v18 = vld [vmem:[%s23608_s2 + $0x268] sm:$0xff]  ;;  %v14862_v19 = vpack.c.bf16 %v2619_v26, %v2617_v30  ;;  %v2621_v10 = vld [vmem:[%s23608_s2 + $0x260] sm:$0xff] }
 0x843   :  { %14857 = vmatprep.subr.bf16.mxu0 %v14856_v5  ;;  %v14864_v2 = vpack.c.bf16 %v2624_v25, %v2622_v18  ;;  %v2623_v5 = vld [vmem:[%s23608_s2 + $0x270] sm:$0xff]  ;;  %v11109_v30 = vld [vmem:[%s23607_s0 + $0xa8] sm:$0xff]  ;;  %v24276_v25 = vld [vmem:[#allocation49_spill] sm:$0xff] }
 0x844   :  { %v2605_v17 = vadd.f32 %v11111_v4, %v2600_v44  ;;  %v14866_v55 = vpack.c.bf16 %v2623_v5, %v2621_v10  ;;  %v24279_v10 = vld [vmem:[#allocation52_spill] sm:$0xff]  ;;  %v24280_v5 = vld [vmem:[#allocation53_spill] sm:$0xff] }
 0x846   :  { %18618 = vtanh.f32 %v2605_v17  ;;  %14859 = vmatpush1.bf16.msra.mxu0 %v14858_v23 }
 0x847   :  { %14861 = vmatprep.subr.bf16.mxu0 %v14860_v37  ;;  %v11110_v37 = vld [vmem:[%s23607_s0 + $0xb0] sm:$0xff] }
 0x84a   :  { %14863 = vmatpush1.bf16.msra.mxu0 %v14862_v19  ;;  %v24277_v19 = vld [vmem:[#allocation50_spill] sm:$0xff] }
 0x84b   :  { %14865 = vmatprep.subr.bf16.mxu0 %v14864_v2  ;;  %v24278_v2 = vld [vmem:[#allocation51_spill] sm:$0xff] }
 0x84e   :  { %14867 = vmatpush1.bf16.msra.mxu0 %v14866_v55  ;;  %v24281_v55 = vld [vmem:[#allocation54_spill] sm:$0xff] }
 0x84f   :  { %14965 = vmatprep.subr.bf16.mxu0 %v24225_v47 }
 0x850   :  { %v20337_v4 = vpop.eup %18618 }
 0x851   :  { %2626 = vrot.lane.b32.xlu0 %v20337_v4, %s18755_s13 }
 0x8c3   :  { %v2627_v17 = vpop.permute.xlu0 %2626 }
 0x8c4   :  { %11112 = vmatmul.mubr.msk.f32.vlgmr.msra.gmra.mrb[12].mxu0 %vm1395_vm2, %v2627_v17  ;;  %v24282_v17 = vld [vmem:[#allocation55_spill] sm:$0xff] }
 0x8c5   :  { %14967 = vmatpush3.bf16.msra.mxu0 %v24226_v32 }
 0x8c6   :  { %14969 = vmatprep.subr.bf16.mxu0 %v24227_v24 }
 0x8c9   :  { %14971 = vmatpush3.bf16.msra.mxu0 %v24228_v16  ;;  %v3010_v16 = vld [vmem:[%s23608_s2 + $0x2f8] sm:$0xff] }
 0x8ca   :  { %14973 = vmatprep.subr.bf16.mxu0 %v24229_v49  ;;  %v3006_v49 = vld [vmem:[%s23608_s2 + $0x2d8] sm:$0xff] }
 0x8cd   :  { %14975 = vmatpush3.bf16.msra.mxu0 %v24230_v27  ;;  %v2999_v27 = vld [vmem:[%s23608_s2 + $0x2a0] sm:$0xff] }
 0x8ce   :  { %14977 = vmatprep.subr.bf16.mxu0 %v24231_v22 }
 0x8d1   :  { %14979 = vmatpush3.bf16.msra.mxu0 %v24232_v31 }
 0x8d2   :  { %14981 = vmatprep.subr.bf16.mxu0 %v24233_v41  ;;  %v3002_v41 = vld [vmem:[%s23608_s2 + $0x2b8] sm:$0xff] }
 0x8d5   :  { %14983 = vmatpush3.bf16.msra.mxu0 %v24234_v54  ;;  %v3000_v54 = vld [vmem:[%s23608_s2 + $0x2a8] sm:$0xff] }
 0x8d6   :  { %14985 = vmatprep.subr.bf16.mxu0 %v24235_v1  ;;  %v2997_v1 = vld [vmem:[%s23608_s2 + $0x290] sm:$0xff]  ;;  %v15024_v22 = vpack.c.bf16 %v3002_v41, %v3000_v54  ;;  %v3003_v54 = vld [vmem:[%s23608_s2 + $0x2c0] sm:$0xff] }
 0x8d9   :  { %14987 = vmatpush3.bf16.msra.mxu0 %v24236_v42 }
 0x8da   :  { %14989 = vmatprep.subr.bf16.mxu0 %v24237_v3  ;;  %v2995_v3 = vld [vmem:[%s23608_s2 + $0x280] sm:$0xff] }
 0x8db   :  { %v15022_v31 = vpack.c.bf16 %v2997_v1, %v2995_v3  ;;  %v3005_v3 = vld [vmem:[%s23608_s2 + $0x2d0] sm:$0xff] }
 0x8dd   :  { %14991 = vmatpush3.bf16.msra.mxu0 %v24238_v0  ;;  %v2998_v0 = vld [vmem:[%s23608_s2 + $0x298] sm:$0xff] }
 0x8de   :  { %14993 = vmatprep.subr.bf16.mxu0 %v24239_v57  ;;  %v2996_v57 = vld [vmem:[%s23608_s2 + $0x288] sm:$0xff] }
 0x8df   :  { %v15020_v42 = vpack.c.bf16 %v2998_v0, %v2996_v57  ;;  %v3001_v57 = vld [vmem:[%s23608_s2 + $0x2b0] sm:$0xff]  ;;  %v3004_v0 = vld [vmem:[%s23608_s2 + $0x2c8] sm:$0xff] }
 0x8e0   :  { %v15026_v1 = vpack.c.bf16 %v3001_v57, %v2999_v27  ;;  %v15028_v41 = vpack.c.bf16 %v3006_v49, %v3004_v0  ;;  %v15030_v27 = vpack.c.bf16 %v3005_v3, %v3003_v54  ;;  %v11115_v3 = vld [vmem:[%s23607_s0 + $0xd0] sm:$0xff] }
 0x8e1   :  { %14995 = vmatpush3.bf16.msra.mxu0 %v24240_v29  ;;  %v24301_v29 = vld [vmem:[#allocation3_spill] sm:$0xff] }
 0x8e2   :  { %14996 = vmatprep.subr.bf16.mxu0 %v24241_v39 }
 0x914   :  { %v2458_v36 = vpop.f32.mrb[22].mxu0 }
 0x915   :  { %v2603_v44 = vadd.f32 %v11109_v30, %v2458_v36  ;;  %v2460_v34 = vpop.f32.mrb[23].mxu0  ;;  %v24283_v30 = vld [vmem:[#allocation2_spill] sm:$0xff]  ;;  %v24286_v36 = vld [vmem:[#allocation13_spill] sm:$0xff] }
 0x916   :  { %v2604_v23 = vadd.f32 %v11110_v37, %v2460_v34  ;;  %v24285_v37 = vld [vmem:[#allocation11_spill] sm:$0xff]  ;;  %v24288_v34 = vld [vmem:[#allocation17_spill] sm:$0xff] }
 0x918   :  { %18620 = vtanh.f32 %v2604_v23  ;;  %v24289_v23 = vld [vmem:[#allocation19_spill] sm:$0xff] }
 0x919   :  { %18622 = vtanh.f32 %v2603_v44  ;;  %v24287_v44 = vld [vmem:[#allocation15_spill] sm:$0xff] }
 0x922   :  { %v18621_v26 = vpop.eup %18620 }
 0x923   :  { %v18623_v18 = vpop.eup %18622  ;;  %2771 = vmatprep.mubr.f32.mxu1 %v18621_v26  ;;  %2913 = vmatprep.mubr.f32.mxu0 %v18621_v26  ;;  %v24290_v26 = vld [vmem:[#allocation21_spill] sm:$0xff] }
 0x924   :  { %2772 = vmatmul.mubr.f32.vlgmr.msra.gmra.mrb[22].mxu1 %v18623_v18  ;;  %2914 = vmatmul.mubr.f32.vlgmr.msra.gmra.mrb[24].mxu0 %v18623_v18  ;;  %v24291_v18 = vld [vmem:[#allocation23_spill] sm:$0xff] }
 0x925   :  { %14935 = vmatpush1.bf16.msra.mxu1 %v18889_v35  ;;  %14998 = vmatpush3.bf16.msra.mxu0 %v24242_v11  ;;  %v24299_v11 = vld [vmem:[#allocation39_spill] sm:$0xff] }
 0x926   :  { %14937 = vmatprep.subr.bf16.mxu1 %v18904_v40  ;;  %14999 = vmatprep.subr.bf16.mxu0 %v24241_v39 }
 0x927   :  { %2842 = vmatprep.mubr.f32.mxu1 %v24161_v61  ;;  %12986 = vmatprep.mubr.msk.f32.mxu0 %vm18754_vm0, %v24161_v61 }
 0x929   :  { %14939 = vmatpush1.bf16.msra.mxu1 %v18920_v45  ;;  %15001 = vmatpush3.bf16.msra.mxu0 %v24276_v25  ;;  %v24298_v25 = vld [vmem:[#allocation37_spill] sm:$0xff] }
 0x92a   :  { %14941 = vmatprep.subr.bf16.mxu1 %v18934_v50  ;;  %15002 = vmatprep.subr.bf16.mxu0 %v24241_v39 }
 0x92d   :  { %14943 = vmatpush1.bf16.msra.mxu1 %v18952_v56  ;;  %15004 = vmatpush3.bf16.msra.mxu0 %v24277_v19  ;;  %v24297_v19 = vld [vmem:[#allocation35_spill] sm:$0xff] }
 0x92e   :  { %14945 = vmatprep.subr.bf16.mxu1 %v18964_v60  ;;  %15005 = vmatprep.subr.bf16.mxu0 %v24241_v39 }
 0x931   :  { %14947 = vmatpush1.bf16.msra.mxu1 %v18991_v7  ;;  %15007 = vmatpush3.bf16.msra.mxu0 %v24278_v2  ;;  %v24296_v2 = vld [vmem:[#allocation33_spill] sm:$0xff] }
 0x932   :  { %14949 = vmatprep.subr.bf16.mxu1 %v19000_v12  ;;  %15008 = vmatprep.subr.bf16.mxu0 %v24241_v39 }
 0x935   :  { %14951 = vmatpush1.bf16.msra.mxu1 %v24269_v38  ;;  %15010 = vmatpush3.bf16.msra.mxu0 %v24279_v10  ;;  %v24295_v10 = vld [vmem:[#allocation31_spill] sm:$0xff] }
 0x936   :  { %14953 = vmatprep.subr.bf16.mxu1 %v24270_v53  ;;  %15011 = vmatprep.subr.bf16.mxu0 %v24241_v39 }
 0x939   :  { %14955 = vmatpush1.bf16.msra.mxu1 %v24271_v43  ;;  %15013 = vmatpush3.bf16.msra.mxu0 %v24280_v5  ;;  %v24294_v5 = vld [vmem:[#allocation29_spill] sm:$0xff] }
 0x93a   :  { %14957 = vmatprep.subr.bf16.mxu1 %v24272_v46  ;;  %15014 = vmatprep.subr.bf16.mxu0 %v24241_v39 }
 0x93d   :  { %14959 = vmatpush1.bf16.msra.mxu1 %v24273_v6  ;;  %15016 = vmatpush3.bf16.msra.mxu0 %v24281_v55  ;;  %v24293_v55 = vld [vmem:[#allocation27_spill] sm:$0xff] }
 0x93e   :  { %14961 = vmatprep.subr.bf16.mxu1 %v24274_v51  ;;  %15017 = vmatprep.subr.bf16.mxu0 %v24241_v39  ;;  %v24300_v39 = vld [vmem:[#allocation41_spill] sm:$0xff] }
 0x941   :  { %14963 = vmatpush1.bf16.msra.mxu1 %v24275_v59  ;;  %15019 = vmatpush3.bf16.msra.mxu0 %v24282_v17  ;;  %v24292_v17 = vld [vmem:[#allocation25_spill] sm:$0xff] }
 0x942   :  { %15037 = vmatprep.subr.bf16.mxu1 %v24283_v30  ;;  %15021 = vmatprep.subr.bf16.mxu0 %v15020_v42  ;;  %v3008_v42 = vld [vmem:[%s23608_s2 + $0x2e8] sm:$0xff] }
 0x943   :  { %v15032_v49 = vpack.c.bf16 %v3010_v16, %v3008_v42  ;;  %v11113_v16 = vld [vmem:[%s23607_s0 + $0xc0] sm:$0xff] }
 0x944   :  { %2843 = vmatmul.mubr.f32.vlgmr.msra.gmra.mrb[22].mxu1 %v20337_v4  ;;  %12987 = vmatmul.mubr.f32.vlgmr.msra.gmra.mrb[26].mxu0 %v20337_v4  ;;  %v24284_v4 = vld [vmem:[#allocation9_spill] sm:$0xff] }
 0x945   :  { %15039 = vmatpush1.bf16.msra.mxu1 %v18810_v8  ;;  %3080 = vmatprep.mubr.f32.mxu0 %v24161_v61 }
 0x946   :  { %15041 = vmatprep.subr.bf16.mxu1 %v18812_v9  ;;  %15023 = vmatpush1.bf16.msra.mxu0 %v15022_v31  ;;  %v3009_v31 = vld [vmem:[%s23608_s2 + $0x2f0] sm:$0xff] }
 0x947   :  { %15025 = vmatprep.subr.bf16.mxu0 %v15024_v22  ;;  %v3007_v22 = vld [vmem:[%s23608_s2 + $0x2e0] sm:$0xff] }
 0x948   :  { %v15034_v57 = vpack.c.bf16 %v3009_v31, %v3007_v22 }
 0x949   :  { %15043 = vmatpush1.bf16.msra.mxu1 %v18828_v14 }
 0x94a   :  { %15045 = vmatprep.subr.bf16.mxu1 %v18831_v15  ;;  %15027 = vmatpush1.bf16.msra.mxu0 %v15026_v1 }
 0x94b   :  { %15029 = vmatprep.subr.bf16.mxu0 %v15028_v41  ;;  %v11114_v41 = vld [vmem:[%s23607_s0 + $0xc8] sm:$0xff] }
 0x94d   :  { %15047 = vmatpush1.bf16.msra.mxu1 %v18846_v20 }
 0x94e   :  { %15049 = vmatprep.subr.bf16.mxu1 %v18849_v21  ;;  %15031 = vmatpush1.bf16.msra.mxu0 %v15030_v27 }
 0x94f   :  { %15033 = vmatprep.subr.bf16.mxu0 %v15032_v49 }
 0x951   :  { %15051 = vmatpush1.bf16.msra.mxu1 %v18870_v28 }
 0x952   :  { %15053 = vmatprep.subr.bf16.mxu1 %v18884_v33  ;;  %15035 = vmatpush1.bf16.msra.mxu0 %v15034_v57 }
 0x953   :  { %15133 = vmatprep.subr.bf16.mxu0 %v24225_v47 }
 0x955   :  { %15055 = vmatpush1.bf16.msra.mxu1 %v24192_v52 }
 0x956   :  { %15057 = vmatprep.subr.bf16.mxu1 %v18929_v48 }
 0x959   :  { %15059 = vmatpush1.bf16.msra.mxu1 %v18958_v58 }
 0x95a   :  { %15061 = vmatprep.subr.bf16.mxu1 %v18973_v63 }
 0x95d   :  { %15063 = vmatpush1.bf16.msra.mxu1 %v24193_v62 }
 0x95e   :  { %15065 = vmatprep.subr.bf16.mxu1 %v24250_v13 }
 0x961   :  { %15067 = vmatpush1.bf16.msra.mxu1 %v24284_v4 }
 0x962   :  { %15069 = vmatprep.subr.bf16.mxu1 %v24285_v37 }
 0x965   :  { %15071 = vmatpush1.bf16.msra.mxu1 %v24286_v36 }
 0x966   :  { %15073 = vmatprep.subr.bf16.mxu1 %v24287_v44 }
 0x969   :  { %15075 = vmatpush1.bf16.msra.mxu1 %v24288_v34 }
 0x96a   :  { %15077 = vmatprep.subr.bf16.mxu1 %v24289_v23 }
 0x96d   :  { %15079 = vmatpush1.bf16.msra.mxu1 %v24290_v26 }
 0x96e   :  { %15081 = vmatprep.subr.bf16.mxu1 %v24291_v18 }
 0x971   :  { %15083 = vmatpush1.bf16.msra.mxu1 %v24292_v17 }
 0x972   :  { %15085 = vmatprep.subr.bf16.mxu1 %v24293_v55 }
 0x975   :  { %15087 = vmatpush1.bf16.msra.mxu1 %v24294_v5 }
 0x976   :  { %15089 = vmatprep.subr.bf16.mxu1 %v24295_v10 }
 0x979   :  { %15091 = vmatpush1.bf16.msra.mxu1 %v24296_v2 }
 0x97a   :  { %15093 = vmatprep.subr.bf16.mxu1 %v24297_v19 }
 0x97d   :  { %15095 = vmatpush1.bf16.msra.mxu1 %v24298_v25 }
 0x97e   :  { %15097 = vmatprep.subr.bf16.mxu1 %v24299_v11 }
 0x981   :  { %15099 = vmatpush1.bf16.msra.mxu1 %v24300_v39 }
 0x982   :  { %15101 = vmatprep.subr.bf16.mxu1 %v24301_v29 }
 0x9f7   :  { %v11597_v0 = vpop.f32.mrb[24].mxu0 }
 0x9f8   :  { %v11598_v24 = vpop.f32.mrb[25].mxu0 }
 0x9f9   :  { %v11599_v1 = vadd.f32 %v11598_v24, %v11597_v0 }
 0xa17   :  { %v2844_v54 = vpop.f32.mrb[22].mxu1  ;;  %v2985_v42 = vpop.f32.mrb[26].mxu0 }
 0xa18   :  { %v2989_v27 = vadd.f32 %v11113_v16, %v2844_v54  ;;  %v2986_v49 = vadd.f32 %v11599_v1, %v2985_v42  ;;  %v2846_v22 = vpop.f32.mrb[23].mxu1  ;;  %v12988_v31 = vpop.f32.mrb[27].mxu0  ;;  %v24302_v16 = vld [vmem:[#allocation24_spill] sm:$0xff] }
 0xa19   :  { %v2990_v57 = vadd.f32 %v11114_v41, %v2846_v22  ;;  %v24303_v41 = vld [vmem:[#allocation26_spill] sm:$0xff]  ;;  %v24304_v54 = vld [vmem:[#allocation28_spill] sm:$0xff] }
 0xa1a   :  { %18624 = vtanh.f32 %v2989_v27  ;;  %v2991_v24 = vadd.f32 %v11115_v3, %v2986_v49  ;;  %v24305_v3 = vld [vmem:[#allocation30_spill] sm:$0xff]  ;;  %v24306_v42 = vld [vmem:[#allocation32_spill] sm:$0xff] }
 0xa1b   :  { %18626 = vtanh.f32 %v2990_v57  ;;  %v24307_v27 = vld [vmem:[#allocation34_spill] sm:$0xff]  ;;  %v24308_v49 = vld [vmem:[#allocation36_spill] sm:$0xff] }
 0xa1c   :  { %18628 = vtanh.f32 %v2991_v24  ;;  %v24309_v22 = vld [vmem:[#allocation38_spill] sm:$0xff]  ;;  %v24310_v31 = vld [vmem:[#allocation40_spill] sm:$0xff]  ;;  %v24312_v24 = vld [vmem:[#allocation43_spill] sm:$0xff] }
 0xa1d   :  { %v24311_v57 = vld [vmem:[#allocation42_spill] sm:$0xff] }
 0xa24   :  { %v20491_v0 = vpop.eup %18624 }
 0xa25   :  { %v18627_v47 = vpop.eup %18626 }
 0xa26   :  { %v20493_v32 = vpop.eup %18628  ;;  %3157 = vmatprep.mubr.f32.mxu1 %v18627_v47 }
 0xa27   :  { %3012 = vrot.lane.b32.xlu1 %v20493_v32, %s18755_s13  ;;  %3158 = vmatmul.mubr.f32.vlgmr.msra.gmra.mrb[24].mxu1 %v20491_v0 }
 0xa28   :  { %15103 = vmatpush1.bf16.msra.mxu1 %v18889_v35  ;;  %3228 = vmatprep.mubr.f32.mxu1 %v24161_v61 }
 0xa29   :  { %15105 = vmatprep.subr.bf16.mxu1 %v18904_v40 }
 0xa2c   :  { %15107 = vmatpush1.bf16.msra.mxu1 %v18920_v45 }
 0xa2d   :  { %15109 = vmatprep.subr.bf16.mxu1 %v18934_v50 }
 0xa30   :  { %15111 = vmatpush1.bf16.msra.mxu1 %v18952_v56 }
 0xa31   :  { %15113 = vmatprep.subr.bf16.mxu1 %v18964_v60 }
 0xa34   :  { %15115 = vmatpush1.bf16.msra.mxu1 %v18991_v7 }
 0xa35   :  { %15117 = vmatprep.subr.bf16.mxu1 %v19000_v12 }
 0xa38   :  { %15119 = vmatpush1.bf16.msra.mxu1 %v24269_v38 }
 0xa39   :  { %15121 = vmatprep.subr.bf16.mxu1 %v24270_v53 }
 0xa3c   :  { %15123 = vmatpush1.bf16.msra.mxu1 %v24271_v43 }
 0xa3d   :  { %15125 = vmatprep.subr.bf16.mxu1 %v24272_v46 }
 0xa40   :  { %15127 = vmatpush1.bf16.msra.mxu1 %v24273_v6 }
 0xa41   :  { %15129 = vmatprep.subr.bf16.mxu1 %v24274_v51 }
 0xa44   :  { %15131 = vmatpush1.bf16.msra.mxu1 %v24275_v59 }
 0xa45   :  { %15205 = vmatprep.subr.bf16.mxu1 %v24283_v30 }
 0xa47   :  { %3229 = vmatmul.mubr.f32.vlgmr.msra.gmra.mrb[24].mxu1 %v20493_v32 }
 0xa48   :  { %15207 = vmatpush1.bf16.msra.mxu1 %v18810_v8 }
 0xa49   :  { %15209 = vmatprep.subr.bf16.mxu1 %v18812_v9 }
 0xa4c   :  { %15211 = vmatpush1.bf16.msra.mxu1 %v18828_v14 }
 0xa4d   :  { %15213 = vmatprep.subr.bf16.mxu1 %v18831_v15 }
 0xa50   :  { %15215 = vmatpush1.bf16.msra.mxu1 %v18846_v20 }
 0xa51   :  { %15217 = vmatprep.subr.bf16.mxu1 %v18849_v21 }
 0xa54   :  { %15219 = vmatpush1.bf16.msra.mxu1 %v18870_v28 }
 0xa55   :  { %15221 = vmatprep.subr.bf16.mxu1 %v18884_v33 }
 0xa58   :  { %15223 = vmatpush1.bf16.msra.mxu1 %v24192_v52 }
 0xa59   :  { %15225 = vmatprep.subr.bf16.mxu1 %v18929_v48 }
 0xa5c   :  { %15227 = vmatpush1.bf16.msra.mxu1 %v18958_v58 }
 0xa5d   :  { %15229 = vmatprep.subr.bf16.mxu1 %v18973_v63 }
 0xa60   :  { %15231 = vmatpush1.bf16.msra.mxu1 %v24193_v62 }
 0xa61   :  { %15233 = vmatprep.subr.bf16.mxu1 %v24250_v13 }
 0xa64   :  { %15235 = vmatpush1.bf16.msra.mxu1 %v24284_v4 }
 0xa65   :  { %15237 = vmatprep.subr.bf16.mxu1 %v24285_v37 }
 0xa68   :  { %15239 = vmatpush1.bf16.msra.mxu1 %v24286_v36 }
 0xa69   :  { %15241 = vmatprep.subr.bf16.mxu1 %v24287_v44 }
 0xa6c   :  { %15243 = vmatpush1.bf16.msra.mxu1 %v24288_v34 }
 0xa6d   :  { %15245 = vmatprep.subr.bf16.mxu1 %v24289_v23 }
 0xa70   :  { %15247 = vmatpush1.bf16.msra.mxu1 %v24290_v26  ;;  %v11118_v26 = vld [vmem:[%s23607_s0 + $0xe0] sm:$0xff] }
 0xa71   :  { %15249 = vmatprep.subr.bf16.mxu1 %v24291_v18  ;;  %v11117_v18 = vld [vmem:[%s23607_s0 + $0xd8] sm:$0xff] }
 0xa74   :  { %15251 = vmatpush1.bf16.msra.mxu1 %v24292_v17  ;;  %v24325_v17 = vld [vmem:[#allocation55_spill] sm:$0xff] }
 0xa75   :  { %15253 = vmatprep.subr.bf16.mxu1 %v24293_v55  ;;  %v24324_v55 = vld [vmem:[#allocation54_spill] sm:$0xff] }
 0xa78   :  { %15255 = vmatpush1.bf16.msra.mxu1 %v24294_v5  ;;  %v24323_v5 = vld [vmem:[#allocation53_spill] sm:$0xff] }
 0xa79   :  { %15257 = vmatprep.subr.bf16.mxu1 %v24295_v10  ;;  %v24321_v10 = vld [vmem:[#allocation51_spill] sm:$0xff] }
 0xa7c   :  { %15259 = vmatpush1.bf16.msra.mxu1 %v24296_v2  ;;  %v24320_v2 = vld [vmem:[#allocation50_spill] sm:$0xff] }
 0xa7d   :  { %15261 = vmatprep.subr.bf16.mxu1 %v24297_v19  ;;  %v24319_v19 = vld [vmem:[#allocation49_spill] sm:$0xff] }
 0xa80   :  { %15263 = vmatpush1.bf16.msra.mxu1 %v24298_v25  ;;  %v24318_v25 = vld [vmem:[#allocation48_spill] sm:$0xff] }
 0xa81   :  { %15265 = vmatprep.subr.bf16.mxu1 %v24299_v11  ;;  %v24317_v11 = vmov 0.0|0.0  }
 0xa84   :  { %15267 = vmatpush1.bf16.msra.mxu1 %v24300_v39  ;;  %v24316_v39 = vld [vmem:[#allocation47_spill] sm:$0xff] }
 0xa85   :  { %15269 = vmatprep.subr.bf16.mxu1 %v24301_v29  ;;  %v24315_v29 = vld [vmem:[#allocation46_spill] sm:$0xff] }
 0xa99   :  { %v3013_v1 = vpop.permute.xlu1 %3012 }
 0xa9a   :  { %11116 = vmatmul.mubr.msk.f32.vlgmr.msra.gmra.mrb[12].mxu0 %vm1395_vm2, %v3013_v1  ;;  %v24314_v1 = vld [vmem:[#allocation45_spill] sm:$0xff] }
 0xa9b   :  { %15135 = vmatpush3.bf16.msra.mxu0 %v24302_v16  ;;  %3299 = vmatprep.mubr.f32.mxu0 %v18627_v47  ;;  %v24313_v47 = vld [vmem:[#allocation44_spill] sm:$0xff] }
 0xa9c   :  { %15137 = vmatprep.subr.bf16.mxu0 %v24303_v41 }
 0xa9f   :  { %15139 = vmatpush3.bf16.msra.mxu0 %v24304_v54 }
 0xaa0   :  { %15141 = vmatprep.subr.bf16.mxu0 %v24305_v3 }
 0xaa3   :  { %15143 = vmatpush3.bf16.msra.mxu0 %v24306_v42 }
 0xaa4   :  { %15145 = vmatprep.subr.bf16.mxu0 %v24307_v27 }
 0xaa7   :  { %15147 = vmatpush3.bf16.msra.mxu0 %v24308_v49 }
 0xaa8   :  { %15149 = vmatprep.subr.bf16.mxu0 %v24309_v22 }
 0xaab   :  { %15151 = vmatpush3.bf16.msra.mxu0 %v24310_v31 }
 0xaac   :  { %15153 = vmatprep.subr.bf16.mxu0 %v24311_v57 }
 0xaaf   :  { %15155 = vmatpush3.bf16.msra.mxu0 %v24312_v24 }
 0xab0   :  { %15157 = vmatprep.subr.bf16.mxu0 %v24313_v47 }
 0xab3   :  { %15159 = vmatpush3.bf16.msra.mxu0 %v24314_v1 }
 0xab4   :  { %15161 = vmatprep.subr.bf16.mxu0 %v24315_v29 }
 0xab7   :  { %15163 = vmatpush3.bf16.msra.mxu0 %v24316_v39 }
 0xab8   :  { %15164 = vmatprep.subr.bf16.mxu0 %v24317_v11 }
 0xaba   :  { %3300 = vmatmul.mubr.f32.vlgmr.msra.gmra.mrb[28].mxu0 %v20491_v0  ;;  %v24322_v0 = vld [vmem:[#allocation52_spill] sm:$0xff] }
 0xabb   :  { %15166 = vmatpush3.bf16.msra.mxu0 %v24318_v25  ;;  %13021 = vmatprep.mubr.msk.f32.mxu0 %vm18754_vm0, %v24161_v61 }
 0xabc   :  { %15167 = vmatprep.subr.bf16.mxu0 %v24317_v11 }
 0xabf   :  { %15169 = vmatpush3.bf16.msra.mxu0 %v24319_v19 }
 0xac0   :  { %15170 = vmatprep.subr.bf16.mxu0 %v24317_v11 }
 0xac3   :  { %15172 = vmatpush3.bf16.msra.mxu0 %v24320_v2 }
 0xac4   :  { %15173 = vmatprep.subr.bf16.mxu0 %v24317_v11 }
 0xac7   :  { %15175 = vmatpush3.bf16.msra.mxu0 %v24321_v10 }
 0xac8   :  { %15176 = vmatprep.subr.bf16.mxu0 %v24317_v11 }
 0xacb   :  { %15178 = vmatpush3.bf16.msra.mxu0 %v24322_v0 }
 0xacc   :  { %15179 = vmatprep.subr.bf16.mxu0 %v24317_v11 }
 0xacf   :  { %15181 = vmatpush3.bf16.msra.mxu0 %v24323_v5 }
 0xad0   :  { %15182 = vmatprep.subr.bf16.mxu0 %v24317_v11 }
 0xad3   :  { %15184 = vmatpush3.bf16.msra.mxu0 %v24324_v55 }
 0xad4   :  { %15185 = vmatprep.subr.bf16.mxu0 %v24317_v11 }
 0xad7   :  { %15187 = vmatpush3.bf16.msra.mxu0 %v24325_v17 }
 0xada   :  { %13022 = vmatmul.mubr.f32.vlgmr.msra.gmra.mrb[30].mxu0 %v20493_v32  ;;  %v3382_v32 = vld [vmem:[%s23608_s2 + $0x308] sm:$0xff] }
 0xadb   :  { %3466 = vmatprep.mubr.f32.mxu0 %v24161_v61 }
 0xb1a   :  { %v3230_v23 = vpop.f32.mrb[24].mxu1 }
 0xb1b   :  { %v3375_v34 = vadd.f32 %v11117_v18, %v3230_v23  ;;  %v3232_v44 = vpop.f32.mrb[25].mxu1  ;;  %v3383_v23 = vld [vmem:[%s23608_s2 + $0x310] sm:$0xff]  ;;  %v3388_v18 = vld [vmem:[%s23608_s2 + $0x338] sm:$0xff] }
 0xb1c   :  { %v3376_v36 = vadd.f32 %v11118_v26, %v3232_v44  ;;  %v3381_v44 = vld [vmem:[%s23608_s2 + $0x300] sm:$0xff]  ;;  %v3386_v26 = vld [vmem:[%s23608_s2 + $0x328] sm:$0xff] }
 0xb1e   :  { %18630 = vtanh.f32 %v3376_v36  ;;  %v3384_v36 = vld [vmem:[%s23608_s2 + $0x318] sm:$0xff] }
 0xb1f   :  { %18632 = vtanh.f32 %v3375_v34  ;;  %v15188_v34 = vpack.c.bf16 %v3384_v36, %v3382_v32  ;;  %v3385_v32 = vld [vmem:[%s23608_s2 + $0x320] sm:$0xff]  ;;  %v3387_v36 = vld [vmem:[%s23608_s2 + $0x330] sm:$0xff] }
 0xb21   :  { %15189 = vmatprep.subr.bf16.mxu0 %v15188_v34  ;;  %v3394_v34 = vld [vmem:[%s23608_s2 + $0x368] sm:$0xff] }
 0xb28   :  { %v20591_v37 = vpop.eup %18630 }
 0xb29   :  { %v20593_v4 = vpop.eup %18632  ;;  %3543 = vmatprep.mubr.f32.mxu1 %v20591_v37 }
 0xb2a   :  { %3544 = vmatmul.mubr.f32.vlgmr.msra.gmra.mrb[26].mxu1 %v20593_v4 }
 0xb2b   :  { %15271 = vmatpush1.bf16.msra.mxu1 %v18889_v35  ;;  %3614 = vmatprep.mubr.f32.mxu1 %v24161_v61 }
 0xb2c   :  { %15273 = vmatprep.subr.bf16.mxu1 %v18904_v40 }
 0xb2f   :  { %15275 = vmatpush1.bf16.msra.mxu1 %v18920_v45 }
 0xb30   :  { %15277 = vmatprep.subr.bf16.mxu1 %v18934_v50 }
 0xb33   :  { %15279 = vmatpush1.bf16.msra.mxu1 %v18952_v56 }
 0xb34   :  { %15281 = vmatprep.subr.bf16.mxu1 %v18964_v60 }
 0xb37   :  { %15283 = vmatpush1.bf16.msra.mxu1 %v18991_v7 }
 0xb38   :  { %15285 = vmatprep.subr.bf16.mxu1 %v19000_v12  ;;  %v3390_v12 = vld [vmem:[%s23608_s2 + $0x348] sm:$0xff] }
 0xb3b   :  { %15287 = vmatpush1.bf16.msra.mxu1 %v24269_v38  ;;  %v15192_v38 = vpack.c.bf16 %v3388_v18, %v3386_v26  ;;  %v3389_v18 = vld [vmem:[%s23608_s2 + $0x340] sm:$0xff] }
 0xb3c   :  { %15289 = vmatprep.subr.bf16.mxu1 %v24270_v53  ;;  %v15190_v53 = vpack.c.bf16 %v3383_v23, %v3381_v44  ;;  %v3392_v44 = vld [vmem:[%s23608_s2 + $0x358] sm:$0xff]  ;;  %v15194_v23 = vpack.c.bf16 %v3387_v36, %v3385_v32  ;;  %v3393_v32 = vld [vmem:[%s23608_s2 + $0x360] sm:$0xff]  ;;  %v3395_v36 = vld [vmem:[%s23608_s2 + $0x370] sm:$0xff] }
 0xb3d   :  { %v15196_v26 = vpack.c.bf16 %v3392_v44, %v3390_v12  ;;  %v24326_v44 = vld [vmem:[#allocation22_spill] sm:$0xff] }
 0xb3e   :  { %15191 = vmatpush1.bf16.msra.mxu0 %v15190_v53  ;;  %v3396_v53 = vld [vmem:[%s23608_s2 + $0x378] sm:$0xff] }
 0xb3f   :  { %15291 = vmatpush1.bf16.msra.mxu1 %v24271_v43  ;;  %15193 = vmatprep.subr.bf16.mxu0 %v15192_v38  ;;  %v3391_v43 = vld [vmem:[%s23608_s2 + $0x350] sm:$0xff]  ;;  %v15200_v38 = vpack.c.bf16 %v3396_v53, %v3394_v34 }
 0xb40   :  { %15293 = vmatprep.subr.bf16.mxu1 %v24272_v46  ;;  %v15198_v12 = vpack.c.bf16 %v3391_v43, %v3389_v18  ;;  %v11119_v18 = vld [vmem:[%s23607_s0 + $0xe8] sm:$0xff] }
 0xb42   :  { %15195 = vmatpush1.bf16.msra.mxu0 %v15194_v23 }
 0xb43   :  { %15295 = vmatpush1.bf16.msra.mxu1 %v24273_v6  ;;  %15197 = vmatprep.subr.bf16.mxu0 %v15196_v26  ;;  %v15202_v6 = vpack.c.bf16 %v3395_v36, %v3393_v32 }
 0xb44   :  { %15297 = vmatprep.subr.bf16.mxu1 %v24274_v51 }
 0xb46   :  { %15199 = vmatpush1.bf16.msra.mxu0 %v15198_v12 }
 0xb47   :  { %15299 = vmatpush1.bf16.msra.mxu1 %v24275_v59  ;;  %15201 = vmatprep.subr.bf16.mxu0 %v15200_v38 }
 0xb48   :  { %15469 = vmatprep.subr.bf16.mxu1 %v24326_v44 }
 0xb4a   :  { %15203 = vmatpush1.bf16.msra.mxu0 %v15202_v6 }
 0xb4b   :  { %15301 = vmatprep.subr.bf16.mxu0 %v24326_v44 }
 0xb8d   :  { %v11649_v43 = vpop.f32.mrb[28].mxu0 }
 0xb8e   :  { %v11650_v23 = vpop.f32.mrb[29].mxu0 }
 0xb8f   :  { %v11651_v26 = vadd.f32 %v11650_v23, %v11649_v43  ;;  %v3770_v43 = vld [vmem:[%s23608_s2 + $0x398] sm:$0xff]  ;;  %v3767_v23 = vld [vmem:[%s23608_s2 + $0x380] sm:$0xff] }
 0xbad   :  { %v3371_v34 = vpop.f32.mrb[30].mxu0 }
 0xbae   :  { %v3372_v53 = vadd.f32 %v11651_v26, %v3371_v34  ;;  %v13023_v51 = vpop.f32.mrb[31].mxu0  ;;  %v3772_v34 = vld [vmem:[%s23608_s2 + $0x3a8] sm:$0xff] }
 0xbaf   :  { %v11122_v51 = vld [vmem:[%s23607_s0 + $0xf8] sm:$0xff] }
 0xbb0   :  { %v3377_v46 = vadd.f32 %v11119_v18, %v3372_v53  ;;  %v3769_v18 = vld [vmem:[%s23608_s2 + $0x390] sm:$0xff]  ;;  %v3774_v53 = vld [vmem:[%s23608_s2 + $0x3b8] sm:$0xff] }
 0xbb2   :  { %18634 = vtanh.f32 %v3377_v46  ;;  %v11121_v46 = vld [vmem:[%s23607_s0 + $0xf0] sm:$0xff] }
 0xbbc   :  { %v18635_v59 = vpop.eup %18634 }
 0xbbd   :  { %3398 = vrot.lane.b32.xlu0 %v18635_v59, %s18755_s13  ;;  %3615 = vmatmul.mubr.f32.vlgmr.msra.gmra.mrb[26].mxu1 %v18635_v59 }
 0xbbe   :  { %15471 = vmatpush3.bf16.msra.mxu1 %v24302_v16 }
 0xbbf   :  { %15473 = vmatprep.subr.bf16.mxu1 %v24303_v41 }
 0xbc2   :  { %15475 = vmatpush3.bf16.msra.mxu1 %v24304_v54 }
 0xbc3   :  { %15477 = vmatprep.subr.bf16.mxu1 %v24305_v3 }
 0xbc6   :  { %15479 = vmatpush3.bf16.msra.mxu1 %v24306_v42 }
 0xbc7   :  { %15481 = vmatprep.subr.bf16.mxu1 %v24307_v27 }
 0xbca   :  { %15483 = vmatpush3.bf16.msra.mxu1 %v24308_v49 }
 0xbcb   :  { %15485 = vmatprep.subr.bf16.mxu1 %v24309_v22 }
 0xbce   :  { %15487 = vmatpush3.bf16.msra.mxu1 %v24310_v31 }
 0xbcf   :  { %15489 = vmatprep.subr.bf16.mxu1 %v24311_v57 }
 0xbd2   :  { %15491 = vmatpush3.bf16.msra.mxu1 %v24312_v24 }
 0xbd3   :  { %15493 = vmatprep.subr.bf16.mxu1 %v24313_v47 }
 0xbd6   :  { %15495 = vmatpush3.bf16.msra.mxu1 %v24314_v1 }
 0xbd7   :  { %15497 = vmatprep.subr.bf16.mxu1 %v24315_v29 }
 0xbda   :  { %15499 = vmatpush3.bf16.msra.mxu1 %v24316_v39 }
 0xbdb   :  { %15500 = vmatprep.subr.bf16.mxu1 %v24317_v11 }
 0xc2f   :  { %v3399_v6 = vpop.permute.xlu0 %3398 }
 0xc30   :  { %11120 = vmatmul.mubr.msk.f32.vlgmr.msra.gmra.mrb[12].mxu0 %vm1395_vm2, %v3399_v6  ;;  %v15358_v6 = vpack.c.bf16 %v3769_v18, %v3767_v23  ;;  %v3777_v23 = vld [vmem:[%s23608_s2 + $0x3d0] sm:$0xff]  ;;  %v3782_v18 = vld [vmem:[%s23608_s2 + $0x3f8] sm:$0xff] }
 0xc31   :  { %15303 = vmatpush3.bf16.msra.mxu0 %v24302_v16  ;;  %3685 = vmatprep.mubr.f32.mxu0 %v20591_v37 }
 0xc32   :  { %15305 = vmatprep.subr.bf16.mxu0 %v24303_v41 }
 0xc35   :  { %15307 = vmatpush3.bf16.msra.mxu0 %v24304_v54 }
 0xc36   :  { %15309 = vmatprep.subr.bf16.mxu0 %v24305_v3 }
 0xc39   :  { %15311 = vmatpush3.bf16.msra.mxu0 %v24306_v42 }
 0xc3a   :  { %15313 = vmatprep.subr.bf16.mxu0 %v24307_v27 }
 0xc3d   :  { %15315 = vmatpush3.bf16.msra.mxu0 %v24308_v49 }
 0xc3e   :  { %15317 = vmatprep.subr.bf16.mxu0 %v24309_v22 }
 0xc41   :  { %15319 = vmatpush3.bf16.msra.mxu0 %v24310_v31 }
 0xc42   :  { %15321 = vmatprep.subr.bf16.mxu0 %v24311_v57 }
 0xc45   :  { %15323 = vmatpush3.bf16.msra.mxu0 %v24312_v24 }
 0xc46   :  { %15325 = vmatprep.subr.bf16.mxu0 %v24313_v47 }
 0xc49   :  { %15327 = vmatpush3.bf16.msra.mxu0 %v24314_v1 }
 0xc4a   :  { %15329 = vmatprep.subr.bf16.mxu0 %v24315_v29 }
 0xc4d   :  { %15331 = vmatpush3.bf16.msra.mxu0 %v24316_v39 }
 0xc4e   :  { %15332 = vmatprep.subr.bf16.mxu0 %v24317_v11 }
 0xc50   :  { %3686 = vmatmul.mubr.f32.vlgmr.msra.gmra.mrb[32].mxu0 %v20593_v4 }
 0xc51   :  { %15334 = vmatpush3.bf16.msra.mxu0 %v24318_v25  ;;  %13056 = vmatprep.mubr.msk.f32.mxu0 %vm18754_vm0, %v24161_v61 }
 0xc52   :  { %15335 = vmatprep.subr.bf16.mxu0 %v24317_v11 }
 0xc55   :  { %15337 = vmatpush3.bf16.msra.mxu0 %v24319_v19 }
 0xc56   :  { %15338 = vmatprep.subr.bf16.mxu0 %v24317_v11 }
 0xc59   :  { %15340 = vmatpush3.bf16.msra.mxu0 %v24320_v2 }
 0xc5a   :  { %15341 = vmatprep.subr.bf16.mxu0 %v24317_v11 }
 0xc5d   :  { %15343 = vmatpush3.bf16.msra.mxu0 %v24321_v10 }
 0xc5e   :  { %15344 = vmatprep.subr.bf16.mxu0 %v24317_v11 }
 0xc61   :  { %15346 = vmatpush3.bf16.msra.mxu0 %v24322_v0 }
 0xc62   :  { %15347 = vmatprep.subr.bf16.mxu0 %v24317_v11 }
 0xc65   :  { %15349 = vmatpush3.bf16.msra.mxu0 %v24323_v5 }
 0xc66   :  { %15350 = vmatprep.subr.bf16.mxu0 %v24317_v11 }
 0xc69   :  { %15352 = vmatpush3.bf16.msra.mxu0 %v24324_v55 }
 0xc6a   :  { %15353 = vmatprep.subr.bf16.mxu0 %v24317_v11 }
 0xc6d   :  { %15355 = vmatpush3.bf16.msra.mxu0 %v24325_v17 }
 0xc70   :  { %13057 = vmatmul.mubr.f32.vlgmr.msra.gmra.mrb[34].mxu0 %v18635_v59  ;;  %v3768_v59 = vld [vmem:[%s23608_s2 + $0x388] sm:$0xff] }
 0xc71   :  { %3852 = vmatprep.mubr.f32.mxu0 %v24161_v61  ;;  %v15356_v26 = vpack.c.bf16 %v3770_v43, %v3768_v59  ;;  %v3775_v43 = vld [vmem:[%s23608_s2 + $0x3c0] sm:$0xff] }
 0xc73   :  { %15357 = vmatprep.subr.bf16.mxu0 %v15356_v26  ;;  %v3780_v26 = vld [vmem:[%s23608_s2 + $0x3e8] sm:$0xff] }
 0xc74   :  { %15359 = vmatpush1.bf16.msra.mxu0 %v15358_v6  ;;  %v3779_v6 = vld [vmem:[%s23608_s2 + $0x3e0] sm:$0xff] }
 0xc90   :  { %v3616_v4 = vpop.f32.mrb[26].mxu1 }
 0xc91   :  { %v3761_v37 = vadd.f32 %v11121_v46, %v3616_v4  ;;  %v3618_v12 = vpop.f32.mrb[27].mxu1  ;;  %v15360_v46 = vpack.c.bf16 %v3774_v53, %v3772_v34  ;;  %v3773_v4 = vld [vmem:[%s23608_s2 + $0x3b0] sm:$0xff]  ;;  %v15366_v34 = vpack.c.bf16 %v3777_v23, %v3775_v43  ;;  %v15368_v53 = vpack.c.bf16 %v3782_v18, %v3780_v26 }
 0xc92   :  { %v3762_v38 = vadd.f32 %v11122_v51, %v3618_v12  ;;  %v3771_v51 = vld [vmem:[%s23608_s2 + $0x3a0] sm:$0xff]  ;;  %v3778_v12 = vld [vmem:[%s23608_s2 + $0x3d8] sm:$0xff] }
 0xc93   :  { %15361 = vmatprep.subr.bf16.mxu0 %v15360_v46  ;;  %v3781_v46 = vld [vmem:[%s23608_s2 + $0x3f0] sm:$0xff] }
 0xc94   :  { %18636 = vtanh.f32 %v3762_v38  ;;  %v15362_v38 = vpack.c.bf16 %v3773_v4, %v3771_v51  ;;  %v15370_v51 = vpack.c.bf16 %v3781_v46, %v3779_v6 }
 0xc95   :  { %18638 = vtanh.f32 %v3761_v37  ;;  %v3776_v37 = vld [vmem:[%s23608_s2 + $0x3c8] sm:$0xff] }
 0xc96   :  { %v15364_v59 = vpack.c.bf16 %v3778_v12, %v3776_v37  ;;  %15363 = vmatpush1.bf16.msra.mxu0 %v15362_v38  ;;  %v11123_v38 = vld [vmem:[%s23607_s0 + $0x100] sm:$0xff] }
 0xc98   :  { %15365 = vmatprep.subr.bf16.mxu0 %v15364_v59 }
 0xc9a   :  { %15367 = vmatpush1.bf16.msra.mxu0 %v15366_v34  ;;  %v24327_v34 = vld [vmem:[#allocation9_spill] sm:$0xff] }
 0xc9b   :  { %15369 = vmatprep.subr.bf16.mxu0 %v15368_v53  ;;  %v24328_v53 = vld [vmem:[#allocation11_spill] sm:$0xff] }
 0xc9e   :  { %v20726_v32 = vpop.eup %18636  ;;  %15371 = vmatpush1.bf16.msra.mxu0 %v15370_v51  ;;  %v24329_v51 = vld [vmem:[#allocation13_spill] sm:$0xff] }
 0xc9f   :  { %v20728_v36 = vpop.eup %18638  ;;  %4071 = vmatprep.mubr.f32.mxu1 %v20726_v32  ;;  %15373 = vmatprep.subr.bf16.mxu0 %v24283_v30 }
 0xca0   :  { %4072 = vmatmul.mubr.f32.vlgmr.msra.gmra.mrb[28].mxu1 %v20728_v36 }
 0xca1   :  { %15502 = vmatpush3.bf16.msra.mxu1 %v24318_v25  ;;  %13091 = vmatprep.mubr.msk.f32.mxu1 %vm18754_vm0, %v24161_v61 }
 0xca2   :  { %15503 = vmatprep.subr.bf16.mxu1 %v24317_v11 }
 0xca5   :  { %15505 = vmatpush3.bf16.msra.mxu1 %v24319_v19 }
 0xca6   :  { %15506 = vmatprep.subr.bf16.mxu1 %v24317_v11 }
 0xca9   :  { %15508 = vmatpush3.bf16.msra.mxu1 %v24320_v2 }
 0xcaa   :  { %15509 = vmatprep.subr.bf16.mxu1 %v24317_v11 }
 0xcad   :  { %15511 = vmatpush3.bf16.msra.mxu1 %v24321_v10  ;;  %v24344_v10 = vld [vmem:[#allocation3_spill] sm:$0xff] }
 0xcae   :  { %15512 = vmatprep.subr.bf16.mxu1 %v24317_v11 }
 0xcb1   :  { %15514 = vmatpush3.bf16.msra.mxu1 %v24322_v0  ;;  %v24343_v0 = vld [vmem:[#allocation41_spill] sm:$0xff] }
 0xcb2   :  { %15515 = vmatprep.subr.bf16.mxu1 %v24317_v11 }
 0xcb5   :  { %15517 = vmatpush3.bf16.msra.mxu1 %v24323_v5  ;;  %v24342_v5 = vld [vmem:[#allocation39_spill] sm:$0xff] }
 0xcb6   :  { %15518 = vmatprep.subr.bf16.mxu1 %v24317_v11 }
 0xcb9   :  { %15520 = vmatpush3.bf16.msra.mxu1 %v24324_v55  ;;  %v24341_v55 = vld [vmem:[#allocation37_spill] sm:$0xff] }
 0xcba   :  { %15521 = vmatprep.subr.bf16.mxu1 %v24317_v11 }
 0xcbd   :  { %15523 = vmatpush3.bf16.msra.mxu1 %v24325_v17  ;;  %v24338_v17 = vld [vmem:[#allocation31_spill] sm:$0xff] }
 0xcbe   :  { %15541 = vmatprep.subr.bf16.mxu1 %v24283_v30  ;;  %v24337_v30 = vld [vmem:[#allocation29_spill] sm:$0xff] }
 0xd23   :  { %v11701_v4 = vpop.f32.mrb[32].mxu0 }
 0xd24   :  { %v11702_v37 = vpop.f32.mrb[33].mxu0 }
 0xd25   :  { %v11703_v12 = vadd.f32 %v11702_v37, %v11701_v4  ;;  %v24330_v37 = vld [vmem:[#allocation15_spill] sm:$0xff] }
 0xd43   :  { %v3757_v59 = vpop.f32.mrb[34].mxu0 }
 0xd44   :  { %v3758_v43 = vadd.f32 %v11703_v12, %v3757_v59  ;;  %v13058_v23 = vpop.f32.mrb[35].mxu0  ;;  %v24331_v12 = vld [vmem:[#allocation17_spill] sm:$0xff] }
 0xd45   :  { %v24333_v59 = vld [vmem:[#allocation21_spill] sm:$0xff] }
 0xd46   :  { %v3763_v26 = vadd.f32 %v11123_v38, %v3758_v43  ;;  %v24332_v38 = vld [vmem:[#allocation19_spill] sm:$0xff]  ;;  %v24335_v23 = vld [vmem:[#allocation25_spill] sm:$0xff] }
 0xd47   :  { %v24334_v43 = vld [vmem:[#allocation23_spill] sm:$0xff] }
 0xd48   :  { %18640 = vtanh.f32 %v3763_v26  ;;  %v24336_v26 = vld [vmem:[#allocation27_spill] sm:$0xff] }
 0xd52   :  { %v20802_v18 = vpop.eup %18640 }
 0xd53   :  { %3784 = vrot.lane.b32.xlu1 %v20802_v18, %s18755_s13  ;;  %13092 = vmatmul.mubr.f32.vlgmr.msra.gmra.mrb[30].mxu1 %v20802_v18 }
 0xd54   :  { %15543 = vmatpush1.bf16.msra.mxu1 %v18810_v8 }
 0xd55   :  { %15545 = vmatprep.subr.bf16.mxu1 %v18812_v9 }
 0xd58   :  { %15547 = vmatpush1.bf16.msra.mxu1 %v18828_v14 }
 0xd59   :  { %15549 = vmatprep.subr.bf16.mxu1 %v18831_v15 }
 0xd5c   :  { %15551 = vmatpush1.bf16.msra.mxu1 %v18846_v20 }
 0xd5d   :  { %15553 = vmatprep.subr.bf16.mxu1 %v18849_v21 }
 0xd60   :  { %15555 = vmatpush1.bf16.msra.mxu1 %v18870_v28 }
 0xd61   :  { %15557 = vmatprep.subr.bf16.mxu1 %v18884_v33 }
 0xd64   :  { %15559 = vmatpush1.bf16.msra.mxu1 %v24192_v52 }
 0xd65   :  { %15561 = vmatprep.subr.bf16.mxu1 %v18929_v48 }
 0xd68   :  { %15563 = vmatpush1.bf16.msra.mxu1 %v18958_v58 }
 0xd69   :  { %15565 = vmatprep.subr.bf16.mxu1 %v18973_v63 }
 0xd6c   :  { %15567 = vmatpush1.bf16.msra.mxu1 %v24193_v62 }
 0xd6d   :  { %15569 = vmatprep.subr.bf16.mxu1 %v24250_v13 }
 0xd70   :  { %15571 = vmatpush1.bf16.msra.mxu1 %v24327_v34 }
 0xd71   :  { %15573 = vmatprep.subr.bf16.mxu1 %v24328_v53 }
 0xd73   :  { %v11753_v6 = vpop.f32.mrb[28].mxu1 }
 0xd74   :  { %v11754_v46 = vpop.f32.mrb[29].mxu1  ;;  %15575 = vmatpush1.bf16.msra.mxu1 %v24329_v51 }
 0xd75   :  { %v20824_v4 = vadd.f32 %v11754_v46, %v11753_v6  ;;  %15577 = vmatprep.subr.bf16.mxu1 %v24330_v37  ;;  %v24339_v6 = vld [vmem:[#allocation33_spill] sm:$0xff]  ;;  %v24340_v46 = vld [vmem:[#allocation35_spill] sm:$0xff] }
 0xd78   :  { %15579 = vmatpush1.bf16.msra.mxu1 %v24331_v12 }
 0xd79   :  { %15581 = vmatprep.subr.bf16.mxu1 %v24332_v38 }
 0xd7c   :  { %15583 = vmatpush1.bf16.msra.mxu1 %v24333_v59 }
 0xd7d   :  { %15585 = vmatprep.subr.bf16.mxu1 %v24334_v43 }
 0xd80   :  { %15587 = vmatpush1.bf16.msra.mxu1 %v24335_v23 }
 0xd81   :  { %15589 = vmatprep.subr.bf16.mxu1 %v24336_v26 }
 0xd84   :  { %15591 = vmatpush1.bf16.msra.mxu1 %v24337_v30 }
 0xd85   :  { %15593 = vmatprep.subr.bf16.mxu1 %v24338_v17 }
 0xd88   :  { %15595 = vmatpush1.bf16.msra.mxu1 %v24339_v6 }
 0xd89   :  { %15597 = vmatprep.subr.bf16.mxu1 %v24340_v46 }
 0xd8c   :  { %15599 = vmatpush1.bf16.msra.mxu1 %v24341_v55 }
 0xd8d   :  { %15601 = vmatprep.subr.bf16.mxu1 %v24342_v5 }
 0xd90   :  { %15603 = vmatpush1.bf16.msra.mxu1 %v24343_v0 }
 0xd91   :  { %15605 = vmatprep.subr.bf16.mxu1 %v24344_v10 }
 0xdc5   :  { %v3785_v2 = vpop.permute.xlu1 %3784 }
 0xdc6   :  { %11124 = vmatmul.mubr.msk.f32.vlgmr.msra.gmra.mrb[12].mxu0 %vm1395_vm2, %v3785_v2  ;;  %v24345_v2 = vld [vmem:[#allocation6_spill] sm:$0xff] }
 0xdc7   :  { %15375 = vmatpush1.bf16.msra.mxu0 %v18810_v8  ;;  %3929 = vmatprep.mubr.f32.mxu0 %v20726_v32  ;;  %v24346_v32 = vld [vmem:[#allocation8_spill] sm:$0xff] }
 0xdc8   :  { %15377 = vmatprep.subr.bf16.mxu0 %v18812_v9 }
 0xdcb   :  { %15379 = vmatpush1.bf16.msra.mxu0 %v18828_v14 }
 0xdcc   :  { %15381 = vmatprep.subr.bf16.mxu0 %v18831_v15 }
 0xdcf   :  { %15383 = vmatpush1.bf16.msra.mxu0 %v18846_v20 }
 0xdd0   :  { %15385 = vmatprep.subr.bf16.mxu0 %v18849_v21 }
 0xdd3   :  { %15387 = vmatpush1.bf16.msra.mxu0 %v18870_v28 }
 0xdd4   :  { %15389 = vmatprep.subr.bf16.mxu0 %v18884_v33 }
 0xdd7   :  { %15391 = vmatpush1.bf16.msra.mxu0 %v24192_v52 }
 0xdd8   :  { %15393 = vmatprep.subr.bf16.mxu0 %v18929_v48 }
 0xddb   :  { %15395 = vmatpush1.bf16.msra.mxu0 %v18958_v58 }
 0xddc   :  { %15397 = vmatprep.subr.bf16.mxu0 %v18973_v63 }
 0xddf   :  { %15399 = vmatpush1.bf16.msra.mxu0 %v24193_v62 }
 0xde0   :  { %15401 = vmatprep.subr.bf16.mxu0 %v24250_v13 }
 0xde3   :  { %15403 = vmatpush1.bf16.msra.mxu0 %v24327_v34  ;;  %v4161_v34 = vld [vmem:[%s23608_s2 + $0x440] sm:$0xff] }
 0xde4   :  { %15405 = vmatprep.subr.bf16.mxu0 %v24328_v53 }
 0xde7   :  { %15407 = vmatpush1.bf16.msra.mxu0 %v24329_v51  ;;  %v4164_v51 = vld [vmem:[%s23608_s2 + $0x458] sm:$0xff] }
 0xde8   :  { %15409 = vmatprep.subr.bf16.mxu0 %v24330_v37  ;;  %v4162_v37 = vld [vmem:[%s23608_s2 + $0x448] sm:$0xff] }
 0xde9   :  { %v15532_v53 = vpack.c.bf16 %v4164_v51, %v4162_v37 }
 0xdeb   :  { %15411 = vmatpush1.bf16.msra.mxu0 %v24331_v12  ;;  %v4159_v12 = vld [vmem:[%s23608_s2 + $0x430] sm:$0xff] }
 0xdec   :  { %15413 = vmatprep.subr.bf16.mxu0 %v24332_v38 }
 0xdef   :  { %15415 = vmatpush1.bf16.msra.mxu0 %v24333_v59  ;;  %v24352_v59 = vld [vmem:[#allocation20_spill] sm:$0xff] }
 0xdf0   :  { %15417 = vmatprep.subr.bf16.mxu0 %v24334_v43  ;;  %v4160_v43 = vld [vmem:[%s23608_s2 + $0x438] sm:$0xff] }
 0xdf3   :  { %15419 = vmatpush1.bf16.msra.mxu0 %v24335_v23  ;;  %v4158_v23 = vld [vmem:[%s23608_s2 + $0x428] sm:$0xff] }
 0xdf4   :  { %15421 = vmatprep.subr.bf16.mxu0 %v24336_v26  ;;  %v4155_v26 = vld [vmem:[%s23608_s2 + $0x410] sm:$0xff] }
 0xdf7   :  { %15423 = vmatpush1.bf16.msra.mxu0 %v24337_v30  ;;  %v4153_v30 = vld [vmem:[%s23608_s2 + $0x400] sm:$0xff] }
 0xdf8   :  { %15425 = vmatprep.subr.bf16.mxu0 %v24338_v17  ;;  %v15526_v38 = vpack.c.bf16 %v4155_v26, %v4153_v30 }
 0xdfb   :  { %15427 = vmatpush1.bf16.msra.mxu0 %v24339_v6  ;;  %v24351_v6 = vld [vmem:[#allocation18_spill] sm:$0xff] }
 0xdfc   :  { %15429 = vmatprep.subr.bf16.mxu0 %v24340_v46  ;;  %v24350_v46 = vld [vmem:[#allocation16_spill] sm:$0xff] }
 0xdff   :  { %15431 = vmatpush1.bf16.msra.mxu0 %v24341_v55  ;;  %v4156_v55 = vld [vmem:[%s23608_s2 + $0x418] sm:$0xff] }
 0xe00   :  { %15433 = vmatprep.subr.bf16.mxu0 %v24342_v5  ;;  %v4154_v5 = vld [vmem:[%s23608_s2 + $0x408] sm:$0xff] }
 0xe01   :  { %v15524_v17 = vpack.c.bf16 %v4156_v55, %v4154_v5  ;;  %v15528_v5 = vpack.c.bf16 %v4160_v43, %v4158_v23  ;;  %v4157_v55 = vld [vmem:[%s23608_s2 + $0x420] sm:$0xff] }
 0xe02   :  { %v15530_v26 = vpack.c.bf16 %v4159_v12, %v4157_v55  ;;  %v4168_v12 = vld [vmem:[%s23608_s2 + $0x478] sm:$0xff] }
 0xe03   :  { %15435 = vmatpush1.bf16.msra.mxu0 %v24343_v0  ;;  %v24349_v0 = vld [vmem:[#allocation14_spill] sm:$0xff] }
 0xe04   :  { %15437 = vmatprep.subr.bf16.mxu0 %v24344_v10  ;;  %v24348_v10 = vld [vmem:[#allocation12_spill] sm:$0xff] }
 0xe06   :  { %3930 = vmatmul.mubr.f32.vlgmr.msra.gmra.mrb[36].mxu0 %v20728_v36  ;;  %v24347_v36 = vld [vmem:[#allocation10_spill] sm:$0xff] }
 0xe07   :  { %15439 = vmatpush1.bf16.msra.mxu0 %v18889_v35  ;;  %4000 = vmatprep.mubr.f32.mxu0 %v24161_v61 }
 0xe08   :  { %15441 = vmatprep.subr.bf16.mxu0 %v18904_v40 }
 0xe0b   :  { %15443 = vmatpush1.bf16.msra.mxu0 %v18920_v45 }
 0xe0c   :  { %15445 = vmatprep.subr.bf16.mxu0 %v18934_v50 }
 0xe0f   :  { %15447 = vmatpush1.bf16.msra.mxu0 %v18952_v56 }
 0xe10   :  { %15449 = vmatprep.subr.bf16.mxu0 %v18964_v60 }
 0xe13   :  { %15451 = vmatpush1.bf16.msra.mxu0 %v18991_v7 }
 0xe14   :  { %15453 = vmatprep.subr.bf16.mxu0 %v24345_v2 }
 0xe17   :  { %15455 = vmatpush1.bf16.msra.mxu0 %v24346_v32 }
 0xe18   :  { %15457 = vmatprep.subr.bf16.mxu0 %v24347_v36 }
 0xe1b   :  { %15459 = vmatpush1.bf16.msra.mxu0 %v24348_v10 }
 0xe1c   :  { %15461 = vmatprep.subr.bf16.mxu0 %v24349_v0 }
 0xe1f   :  { %15463 = vmatpush1.bf16.msra.mxu0 %v24350_v46 }
 0xe20   :  { %15465 = vmatprep.subr.bf16.mxu0 %v24351_v6 }
 0xe23   :  { %15467 = vmatpush1.bf16.msra.mxu0 %v24352_v59 }
 0xe24   :  { %15525 = vmatprep.subr.bf16.mxu0 %v15524_v17  ;;  %v11127_v17 = vld [vmem:[%s23607_s0 + $0x118] sm:$0xff] }
 0xe26   :  { %4001 = vmatmul.mubr.f32.vlgmr.msra.gmra.mrb[36].mxu0 %v20802_v18  ;;  %v4143_v30 = vpop.f32.mrb[30].mxu1  ;;  %v4163_v18 = vld [vmem:[%s23608_s2 + $0x450] sm:$0xff] }
 0xe27   :  { %v4144_v43 = vadd.f32 %v20824_v4, %v4143_v30  ;;  %v13093_v23 = vpop.f32.mrb[31].mxu1  ;;  %15527 = vmatpush1.bf16.msra.mxu0 %v15526_v38  ;;  %4238 = vmatprep.mubr.f32.mxu0 %v24161_v61  ;;  %v4166_v4 = vld [vmem:[%s23608_s2 + $0x468] sm:$0xff]  ;;  %v15534_v51 = vpack.c.bf16 %v4163_v18, %v4161_v34  ;;  %v4165_v38 = vld [vmem:[%s23608_s2 + $0x460] sm:$0xff] }
 0xe28   :  { %15529 = vmatprep.subr.bf16.mxu0 %v15528_v5  ;;  %v15536_v37 = vpack.c.bf16 %v4168_v12, %v4166_v4  ;;  %v4167_v5 = vld [vmem:[%s23608_s2 + $0x470] sm:$0xff]  ;;  %v11125_v34 = vld [vmem:[%s23607_s0 + $0x108] sm:$0xff]  ;;  %v24353_v12 = vld [vmem:[#allocation50_spill] sm:$0xff] }
 0xe29   :  { %v4149_v13 = vadd.f32 %v11127_v17, %v4144_v43  ;;  %v15538_v55 = vpack.c.bf16 %v4167_v5, %v4165_v38  ;;  %v24356_v38 = vld [vmem:[#allocation53_spill] sm:$0xff]  ;;  %v24357_v5 = vld [vmem:[#allocation54_spill] sm:$0xff] }
 0xe2b   :  { %18642 = vtanh.f32 %v4149_v13  ;;  %15531 = vmatpush1.bf16.msra.mxu0 %v15530_v26 }
 0xe2c   :  { %15533 = vmatprep.subr.bf16.mxu0 %v15532_v53  ;;  %v11126_v53 = vld [vmem:[%s23607_s0 + $0x110] sm:$0xff] }
 0xe2f   :  { %15535 = vmatpush1.bf16.msra.mxu0 %v15534_v51  ;;  %v24354_v51 = vld [vmem:[#allocation51_spill] sm:$0xff] }
 0xe30   :  { %15537 = vmatprep.subr.bf16.mxu0 %v15536_v37  ;;  %v24355_v37 = vld [vmem:[#allocation52_spill] sm:$0xff] }
 0xe33   :  { %15539 = vmatpush1.bf16.msra.mxu0 %v15538_v55  ;;  %v24358_v55 = vld [vmem:[#allocation55_spill] sm:$0xff] }
 0xe34   :  { %15637 = vmatprep.subr.bf16.mxu0 %v24326_v44 }
 0xe35   :  { %v20947_v17 = vpop.eup %18642 }
 0xe36   :  { %4170 = vrot.lane.b32.xlu0 %v20947_v17, %s18755_s13 }
 0xea8   :  { %v4171_v13 = vpop.permute.xlu0 %4170 }
 0xea9   :  { %11128 = vmatmul.mubr.msk.f32.vlgmr.msra.gmra.mrb[12].mxu0 %vm1395_vm2, %v4171_v13  ;;  %v24359_v13 = vld [vmem:[#allocation2_spill] sm:$0xff] }
 0xeaa   :  { %15639 = vmatpush3.bf16.msra.mxu0 %v24302_v16 }
 0xeab   :  { %15641 = vmatprep.subr.bf16.mxu0 %v24303_v41 }
 0xeae   :  { %15643 = vmatpush3.bf16.msra.mxu0 %v24304_v54  ;;  %v4554_v54 = vld [vmem:[%s23608_s2 + $0x4f8] sm:$0xff] }
 0xeaf   :  { %15645 = vmatprep.subr.bf16.mxu0 %v24305_v3  ;;  %v4550_v3 = vld [vmem:[%s23608_s2 + $0x4d8] sm:$0xff] }
 0xeb2   :  { %15647 = vmatpush3.bf16.msra.mxu0 %v24306_v42  ;;  %v4543_v42 = vld [vmem:[%s23608_s2 + $0x4a0] sm:$0xff] }
 0xeb3   :  { %15649 = vmatprep.subr.bf16.mxu0 %v24307_v27 }
 0xeb6   :  { %15651 = vmatpush3.bf16.msra.mxu0 %v24308_v49 }
 0xeb7   :  { %15653 = vmatprep.subr.bf16.mxu0 %v24309_v22  ;;  %v4546_v22 = vld [vmem:[%s23608_s2 + $0x4b8] sm:$0xff] }
 0xeba   :  { %15655 = vmatpush3.bf16.msra.mxu0 %v24310_v31  ;;  %v4544_v31 = vld [vmem:[%s23608_s2 + $0x4a8] sm:$0xff] }
 0xebb   :  { %15657 = vmatprep.subr.bf16.mxu0 %v24311_v57  ;;  %v4541_v57 = vld [vmem:[%s23608_s2 + $0x490] sm:$0xff]  ;;  %v15696_v27 = vpack.c.bf16 %v4546_v22, %v4544_v31  ;;  %v4547_v31 = vld [vmem:[%s23608_s2 + $0x4c0] sm:$0xff] }
 0xebe   :  { %15659 = vmatpush3.bf16.msra.mxu0 %v24312_v24 }
 0xebf   :  { %15661 = vmatprep.subr.bf16.mxu0 %v24313_v47  ;;  %v4539_v47 = vld [vmem:[%s23608_s2 + $0x480] sm:$0xff] }
 0xec0   :  { %v15694_v49 = vpack.c.bf16 %v4541_v57, %v4539_v47  ;;  %v4549_v47 = vld [vmem:[%s23608_s2 + $0x4d0] sm:$0xff] }
 0xec2   :  { %15663 = vmatpush3.bf16.msra.mxu0 %v24314_v1  ;;  %v4542_v1 = vld [vmem:[%s23608_s2 + $0x498] sm:$0xff] }
 0xec3   :  { %15665 = vmatprep.subr.bf16.mxu0 %v24315_v29  ;;  %v4540_v29 = vld [vmem:[%s23608_s2 + $0x488] sm:$0xff] }
 0xec4   :  { %v15692_v24 = vpack.c.bf16 %v4542_v1, %v4540_v29  ;;  %v4545_v29 = vld [vmem:[%s23608_s2 + $0x4b0] sm:$0xff]  ;;  %v4548_v1 = vld [vmem:[%s23608_s2 + $0x4c8] sm:$0xff] }
 0xec5   :  { %v15698_v57 = vpack.c.bf16 %v4545_v29, %v4543_v42  ;;  %v15700_v22 = vpack.c.bf16 %v4550_v3, %v4548_v1  ;;  %v15702_v42 = vpack.c.bf16 %v4549_v47, %v4547_v31  ;;  %v11131_v47 = vld [vmem:[%s23607_s0 + $0x130] sm:$0xff] }
 0xec6   :  { %15667 = vmatpush3.bf16.msra.mxu0 %v24316_v39  ;;  %v24378_v39 = vld [vmem:[#allocation3_spill] sm:$0xff] }
 0xec7   :  { %15668 = vmatprep.subr.bf16.mxu0 %v24317_v11 }
 0xef9   :  { %v4002_v30 = vpop.f32.mrb[36].mxu0 }
 0xefa   :  { %v4147_v43 = vadd.f32 %v11125_v34, %v4002_v30  ;;  %v4004_v23 = vpop.f32.mrb[37].mxu0  ;;  %v24361_v34 = vld [vmem:[#allocation9_spill] sm:$0xff] }
 0xefb   :  { %v4148_v26 = vadd.f32 %v11126_v53, %v4004_v23  ;;  %v24362_v53 = vld [vmem:[#allocation11_spill] sm:$0xff]  ;;  %v24363_v30 = vld [vmem:[#allocation13_spill] sm:$0xff] }
 0xefc   :  { %v24365_v23 = vld [vmem:[#allocation17_spill] sm:$0xff] }
 0xefd   :  { %18644 = vtanh.f32 %v4148_v26  ;;  %v24366_v26 = vld [vmem:[#allocation19_spill] sm:$0xff] }
 0xefe   :  { %18646 = vtanh.f32 %v4147_v43  ;;  %v24364_v43 = vld [vmem:[#allocation15_spill] sm:$0xff] }
 0xf07   :  { %v18645_v18 = vpop.eup %18644 }
 0xf08   :  { %v18647_v4 = vpop.eup %18646  ;;  %4315 = vmatprep.mubr.f32.mxu1 %v18645_v18  ;;  %4457 = vmatprep.mubr.f32.mxu0 %v18645_v18  ;;  %v24367_v18 = vld [vmem:[#allocation21_spill] sm:$0xff] }
 0xf09   :  { %4316 = vmatmul.mubr.f32.vlgmr.msra.gmra.mrb[32].mxu1 %v18647_v4  ;;  %4458 = vmatmul.mubr.f32.vlgmr.msra.gmra.mrb[38].mxu0 %v18647_v4  ;;  %v24368_v4 = vld [vmem:[#allocation23_spill] sm:$0xff] }
 0xf0a   :  { %15607 = vmatpush1.bf16.msra.mxu1 %v18889_v35  ;;  %15670 = vmatpush3.bf16.msra.mxu0 %v24318_v25  ;;  %v24376_v25 = vld [vmem:[#allocation39_spill] sm:$0xff] }
 0xf0b   :  { %15609 = vmatprep.subr.bf16.mxu1 %v18904_v40  ;;  %15671 = vmatprep.subr.bf16.mxu0 %v24317_v11 }
 0xf0c   :  { %4386 = vmatprep.mubr.f32.mxu1 %v24161_v61  ;;  %13126 = vmatprep.mubr.msk.f32.mxu0 %vm18754_vm0, %v24161_v61 }
 0xf0e   :  { %15611 = vmatpush1.bf16.msra.mxu1 %v18920_v45  ;;  %15673 = vmatpush3.bf16.msra.mxu0 %v24319_v19  ;;  %v24375_v19 = vld [vmem:[#allocation37_spill] sm:$0xff] }
 0xf0f   :  { %15613 = vmatprep.subr.bf16.mxu1 %v18934_v50  ;;  %15674 = vmatprep.subr.bf16.mxu0 %v24317_v11 }
 0xf12   :  { %15615 = vmatpush1.bf16.msra.mxu1 %v18952_v56  ;;  %15676 = vmatpush3.bf16.msra.mxu0 %v24353_v12  ;;  %v24374_v12 = vld [vmem:[#allocation35_spill] sm:$0xff] }
 0xf13   :  { %15617 = vmatprep.subr.bf16.mxu1 %v18964_v60  ;;  %15677 = vmatprep.subr.bf16.mxu0 %v24317_v11 }
 0xf16   :  { %15619 = vmatpush1.bf16.msra.mxu1 %v18991_v7  ;;  %15679 = vmatpush3.bf16.msra.mxu0 %v24354_v51  ;;  %v24373_v51 = vld [vmem:[#allocation33_spill] sm:$0xff] }
 0xf17   :  { %15621 = vmatprep.subr.bf16.mxu1 %v24345_v2  ;;  %15680 = vmatprep.subr.bf16.mxu0 %v24317_v11 }
 0xf1a   :  { %15623 = vmatpush1.bf16.msra.mxu1 %v24346_v32  ;;  %15682 = vmatpush3.bf16.msra.mxu0 %v24355_v37  ;;  %v24372_v37 = vld [vmem:[#allocation31_spill] sm:$0xff] }
 0xf1b   :  { %15625 = vmatprep.subr.bf16.mxu1 %v24347_v36  ;;  %15683 = vmatprep.subr.bf16.mxu0 %v24317_v11 }
 0xf1e   :  { %15627 = vmatpush1.bf16.msra.mxu1 %v24348_v10  ;;  %15685 = vmatpush3.bf16.msra.mxu0 %v24356_v38  ;;  %v24371_v38 = vld [vmem:[#allocation29_spill] sm:$0xff] }
 0xf1f   :  { %15629 = vmatprep.subr.bf16.mxu1 %v24349_v0  ;;  %15686 = vmatprep.subr.bf16.mxu0 %v24317_v11 }
 0xf22   :  { %15631 = vmatpush1.bf16.msra.mxu1 %v24350_v46  ;;  %15688 = vmatpush3.bf16.msra.mxu0 %v24357_v5  ;;  %v24370_v5 = vld [vmem:[#allocation27_spill] sm:$0xff] }
 0xf23   :  { %15633 = vmatprep.subr.bf16.mxu1 %v24351_v6  ;;  %15689 = vmatprep.subr.bf16.mxu0 %v24317_v11  ;;  %v24377_v11 = vld [vmem:[#allocation41_spill] sm:$0xff] }
 0xf26   :  { %15635 = vmatpush1.bf16.msra.mxu1 %v24352_v59  ;;  %15691 = vmatpush3.bf16.msra.mxu0 %v24358_v55  ;;  %v24369_v55 = vld [vmem:[#allocation25_spill] sm:$0xff] }
 0xf27   :  { %15709 = vmatprep.subr.bf16.mxu1 %v24359_v13  ;;  %15693 = vmatprep.subr.bf16.mxu0 %v15692_v24  ;;  %v4552_v24 = vld [vmem:[%s23608_s2 + $0x4e8] sm:$0xff] }
 0xf28   :  { %v15704_v3 = vpack.c.bf16 %v4554_v54, %v4552_v24  ;;  %v11129_v54 = vld [vmem:[%s23607_s0 + $0x120] sm:$0xff] }
 0xf29   :  { %4387 = vmatmul.mubr.f32.vlgmr.msra.gmra.mrb[32].mxu1 %v20947_v17  ;;  %13127 = vmatmul.mubr.f32.vlgmr.msra.gmra.mrb[40].mxu0 %v20947_v17  ;;  %v24360_v17 = vld [vmem:[#allocation7_spill] sm:$0xff] }
 0xf2a   :  { %15711 = vmatpush1.bf16.msra.mxu1 %v18810_v8  ;;  %4624 = vmatprep.mubr.f32.mxu0 %v24161_v61 }
 0xf2b   :  { %15713 = vmatprep.subr.bf16.mxu1 %v18812_v9  ;;  %15695 = vmatpush1.bf16.msra.mxu0 %v15694_v49  ;;  %v4553_v49 = vld [vmem:[%s23608_s2 + $0x4f0] sm:$0xff] }
 0xf2c   :  { %15697 = vmatprep.subr.bf16.mxu0 %v15696_v27  ;;  %v4551_v27 = vld [vmem:[%s23608_s2 + $0x4e0] sm:$0xff] }
 0xf2d   :  { %v15706_v29 = vpack.c.bf16 %v4553_v49, %v4551_v27 }
 0xf2e   :  { %15715 = vmatpush1.bf16.msra.mxu1 %v18828_v14 }
 0xf2f   :  { %15717 = vmatprep.subr.bf16.mxu1 %v18831_v15  ;;  %15699 = vmatpush1.bf16.msra.mxu0 %v15698_v57 }
 0xf30   :  { %15701 = vmatprep.subr.bf16.mxu0 %v15700_v22  ;;  %v11130_v22 = vld [vmem:[%s23607_s0 + $0x128] sm:$0xff] }
 0xf32   :  { %15719 = vmatpush1.bf16.msra.mxu1 %v18846_v20 }
 0xf33   :  { %15721 = vmatprep.subr.bf16.mxu1 %v18849_v21  ;;  %15703 = vmatpush1.bf16.msra.mxu0 %v15702_v42 }
 0xf34   :  { %15705 = vmatprep.subr.bf16.mxu0 %v15704_v3 }
 0xf36   :  { %15723 = vmatpush1.bf16.msra.mxu1 %v18870_v28 }
 0xf37   :  { %15725 = vmatprep.subr.bf16.mxu1 %v18884_v33  ;;  %15707 = vmatpush1.bf16.msra.mxu0 %v15706_v29 }
 0xf38   :  { %15805 = vmatprep.subr.bf16.mxu0 %v24326_v44 }
 0xf3a   :  { %15727 = vmatpush1.bf16.msra.mxu1 %v24192_v52 }
 0xf3b   :  { %15729 = vmatprep.subr.bf16.mxu1 %v18929_v48 }
 0xf3e   :  { %15731 = vmatpush1.bf16.msra.mxu1 %v18958_v58 }
 0xf3f   :  { %15733 = vmatprep.subr.bf16.mxu1 %v18973_v63 }
 0xf42   :  { %15735 = vmatpush1.bf16.msra.mxu1 %v24193_v62 }
 0xf43   :  { %15737 = vmatprep.subr.bf16.mxu1 %v24360_v17 }
 0xf46   :  { %15739 = vmatpush1.bf16.msra.mxu1 %v24361_v34 }
 0xf47   :  { %15741 = vmatprep.subr.bf16.mxu1 %v24362_v53 }
 0xf4a   :  { %15743 = vmatpush1.bf16.msra.mxu1 %v24363_v30 }
 0xf4b   :  { %15745 = vmatprep.subr.bf16.mxu1 %v24364_v43 }
 0xf4e   :  { %15747 = vmatpush1.bf16.msra.mxu1 %v24365_v23 }
 0xf4f   :  { %15749 = vmatprep.subr.bf16.mxu1 %v24366_v26 }
 0xf52   :  { %15751 = vmatpush1.bf16.msra.mxu1 %v24367_v18 }
 0xf53   :  { %15753 = vmatprep.subr.bf16.mxu1 %v24368_v4 }
 0xf56   :  { %15755 = vmatpush1.bf16.msra.mxu1 %v24369_v55 }
 0xf57   :  { %15757 = vmatprep.subr.bf16.mxu1 %v24370_v5 }
 0xf5a   :  { %15759 = vmatpush1.bf16.msra.mxu1 %v24371_v38 }
 0xf5b   :  { %15761 = vmatprep.subr.bf16.mxu1 %v24372_v37 }
 0xf5e   :  { %15763 = vmatpush1.bf16.msra.mxu1 %v24373_v51 }
 0xf5f   :  { %15765 = vmatprep.subr.bf16.mxu1 %v24374_v12 }
 0xf62   :  { %15767 = vmatpush1.bf16.msra.mxu1 %v24375_v19 }
 0xf63   :  { %15769 = vmatprep.subr.bf16.mxu1 %v24376_v25 }
 0xf66   :  { %15771 = vmatpush1.bf16.msra.mxu1 %v24377_v11 }
 0xf67   :  { %15773 = vmatprep.subr.bf16.mxu1 %v24378_v39 }
 0xfdc   :  { %v11805_v1 = vpop.f32.mrb[38].mxu0 }
 0xfdd   :  { %v11806_v41 = vpop.f32.mrb[39].mxu0 }
 0xfde   :  { %v11807_v57 = vadd.f32 %v11806_v41, %v11805_v1 }
 0xffc   :  { %v4388_v31 = vpop.f32.mrb[32].mxu1  ;;  %v4529_v24 = vpop.f32.mrb[40].mxu0 }
 0xffd   :  { %v4533_v42 = vadd.f32 %v11129_v54, %v4388_v31  ;;  %v4530_v3 = vadd.f32 %v11807_v57, %v4529_v24  ;;  %v4390_v27 = vpop.f32.mrb[33].mxu1  ;;  %v13128_v49 = vpop.f32.mrb[41].mxu0  ;;  %v24379_v54 = vld [vmem:[#allocation24_spill] sm:$0xff] }
 0xffe   :  { %v4534_v29 = vadd.f32 %v11130_v22, %v4390_v27  ;;  %v24380_v22 = vld [vmem:[#allocation26_spill] sm:$0xff]  ;;  %v24381_v31 = vld [vmem:[#allocation28_spill] sm:$0xff] }
 0xfff   :  { %18648 = vtanh.f32 %v4533_v42  ;;  %v4535_v41 = vadd.f32 %v11131_v47, %v4530_v3  ;;  %v24382_v47 = vld [vmem:[#allocation30_spill] sm:$0xff]  ;;  %v24383_v24 = vld [vmem:[#allocation32_spill] sm:$0xff] }
0x1000   :  { %18650 = vtanh.f32 %v4534_v29  ;;  %v24384_v42 = vld [vmem:[#allocation34_spill] sm:$0xff]  ;;  %v24385_v3 = vld [vmem:[#allocation36_spill] sm:$0xff] }
0x1001   :  { %18652 = vtanh.f32 %v4535_v41  ;;  %v24386_v27 = vld [vmem:[#allocation38_spill] sm:$0xff]  ;;  %v24387_v49 = vld [vmem:[#allocation40_spill] sm:$0xff]  ;;  %v24389_v41 = vld [vmem:[#allocation43_spill] sm:$0xff] }
0x1002   :  { %v24388_v29 = vld [vmem:[#allocation42_spill] sm:$0xff] }
0x1009   :  { %v21101_v1 = vpop.eup %18648 }
0x100a   :  { %v18651_v44 = vpop.eup %18650 }
0x100b   :  { %v21103_v16 = vpop.eup %18652  ;;  %4701 = vmatprep.mubr.f32.mxu1 %v18651_v44 }
0x100c   :  { %4556 = vrot.lane.b32.xlu1 %v21103_v16, %s18755_s13  ;;  %4702 = vmatmul.mubr.f32.vlgmr.msra.gmra.mrb[34].mxu1 %v21101_v1 }
0x100d   :  { %15775 = vmatpush1.bf16.msra.mxu1 %v18889_v35  ;;  %4772 = vmatprep.mubr.f32.mxu1 %v24161_v61 }
0x100e   :  { %15777 = vmatprep.subr.bf16.mxu1 %v18904_v40 }
0x1011   :  { %15779 = vmatpush1.bf16.msra.mxu1 %v18920_v45 }
0x1012   :  { %15781 = vmatprep.subr.bf16.mxu1 %v18934_v50 }
0x1015   :  { %15783 = vmatpush1.bf16.msra.mxu1 %v18952_v56 }
0x1016   :  { %15785 = vmatprep.subr.bf16.mxu1 %v18964_v60 }
0x1019   :  { %15787 = vmatpush1.bf16.msra.mxu1 %v18991_v7 }
0x101a   :  { %15789 = vmatprep.subr.bf16.mxu1 %v24345_v2 }
0x101d   :  { %15791 = vmatpush1.bf16.msra.mxu1 %v24346_v32 }
0x101e   :  { %15793 = vmatprep.subr.bf16.mxu1 %v24347_v36 }
0x1021   :  { %15795 = vmatpush1.bf16.msra.mxu1 %v24348_v10 }
0x1022   :  { %15797 = vmatprep.subr.bf16.mxu1 %v24349_v0 }
0x1025   :  { %15799 = vmatpush1.bf16.msra.mxu1 %v24350_v46 }
0x1026   :  { %15801 = vmatprep.subr.bf16.mxu1 %v24351_v6 }
0x1029   :  { %15803 = vmatpush1.bf16.msra.mxu1 %v24352_v59 }
0x102a   :  { %15877 = vmatprep.subr.bf16.mxu1 %v24359_v13 }
0x102c   :  { %4773 = vmatmul.mubr.f32.vlgmr.msra.gmra.mrb[34].mxu1 %v21103_v16 }
0x102d   :  { %15879 = vmatpush1.bf16.msra.mxu1 %v18810_v8 }
0x102e   :  { %15881 = vmatprep.subr.bf16.mxu1 %v18812_v9 }
0x1031   :  { %15883 = vmatpush1.bf16.msra.mxu1 %v18828_v14 }
0x1032   :  { %15885 = vmatprep.subr.bf16.mxu1 %v18831_v15 }
0x1035   :  { %15887 = vmatpush1.bf16.msra.mxu1 %v18846_v20 }
0x1036   :  { %15889 = vmatprep.subr.bf16.mxu1 %v18849_v21 }
0x1039   :  { %15891 = vmatpush1.bf16.msra.mxu1 %v18870_v28 }
0x103a   :  { %15893 = vmatprep.subr.bf16.mxu1 %v18884_v33 }
0x103d   :  { %15895 = vmatpush1.bf16.msra.mxu1 %v24192_v52 }
0x103e   :  { %15897 = vmatprep.subr.bf16.mxu1 %v18929_v48 }
0x1041   :  { %15899 = vmatpush1.bf16.msra.mxu1 %v18958_v58 }
0x1042   :  { %15901 = vmatprep.subr.bf16.mxu1 %v18973_v63 }
0x1045   :  { %15903 = vmatpush1.bf16.msra.mxu1 %v24193_v62 }
0x1046   :  { %15905 = vmatprep.subr.bf16.mxu1 %v24360_v17 }
0x1049   :  { %15907 = vmatpush1.bf16.msra.mxu1 %v24361_v34 }
0x104a   :  { %15909 = vmatprep.subr.bf16.mxu1 %v24362_v53 }
0x104d   :  { %15911 = vmatpush1.bf16.msra.mxu1 %v24363_v30 }
0x104e   :  { %15913 = vmatprep.subr.bf16.mxu1 %v24364_v43 }
0x1051   :  { %15915 = vmatpush1.bf16.msra.mxu1 %v24365_v23 }
0x1052   :  { %15917 = vmatprep.subr.bf16.mxu1 %v24366_v26 }
0x1055   :  { %15919 = vmatpush1.bf16.msra.mxu1 %v24367_v18  ;;  %v11134_v18 = vld [vmem:[%s23607_s0 + $0x140] sm:$0xff] }
0x1056   :  { %15921 = vmatprep.subr.bf16.mxu1 %v24368_v4  ;;  %v11133_v4 = vld [vmem:[%s23607_s0 + $0x138] sm:$0xff] }
0x1059   :  { %15923 = vmatpush1.bf16.msra.mxu1 %v24369_v55  ;;  %v24402_v55 = vld [vmem:[#allocation55_spill] sm:$0xff] }
0x105a   :  { %15925 = vmatprep.subr.bf16.mxu1 %v24370_v5  ;;  %v24401_v5 = vld [vmem:[#allocation54_spill] sm:$0xff] }
0x105d   :  { %15927 = vmatpush1.bf16.msra.mxu1 %v24371_v38  ;;  %v24400_v38 = vld [vmem:[#allocation53_spill] sm:$0xff] }
0x105e   :  { %15929 = vmatprep.subr.bf16.mxu1 %v24372_v37  ;;  %v24398_v37 = vld [vmem:[#allocation51_spill] sm:$0xff] }
0x1061   :  { %15931 = vmatpush1.bf16.msra.mxu1 %v24373_v51  ;;  %v24397_v51 = vld [vmem:[#allocation50_spill] sm:$0xff] }
0x1062   :  { %15933 = vmatprep.subr.bf16.mxu1 %v24374_v12  ;;  %v24396_v12 = vld [vmem:[#allocation49_spill] sm:$0xff] }
0x1065   :  { %15935 = vmatpush1.bf16.msra.mxu1 %v24375_v19  ;;  %v24395_v19 = vld [vmem:[#allocation48_spill] sm:$0xff] }
0x1066   :  { %15937 = vmatprep.subr.bf16.mxu1 %v24376_v25  ;;  %v24394_v25 = vmov 0.0|0.0  }
0x1069   :  { %15939 = vmatpush1.bf16.msra.mxu1 %v24377_v11  ;;  %v24393_v11 = vld [vmem:[#allocation47_spill] sm:$0xff] }
0x106a   :  { %15941 = vmatprep.subr.bf16.mxu1 %v24378_v39  ;;  %v24392_v39 = vld [vmem:[#allocation46_spill] sm:$0xff] }
0x107e   :  { %v4557_v57 = vpop.permute.xlu1 %4556 }
0x107f   :  { %11132 = vmatmul.mubr.msk.f32.vlgmr.msra.gmra.mrb[12].mxu0 %vm1395_vm2, %v4557_v57  ;;  %v24391_v57 = vld [vmem:[#allocation45_spill] sm:$0xff] }
0x1080   :  { %15807 = vmatpush3.bf16.msra.mxu0 %v24379_v54  ;;  %4843 = vmatprep.mubr.f32.mxu0 %v18651_v44  ;;  %v24390_v44 = vld [vmem:[#allocation44_spill] sm:$0xff] }
0x1081   :  { %15809 = vmatprep.subr.bf16.mxu0 %v24380_v22 }
0x1084   :  { %15811 = vmatpush3.bf16.msra.mxu0 %v24381_v31 }
0x1085   :  { %15813 = vmatprep.subr.bf16.mxu0 %v24382_v47 }
0x1088   :  { %15815 = vmatpush3.bf16.msra.mxu0 %v24383_v24 }
0x1089   :  { %15817 = vmatprep.subr.bf16.mxu0 %v24384_v42 }
0x108c   :  { %15819 = vmatpush3.bf16.msra.mxu0 %v24385_v3 }
0x108d   :  { %15821 = vmatprep.subr.bf16.mxu0 %v24386_v27 }
0x1090   :  { %15823 = vmatpush3.bf16.msra.mxu0 %v24387_v49 }
0x1091   :  { %15825 = vmatprep.subr.bf16.mxu0 %v24388_v29 }
0x1094   :  { %15827 = vmatpush3.bf16.msra.mxu0 %v24389_v41 }
0x1095   :  { %15829 = vmatprep.subr.bf16.mxu0 %v24390_v44 }
0x1098   :  { %15831 = vmatpush3.bf16.msra.mxu0 %v24391_v57 }
0x1099   :  { %15833 = vmatprep.subr.bf16.mxu0 %v24392_v39 }
0x109c   :  { %15835 = vmatpush3.bf16.msra.mxu0 %v24393_v11 }
0x109d   :  { %15836 = vmatprep.subr.bf16.mxu0 %v24394_v25 }
0x109f   :  { %4844 = vmatmul.mubr.f32.vlgmr.msra.gmra.mrb[42].mxu0 %v21101_v1  ;;  %v24399_v1 = vld [vmem:[#allocation52_spill] sm:$0xff] }
0x10a0   :  { %15838 = vmatpush3.bf16.msra.mxu0 %v24395_v19  ;;  %13161 = vmatprep.mubr.msk.f32.mxu0 %vm18754_vm0, %v24161_v61 }
0x10a1   :  { %15839 = vmatprep.subr.bf16.mxu0 %v24394_v25 }
0x10a4   :  { %15841 = vmatpush3.bf16.msra.mxu0 %v24396_v12 }
0x10a5   :  { %15842 = vmatprep.subr.bf16.mxu0 %v24394_v25 }
0x10a8   :  { %15844 = vmatpush3.bf16.msra.mxu0 %v24397_v51 }
0x10a9   :  { %15845 = vmatprep.subr.bf16.mxu0 %v24394_v25 }
0x10ac   :  { %15847 = vmatpush3.bf16.msra.mxu0 %v24398_v37 }
0x10ad   :  { %15848 = vmatprep.subr.bf16.mxu0 %v24394_v25 }
0x10b0   :  { %15850 = vmatpush3.bf16.msra.mxu0 %v24399_v1 }
0x10b1   :  { %15851 = vmatprep.subr.bf16.mxu0 %v24394_v25 }
0x10b4   :  { %15853 = vmatpush3.bf16.msra.mxu0 %v24400_v38 }
0x10b5   :  { %15854 = vmatprep.subr.bf16.mxu0 %v24394_v25 }
0x10b8   :  { %15856 = vmatpush3.bf16.msra.mxu0 %v24401_v5 }
0x10b9   :  { %15857 = vmatprep.subr.bf16.mxu0 %v24394_v25 }
0x10bc   :  { %15859 = vmatpush3.bf16.msra.mxu0 %v24402_v55 }
0x10bf   :  { %13162 = vmatmul.mubr.f32.vlgmr.msra.gmra.mrb[44].mxu0 %v21103_v16  ;;  %v4926_v16 = vld [vmem:[%s23608_s2 + $0x508] sm:$0xff] }
0x10c0   :  { %5010 = vmatprep.mubr.f32.mxu0 %v24161_v61 }
0x10ff   :  { %v4774_v26 = vpop.f32.mrb[34].mxu1 }
0x1100   :  { %v4919_v23 = vadd.f32 %v11133_v4, %v4774_v26  ;;  %v4776_v43 = vpop.f32.mrb[35].mxu1  ;;  %v4927_v26 = vld [vmem:[%s23608_s2 + $0x510] sm:$0xff]  ;;  %v4932_v4 = vld [vmem:[%s23608_s2 + $0x538] sm:$0xff] }
0x1101   :  { %v4920_v30 = vadd.f32 %v11134_v18, %v4776_v43  ;;  %v4925_v43 = vld [vmem:[%s23608_s2 + $0x500] sm:$0xff]  ;;  %v4930_v18 = vld [vmem:[%s23608_s2 + $0x528] sm:$0xff] }
0x1103   :  { %18654 = vtanh.f32 %v4920_v30  ;;  %v4928_v30 = vld [vmem:[%s23608_s2 + $0x518] sm:$0xff] }
0x1104   :  { %18656 = vtanh.f32 %v4919_v23  ;;  %v15860_v23 = vpack.c.bf16 %v4928_v30, %v4926_v16  ;;  %v4929_v16 = vld [vmem:[%s23608_s2 + $0x520] sm:$0xff]  ;;  %v4931_v30 = vld [vmem:[%s23608_s2 + $0x530] sm:$0xff] }
0x1106   :  { %15861 = vmatprep.subr.bf16.mxu0 %v15860_v23  ;;  %v4938_v23 = vld [vmem:[%s23608_s2 + $0x568] sm:$0xff] }
0x110d   :  { %v21201_v53 = vpop.eup %18654 }
0x110e   :  { %v21203_v34 = vpop.eup %18656  ;;  %5087 = vmatprep.mubr.f32.mxu1 %v21201_v53 }
0x110f   :  { %5088 = vmatmul.mubr.f32.vlgmr.msra.gmra.mrb[36].mxu1 %v21203_v34 }
0x1110   :  { %15943 = vmatpush1.bf16.msra.mxu1 %v18889_v35  ;;  %5158 = vmatprep.mubr.f32.mxu1 %v24161_v61 }
0x1111   :  { %15945 = vmatprep.subr.bf16.mxu1 %v18904_v40 }
0x1114   :  { %15947 = vmatpush1.bf16.msra.mxu1 %v18920_v45 }
0x1115   :  { %15949 = vmatprep.subr.bf16.mxu1 %v18934_v50 }
0x1118   :  { %15951 = vmatpush1.bf16.msra.mxu1 %v18952_v56 }
0x1119   :  { %15953 = vmatprep.subr.bf16.mxu1 %v18964_v60 }
0x111c   :  { %15955 = vmatpush1.bf16.msra.mxu1 %v18991_v7 }
0x111d   :  { %15957 = vmatprep.subr.bf16.mxu1 %v24345_v2  ;;  %v4934_v2 = vld [vmem:[%s23608_s2 + $0x548] sm:$0xff] }
0x1120   :  { %15959 = vmatpush1.bf16.msra.mxu1 %v24346_v32  ;;  %v15864_v32 = vpack.c.bf16 %v4932_v4, %v4930_v18  ;;  %v4933_v4 = vld [vmem:[%s23608_s2 + $0x540] sm:$0xff] }
0x1121   :  { %15961 = vmatprep.subr.bf16.mxu1 %v24347_v36  ;;  %v15862_v36 = vpack.c.bf16 %v4927_v26, %v4925_v43  ;;  %v4936_v43 = vld [vmem:[%s23608_s2 + $0x558] sm:$0xff]  ;;  %v15866_v26 = vpack.c.bf16 %v4931_v30, %v4929_v16  ;;  %v4937_v16 = vld [vmem:[%s23608_s2 + $0x560] sm:$0xff]  ;;  %v4939_v30 = vld [vmem:[%s23608_s2 + $0x570] sm:$0xff] }
0x1122   :  { %v15868_v18 = vpack.c.bf16 %v4936_v43, %v4934_v2  ;;  %v24403_v43 = vld [vmem:[#allocation22_spill] sm:$0xff] }
0x1123   :  { %15863 = vmatpush1.bf16.msra.mxu0 %v15862_v36  ;;  %v4940_v36 = vld [vmem:[%s23608_s2 + $0x578] sm:$0xff] }
0x1124   :  { %15963 = vmatpush1.bf16.msra.mxu1 %v24348_v10  ;;  %15865 = vmatprep.subr.bf16.mxu0 %v15864_v32  ;;  %v4935_v10 = vld [vmem:[%s23608_s2 + $0x550] sm:$0xff]  ;;  %v15872_v32 = vpack.c.bf16 %v4940_v36, %v4938_v23 }
0x1125   :  { %15965 = vmatprep.subr.bf16.mxu1 %v24349_v0  ;;  %v15870_v2 = vpack.c.bf16 %v4935_v10, %v4933_v4  ;;  %v11135_v4 = vld [vmem:[%s23607_s0 + $0x148] sm:$0xff] }
0x1127   :  { %15867 = vmatpush1.bf16.msra.mxu0 %v15866_v26 }
0x1128   :  { %15967 = vmatpush1.bf16.msra.mxu1 %v24350_v46  ;;  %15869 = vmatprep.subr.bf16.mxu0 %v15868_v18  ;;  %v15874_v46 = vpack.c.bf16 %v4939_v30, %v4937_v16 }
0x1129   :  { %15969 = vmatprep.subr.bf16.mxu1 %v24351_v6 }
0x112b   :  { %15871 = vmatpush1.bf16.msra.mxu0 %v15870_v2 }
0x112c   :  { %15971 = vmatpush1.bf16.msra.mxu1 %v24352_v59  ;;  %15873 = vmatprep.subr.bf16.mxu0 %v15872_v32 }
0x112d   :  { %16141 = vmatprep.subr.bf16.mxu1 %v24403_v43 }
0x112f   :  { %15875 = vmatpush1.bf16.msra.mxu0 %v15874_v46  ;;  %v11138_v46 = vld [vmem:[%s23607_s0 + $0x158] sm:$0xff] }
0x1130   :  { %15973 = vmatprep.subr.bf16.mxu0 %v24403_v43 }
0x1172   :  { %v11857_v10 = vpop.f32.mrb[42].mxu0 }
0x1173   :  { %v11858_v26 = vpop.f32.mrb[43].mxu0 }
0x1174   :  { %v11859_v18 = vadd.f32 %v11858_v26, %v11857_v10  ;;  %v5314_v10 = vld [vmem:[%s23608_s2 + $0x598] sm:$0xff]  ;;  %v5311_v26 = vld [vmem:[%s23608_s2 + $0x580] sm:$0xff] }
0x1192   :  { %v4915_v23 = vpop.f32.mrb[44].mxu0 }
0x1193   :  { %v4916_v36 = vadd.f32 %v11859_v18, %v4915_v23  ;;  %v13163_v6 = vpop.f32.mrb[45].mxu0  ;;  %v5316_v23 = vld [vmem:[%s23608_s2 + $0x5a8] sm:$0xff] }
0x1194   :  { %v11137_v6 = vld [vmem:[%s23607_s0 + $0x150] sm:$0xff] }
0x1195   :  { %v4921_v0 = vadd.f32 %v11135_v4, %v4916_v36  ;;  %v5313_v4 = vld [vmem:[%s23608_s2 + $0x590] sm:$0xff]  ;;  %v5318_v36 = vld [vmem:[%s23608_s2 + $0x5b8] sm:$0xff] }
0x1197   :  { %18658 = vtanh.f32 %v4921_v0 }
0x11a1   :  { %v18659_v59 = vpop.eup %18658 }
0x11a2   :  { %4942 = vrot.lane.b32.xlu0 %v18659_v59, %s18755_s13  ;;  %5159 = vmatmul.mubr.f32.vlgmr.msra.gmra.mrb[36].mxu1 %v18659_v59 }
0x11a3   :  { %16143 = vmatpush3.bf16.msra.mxu1 %v24379_v54 }
0x11a4   :  { %16145 = vmatprep.subr.bf16.mxu1 %v24380_v22 }
0x11a7   :  { %16147 = vmatpush3.bf16.msra.mxu1 %v24381_v31 }
0x11a8   :  { %16149 = vmatprep.subr.bf16.mxu1 %v24382_v47 }
0x11ab   :  { %16151 = vmatpush3.bf16.msra.mxu1 %v24383_v24 }
0x11ac   :  { %16153 = vmatprep.subr.bf16.mxu1 %v24384_v42 }
0x11af   :  { %16155 = vmatpush3.bf16.msra.mxu1 %v24385_v3 }
0x11b0   :  { %16157 = vmatprep.subr.bf16.mxu1 %v24386_v27 }
0x11b3   :  { %16159 = vmatpush3.bf16.msra.mxu1 %v24387_v49 }
0x11b4   :  { %16161 = vmatprep.subr.bf16.mxu1 %v24388_v29 }
0x11b7   :  { %16163 = vmatpush3.bf16.msra.mxu1 %v24389_v41 }
0x11b8   :  { %16165 = vmatprep.subr.bf16.mxu1 %v24390_v44 }
0x11bb   :  { %16167 = vmatpush3.bf16.msra.mxu1 %v24391_v57 }
0x11bc   :  { %16169 = vmatprep.subr.bf16.mxu1 %v24392_v39 }
0x11bf   :  { %16171 = vmatpush3.bf16.msra.mxu1 %v24393_v11 }
0x11c0   :  { %16172 = vmatprep.subr.bf16.mxu1 %v24394_v25 }
0x1214   :  { %v4943_v0 = vpop.permute.xlu0 %4942 }
0x1215   :  { %11136 = vmatmul.mubr.msk.f32.vlgmr.msra.gmra.mrb[12].mxu0 %vm1395_vm2, %v4943_v0  ;;  %v16030_v0 = vpack.c.bf16 %v5313_v4, %v5311_v26  ;;  %v5321_v26 = vld [vmem:[%s23608_s2 + $0x5d0] sm:$0xff]  ;;  %v5326_v4 = vld [vmem:[%s23608_s2 + $0x5f8] sm:$0xff] }
0x1216   :  { %15975 = vmatpush3.bf16.msra.mxu0 %v24379_v54  ;;  %5229 = vmatprep.mubr.f32.mxu0 %v21201_v53 }
0x1217   :  { %15977 = vmatprep.subr.bf16.mxu0 %v24380_v22 }
0x121a   :  { %15979 = vmatpush3.bf16.msra.mxu0 %v24381_v31 }
0x121b   :  { %15981 = vmatprep.subr.bf16.mxu0 %v24382_v47 }
0x121e   :  { %15983 = vmatpush3.bf16.msra.mxu0 %v24383_v24 }
0x121f   :  { %15985 = vmatprep.subr.bf16.mxu0 %v24384_v42 }
0x1222   :  { %15987 = vmatpush3.bf16.msra.mxu0 %v24385_v3 }
0x1223   :  { %15989 = vmatprep.subr.bf16.mxu0 %v24386_v27 }
0x1226   :  { %15991 = vmatpush3.bf16.msra.mxu0 %v24387_v49 }
0x1227   :  { %15993 = vmatprep.subr.bf16.mxu0 %v24388_v29 }
0x122a   :  { %15995 = vmatpush3.bf16.msra.mxu0 %v24389_v41 }
0x122b   :  { %15997 = vmatprep.subr.bf16.mxu0 %v24390_v44 }
0x122e   :  { %15999 = vmatpush3.bf16.msra.mxu0 %v24391_v57 }
0x122f   :  { %16001 = vmatprep.subr.bf16.mxu0 %v24392_v39 }
0x1232   :  { %16003 = vmatpush3.bf16.msra.mxu0 %v24393_v11 }
0x1233   :  { %16004 = vmatprep.subr.bf16.mxu0 %v24394_v25 }
0x1235   :  { %5230 = vmatmul.mubr.f32.vlgmr.msra.gmra.mrb[46].mxu0 %v21203_v34 }
0x1236   :  { %16006 = vmatpush3.bf16.msra.mxu0 %v24395_v19  ;;  %13196 = vmatprep.mubr.msk.f32.mxu0 %vm18754_vm0, %v24161_v61 }
0x1237   :  { %16007 = vmatprep.subr.bf16.mxu0 %v24394_v25 }
0x123a   :  { %16009 = vmatpush3.bf16.msra.mxu0 %v24396_v12 }
0x123b   :  { %16010 = vmatprep.subr.bf16.mxu0 %v24394_v25 }
0x123e   :  { %16012 = vmatpush3.bf16.msra.mxu0 %v24397_v51 }
0x123f   :  { %16013 = vmatprep.subr.bf16.mxu0 %v24394_v25 }
0x1242   :  { %16015 = vmatpush3.bf16.msra.mxu0 %v24398_v37 }
0x1243   :  { %16016 = vmatprep.subr.bf16.mxu0 %v24394_v25 }
0x1246   :  { %16018 = vmatpush3.bf16.msra.mxu0 %v24399_v1 }
0x1247   :  { %16019 = vmatprep.subr.bf16.mxu0 %v24394_v25 }
0x124a   :  { %16021 = vmatpush3.bf16.msra.mxu0 %v24400_v38 }
0x124b   :  { %16022 = vmatprep.subr.bf16.mxu0 %v24394_v25 }
0x124e   :  { %16024 = vmatpush3.bf16.msra.mxu0 %v24401_v5 }
0x124f   :  { %16025 = vmatprep.subr.bf16.mxu0 %v24394_v25 }
0x1252   :  { %16027 = vmatpush3.bf16.msra.mxu0 %v24402_v55 }
0x1255   :  { %13197 = vmatmul.mubr.f32.vlgmr.msra.gmra.mrb[48].mxu0 %v18659_v59  ;;  %v5312_v59 = vld [vmem:[%s23608_s2 + $0x588] sm:$0xff] }
0x1256   :  { %5396 = vmatprep.mubr.f32.mxu0 %v24161_v61  ;;  %v16028_v18 = vpack.c.bf16 %v5314_v10, %v5312_v59  ;;  %v5319_v10 = vld [vmem:[%s23608_s2 + $0x5c0] sm:$0xff] }
0x1258   :  { %16029 = vmatprep.subr.bf16.mxu0 %v16028_v18  ;;  %v5324_v18 = vld [vmem:[%s23608_s2 + $0x5e8] sm:$0xff] }
0x1259   :  { %16031 = vmatpush1.bf16.msra.mxu0 %v16030_v0  ;;  %v5323_v0 = vld [vmem:[%s23608_s2 + $0x5e0] sm:$0xff] }
0x1275   :  { %v5160_v34 = vpop.f32.mrb[36].mxu1 }
0x1276   :  { %v5305_v53 = vadd.f32 %v11137_v6, %v5160_v34  ;;  %v5162_v2 = vpop.f32.mrb[37].mxu1  ;;  %v16032_v6 = vpack.c.bf16 %v5318_v36, %v5316_v23  ;;  %v5317_v34 = vld [vmem:[%s23608_s2 + $0x5b0] sm:$0xff]  ;;  %v16038_v23 = vpack.c.bf16 %v5321_v26, %v5319_v10  ;;  %v16040_v36 = vpack.c.bf16 %v5326_v4, %v5324_v18 }
0x1277   :  { %v5306_v32 = vadd.f32 %v11138_v46, %v5162_v2  ;;  %v5315_v46 = vld [vmem:[%s23608_s2 + $0x5a0] sm:$0xff]  ;;  %v5322_v2 = vld [vmem:[%s23608_s2 + $0x5d8] sm:$0xff] }
0x1278   :  { %16033 = vmatprep.subr.bf16.mxu0 %v16032_v6  ;;  %v5325_v6 = vld [vmem:[%s23608_s2 + $0x5f0] sm:$0xff] }
0x1279   :  { %18660 = vtanh.f32 %v5306_v32  ;;  %v16034_v32 = vpack.c.bf16 %v5317_v34, %v5315_v46  ;;  %v16042_v46 = vpack.c.bf16 %v5325_v6, %v5323_v0 }
0x127a   :  { %18662 = vtanh.f32 %v5305_v53  ;;  %v5320_v53 = vld [vmem:[%s23608_s2 + $0x5c8] sm:$0xff] }
0x127b   :  { %v16036_v59 = vpack.c.bf16 %v5322_v2, %v5320_v53  ;;  %16035 = vmatpush1.bf16.msra.mxu0 %v16034_v32  ;;  %v11139_v32 = vld [vmem:[%s23607_s0 + $0x160] sm:$0xff] }
0x127d   :  { %16037 = vmatprep.subr.bf16.mxu0 %v16036_v59 }
0x127f   :  { %16039 = vmatpush1.bf16.msra.mxu0 %v16038_v23  ;;  %v24404_v23 = vld [vmem:[#allocation9_spill] sm:$0xff] }
0x1280   :  { %16041 = vmatprep.subr.bf16.mxu0 %v16040_v36  ;;  %v24405_v36 = vld [vmem:[#allocation11_spill] sm:$0xff] }
0x1283   :  { %v21336_v16 = vpop.eup %18660  ;;  %16043 = vmatpush1.bf16.msra.mxu0 %v16042_v46  ;;  %v24406_v46 = vld [vmem:[#allocation13_spill] sm:$0xff] }
0x1284   :  { %v21338_v30 = vpop.eup %18662  ;;  %5615 = vmatprep.mubr.f32.mxu1 %v21336_v16  ;;  %16045 = vmatprep.subr.bf16.mxu0 %v24359_v13 }
0x1285   :  { %5616 = vmatmul.mubr.f32.vlgmr.msra.gmra.mrb[38].mxu1 %v21338_v30 }
0x1286   :  { %16174 = vmatpush3.bf16.msra.mxu1 %v24395_v19  ;;  %13231 = vmatprep.mubr.msk.f32.mxu1 %vm18754_vm0, %v24161_v61 }
0x1287   :  { %16175 = vmatprep.subr.bf16.mxu1 %v24394_v25 }
0x128a   :  { %16177 = vmatpush3.bf16.msra.mxu1 %v24396_v12 }
0x128b   :  { %16178 = vmatprep.subr.bf16.mxu1 %v24394_v25 }
0x128e   :  { %16180 = vmatpush3.bf16.msra.mxu1 %v24397_v51 }
0x128f   :  { %16181 = vmatprep.subr.bf16.mxu1 %v24394_v25 }
0x1292   :  { %16183 = vmatpush3.bf16.msra.mxu1 %v24398_v37  ;;  %v24421_v37 = vld [vmem:[#allocation3_spill] sm:$0xff] }
0x1293   :  { %16184 = vmatprep.subr.bf16.mxu1 %v24394_v25 }
0x1296   :  { %16186 = vmatpush3.bf16.msra.mxu1 %v24399_v1  ;;  %v24420_v1 = vld [vmem:[#allocation41_spill] sm:$0xff] }
0x1297   :  { %16187 = vmatprep.subr.bf16.mxu1 %v24394_v25 }
0x129a   :  { %16189 = vmatpush3.bf16.msra.mxu1 %v24400_v38  ;;  %v24419_v38 = vld [vmem:[#allocation39_spill] sm:$0xff] }
0x129b   :  { %16190 = vmatprep.subr.bf16.mxu1 %v24394_v25 }
0x129e   :  { %16192 = vmatpush3.bf16.msra.mxu1 %v24401_v5  ;;  %v24418_v5 = vld [vmem:[#allocation37_spill] sm:$0xff] }
0x129f   :  { %16193 = vmatprep.subr.bf16.mxu1 %v24394_v25 }
0x12a2   :  { %16195 = vmatpush3.bf16.msra.mxu1 %v24402_v55  ;;  %v24415_v55 = vld [vmem:[#allocation31_spill] sm:$0xff] }
0x12a3   :  { %16213 = vmatprep.subr.bf16.mxu1 %v24359_v13  ;;  %v24414_v13 = vld [vmem:[#allocation29_spill] sm:$0xff] }
0x1308   :  { %v11909_v34 = vpop.f32.mrb[46].mxu0 }
0x1309   :  { %v11910_v53 = vpop.f32.mrb[47].mxu0 }
0x130a   :  { %v11911_v2 = vadd.f32 %v11910_v53, %v11909_v34  ;;  %v24407_v53 = vld [vmem:[#allocation15_spill] sm:$0xff] }
0x1328   :  { %v5301_v59 = vpop.f32.mrb[48].mxu0 }
0x1329   :  { %v5302_v10 = vadd.f32 %v11911_v2, %v5301_v59  ;;  %v13198_v26 = vpop.f32.mrb[49].mxu0  ;;  %v24408_v2 = vld [vmem:[#allocation17_spill] sm:$0xff] }
0x132a   :  { %v24410_v59 = vld [vmem:[#allocation21_spill] sm:$0xff] }
0x132b   :  { %v5307_v18 = vadd.f32 %v11139_v32, %v5302_v10  ;;  %v24409_v32 = vld [vmem:[#allocation19_spill] sm:$0xff]  ;;  %v24412_v26 = vld [vmem:[#allocation25_spill] sm:$0xff] }
0x132c   :  { %v24411_v10 = vld [vmem:[#allocation23_spill] sm:$0xff] }
0x132d   :  { %18664 = vtanh.f32 %v5307_v18  ;;  %v24413_v18 = vld [vmem:[#allocation27_spill] sm:$0xff] }
0x1337   :  { %v21412_v4 = vpop.eup %18664 }
0x1338   :  { %5328 = vrot.lane.b32.xlu1 %v21412_v4, %s18755_s13  ;;  %13232 = vmatmul.mubr.f32.vlgmr.msra.gmra.mrb[40].mxu1 %v21412_v4 }
0x1339   :  { %16215 = vmatpush1.bf16.msra.mxu1 %v18810_v8 }
0x133a   :  { %16217 = vmatprep.subr.bf16.mxu1 %v18812_v9 }
0x133d   :  { %16219 = vmatpush1.bf16.msra.mxu1 %v18828_v14 }
0x133e   :  { %16221 = vmatprep.subr.bf16.mxu1 %v18831_v15 }
0x1341   :  { %16223 = vmatpush1.bf16.msra.mxu1 %v18846_v20 }
0x1342   :  { %16225 = vmatprep.subr.bf16.mxu1 %v18849_v21 }
0x1345   :  { %16227 = vmatpush1.bf16.msra.mxu1 %v18870_v28 }
0x1346   :  { %16229 = vmatprep.subr.bf16.mxu1 %v18884_v33 }
0x1349   :  { %16231 = vmatpush1.bf16.msra.mxu1 %v24192_v52 }
0x134a   :  { %16233 = vmatprep.subr.bf16.mxu1 %v18929_v48 }
0x134d   :  { %16235 = vmatpush1.bf16.msra.mxu1 %v18958_v58 }
0x134e   :  { %16237 = vmatprep.subr.bf16.mxu1 %v18973_v63 }
0x1351   :  { %16239 = vmatpush1.bf16.msra.mxu1 %v24193_v62 }
0x1352   :  { %16241 = vmatprep.subr.bf16.mxu1 %v24360_v17 }
0x1355   :  { %16243 = vmatpush1.bf16.msra.mxu1 %v24404_v23 }
0x1356   :  { %16245 = vmatprep.subr.bf16.mxu1 %v24405_v36 }
0x1358   :  { %v11961_v0 = vpop.f32.mrb[38].mxu1 }
0x1359   :  { %v11962_v6 = vpop.f32.mrb[39].mxu1  ;;  %16247 = vmatpush1.bf16.msra.mxu1 %v24406_v46 }
0x135a   :  { %v21434_v34 = vadd.f32 %v11962_v6, %v11961_v0  ;;  %16249 = vmatprep.subr.bf16.mxu1 %v24407_v53  ;;  %v24416_v0 = vld [vmem:[#allocation33_spill] sm:$0xff]  ;;  %v24417_v6 = vld [vmem:[#allocation35_spill] sm:$0xff] }
0x135d   :  { %16251 = vmatpush1.bf16.msra.mxu1 %v24408_v2 }
0x135e   :  { %16253 = vmatprep.subr.bf16.mxu1 %v24409_v32 }
0x1361   :  { %16255 = vmatpush1.bf16.msra.mxu1 %v24410_v59 }
0x1362   :  { %16257 = vmatprep.subr.bf16.mxu1 %v24411_v10 }
0x1365   :  { %16259 = vmatpush1.bf16.msra.mxu1 %v24412_v26 }
0x1366   :  { %16261 = vmatprep.subr.bf16.mxu1 %v24413_v18 }
0x1369   :  { %16263 = vmatpush1.bf16.msra.mxu1 %v24414_v13 }
0x136a   :  { %16265 = vmatprep.subr.bf16.mxu1 %v24415_v55 }
0x136d   :  { %16267 = vmatpush1.bf16.msra.mxu1 %v24416_v0 }
0x136e   :  { %16269 = vmatprep.subr.bf16.mxu1 %v24417_v6 }
0x1371   :  { %16271 = vmatpush1.bf16.msra.mxu1 %v24418_v5 }
0x1372   :  { %16273 = vmatprep.subr.bf16.mxu1 %v24419_v38 }
0x1375   :  { %16275 = vmatpush1.bf16.msra.mxu1 %v24420_v1 }
0x1376   :  { %16277 = vmatprep.subr.bf16.mxu1 %v24421_v37 }
0x13aa   :  { %v5329_v51 = vpop.permute.xlu1 %5328 }
0x13ab   :  { %11140 = vmatmul.mubr.msk.f32.vlgmr.msra.gmra.mrb[12].mxu0 %vm1395_vm2, %v5329_v51  ;;  %v24422_v51 = vld [vmem:[#allocation6_spill] sm:$0xff] }
0x13ac   :  { %16047 = vmatpush1.bf16.msra.mxu0 %v18810_v8  ;;  %5473 = vmatprep.mubr.f32.mxu0 %v21336_v16  ;;  %v24423_v16 = vld [vmem:[#allocation8_spill] sm:$0xff] }
0x13ad   :  { %16049 = vmatprep.subr.bf16.mxu0 %v18812_v9 }
0x13b0   :  { %16051 = vmatpush1.bf16.msra.mxu0 %v18828_v14 }
0x13b1   :  { %16053 = vmatprep.subr.bf16.mxu0 %v18831_v15 }
0x13b4   :  { %16055 = vmatpush1.bf16.msra.mxu0 %v18846_v20 }
0x13b5   :  { %16057 = vmatprep.subr.bf16.mxu0 %v18849_v21 }
0x13b8   :  { %16059 = vmatpush1.bf16.msra.mxu0 %v18870_v28 }
0x13b9   :  { %16061 = vmatprep.subr.bf16.mxu0 %v18884_v33 }
0x13bc   :  { %16063 = vmatpush1.bf16.msra.mxu0 %v24192_v52 }
0x13bd   :  { %16065 = vmatprep.subr.bf16.mxu0 %v18929_v48 }
0x13c0   :  { %16067 = vmatpush1.bf16.msra.mxu0 %v18958_v58 }
0x13c1   :  { %16069 = vmatprep.subr.bf16.mxu0 %v18973_v63 }
0x13c4   :  { %16071 = vmatpush1.bf16.msra.mxu0 %v24193_v62 }
0x13c5   :  { %16073 = vmatprep.subr.bf16.mxu0 %v24360_v17 }
0x13c8   :  { %16075 = vmatpush1.bf16.msra.mxu0 %v24404_v23  ;;  %v5705_v23 = vld [vmem:[%s23608_s2 + $0x640] sm:$0xff] }
0x13c9   :  { %16077 = vmatprep.subr.bf16.mxu0 %v24405_v36 }
0x13cc   :  { %16079 = vmatpush1.bf16.msra.mxu0 %v24406_v46  ;;  %v5708_v46 = vld [vmem:[%s23608_s2 + $0x658] sm:$0xff] }
0x13cd   :  { %16081 = vmatprep.subr.bf16.mxu0 %v24407_v53  ;;  %v5706_v53 = vld [vmem:[%s23608_s2 + $0x648] sm:$0xff] }
0x13ce   :  { %v16204_v36 = vpack.c.bf16 %v5708_v46, %v5706_v53 }
0x13d0   :  { %16083 = vmatpush1.bf16.msra.mxu0 %v24408_v2  ;;  %v5703_v2 = vld [vmem:[%s23608_s2 + $0x630] sm:$0xff] }
0x13d1   :  { %16085 = vmatprep.subr.bf16.mxu0 %v24409_v32 }
0x13d4   :  { %16087 = vmatpush1.bf16.msra.mxu0 %v24410_v59  ;;  %v24429_v59 = vld [vmem:[#allocation20_spill] sm:$0xff] }
0x13d5   :  { %16089 = vmatprep.subr.bf16.mxu0 %v24411_v10  ;;  %v5704_v10 = vld [vmem:[%s23608_s2 + $0x638] sm:$0xff] }
0x13d8   :  { %16091 = vmatpush1.bf16.msra.mxu0 %v24412_v26  ;;  %v5702_v26 = vld [vmem:[%s23608_s2 + $0x628] sm:$0xff] }
0x13d9   :  { %16093 = vmatprep.subr.bf16.mxu0 %v24413_v18  ;;  %v5699_v18 = vld [vmem:[%s23608_s2 + $0x610] sm:$0xff] }
0x13dc   :  { %16095 = vmatpush1.bf16.msra.mxu0 %v24414_v13  ;;  %v5697_v13 = vld [vmem:[%s23608_s2 + $0x600] sm:$0xff] }
0x13dd   :  { %16097 = vmatprep.subr.bf16.mxu0 %v24415_v55  ;;  %v16198_v32 = vpack.c.bf16 %v5699_v18, %v5697_v13 }
0x13e0   :  { %16099 = vmatpush1.bf16.msra.mxu0 %v24416_v0  ;;  %v24428_v0 = vld [vmem:[#allocation18_spill] sm:$0xff] }
0x13e1   :  { %16101 = vmatprep.subr.bf16.mxu0 %v24417_v6  ;;  %v24427_v6 = vld [vmem:[#allocation16_spill] sm:$0xff] }
0x13e4   :  { %16103 = vmatpush1.bf16.msra.mxu0 %v24418_v5  ;;  %v5700_v5 = vld [vmem:[%s23608_s2 + $0x618] sm:$0xff] }
0x13e5   :  { %16105 = vmatprep.subr.bf16.mxu0 %v24419_v38  ;;  %v5698_v38 = vld [vmem:[%s23608_s2 + $0x608] sm:$0xff] }
0x13e6   :  { %v16196_v55 = vpack.c.bf16 %v5700_v5, %v5698_v38  ;;  %v16200_v38 = vpack.c.bf16 %v5704_v10, %v5702_v26  ;;  %v5701_v5 = vld [vmem:[%s23608_s2 + $0x620] sm:$0xff] }
0x13e7   :  { %v16202_v18 = vpack.c.bf16 %v5703_v2, %v5701_v5  ;;  %v5712_v2 = vld [vmem:[%s23608_s2 + $0x678] sm:$0xff] }
0x13e8   :  { %16107 = vmatpush1.bf16.msra.mxu0 %v24420_v1  ;;  %v24426_v1 = vld [vmem:[#allocation14_spill] sm:$0xff] }
0x13e9   :  { %16109 = vmatprep.subr.bf16.mxu0 %v24421_v37  ;;  %v24425_v37 = vld [vmem:[#allocation12_spill] sm:$0xff] }
0x13eb   :  { %5474 = vmatmul.mubr.f32.vlgmr.msra.gmra.mrb[50].mxu0 %v21338_v30  ;;  %v24424_v30 = vld [vmem:[#allocation10_spill] sm:$0xff] }
0x13ec   :  { %16111 = vmatpush1.bf16.msra.mxu0 %v18889_v35  ;;  %5544 = vmatprep.mubr.f32.mxu0 %v24161_v61 }
0x13ed   :  { %16113 = vmatprep.subr.bf16.mxu0 %v18904_v40 }
0x13f0   :  { %16115 = vmatpush1.bf16.msra.mxu0 %v18920_v45 }
0x13f1   :  { %16117 = vmatprep.subr.bf16.mxu0 %v18934_v50 }
0x13f4   :  { %16119 = vmatpush1.bf16.msra.mxu0 %v18952_v56 }
0x13f5   :  { %16121 = vmatprep.subr.bf16.mxu0 %v18964_v60 }
0x13f8   :  { %16123 = vmatpush1.bf16.msra.mxu0 %v18991_v7 }
0x13f9   :  { %16125 = vmatprep.subr.bf16.mxu0 %v24422_v51 }
0x13fc   :  { %16127 = vmatpush1.bf16.msra.mxu0 %v24423_v16 }
0x13fd   :  { %16129 = vmatprep.subr.bf16.mxu0 %v24424_v30 }
0x1400   :  { %16131 = vmatpush1.bf16.msra.mxu0 %v24425_v37 }
0x1401   :  { %16133 = vmatprep.subr.bf16.mxu0 %v24426_v1 }
0x1404   :  { %16135 = vmatpush1.bf16.msra.mxu0 %v24427_v6 }
0x1405   :  { %16137 = vmatprep.subr.bf16.mxu0 %v24428_v0 }
0x1408   :  { %16139 = vmatpush1.bf16.msra.mxu0 %v24429_v59 }
0x1409   :  { %16197 = vmatprep.subr.bf16.mxu0 %v16196_v55  ;;  %v11143_v55 = vld [vmem:[%s23607_s0 + $0x178] sm:$0xff] }
0x140b   :  { %5545 = vmatmul.mubr.f32.vlgmr.msra.gmra.mrb[50].mxu0 %v21412_v4  ;;  %v5687_v13 = vpop.f32.mrb[40].mxu1  ;;  %v5707_v4 = vld [vmem:[%s23608_s2 + $0x650] sm:$0xff] }
0x140c   :  { %v5688_v10 = vadd.f32 %v21434_v34, %v5687_v13  ;;  %v13233_v26 = vpop.f32.mrb[41].mxu1  ;;  %16199 = vmatpush1.bf16.msra.mxu0 %v16198_v32  ;;  %5782 = vmatprep.mubr.f32.mxu0 %v24161_v61  ;;  %v5710_v34 = vld [vmem:[%s23608_s2 + $0x668] sm:$0xff]  ;;  %v16206_v46 = vpack.c.bf16 %v5707_v4, %v5705_v23  ;;  %v5709_v32 = vld [vmem:[%s23608_s2 + $0x660] sm:$0xff] }
0x140d   :  { %16201 = vmatprep.subr.bf16.mxu0 %v16200_v38  ;;  %v16208_v53 = vpack.c.bf16 %v5712_v2, %v5710_v34  ;;  %v5711_v38 = vld [vmem:[%s23608_s2 + $0x670] sm:$0xff]  ;;  %v11141_v23 = vld [vmem:[%s23607_s0 + $0x168] sm:$0xff]  ;;  %v24430_v2 = vld [vmem:[#allocation50_spill] sm:$0xff] }
0x140e   :  { %v5693_v17 = vadd.f32 %v11143_v55, %v5688_v10  ;;  %v16210_v5 = vpack.c.bf16 %v5711_v38, %v5709_v32  ;;  %v24433_v32 = vld [vmem:[#allocation53_spill] sm:$0xff]  ;;  %v24434_v38 = vld [vmem:[#allocation54_spill] sm:$0xff] }
0x1410   :  { %18666 = vtanh.f32 %v5693_v17  ;;  %16203 = vmatpush1.bf16.msra.mxu0 %v16202_v18 }
0x1411   :  { %16205 = vmatprep.subr.bf16.mxu0 %v16204_v36  ;;  %v11142_v36 = vld [vmem:[%s23607_s0 + $0x170] sm:$0xff] }
0x1414   :  { %16207 = vmatpush1.bf16.msra.mxu0 %v16206_v46  ;;  %v24431_v46 = vld [vmem:[#allocation51_spill] sm:$0xff] }
0x1415   :  { %16209 = vmatprep.subr.bf16.mxu0 %v16208_v53  ;;  %v24432_v53 = vld [vmem:[#allocation52_spill] sm:$0xff] }
0x1418   :  { %16211 = vmatpush1.bf16.msra.mxu0 %v16210_v5  ;;  %v24435_v5 = vld [vmem:[#allocation55_spill] sm:$0xff] }
0x1419   :  { %16309 = vmatprep.subr.bf16.mxu0 %v24403_v43 }
0x141a   :  { %v21557_v55 = vpop.eup %18666 }
0x141b   :  { %5714 = vrot.lane.b32.xlu0 %v21557_v55, %s18755_s13 }
0x148d   :  { %v5715_v17 = vpop.permute.xlu0 %5714 }
0x148e   :  { %11144 = vmatmul.mubr.msk.f32.vlgmr.msra.gmra.mrb[12].mxu0 %vm1395_vm2, %v5715_v17  ;;  %v24436_v17 = vld [vmem:[#allocation2_spill] sm:$0xff] }
0x148f   :  { %16311 = vmatpush3.bf16.msra.mxu0 %v24379_v54 }
0x1490   :  { %16313 = vmatprep.subr.bf16.mxu0 %v24380_v22 }
0x1493   :  { %16315 = vmatpush3.bf16.msra.mxu0 %v24381_v31  ;;  %v6098_v31 = vld [vmem:[%s23608_s2 + $0x6f8] sm:$0xff] }
0x1494   :  { %16317 = vmatprep.subr.bf16.mxu0 %v24382_v47  ;;  %v6094_v47 = vld [vmem:[%s23608_s2 + $0x6d8] sm:$0xff] }
0x1497   :  { %16319 = vmatpush3.bf16.msra.mxu0 %v24383_v24  ;;  %v6087_v24 = vld [vmem:[%s23608_s2 + $0x6a0] sm:$0xff] }
0x1498   :  { %16321 = vmatprep.subr.bf16.mxu0 %v24384_v42 }
0x149b   :  { %16323 = vmatpush3.bf16.msra.mxu0 %v24385_v3 }
0x149c   :  { %16325 = vmatprep.subr.bf16.mxu0 %v24386_v27  ;;  %v6090_v27 = vld [vmem:[%s23608_s2 + $0x6b8] sm:$0xff] }
0x149f   :  { %16327 = vmatpush3.bf16.msra.mxu0 %v24387_v49  ;;  %v6088_v49 = vld [vmem:[%s23608_s2 + $0x6a8] sm:$0xff] }
0x14a0   :  { %16329 = vmatprep.subr.bf16.mxu0 %v24388_v29  ;;  %v6085_v29 = vld [vmem:[%s23608_s2 + $0x690] sm:$0xff]  ;;  %v16368_v42 = vpack.c.bf16 %v6090_v27, %v6088_v49  ;;  %v6091_v49 = vld [vmem:[%s23608_s2 + $0x6c0] sm:$0xff] }
0x14a3   :  { %16331 = vmatpush3.bf16.msra.mxu0 %v24389_v41 }
0x14a4   :  { %16333 = vmatprep.subr.bf16.mxu0 %v24390_v44  ;;  %v6083_v44 = vld [vmem:[%s23608_s2 + $0x680] sm:$0xff] }
0x14a5   :  { %v16366_v3 = vpack.c.bf16 %v6085_v29, %v6083_v44  ;;  %v6093_v44 = vld [vmem:[%s23608_s2 + $0x6d0] sm:$0xff] }
0x14a7   :  { %16335 = vmatpush3.bf16.msra.mxu0 %v24391_v57  ;;  %v6086_v57 = vld [vmem:[%s23608_s2 + $0x698] sm:$0xff] }
0x14a8   :  { %16337 = vmatprep.subr.bf16.mxu0 %v24392_v39  ;;  %v6084_v39 = vld [vmem:[%s23608_s2 + $0x688] sm:$0xff] }
0x14a9   :  { %v16364_v41 = vpack.c.bf16 %v6086_v57, %v6084_v39  ;;  %v6089_v39 = vld [vmem:[%s23608_s2 + $0x6b0] sm:$0xff]  ;;  %v6092_v57 = vld [vmem:[%s23608_s2 + $0x6c8] sm:$0xff] }
0x14aa   :  { %v16370_v29 = vpack.c.bf16 %v6089_v39, %v6087_v24  ;;  %v16372_v27 = vpack.c.bf16 %v6094_v47, %v6092_v57  ;;  %v16374_v24 = vpack.c.bf16 %v6093_v44, %v6091_v49  ;;  %v11147_v44 = vld [vmem:[%s23607_s0 + $0x190] sm:$0xff] }
0x14ab   :  { %16339 = vmatpush3.bf16.msra.mxu0 %v24393_v11  ;;  %v24455_v11 = vld [vmem:[#allocation3_spill] sm:$0xff] }
0x14ac   :  { %16340 = vmatprep.subr.bf16.mxu0 %v24394_v25 }
0x14de   :  { %v5546_v13 = vpop.f32.mrb[50].mxu0 }
0x14df   :  { %v5691_v10 = vadd.f32 %v11141_v23, %v5546_v13  ;;  %v5548_v26 = vpop.f32.mrb[51].mxu0  ;;  %v24438_v23 = vld [vmem:[#allocation9_spill] sm:$0xff] }
0x14e0   :  { %v5692_v18 = vadd.f32 %v11142_v36, %v5548_v26  ;;  %v24439_v36 = vld [vmem:[#allocation11_spill] sm:$0xff]  ;;  %v24440_v13 = vld [vmem:[#allocation13_spill] sm:$0xff] }
0x14e1   :  { %v24442_v26 = vld [vmem:[#allocation17_spill] sm:$0xff] }
0x14e2   :  { %18668 = vtanh.f32 %v5692_v18  ;;  %v24443_v18 = vld [vmem:[#allocation19_spill] sm:$0xff] }
0x14e3   :  { %18670 = vtanh.f32 %v5691_v10  ;;  %v24441_v10 = vld [vmem:[#allocation15_spill] sm:$0xff] }
0x14ec   :  { %v18669_v4 = vpop.eup %18668 }
0x14ed   :  { %v18671_v34 = vpop.eup %18670  ;;  %5859 = vmatprep.mubr.f32.mxu1 %v18669_v4  ;;  %6001 = vmatprep.mubr.f32.mxu0 %v18669_v4  ;;  %v24444_v4 = vld [vmem:[#allocation21_spill] sm:$0xff] }
0x14ee   :  { %5860 = vmatmul.mubr.f32.vlgmr.msra.gmra.mrb[42].mxu1 %v18671_v34  ;;  %6002 = vmatmul.mubr.f32.vlgmr.msra.gmra.mrb[52].mxu0 %v18671_v34  ;;  %v24445_v34 = vld [vmem:[#allocation23_spill] sm:$0xff] }
0x14ef   :  { %16279 = vmatpush1.bf16.msra.mxu1 %v18889_v35  ;;  %16342 = vmatpush3.bf16.msra.mxu0 %v24395_v19  ;;  %v24453_v19 = vld [vmem:[#allocation39_spill] sm:$0xff] }
0x14f0   :  { %16281 = vmatprep.subr.bf16.mxu1 %v18904_v40  ;;  %16343 = vmatprep.subr.bf16.mxu0 %v24394_v25 }
0x14f1   :  { %5930 = vmatprep.mubr.f32.mxu1 %v24161_v61  ;;  %13266 = vmatprep.mubr.msk.f32.mxu0 %vm18754_vm0, %v24161_v61 }
0x14f3   :  { %16283 = vmatpush1.bf16.msra.mxu1 %v18920_v45  ;;  %16345 = vmatpush3.bf16.msra.mxu0 %v24396_v12  ;;  %v24452_v12 = vld [vmem:[#allocation37_spill] sm:$0xff] }
0x14f4   :  { %16285 = vmatprep.subr.bf16.mxu1 %v18934_v50  ;;  %16346 = vmatprep.subr.bf16.mxu0 %v24394_v25 }
0x14f7   :  { %16287 = vmatpush1.bf16.msra.mxu1 %v18952_v56  ;;  %16348 = vmatpush3.bf16.msra.mxu0 %v24430_v2  ;;  %v24451_v2 = vld [vmem:[#allocation35_spill] sm:$0xff] }
0x14f8   :  { %16289 = vmatprep.subr.bf16.mxu1 %v18964_v60  ;;  %16349 = vmatprep.subr.bf16.mxu0 %v24394_v25 }
0x14fb   :  { %16291 = vmatpush1.bf16.msra.mxu1 %v18991_v7  ;;  %16351 = vmatpush3.bf16.msra.mxu0 %v24431_v46  ;;  %v24450_v46 = vld [vmem:[#allocation33_spill] sm:$0xff] }
0x14fc   :  { %16293 = vmatprep.subr.bf16.mxu1 %v24422_v51  ;;  %16352 = vmatprep.subr.bf16.mxu0 %v24394_v25 }
0x14ff   :  { %16295 = vmatpush1.bf16.msra.mxu1 %v24423_v16  ;;  %16354 = vmatpush3.bf16.msra.mxu0 %v24432_v53  ;;  %v24449_v53 = vld [vmem:[#allocation31_spill] sm:$0xff] }
0x1500   :  { %16297 = vmatprep.subr.bf16.mxu1 %v24424_v30  ;;  %16355 = vmatprep.subr.bf16.mxu0 %v24394_v25 }
0x1503   :  { %16299 = vmatpush1.bf16.msra.mxu1 %v24425_v37  ;;  %16357 = vmatpush3.bf16.msra.mxu0 %v24433_v32  ;;  %v24448_v32 = vld [vmem:[#allocation29_spill] sm:$0xff] }
0x1504   :  { %16301 = vmatprep.subr.bf16.mxu1 %v24426_v1  ;;  %16358 = vmatprep.subr.bf16.mxu0 %v24394_v25 }
0x1507   :  { %16303 = vmatpush1.bf16.msra.mxu1 %v24427_v6  ;;  %16360 = vmatpush3.bf16.msra.mxu0 %v24434_v38  ;;  %v24447_v38 = vld [vmem:[#allocation27_spill] sm:$0xff] }
0x1508   :  { %16305 = vmatprep.subr.bf16.mxu1 %v24428_v0  ;;  %16361 = vmatprep.subr.bf16.mxu0 %v24394_v25  ;;  %v24454_v25 = vld [vmem:[#allocation41_spill] sm:$0xff] }
0x150b   :  { %16307 = vmatpush1.bf16.msra.mxu1 %v24429_v59  ;;  %16363 = vmatpush3.bf16.msra.mxu0 %v24435_v5  ;;  %v24446_v5 = vld [vmem:[#allocation25_spill] sm:$0xff] }
0x150c   :  { %16381 = vmatprep.subr.bf16.mxu1 %v24436_v17  ;;  %16365 = vmatprep.subr.bf16.mxu0 %v16364_v41  ;;  %v6096_v41 = vld [vmem:[%s23608_s2 + $0x6e8] sm:$0xff] }
0x150d   :  { %v16376_v47 = vpack.c.bf16 %v6098_v31, %v6096_v41  ;;  %v11145_v31 = vld [vmem:[%s23607_s0 + $0x180] sm:$0xff] }
0x150e   :  { %5931 = vmatmul.mubr.f32.vlgmr.msra.gmra.mrb[42].mxu1 %v21557_v55  ;;  %13267 = vmatmul.mubr.f32.vlgmr.msra.gmra.mrb[54].mxu0 %v21557_v55  ;;  %v24437_v55 = vld [vmem:[#allocation7_spill] sm:$0xff] }
0x150f   :  { %16383 = vmatpush1.bf16.msra.mxu1 %v18810_v8  ;;  %6168 = vmatprep.mubr.f32.mxu0 %v24161_v61 }
0x1510   :  { %16385 = vmatprep.subr.bf16.mxu1 %v18812_v9  ;;  %16367 = vmatpush1.bf16.msra.mxu0 %v16366_v3  ;;  %v6097_v3 = vld [vmem:[%s23608_s2 + $0x6f0] sm:$0xff] }
0x1511   :  { %16369 = vmatprep.subr.bf16.mxu0 %v16368_v42  ;;  %v6095_v42 = vld [vmem:[%s23608_s2 + $0x6e0] sm:$0xff] }
0x1512   :  { %v16378_v39 = vpack.c.bf16 %v6097_v3, %v6095_v42 }
0x1513   :  { %16387 = vmatpush1.bf16.msra.mxu1 %v18828_v14 }
0x1514   :  { %16389 = vmatprep.subr.bf16.mxu1 %v18831_v15  ;;  %16371 = vmatpush1.bf16.msra.mxu0 %v16370_v29 }
0x1515   :  { %16373 = vmatprep.subr.bf16.mxu0 %v16372_v27  ;;  %v11146_v27 = vld [vmem:[%s23607_s0 + $0x188] sm:$0xff] }
0x1517   :  { %16391 = vmatpush1.bf16.msra.mxu1 %v18846_v20 }
0x1518   :  { %16393 = vmatprep.subr.bf16.mxu1 %v18849_v21  ;;  %16375 = vmatpush1.bf16.msra.mxu0 %v16374_v24 }
0x1519   :  { %16377 = vmatprep.subr.bf16.mxu0 %v16376_v47 }
0x151b   :  { %16395 = vmatpush1.bf16.msra.mxu1 %v18870_v28 }
0x151c   :  { %16397 = vmatprep.subr.bf16.mxu1 %v18884_v33  ;;  %16379 = vmatpush1.bf16.msra.mxu0 %v16378_v39 }
0x151d   :  { %16477 = vmatprep.subr.bf16.mxu0 %v24403_v43 }
0x151f   :  { %16399 = vmatpush1.bf16.msra.mxu1 %v24192_v52 }
0x1520   :  { %16401 = vmatprep.subr.bf16.mxu1 %v18929_v48 }
0x1523   :  { %16403 = vmatpush1.bf16.msra.mxu1 %v18958_v58 }
0x1524   :  { %16405 = vmatprep.subr.bf16.mxu1 %v18973_v63 }
0x1527   :  { %16407 = vmatpush1.bf16.msra.mxu1 %v24193_v62 }
0x1528   :  { %16409 = vmatprep.subr.bf16.mxu1 %v24437_v55 }
0x152b   :  { %16411 = vmatpush1.bf16.msra.mxu1 %v24438_v23 }
0x152c   :  { %16413 = vmatprep.subr.bf16.mxu1 %v24439_v36 }
0x152f   :  { %16415 = vmatpush1.bf16.msra.mxu1 %v24440_v13 }
0x1530   :  { %16417 = vmatprep.subr.bf16.mxu1 %v24441_v10 }
0x1533   :  { %16419 = vmatpush1.bf16.msra.mxu1 %v24442_v26 }
0x1534   :  { %16421 = vmatprep.subr.bf16.mxu1 %v24443_v18 }
0x1537   :  { %16423 = vmatpush1.bf16.msra.mxu1 %v24444_v4 }
0x1538   :  { %16425 = vmatprep.subr.bf16.mxu1 %v24445_v34 }
0x153b   :  { %16427 = vmatpush1.bf16.msra.mxu1 %v24446_v5 }
0x153c   :  { %16429 = vmatprep.subr.bf16.mxu1 %v24447_v38 }
0x153f   :  { %16431 = vmatpush1.bf16.msra.mxu1 %v24448_v32 }
0x1540   :  { %16433 = vmatprep.subr.bf16.mxu1 %v24449_v53 }
0x1543   :  { %16435 = vmatpush1.bf16.msra.mxu1 %v24450_v46 }
0x1544   :  { %16437 = vmatprep.subr.bf16.mxu1 %v24451_v2 }
0x1547   :  { %16439 = vmatpush1.bf16.msra.mxu1 %v24452_v12 }
0x1548   :  { %16441 = vmatprep.subr.bf16.mxu1 %v24453_v19 }
0x154b   :  { %16443 = vmatpush1.bf16.msra.mxu1 %v24454_v25 }
0x154c   :  { %16445 = vmatprep.subr.bf16.mxu1 %v24455_v11 }
0x15c1   :  { %v12013_v57 = vpop.f32.mrb[52].mxu0 }
0x15c2   :  { %v12014_v22 = vpop.f32.mrb[53].mxu0 }
0x15c3   :  { %v12015_v29 = vadd.f32 %v12014_v22, %v12013_v57 }
0x15e1   :  { %v5932_v49 = vpop.f32.mrb[42].mxu1  ;;  %v6073_v41 = vpop.f32.mrb[54].mxu0 }
0x15e2   :  { %v6077_v24 = vadd.f32 %v11145_v31, %v5932_v49  ;;  %v6074_v47 = vadd.f32 %v12015_v29, %v6073_v41  ;;  %v5934_v42 = vpop.f32.mrb[43].mxu1  ;;  %v13268_v3 = vpop.f32.mrb[55].mxu0  ;;  %v24456_v31 = vld [vmem:[#allocation24_spill] sm:$0xff] }
0x15e3   :  { %v6078_v39 = vadd.f32 %v11146_v27, %v5934_v42  ;;  %v24457_v27 = vld [vmem:[#allocation26_spill] sm:$0xff]  ;;  %v24458_v49 = vld [vmem:[#allocation28_spill] sm:$0xff] }
0x15e4   :  { %18672 = vtanh.f32 %v6077_v24  ;;  %v6079_v22 = vadd.f32 %v11147_v44, %v6074_v47  ;;  %v24459_v44 = vld [vmem:[#allocation30_spill] sm:$0xff]  ;;  %v24460_v41 = vld [vmem:[#allocation32_spill] sm:$0xff] }
0x15e5   :  { %18674 = vtanh.f32 %v6078_v39  ;;  %v24461_v24 = vld [vmem:[#allocation34_spill] sm:$0xff]  ;;  %v24462_v47 = vld [vmem:[#allocation36_spill] sm:$0xff] }
0x15e6   :  { %18676 = vtanh.f32 %v6079_v22  ;;  %v24463_v42 = vld [vmem:[#allocation38_spill] sm:$0xff]  ;;  %v24464_v3 = vld [vmem:[#allocation40_spill] sm:$0xff]  ;;  %v24466_v22 = vld [vmem:[#allocation43_spill] sm:$0xff] }
0x15e7   :  { %v24465_v39 = vld [vmem:[#allocation42_spill] sm:$0xff] }
0x15ee   :  { %v21711_v57 = vpop.eup %18672 }
0x15ef   :  { %v18675_v43 = vpop.eup %18674 }
0x15f0   :  { %v21713_v54 = vpop.eup %18676  ;;  %6245 = vmatprep.mubr.f32.mxu1 %v18675_v43 }
0x15f1   :  { %6100 = vrot.lane.b32.xlu1 %v21713_v54, %s18755_s13  ;;  %6246 = vmatmul.mubr.f32.vlgmr.msra.gmra.mrb[44].mxu1 %v21711_v57 }
0x15f2   :  { %16447 = vmatpush1.bf16.msra.mxu1 %v18889_v35  ;;  %6316 = vmatprep.mubr.f32.mxu1 %v24161_v61 }
0x15f3   :  { %16449 = vmatprep.subr.bf16.mxu1 %v18904_v40 }
0x15f6   :  { %16451 = vmatpush1.bf16.msra.mxu1 %v18920_v45 }
0x15f7   :  { %16453 = vmatprep.subr.bf16.mxu1 %v18934_v50 }
0x15fa   :  { %16455 = vmatpush1.bf16.msra.mxu1 %v18952_v56 }
0x15fb   :  { %16457 = vmatprep.subr.bf16.mxu1 %v18964_v60 }
0x15fe   :  { %16459 = vmatpush1.bf16.msra.mxu1 %v18991_v7 }
0x15ff   :  { %16461 = vmatprep.subr.bf16.mxu1 %v24422_v51 }
0x1602   :  { %16463 = vmatpush1.bf16.msra.mxu1 %v24423_v16 }
0x1603   :  { %16465 = vmatprep.subr.bf16.mxu1 %v24424_v30 }
0x1606   :  { %16467 = vmatpush1.bf16.msra.mxu1 %v24425_v37 }
0x1607   :  { %16469 = vmatprep.subr.bf16.mxu1 %v24426_v1 }
0x160a   :  { %16471 = vmatpush1.bf16.msra.mxu1 %v24427_v6 }
0x160b   :  { %16473 = vmatprep.subr.bf16.mxu1 %v24428_v0 }
0x160e   :  { %16475 = vmatpush1.bf16.msra.mxu1 %v24429_v59 }
0x160f   :  { %16549 = vmatprep.subr.bf16.mxu1 %v24436_v17 }
0x1611   :  { %6317 = vmatmul.mubr.f32.vlgmr.msra.gmra.mrb[44].mxu1 %v21713_v54 }
0x1612   :  { %16551 = vmatpush1.bf16.msra.mxu1 %v18810_v8 }
0x1613   :  { %16553 = vmatprep.subr.bf16.mxu1 %v18812_v9 }
0x1616   :  { %16555 = vmatpush1.bf16.msra.mxu1 %v18828_v14 }
0x1617   :  { %16557 = vmatprep.subr.bf16.mxu1 %v18831_v15 }
0x161a   :  { %16559 = vmatpush1.bf16.msra.mxu1 %v18846_v20 }
0x161b   :  { %16561 = vmatprep.subr.bf16.mxu1 %v18849_v21 }
0x161e   :  { %16563 = vmatpush1.bf16.msra.mxu1 %v18870_v28 }
0x161f   :  { %16565 = vmatprep.subr.bf16.mxu1 %v18884_v33 }
0x1622   :  { %16567 = vmatpush1.bf16.msra.mxu1 %v24192_v52 }
0x1623   :  { %16569 = vmatprep.subr.bf16.mxu1 %v18929_v48 }
0x1626   :  { %16571 = vmatpush1.bf16.msra.mxu1 %v18958_v58 }
0x1627   :  { %16573 = vmatprep.subr.bf16.mxu1 %v18973_v63 }
0x162a   :  { %16575 = vmatpush1.bf16.msra.mxu1 %v24193_v62 }
0x162b   :  { %16577 = vmatprep.subr.bf16.mxu1 %v24437_v55 }
0x162e   :  { %16579 = vmatpush1.bf16.msra.mxu1 %v24438_v23 }
0x162f   :  { %16581 = vmatprep.subr.bf16.mxu1 %v24439_v36 }
0x1632   :  { %16583 = vmatpush1.bf16.msra.mxu1 %v24440_v13 }
0x1633   :  { %16585 = vmatprep.subr.bf16.mxu1 %v24441_v10 }
0x1636   :  { %16587 = vmatpush1.bf16.msra.mxu1 %v24442_v26 }
0x1637   :  { %16589 = vmatprep.subr.bf16.mxu1 %v24443_v18 }
0x163a   :  { %16591 = vmatpush1.bf16.msra.mxu1 %v24444_v4  ;;  %v11150_v4 = vld [vmem:[%s23607_s0 + $0x1a0] sm:$0xff] }
0x163b   :  { %16593 = vmatprep.subr.bf16.mxu1 %v24445_v34  ;;  %v11149_v34 = vld [vmem:[%s23607_s0 + $0x198] sm:$0xff] }
0x163e   :  { %16595 = vmatpush1.bf16.msra.mxu1 %v24446_v5  ;;  %v24479_v5 = vld [vmem:[#allocation55_spill] sm:$0xff] }
0x163f   :  { %16597 = vmatprep.subr.bf16.mxu1 %v24447_v38  ;;  %v24478_v38 = vld [vmem:[#allocation54_spill] sm:$0xff] }
0x1642   :  { %16599 = vmatpush1.bf16.msra.mxu1 %v24448_v32  ;;  %v24477_v32 = vld [vmem:[#allocation53_spill] sm:$0xff] }
0x1643   :  { %16601 = vmatprep.subr.bf16.mxu1 %v24449_v53  ;;  %v24475_v53 = vld [vmem:[#allocation51_spill] sm:$0xff] }
0x1646   :  { %16603 = vmatpush1.bf16.msra.mxu1 %v24450_v46  ;;  %v24474_v46 = vld [vmem:[#allocation50_spill] sm:$0xff] }
0x1647   :  { %16605 = vmatprep.subr.bf16.mxu1 %v24451_v2  ;;  %v24473_v2 = vld [vmem:[#allocation49_spill] sm:$0xff] }
0x164a   :  { %16607 = vmatpush1.bf16.msra.mxu1 %v24452_v12  ;;  %v24472_v12 = vld [vmem:[#allocation48_spill] sm:$0xff] }
0x164b   :  { %16609 = vmatprep.subr.bf16.mxu1 %v24453_v19  ;;  %v24471_v19 = vmov 0.0|0.0  }
0x164e   :  { %16611 = vmatpush1.bf16.msra.mxu1 %v24454_v25  ;;  %v24470_v25 = vld [vmem:[#allocation47_spill] sm:$0xff] }
0x164f   :  { %16613 = vmatprep.subr.bf16.mxu1 %v24455_v11  ;;  %v24469_v11 = vld [vmem:[#allocation46_spill] sm:$0xff] }
0x1663   :  { %v6101_v29 = vpop.permute.xlu1 %6100 }
0x1664   :  { %11148 = vmatmul.mubr.msk.f32.vlgmr.msra.gmra.mrb[12].mxu0 %vm1395_vm2, %v6101_v29  ;;  %v24468_v29 = vld [vmem:[#allocation45_spill] sm:$0xff] }
0x1665   :  { %16479 = vmatpush3.bf16.msra.mxu0 %v24456_v31  ;;  %6387 = vmatprep.mubr.f32.mxu0 %v18675_v43  ;;  %v24467_v43 = vld [vmem:[#allocation44_spill] sm:$0xff] }
0x1666   :  { %16481 = vmatprep.subr.bf16.mxu0 %v24457_v27 }
0x1669   :  { %16483 = vmatpush3.bf16.msra.mxu0 %v24458_v49 }
0x166a   :  { %16485 = vmatprep.subr.bf16.mxu0 %v24459_v44 }
0x166d   :  { %16487 = vmatpush3.bf16.msra.mxu0 %v24460_v41 }
0x166e   :  { %16489 = vmatprep.subr.bf16.mxu0 %v24461_v24 }
0x1671   :  { %16491 = vmatpush3.bf16.msra.mxu0 %v24462_v47 }
0x1672   :  { %16493 = vmatprep.subr.bf16.mxu0 %v24463_v42 }
0x1675   :  { %16495 = vmatpush3.bf16.msra.mxu0 %v24464_v3 }
0x1676   :  { %16497 = vmatprep.subr.bf16.mxu0 %v24465_v39 }
0x1679   :  { %16499 = vmatpush3.bf16.msra.mxu0 %v24466_v22 }
0x167a   :  { %16501 = vmatprep.subr.bf16.mxu0 %v24467_v43 }
0x167d   :  { %16503 = vmatpush3.bf16.msra.mxu0 %v24468_v29 }
0x167e   :  { %16505 = vmatprep.subr.bf16.mxu0 %v24469_v11 }
0x1681   :  { %16507 = vmatpush3.bf16.msra.mxu0 %v24470_v25 }
0x1682   :  { %16508 = vmatprep.subr.bf16.mxu0 %v24471_v19 }
0x1684   :  { %6388 = vmatmul.mubr.f32.vlgmr.msra.gmra.mrb[56].mxu0 %v21711_v57  ;;  %v24476_v57 = vld [vmem:[#allocation52_spill] sm:$0xff] }
0x1685   :  { %16510 = vmatpush3.bf16.msra.mxu0 %v24472_v12  ;;  %13301 = vmatprep.mubr.msk.f32.mxu0 %vm18754_vm0, %v24161_v61 }
0x1686   :  { %16511 = vmatprep.subr.bf16.mxu0 %v24471_v19 }
0x1689   :  { %16513 = vmatpush3.bf16.msra.mxu0 %v24473_v2 }
0x168a   :  { %16514 = vmatprep.subr.bf16.mxu0 %v24471_v19 }
0x168d   :  { %16516 = vmatpush3.bf16.msra.mxu0 %v24474_v46 }
0x168e   :  { %16517 = vmatprep.subr.bf16.mxu0 %v24471_v19 }
0x1691   :  { %16519 = vmatpush3.bf16.msra.mxu0 %v24475_v53 }
0x1692   :  { %16520 = vmatprep.subr.bf16.mxu0 %v24471_v19 }
0x1695   :  { %16522 = vmatpush3.bf16.msra.mxu0 %v24476_v57 }
0x1696   :  { %16523 = vmatprep.subr.bf16.mxu0 %v24471_v19 }
0x1699   :  { %16525 = vmatpush3.bf16.msra.mxu0 %v24477_v32 }
0x169a   :  { %16526 = vmatprep.subr.bf16.mxu0 %v24471_v19 }
0x169d   :  { %16528 = vmatpush3.bf16.msra.mxu0 %v24478_v38 }
0x169e   :  { %16529 = vmatprep.subr.bf16.mxu0 %v24471_v19 }
0x16a1   :  { %16531 = vmatpush3.bf16.msra.mxu0 %v24479_v5 }
0x16a4   :  { %13302 = vmatmul.mubr.f32.vlgmr.msra.gmra.mrb[58].mxu0 %v21713_v54  ;;  %v6470_v54 = vld [vmem:[%s23608_s2 + $0x708] sm:$0xff] }
0x16a5   :  { %6554 = vmatprep.mubr.f32.mxu0 %v24161_v61 }
0x16e4   :  { %v6318_v18 = vpop.f32.mrb[44].mxu1 }
0x16e5   :  { %v6463_v26 = vadd.f32 %v11149_v34, %v6318_v18  ;;  %v6320_v10 = vpop.f32.mrb[45].mxu1  ;;  %v6471_v18 = vld [vmem:[%s23608_s2 + $0x710] sm:$0xff]  ;;  %v6476_v34 = vld [vmem:[%s23608_s2 + $0x738] sm:$0xff] }
0x16e6   :  { %v6464_v13 = vadd.f32 %v11150_v4, %v6320_v10  ;;  %v6469_v10 = vld [vmem:[%s23608_s2 + $0x700] sm:$0xff]  ;;  %v6474_v4 = vld [vmem:[%s23608_s2 + $0x728] sm:$0xff] }
0x16e8   :  { %18678 = vtanh.f32 %v6464_v13  ;;  %v6472_v13 = vld [vmem:[%s23608_s2 + $0x718] sm:$0xff] }
0x16e9   :  { %18680 = vtanh.f32 %v6463_v26  ;;  %v16532_v26 = vpack.c.bf16 %v6472_v13, %v6470_v54  ;;  %v6473_v54 = vld [vmem:[%s23608_s2 + $0x720] sm:$0xff]  ;;  %v6475_v13 = vld [vmem:[%s23608_s2 + $0x730] sm:$0xff] }
0x16eb   :  { %16533 = vmatprep.subr.bf16.mxu0 %v16532_v26  ;;  %v6482_v26 = vld [vmem:[%s23608_s2 + $0x768] sm:$0xff] }
0x16f2   :  { %v21811_v36 = vpop.eup %18678 }
0x16f3   :  { %v21813_v23 = vpop.eup %18680  ;;  %6631 = vmatprep.mubr.f32.mxu1 %v21811_v36 }
0x16f4   :  { %6632 = vmatmul.mubr.f32.vlgmr.msra.gmra.mrb[46].mxu1 %v21813_v23 }
0x16f5   :  { %16615 = vmatpush1.bf16.msra.mxu1 %v18889_v35  ;;  %6702 = vmatprep.mubr.f32.mxu1 %v24161_v61 }
0x16f6   :  { %16617 = vmatprep.subr.bf16.mxu1 %v18904_v40 }
0x16f9   :  { %16619 = vmatpush1.bf16.msra.mxu1 %v18920_v45 }
0x16fa   :  { %16621 = vmatprep.subr.bf16.mxu1 %v18934_v50 }
0x16fd   :  { %16623 = vmatpush1.bf16.msra.mxu1 %v18952_v56 }
0x16fe   :  { %16625 = vmatprep.subr.bf16.mxu1 %v18964_v60 }
0x1701   :  { %16627 = vmatpush1.bf16.msra.mxu1 %v18991_v7 }
0x1702   :  { %16629 = vmatprep.subr.bf16.mxu1 %v24422_v51  ;;  %v6478_v51 = vld [vmem:[%s23608_s2 + $0x748] sm:$0xff] }
0x1705   :  { %16631 = vmatpush1.bf16.msra.mxu1 %v24423_v16  ;;  %v16536_v16 = vpack.c.bf16 %v6476_v34, %v6474_v4  ;;  %v6477_v34 = vld [vmem:[%s23608_s2 + $0x740] sm:$0xff] }
0x1706   :  { %16633 = vmatprep.subr.bf16.mxu1 %v24424_v30  ;;  %v16534_v30 = vpack.c.bf16 %v6471_v18, %v6469_v10  ;;  %v6480_v10 = vld [vmem:[%s23608_s2 + $0x758] sm:$0xff]  ;;  %v16538_v18 = vpack.c.bf16 %v6475_v13, %v6473_v54  ;;  %v6481_v54 = vld [vmem:[%s23608_s2 + $0x760] sm:$0xff]  ;;  %v6483_v13 = vld [vmem:[%s23608_s2 + $0x770] sm:$0xff] }
0x1707   :  { %v16540_v4 = vpack.c.bf16 %v6480_v10, %v6478_v51  ;;  %v24480_v10 = vld [vmem:[#allocation22_spill] sm:$0xff] }
0x1708   :  { %16535 = vmatpush1.bf16.msra.mxu0 %v16534_v30  ;;  %v6484_v30 = vld [vmem:[%s23608_s2 + $0x778] sm:$0xff] }
0x1709   :  { %16635 = vmatpush1.bf16.msra.mxu1 %v24425_v37  ;;  %16537 = vmatprep.subr.bf16.mxu0 %v16536_v16  ;;  %v6479_v37 = vld [vmem:[%s23608_s2 + $0x750] sm:$0xff]  ;;  %v16544_v16 = vpack.c.bf16 %v6484_v30, %v6482_v26 }
0x170a   :  { %16637 = vmatprep.subr.bf16.mxu1 %v24426_v1  ;;  %v16542_v51 = vpack.c.bf16 %v6479_v37, %v6477_v34  ;;  %v11151_v34 = vld [vmem:[%s23607_s0 + $0x1a8] sm:$0xff] }
0x170c   :  { %16539 = vmatpush1.bf16.msra.mxu0 %v16538_v18 }
0x170d   :  { %16639 = vmatpush1.bf16.msra.mxu1 %v24427_v6  ;;  %16541 = vmatprep.subr.bf16.mxu0 %v16540_v4  ;;  %v16546_v6 = vpack.c.bf16 %v6483_v13, %v6481_v54 }
0x170e   :  { %16641 = vmatprep.subr.bf16.mxu1 %v24428_v0 }
0x1710   :  { %16543 = vmatpush1.bf16.msra.mxu0 %v16542_v51 }
0x1711   :  { %16643 = vmatpush1.bf16.msra.mxu1 %v24429_v59  ;;  %16545 = vmatprep.subr.bf16.mxu0 %v16544_v16 }
0x1712   :  { %16813 = vmatprep.subr.bf16.mxu1 %v24480_v10 }
0x1714   :  { %16547 = vmatpush1.bf16.msra.mxu0 %v16546_v6  ;;  %v11154_v6 = vld [vmem:[%s23607_s0 + $0x1b8] sm:$0xff] }
0x1715   :  { %16645 = vmatprep.subr.bf16.mxu0 %v24480_v10 }
0x1757   :  { %v12065_v37 = vpop.f32.mrb[56].mxu0 }
0x1758   :  { %v12066_v18 = vpop.f32.mrb[57].mxu0 }
0x1759   :  { %v12067_v4 = vadd.f32 %v12066_v18, %v12065_v37  ;;  %v6858_v37 = vld [vmem:[%s23608_s2 + $0x798] sm:$0xff]  ;;  %v6855_v18 = vld [vmem:[%s23608_s2 + $0x780] sm:$0xff] }
0x1777   :  { %v6459_v26 = vpop.f32.mrb[58].mxu0 }
0x1778   :  { %v6460_v30 = vadd.f32 %v12067_v4, %v6459_v26  ;;  %v13303_v0 = vpop.f32.mrb[59].mxu0  ;;  %v6860_v26 = vld [vmem:[%s23608_s2 + $0x7a8] sm:$0xff] }
0x1779   :  { %v11153_v0 = vld [vmem:[%s23607_s0 + $0x1b0] sm:$0xff] }
0x177a   :  { %v6465_v1 = vadd.f32 %v11151_v34, %v6460_v30  ;;  %v6857_v34 = vld [vmem:[%s23608_s2 + $0x790] sm:$0xff]  ;;  %v6862_v30 = vld [vmem:[%s23608_s2 + $0x7b8] sm:$0xff] }
0x177c   :  { %18682 = vtanh.f32 %v6465_v1 }
0x1786   :  { %v18683_v59 = vpop.eup %18682 }
0x1787   :  { %6486 = vrot.lane.b32.xlu0 %v18683_v59, %s18755_s13  ;;  %6703 = vmatmul.mubr.f32.vlgmr.msra.gmra.mrb[46].mxu1 %v18683_v59 }
0x1788   :  { %16815 = vmatpush3.bf16.msra.mxu1 %v24456_v31 }
0x1789   :  { %16817 = vmatprep.subr.bf16.mxu1 %v24457_v27 }
0x178c   :  { %16819 = vmatpush3.bf16.msra.mxu1 %v24458_v49 }
0x178d   :  { %16821 = vmatprep.subr.bf16.mxu1 %v24459_v44 }
0x1790   :  { %16823 = vmatpush3.bf16.msra.mxu1 %v24460_v41 }
0x1791   :  { %16825 = vmatprep.subr.bf16.mxu1 %v24461_v24 }
0x1794   :  { %16827 = vmatpush3.bf16.msra.mxu1 %v24462_v47 }
0x1795   :  { %16829 = vmatprep.subr.bf16.mxu1 %v24463_v42 }
0x1798   :  { %16831 = vmatpush3.bf16.msra.mxu1 %v24464_v3 }
0x1799   :  { %16833 = vmatprep.subr.bf16.mxu1 %v24465_v39 }
0x179c   :  { %16835 = vmatpush3.bf16.msra.mxu1 %v24466_v22 }
0x179d   :  { %16837 = vmatprep.subr.bf16.mxu1 %v24467_v43 }
0x17a0   :  { %16839 = vmatpush3.bf16.msra.mxu1 %v24468_v29 }
0x17a1   :  { %16841 = vmatprep.subr.bf16.mxu1 %v24469_v11 }
0x17a4   :  { %16843 = vmatpush3.bf16.msra.mxu1 %v24470_v25 }
0x17a5   :  { %16844 = vmatprep.subr.bf16.mxu1 %v24471_v19 }
0x17f9   :  { %v6487_v1 = vpop.permute.xlu0 %6486 }
0x17fa   :  { %11152 = vmatmul.mubr.msk.f32.vlgmr.msra.gmra.mrb[12].mxu0 %vm1395_vm2, %v6487_v1  ;;  %v16702_v1 = vpack.c.bf16 %v6857_v34, %v6855_v18  ;;  %v6865_v18 = vld [vmem:[%s23608_s2 + $0x7d0] sm:$0xff]  ;;  %v6870_v34 = vld [vmem:[%s23608_s2 + $0x7f8] sm:$0xff] }
0x17fb   :  { %16647 = vmatpush3.bf16.msra.mxu0 %v24456_v31  ;;  %6773 = vmatprep.mubr.f32.mxu0 %v21811_v36 }
0x17fc   :  { %16649 = vmatprep.subr.bf16.mxu0 %v24457_v27 }
0x17ff   :  { %16651 = vmatpush3.bf16.msra.mxu0 %v24458_v49 }
0x1800   :  { %16653 = vmatprep.subr.bf16.mxu0 %v24459_v44 }
0x1803   :  { %16655 = vmatpush3.bf16.msra.mxu0 %v24460_v41 }
0x1804   :  { %16657 = vmatprep.subr.bf16.mxu0 %v24461_v24 }
0x1807   :  { %16659 = vmatpush3.bf16.msra.mxu0 %v24462_v47 }
0x1808   :  { %16661 = vmatprep.subr.bf16.mxu0 %v24463_v42 }
0x180b   :  { %16663 = vmatpush3.bf16.msra.mxu0 %v24464_v3 }
0x180c   :  { %16665 = vmatprep.subr.bf16.mxu0 %v24465_v39 }
0x180f   :  { %16667 = vmatpush3.bf16.msra.mxu0 %v24466_v22 }
0x1810   :  { %16669 = vmatprep.subr.bf16.mxu0 %v24467_v43 }
0x1813   :  { %16671 = vmatpush3.bf16.msra.mxu0 %v24468_v29 }
0x1814   :  { %16673 = vmatprep.subr.bf16.mxu0 %v24469_v11 }
0x1817   :  { %16675 = vmatpush3.bf16.msra.mxu0 %v24470_v25 }
0x1818   :  { %16676 = vmatprep.subr.bf16.mxu0 %v24471_v19 }
0x181a   :  { %6774 = vmatmul.mubr.f32.vlgmr.msra.gmra.mrb[60].mxu0 %v21813_v23 }
0x181b   :  { %16678 = vmatpush3.bf16.msra.mxu0 %v24472_v12  ;;  %13336 = vmatprep.mubr.msk.f32.mxu0 %vm18754_vm0, %v24161_v61 }
0x181c   :  { %16679 = vmatprep.subr.bf16.mxu0 %v24471_v19 }
0x181f   :  { %16681 = vmatpush3.bf16.msra.mxu0 %v24473_v2 }
0x1820   :  { %16682 = vmatprep.subr.bf16.mxu0 %v24471_v19 }
0x1823   :  { %16684 = vmatpush3.bf16.msra.mxu0 %v24474_v46 }
0x1824   :  { %16685 = vmatprep.subr.bf16.mxu0 %v24471_v19 }
0x1827   :  { %16687 = vmatpush3.bf16.msra.mxu0 %v24475_v53 }
0x1828   :  { %16688 = vmatprep.subr.bf16.mxu0 %v24471_v19 }
0x182b   :  { %16690 = vmatpush3.bf16.msra.mxu0 %v24476_v57 }
0x182c   :  { %16691 = vmatprep.subr.bf16.mxu0 %v24471_v19 }
0x182f   :  { %16693 = vmatpush3.bf16.msra.mxu0 %v24477_v32 }
0x1830   :  { %16694 = vmatprep.subr.bf16.mxu0 %v24471_v19 }
0x1833   :  { %16696 = vmatpush3.bf16.msra.mxu0 %v24478_v38 }
0x1834   :  { %16697 = vmatprep.subr.bf16.mxu0 %v24471_v19 }
0x1837   :  { %16699 = vmatpush3.bf16.msra.mxu0 %v24479_v5 }
0x183a   :  { %13337 = vmatmul.mubr.f32.vlgmr.msra.gmra.mrb[62].mxu0 %v18683_v59  ;;  %v6856_v59 = vld [vmem:[%s23608_s2 + $0x788] sm:$0xff] }
0x183b   :  { %6940 = vmatprep.mubr.f32.mxu0 %v24161_v61  ;;  %v16700_v4 = vpack.c.bf16 %v6858_v37, %v6856_v59  ;;  %v6863_v37 = vld [vmem:[%s23608_s2 + $0x7c0] sm:$0xff] }
0x183d   :  { %16701 = vmatprep.subr.bf16.mxu0 %v16700_v4  ;;  %v6868_v4 = vld [vmem:[%s23608_s2 + $0x7e8] sm:$0xff] }
0x183e   :  { %16703 = vmatpush1.bf16.msra.mxu0 %v16702_v1  ;;  %v6867_v1 = vld [vmem:[%s23608_s2 + $0x7e0] sm:$0xff] }
0x185a   :  { %v6704_v23 = vpop.f32.mrb[46].mxu1 }
0x185b   :  { %v6849_v36 = vadd.f32 %v11153_v0, %v6704_v23  ;;  %v6706_v51 = vpop.f32.mrb[47].mxu1  ;;  %v16704_v0 = vpack.c.bf16 %v6862_v30, %v6860_v26  ;;  %v6861_v23 = vld [vmem:[%s23608_s2 + $0x7b0] sm:$0xff]  ;;  %v16710_v26 = vpack.c.bf16 %v6865_v18, %v6863_v37  ;;  %v16712_v30 = vpack.c.bf16 %v6870_v34, %v6868_v4 }
0x185c   :  { %v6850_v16 = vadd.f32 %v11154_v6, %v6706_v51  ;;  %v6859_v6 = vld [vmem:[%s23608_s2 + $0x7a0] sm:$0xff]  ;;  %v6866_v51 = vld [vmem:[%s23608_s2 + $0x7d8] sm:$0xff] }
0x185d   :  { %16705 = vmatprep.subr.bf16.mxu0 %v16704_v0  ;;  %v6869_v0 = vld [vmem:[%s23608_s2 + $0x7f0] sm:$0xff] }
0x185e   :  { %18684 = vtanh.f32 %v6850_v16  ;;  %v16706_v16 = vpack.c.bf16 %v6861_v23, %v6859_v6  ;;  %v16714_v6 = vpack.c.bf16 %v6869_v0, %v6867_v1 }
0x185f   :  { %18686 = vtanh.f32 %v6849_v36  ;;  %v6864_v36 = vld [vmem:[%s23608_s2 + $0x7c8] sm:$0xff] }
0x1860   :  { %v16708_v59 = vpack.c.bf16 %v6866_v51, %v6864_v36  ;;  %16707 = vmatpush1.bf16.msra.mxu0 %v16706_v16  ;;  %v11155_v16 = vld [vmem:[%s23607_s0 + $0x1c0] sm:$0xff] }
0x1862   :  { %16709 = vmatprep.subr.bf16.mxu0 %v16708_v59 }
0x1864   :  { %16711 = vmatpush1.bf16.msra.mxu0 %v16710_v26  ;;  %v24481_v26 = vld [vmem:[#allocation9_spill] sm:$0xff] }
0x1865   :  { %16713 = vmatprep.subr.bf16.mxu0 %v16712_v30  ;;  %v24482_v30 = vld [vmem:[#allocation11_spill] sm:$0xff] }
0x1868   :  { %v21946_v54 = vpop.eup %18684  ;;  %16715 = vmatpush1.bf16.msra.mxu0 %v16714_v6  ;;  %v24483_v6 = vld [vmem:[#allocation13_spill] sm:$0xff] }
0x1869   :  { %v21948_v13 = vpop.eup %18686  ;;  %7159 = vmatprep.mubr.f32.mxu1 %v21946_v54  ;;  %16717 = vmatprep.subr.bf16.mxu0 %v24436_v17 }
0x186a   :  { %7160 = vmatmul.mubr.f32.vlgmr.msra.gmra.mrb[48].mxu1 %v21948_v13 }
0x186b   :  { %16846 = vmatpush3.bf16.msra.mxu1 %v24472_v12  ;;  %13371 = vmatprep.mubr.msk.f32.mxu1 %vm18754_vm0, %v24161_v61 }
0x186c   :  { %16847 = vmatprep.subr.bf16.mxu1 %v24471_v19 }
0x186f   :  { %16849 = vmatpush3.bf16.msra.mxu1 %v24473_v2 }
0x1870   :  { %16850 = vmatprep.subr.bf16.mxu1 %v24471_v19 }
0x1873   :  { %16852 = vmatpush3.bf16.msra.mxu1 %v24474_v46 }
0x1874   :  { %16853 = vmatprep.subr.bf16.mxu1 %v24471_v19 }
0x1877   :  { %16855 = vmatpush3.bf16.msra.mxu1 %v24475_v53  ;;  %v24498_v53 = vld [vmem:[#allocation3_spill] sm:$0xff] }
0x1878   :  { %16856 = vmatprep.subr.bf16.mxu1 %v24471_v19 }
0x187b   :  { %16858 = vmatpush3.bf16.msra.mxu1 %v24476_v57  ;;  %v24497_v57 = vld [vmem:[#allocation41_spill] sm:$0xff] }
0x187c   :  { %16859 = vmatprep.subr.bf16.mxu1 %v24471_v19 }
0x187f   :  { %16861 = vmatpush3.bf16.msra.mxu1 %v24477_v32  ;;  %v24496_v32 = vld [vmem:[#allocation39_spill] sm:$0xff] }
0x1880   :  { %16862 = vmatprep.subr.bf16.mxu1 %v24471_v19 }
0x1883   :  { %16864 = vmatpush3.bf16.msra.mxu1 %v24478_v38  ;;  %v24495_v38 = vld [vmem:[#allocation37_spill] sm:$0xff] }
0x1884   :  { %16865 = vmatprep.subr.bf16.mxu1 %v24471_v19 }
0x1887   :  { %16867 = vmatpush3.bf16.msra.mxu1 %v24479_v5  ;;  %v24492_v5 = vld [vmem:[#allocation31_spill] sm:$0xff] }
0x1888   :  { %16885 = vmatprep.subr.bf16.mxu1 %v24436_v17  ;;  %v24491_v17 = vld [vmem:[#allocation29_spill] sm:$0xff] }
0x18ed   :  { %v12117_v23 = vpop.f32.mrb[60].mxu0 }
0x18ee   :  { %v12118_v36 = vpop.f32.mrb[61].mxu0 }
0x18ef   :  { %v12119_v51 = vadd.f32 %v12118_v36, %v12117_v23  ;;  %v24484_v36 = vld [vmem:[#allocation15_spill] sm:$0xff] }
0x190d   :  { %v6845_v59 = vpop.f32.mrb[62].mxu0 }
0x190e   :  { %v6846_v37 = vadd.f32 %v12119_v51, %v6845_v59  ;;  %v13338_v18 = vpop.f32.mrb[63].mxu0  ;;  %v24485_v51 = vld [vmem:[#allocation17_spill] sm:$0xff] }
0x190f   :  { %v24487_v59 = vld [vmem:[#allocation21_spill] sm:$0xff] }
0x1910   :  { %v6851_v4 = vadd.f32 %v11155_v16, %v6846_v37  ;;  %v24486_v16 = vld [vmem:[#allocation19_spill] sm:$0xff]  ;;  %v24489_v18 = vld [vmem:[#allocation25_spill] sm:$0xff] }
0x1911   :  { %v24488_v37 = vld [vmem:[#allocation23_spill] sm:$0xff] }
0x1912   :  { %18688 = vtanh.f32 %v6851_v4  ;;  %v24490_v4 = vld [vmem:[#allocation27_spill] sm:$0xff] }
0x191c   :  { %v22022_v34 = vpop.eup %18688 }
0x191d   :  { %6872 = vrot.lane.b32.xlu1 %v22022_v34, %s18755_s13  ;;  %13372 = vmatmul.mubr.f32.vlgmr.msra.gmra.mrb[50].mxu1 %v22022_v34 }
0x191e   :  { %16887 = vmatpush1.bf16.msra.mxu1 %v18810_v8 }
0x191f   :  { %16889 = vmatprep.subr.bf16.mxu1 %v18812_v9 }
0x1922   :  { %16891 = vmatpush1.bf16.msra.mxu1 %v18828_v14 }
0x1923   :  { %16893 = vmatprep.subr.bf16.mxu1 %v18831_v15 }
0x1926   :  { %16895 = vmatpush1.bf16.msra.mxu1 %v18846_v20 }
0x1927   :  { %16897 = vmatprep.subr.bf16.mxu1 %v18849_v21 }
0x192a   :  { %16899 = vmatpush1.bf16.msra.mxu1 %v18870_v28 }
0x192b   :  { %16901 = vmatprep.subr.bf16.mxu1 %v18884_v33 }
0x192e   :  { %16903 = vmatpush1.bf16.msra.mxu1 %v24192_v52 }
0x192f   :  { %16905 = vmatprep.subr.bf16.mxu1 %v18929_v48 }
0x1932   :  { %16907 = vmatpush1.bf16.msra.mxu1 %v18958_v58 }
0x1933   :  { %16909 = vmatprep.subr.bf16.mxu1 %v18973_v63 }
0x1936   :  { %16911 = vmatpush1.bf16.msra.mxu1 %v24193_v62 }
0x1937   :  { %16913 = vmatprep.subr.bf16.mxu1 %v24437_v55 }
0x193a   :  { %16915 = vmatpush1.bf16.msra.mxu1 %v24481_v26 }
0x193b   :  { %16917 = vmatprep.subr.bf16.mxu1 %v24482_v30 }
0x193d   :  { %v12169_v1 = vpop.f32.mrb[48].mxu1 }
0x193e   :  { %v12170_v0 = vpop.f32.mrb[49].mxu1  ;;  %16919 = vmatpush1.bf16.msra.mxu1 %v24483_v6 }
0x193f   :  { %v22044_v23 = vadd.f32 %v12170_v0, %v12169_v1  ;;  %16921 = vmatprep.subr.bf16.mxu1 %v24484_v36  ;;  %v24493_v1 = vld [vmem:[#allocation33_spill] sm:$0xff]  ;;  %v24494_v0 = vld [vmem:[#allocation35_spill] sm:$0xff] }
0x1942   :  { %16923 = vmatpush1.bf16.msra.mxu1 %v24485_v51 }
0x1943   :  { %16925 = vmatprep.subr.bf16.mxu1 %v24486_v16 }
0x1946   :  { %16927 = vmatpush1.bf16.msra.mxu1 %v24487_v59 }
0x1947   :  { %16929 = vmatprep.subr.bf16.mxu1 %v24488_v37 }
0x194a   :  { %16931 = vmatpush1.bf16.msra.mxu1 %v24489_v18 }
0x194b   :  { %16933 = vmatprep.subr.bf16.mxu1 %v24490_v4 }
0x194e   :  { %16935 = vmatpush1.bf16.msra.mxu1 %v24491_v17 }
0x194f   :  { %16937 = vmatprep.subr.bf16.mxu1 %v24492_v5 }
0x1952   :  { %16939 = vmatpush1.bf16.msra.mxu1 %v24493_v1 }
0x1953   :  { %16941 = vmatprep.subr.bf16.mxu1 %v24494_v0 }
0x1956   :  { %16943 = vmatpush1.bf16.msra.mxu1 %v24495_v38 }
0x1957   :  { %16945 = vmatprep.subr.bf16.mxu1 %v24496_v32 }
0x195a   :  { %16947 = vmatpush1.bf16.msra.mxu1 %v24497_v57 }
0x195b   :  { %16949 = vmatprep.subr.bf16.mxu1 %v24498_v53 }
0x198f   :  { %v6873_v46 = vpop.permute.xlu1 %6872 }
0x1990   :  { %11156 = vmatmul.mubr.msk.f32.vlgmr.msra.gmra.mrb[12].mxu0 %vm1395_vm2, %v6873_v46  ;;  %v24499_v46 = vld [vmem:[#allocation6_spill] sm:$0xff] }
0x1991   :  { %16719 = vmatpush1.bf16.msra.mxu0 %v18810_v8  ;;  %7017 = vmatprep.mubr.f32.mxu0 %v21946_v54  ;;  %v24500_v54 = vld [vmem:[#allocation8_spill] sm:$0xff] }
0x1992   :  { %16721 = vmatprep.subr.bf16.mxu0 %v18812_v9 }
0x1995   :  { %16723 = vmatpush1.bf16.msra.mxu0 %v18828_v14 }
0x1996   :  { %16725 = vmatprep.subr.bf16.mxu0 %v18831_v15 }
0x1999   :  { %16727 = vmatpush1.bf16.msra.mxu0 %v18846_v20 }
0x199a   :  { %16729 = vmatprep.subr.bf16.mxu0 %v18849_v21 }
0x199d   :  { %16731 = vmatpush1.bf16.msra.mxu0 %v18870_v28 }
0x199e   :  { %16733 = vmatprep.subr.bf16.mxu0 %v18884_v33 }
0x19a1   :  { %16735 = vmatpush1.bf16.msra.mxu0 %v24192_v52 }
0x19a2   :  { %16737 = vmatprep.subr.bf16.mxu0 %v18929_v48 }
0x19a5   :  { %16739 = vmatpush1.bf16.msra.mxu0 %v18958_v58 }
0x19a6   :  { %16741 = vmatprep.subr.bf16.mxu0 %v18973_v63 }
0x19a9   :  { %16743 = vmatpush1.bf16.msra.mxu0 %v24193_v62 }
0x19aa   :  { %16745 = vmatprep.subr.bf16.mxu0 %v24437_v55 }
0x19ad   :  { %16747 = vmatpush1.bf16.msra.mxu0 %v24481_v26  ;;  %v7249_v26 = vld [vmem:[%s23608_s2 + $0x840] sm:$0xff] }
0x19ae   :  { %16749 = vmatprep.subr.bf16.mxu0 %v24482_v30 }
0x19b1   :  { %16751 = vmatpush1.bf16.msra.mxu0 %v24483_v6  ;;  %v7252_v6 = vld [vmem:[%s23608_s2 + $0x858] sm:$0xff] }
0x19b2   :  { %16753 = vmatprep.subr.bf16.mxu0 %v24484_v36  ;;  %v7250_v36 = vld [vmem:[%s23608_s2 + $0x848] sm:$0xff] }
0x19b3   :  { %v16876_v30 = vpack.c.bf16 %v7252_v6, %v7250_v36 }
0x19b5   :  { %16755 = vmatpush1.bf16.msra.mxu0 %v24485_v51  ;;  %v7247_v51 = vld [vmem:[%s23608_s2 + $0x830] sm:$0xff] }
0x19b6   :  { %16757 = vmatprep.subr.bf16.mxu0 %v24486_v16 }
0x19b9   :  { %16759 = vmatpush1.bf16.msra.mxu0 %v24487_v59  ;;  %v24506_v59 = vld [vmem:[#allocation20_spill] sm:$0xff] }
0x19ba   :  { %16761 = vmatprep.subr.bf16.mxu0 %v24488_v37  ;;  %v7248_v37 = vld [vmem:[%s23608_s2 + $0x838] sm:$0xff] }
0x19bd   :  { %16763 = vmatpush1.bf16.msra.mxu0 %v24489_v18  ;;  %v7246_v18 = vld [vmem:[%s23608_s2 + $0x828] sm:$0xff] }
0x19be   :  { %16765 = vmatprep.subr.bf16.mxu0 %v24490_v4  ;;  %v7243_v4 = vld [vmem:[%s23608_s2 + $0x810] sm:$0xff] }
0x19c1   :  { %16767 = vmatpush1.bf16.msra.mxu0 %v24491_v17  ;;  %v7241_v17 = vld [vmem:[%s23608_s2 + $0x800] sm:$0xff] }
0x19c2   :  { %16769 = vmatprep.subr.bf16.mxu0 %v24492_v5  ;;  %v16870_v16 = vpack.c.bf16 %v7243_v4, %v7241_v17 }
0x19c5   :  { %16771 = vmatpush1.bf16.msra.mxu0 %v24493_v1  ;;  %v24505_v1 = vld [vmem:[#allocation18_spill] sm:$0xff] }
0x19c6   :  { %16773 = vmatprep.subr.bf16.mxu0 %v24494_v0  ;;  %v24504_v0 = vld [vmem:[#allocation16_spill] sm:$0xff] }
0x19c9   :  { %16775 = vmatpush1.bf16.msra.mxu0 %v24495_v38  ;;  %v7244_v38 = vld [vmem:[%s23608_s2 + $0x818] sm:$0xff] }
0x19ca   :  { %16777 = vmatprep.subr.bf16.mxu0 %v24496_v32  ;;  %v7242_v32 = vld [vmem:[%s23608_s2 + $0x808] sm:$0xff] }
0x19cb   :  { %v16868_v5 = vpack.c.bf16 %v7244_v38, %v7242_v32  ;;  %v16872_v32 = vpack.c.bf16 %v7248_v37, %v7246_v18  ;;  %v7245_v38 = vld [vmem:[%s23608_s2 + $0x820] sm:$0xff] }
0x19cc   :  { %v16874_v4 = vpack.c.bf16 %v7247_v51, %v7245_v38  ;;  %v7256_v51 = vld [vmem:[%s23608_s2 + $0x878] sm:$0xff] }
0x19cd   :  { %16779 = vmatpush1.bf16.msra.mxu0 %v24497_v57  ;;  %v24503_v57 = vld [vmem:[#allocation14_spill] sm:$0xff] }
0x19ce   :  { %16781 = vmatprep.subr.bf16.mxu0 %v24498_v53  ;;  %v24502_v53 = vld [vmem:[#allocation12_spill] sm:$0xff] }
0x19d0   :  { %7018 = vmatmul.mubr.f32.vlgmr.msra.gmra.mrb[64].mxu0 %v21948_v13  ;;  %v24501_v13 = vld [vmem:[#allocation10_spill] sm:$0xff] }
0x19d1   :  { %16783 = vmatpush1.bf16.msra.mxu0 %v18889_v35  ;;  %7088 = vmatprep.mubr.f32.mxu0 %v24161_v61 }
0x19d2   :  { %16785 = vmatprep.subr.bf16.mxu0 %v18904_v40 }
0x19d5   :  { %16787 = vmatpush1.bf16.msra.mxu0 %v18920_v45 }
0x19d6   :  { %16789 = vmatprep.subr.bf16.mxu0 %v18934_v50 }
0x19d9   :  { %16791 = vmatpush1.bf16.msra.mxu0 %v18952_v56 }
0x19da   :  { %16793 = vmatprep.subr.bf16.mxu0 %v18964_v60 }
0x19dd   :  { %16795 = vmatpush1.bf16.msra.mxu0 %v18991_v7 }
0x19de   :  { %16797 = vmatprep.subr.bf16.mxu0 %v24499_v46 }
0x19e1   :  { %16799 = vmatpush1.bf16.msra.mxu0 %v24500_v54 }
0x19e2   :  { %16801 = vmatprep.subr.bf16.mxu0 %v24501_v13 }
0x19e5   :  { %16803 = vmatpush1.bf16.msra.mxu0 %v24502_v53 }
0x19e6   :  { %16805 = vmatprep.subr.bf16.mxu0 %v24503_v57 }
0x19e9   :  { %16807 = vmatpush1.bf16.msra.mxu0 %v24504_v0 }
0x19ea   :  { %16809 = vmatprep.subr.bf16.mxu0 %v24505_v1 }
0x19ed   :  { %16811 = vmatpush1.bf16.msra.mxu0 %v24506_v59 }
0x19ee   :  { %16869 = vmatprep.subr.bf16.mxu0 %v16868_v5  ;;  %v11159_v5 = vld [vmem:[%s23607_s0 + $0x1d8] sm:$0xff] }
0x19f0   :  { %7089 = vmatmul.mubr.f32.vlgmr.msra.gmra.mrb[64].mxu0 %v22022_v34  ;;  %v7231_v17 = vpop.f32.mrb[50].mxu1  ;;  %v7251_v34 = vld [vmem:[%s23608_s2 + $0x850] sm:$0xff] }
0x19f1   :  { %v7232_v37 = vadd.f32 %v22044_v23, %v7231_v17  ;;  %v13373_v18 = vpop.f32.mrb[51].mxu1  ;;  %16871 = vmatpush1.bf16.msra.mxu0 %v16870_v16  ;;  %7326 = vmatprep.mubr.f32.mxu0 %v24161_v61  ;;  %v7254_v23 = vld [vmem:[%s23608_s2 + $0x868] sm:$0xff]  ;;  %v16878_v6 = vpack.c.bf16 %v7251_v34, %v7249_v26  ;;  %v7253_v16 = vld [vmem:[%s23608_s2 + $0x860] sm:$0xff] }
0x19f2   :  { %16873 = vmatprep.subr.bf16.mxu0 %v16872_v32  ;;  %v16880_v36 = vpack.c.bf16 %v7256_v51, %v7254_v23  ;;  %v7255_v32 = vld [vmem:[%s23608_s2 + $0x870] sm:$0xff]  ;;  %v11157_v26 = vld [vmem:[%s23607_s0 + $0x1c8] sm:$0xff]  ;;  %v24507_v51 = vld [vmem:[#allocation50_spill] sm:$0xff] }
0x19f3   :  { %v7237_v55 = vadd.f32 %v11159_v5, %v7232_v37  ;;  %v16882_v38 = vpack.c.bf16 %v7255_v32, %v7253_v16  ;;  %v24510_v16 = vld [vmem:[#allocation53_spill] sm:$0xff]  ;;  %v24511_v32 = vld [vmem:[#allocation54_spill] sm:$0xff] }
0x19f5   :  { %18690 = vtanh.f32 %v7237_v55  ;;  %16875 = vmatpush1.bf16.msra.mxu0 %v16874_v4 }
0x19f6   :  { %16877 = vmatprep.subr.bf16.mxu0 %v16876_v30  ;;  %v11158_v30 = vld [vmem:[%s23607_s0 + $0x1d0] sm:$0xff] }
0x19f9   :  { %16879 = vmatpush1.bf16.msra.mxu0 %v16878_v6  ;;  %v24508_v6 = vld [vmem:[#allocation51_spill] sm:$0xff] }
0x19fa   :  { %16881 = vmatprep.subr.bf16.mxu0 %v16880_v36  ;;  %v24509_v36 = vld [vmem:[#allocation52_spill] sm:$0xff] }
0x19fd   :  { %16883 = vmatpush1.bf16.msra.mxu0 %v16882_v38  ;;  %v24512_v38 = vld [vmem:[#allocation55_spill] sm:$0xff] }
0x19fe   :  { %16981 = vmatprep.subr.bf16.mxu0 %v24480_v10 }
0x19ff   :  { %v22167_v5 = vpop.eup %18690 }
0x1a00   :  { %7258 = vrot.lane.b32.xlu0 %v22167_v5, %s18755_s13 }
0x1a72   :  { %v7259_v55 = vpop.permute.xlu0 %7258 }
0x1a73   :  { %11160 = vmatmul.mubr.msk.f32.vlgmr.msra.gmra.mrb[12].mxu0 %vm1395_vm2, %v7259_v55  ;;  %v24513_v55 = vld [vmem:[#allocation2_spill] sm:$0xff] }
0x1a74   :  { %16983 = vmatpush3.bf16.msra.mxu0 %v24456_v31 }
0x1a75   :  { %16985 = vmatprep.subr.bf16.mxu0 %v24457_v27 }
0x1a78   :  { %16987 = vmatpush3.bf16.msra.mxu0 %v24458_v49  ;;  %v7642_v49 = vld [vmem:[%s23608_s2 + $0x8f8] sm:$0xff] }
0x1a79   :  { %16989 = vmatprep.subr.bf16.mxu0 %v24459_v44  ;;  %v7638_v44 = vld [vmem:[%s23608_s2 + $0x8d8] sm:$0xff] }
0x1a7c   :  { %16991 = vmatpush3.bf16.msra.mxu0 %v24460_v41  ;;  %v7631_v41 = vld [vmem:[%s23608_s2 + $0x8a0] sm:$0xff] }
0x1a7d   :  { %16993 = vmatprep.subr.bf16.mxu0 %v24461_v24 }
0x1a80   :  { %16995 = vmatpush3.bf16.msra.mxu0 %v24462_v47 }
0x1a81   :  { %16997 = vmatprep.subr.bf16.mxu0 %v24463_v42  ;;  %v7634_v42 = vld [vmem:[%s23608_s2 + $0x8b8] sm:$0xff] }
0x1a84   :  { %16999 = vmatpush3.bf16.msra.mxu0 %v24464_v3  ;;  %v7632_v3 = vld [vmem:[%s23608_s2 + $0x8a8] sm:$0xff] }
0x1a85   :  { %17001 = vmatprep.subr.bf16.mxu0 %v24465_v39  ;;  %v7629_v39 = vld [vmem:[%s23608_s2 + $0x890] sm:$0xff]  ;;  %v17040_v24 = vpack.c.bf16 %v7634_v42, %v7632_v3  ;;  %v7635_v3 = vld [vmem:[%s23608_s2 + $0x8c0] sm:$0xff] }
0x1a88   :  { %17003 = vmatpush3.bf16.msra.mxu0 %v24466_v22 }
0x1a89   :  { %17005 = vmatprep.subr.bf16.mxu0 %v24467_v43  ;;  %v7627_v43 = vld [vmem:[%s23608_s2 + $0x880] sm:$0xff] }
0x1a8a   :  { %v17038_v47 = vpack.c.bf16 %v7629_v39, %v7627_v43  ;;  %v7637_v43 = vld [vmem:[%s23608_s2 + $0x8d0] sm:$0xff] }
0x1a8c   :  { %17007 = vmatpush3.bf16.msra.mxu0 %v24468_v29  ;;  %v7630_v29 = vld [vmem:[%s23608_s2 + $0x898] sm:$0xff] }
0x1a8d   :  { %17009 = vmatprep.subr.bf16.mxu0 %v24469_v11  ;;  %v7628_v11 = vld [vmem:[%s23608_s2 + $0x888] sm:$0xff] }
0x1a8e   :  { %v17036_v22 = vpack.c.bf16 %v7630_v29, %v7628_v11  ;;  %v7633_v11 = vld [vmem:[%s23608_s2 + $0x8b0] sm:$0xff]  ;;  %v7636_v29 = vld [vmem:[%s23608_s2 + $0x8c8] sm:$0xff] }
0x1a8f   :  { %v17042_v39 = vpack.c.bf16 %v7633_v11, %v7631_v41  ;;  %v17044_v42 = vpack.c.bf16 %v7638_v44, %v7636_v29  ;;  %v17046_v41 = vpack.c.bf16 %v7637_v43, %v7635_v3  ;;  %v11163_v43 = vld [vmem:[%s23607_s0 + $0x1f0] sm:$0xff] }
0x1a90   :  { %17011 = vmatpush3.bf16.msra.mxu0 %v24470_v25  ;;  %v24532_v25 = vld [vmem:[#allocation3_spill] sm:$0xff] }
0x1a91   :  { %17012 = vmatprep.subr.bf16.mxu0 %v24471_v19 }
0x1ac3   :  { %v7090_v17 = vpop.f32.mrb[64].mxu0 }
0x1ac4   :  { %v7235_v37 = vadd.f32 %v11157_v26, %v7090_v17  ;;  %v7092_v18 = vpop.f32.mrb[65].mxu0  ;;  %v24515_v26 = vld [vmem:[#allocation9_spill] sm:$0xff] }
0x1ac5   :  { %v7236_v4 = vadd.f32 %v11158_v30, %v7092_v18  ;;  %v24516_v30 = vld [vmem:[#allocation11_spill] sm:$0xff]  ;;  %v24517_v17 = vld [vmem:[#allocation13_spill] sm:$0xff] }
0x1ac6   :  { %v24519_v18 = vld [vmem:[#allocation17_spill] sm:$0xff] }
0x1ac7   :  { %18692 = vtanh.f32 %v7236_v4  ;;  %v24520_v4 = vld [vmem:[#allocation19_spill] sm:$0xff] }
0x1ac8   :  { %18694 = vtanh.f32 %v7235_v37  ;;  %v24518_v37 = vld [vmem:[#allocation15_spill] sm:$0xff] }
0x1ad1   :  { %v18693_v34 = vpop.eup %18692 }
0x1ad2   :  { %v18695_v23 = vpop.eup %18694  ;;  %7403 = vmatprep.mubr.f32.mxu1 %v18693_v34  ;;  %7545 = vmatprep.mubr.f32.mxu0 %v18693_v34  ;;  %v24521_v34 = vld [vmem:[#allocation21_spill] sm:$0xff] }
0x1ad3   :  { %7404 = vmatmul.mubr.f32.vlgmr.msra.gmra.mrb[52].mxu1 %v18695_v23  ;;  %7546 = vmatmul.mubr.f32.vlgmr.msra.gmra.mrb[66].mxu0 %v18695_v23  ;;  %v24522_v23 = vld [vmem:[#allocation23_spill] sm:$0xff] }
0x1ad4   :  { %16951 = vmatpush1.bf16.msra.mxu1 %v18889_v35  ;;  %17014 = vmatpush3.bf16.msra.mxu0 %v24472_v12  ;;  %v24530_v12 = vld [vmem:[#allocation39_spill] sm:$0xff] }
0x1ad5   :  { %16953 = vmatprep.subr.bf16.mxu1 %v18904_v40  ;;  %17015 = vmatprep.subr.bf16.mxu0 %v24471_v19 }
0x1ad6   :  { %7474 = vmatprep.mubr.f32.mxu1 %v24161_v61  ;;  %13406 = vmatprep.mubr.msk.f32.mxu0 %vm18754_vm0, %v24161_v61 }
0x1ad8   :  { %16955 = vmatpush1.bf16.msra.mxu1 %v18920_v45  ;;  %17017 = vmatpush3.bf16.msra.mxu0 %v24473_v2  ;;  %v24529_v2 = vld [vmem:[#allocation37_spill] sm:$0xff] }
0x1ad9   :  { %16957 = vmatprep.subr.bf16.mxu1 %v18934_v50  ;;  %17018 = vmatprep.subr.bf16.mxu0 %v24471_v19 }
0x1adc   :  { %16959 = vmatpush1.bf16.msra.mxu1 %v18952_v56  ;;  %17020 = vmatpush3.bf16.msra.mxu0 %v24507_v51  ;;  %v24528_v51 = vld [vmem:[#allocation35_spill] sm:$0xff] }
0x1add   :  { %16961 = vmatprep.subr.bf16.mxu1 %v18964_v60  ;;  %17021 = vmatprep.subr.bf16.mxu0 %v24471_v19 }
0x1ae0   :  { %16963 = vmatpush1.bf16.msra.mxu1 %v18991_v7  ;;  %17023 = vmatpush3.bf16.msra.mxu0 %v24508_v6  ;;  %v24527_v6 = vld [vmem:[#allocation33_spill] sm:$0xff] }
0x1ae1   :  { %16965 = vmatprep.subr.bf16.mxu1 %v24499_v46  ;;  %17024 = vmatprep.subr.bf16.mxu0 %v24471_v19 }
0x1ae4   :  { %16967 = vmatpush1.bf16.msra.mxu1 %v24500_v54  ;;  %17026 = vmatpush3.bf16.msra.mxu0 %v24509_v36  ;;  %v24526_v36 = vld [vmem:[#allocation31_spill] sm:$0xff] }
0x1ae5   :  { %16969 = vmatprep.subr.bf16.mxu1 %v24501_v13  ;;  %17027 = vmatprep.subr.bf16.mxu0 %v24471_v19 }
0x1ae8   :  { %16971 = vmatpush1.bf16.msra.mxu1 %v24502_v53  ;;  %17029 = vmatpush3.bf16.msra.mxu0 %v24510_v16  ;;  %v24525_v16 = vld [vmem:[#allocation29_spill] sm:$0xff] }
0x1ae9   :  { %16973 = vmatprep.subr.bf16.mxu1 %v24503_v57  ;;  %17030 = vmatprep.subr.bf16.mxu0 %v24471_v19 }
0x1aec   :  { %16975 = vmatpush1.bf16.msra.mxu1 %v24504_v0  ;;  %17032 = vmatpush3.bf16.msra.mxu0 %v24511_v32  ;;  %v24524_v32 = vld [vmem:[#allocation27_spill] sm:$0xff] }
0x1aed   :  { %16977 = vmatprep.subr.bf16.mxu1 %v24505_v1  ;;  %17033 = vmatprep.subr.bf16.mxu0 %v24471_v19  ;;  %v24531_v19 = vld [vmem:[#allocation41_spill] sm:$0xff] }
0x1af0   :  { %16979 = vmatpush1.bf16.msra.mxu1 %v24506_v59  ;;  %17035 = vmatpush3.bf16.msra.mxu0 %v24512_v38  ;;  %v24523_v38 = vld [vmem:[#allocation25_spill] sm:$0xff] }
0x1af1   :  { %17053 = vmatprep.subr.bf16.mxu1 %v24513_v55  ;;  %17037 = vmatprep.subr.bf16.mxu0 %v17036_v22  ;;  %v7640_v22 = vld [vmem:[%s23608_s2 + $0x8e8] sm:$0xff] }
0x1af2   :  { %v17048_v44 = vpack.c.bf16 %v7642_v49, %v7640_v22  ;;  %v11161_v49 = vld [vmem:[%s23607_s0 + $0x1e0] sm:$0xff] }
0x1af3   :  { %7475 = vmatmul.mubr.f32.vlgmr.msra.gmra.mrb[52].mxu1 %v22167_v5  ;;  %13407 = vmatmul.mubr.f32.vlgmr.msra.gmra.mrb[68].mxu0 %v22167_v5  ;;  %v24514_v5 = vld [vmem:[#allocation7_spill] sm:$0xff] }
0x1af4   :  { %17055 = vmatpush1.bf16.msra.mxu1 %v18810_v8  ;;  %7712 = vmatprep.mubr.f32.mxu0 %v24161_v61 }
0x1af5   :  { %17057 = vmatprep.subr.bf16.mxu1 %v18812_v9  ;;  %17039 = vmatpush1.bf16.msra.mxu0 %v17038_v47  ;;  %v7641_v47 = vld [vmem:[%s23608_s2 + $0x8f0] sm:$0xff] }
0x1af6   :  { %17041 = vmatprep.subr.bf16.mxu0 %v17040_v24  ;;  %v7639_v24 = vld [vmem:[%s23608_s2 + $0x8e0] sm:$0xff] }
0x1af7   :  { %v17050_v11 = vpack.c.bf16 %v7641_v47, %v7639_v24 }
0x1af8   :  { %17059 = vmatpush1.bf16.msra.mxu1 %v18828_v14 }
0x1af9   :  { %17061 = vmatprep.subr.bf16.mxu1 %v18831_v15  ;;  %17043 = vmatpush1.bf16.msra.mxu0 %v17042_v39 }
0x1afa   :  { %17045 = vmatprep.subr.bf16.mxu0 %v17044_v42  ;;  %v11162_v42 = vld [vmem:[%s23607_s0 + $0x1e8] sm:$0xff] }
0x1afc   :  { %17063 = vmatpush1.bf16.msra.mxu1 %v18846_v20 }
0x1afd   :  { %17065 = vmatprep.subr.bf16.mxu1 %v18849_v21  ;;  %17047 = vmatpush1.bf16.msra.mxu0 %v17046_v41 }
0x1afe   :  { %17049 = vmatprep.subr.bf16.mxu0 %v17048_v44 }
0x1b00   :  { %17067 = vmatpush1.bf16.msra.mxu1 %v18870_v28 }
0x1b01   :  { %17069 = vmatprep.subr.bf16.mxu1 %v18884_v33  ;;  %17051 = vmatpush1.bf16.msra.mxu0 %v17050_v11 }
0x1b02   :  { %17149 = vmatprep.subr.bf16.mxu0 %v24480_v10 }
0x1b04   :  { %17071 = vmatpush1.bf16.msra.mxu1 %v24192_v52 }
0x1b05   :  { %17073 = vmatprep.subr.bf16.mxu1 %v18929_v48 }
0x1b08   :  { %17075 = vmatpush1.bf16.msra.mxu1 %v18958_v58 }
0x1b09   :  { %17077 = vmatprep.subr.bf16.mxu1 %v18973_v63 }
0x1b0c   :  { %17079 = vmatpush1.bf16.msra.mxu1 %v24193_v62 }
0x1b0d   :  { %17081 = vmatprep.subr.bf16.mxu1 %v24514_v5 }
0x1b10   :  { %17083 = vmatpush1.bf16.msra.mxu1 %v24515_v26 }
0x1b11   :  { %17085 = vmatprep.subr.bf16.mxu1 %v24516_v30 }
0x1b14   :  { %17087 = vmatpush1.bf16.msra.mxu1 %v24517_v17 }
0x1b15   :  { %17089 = vmatprep.subr.bf16.mxu1 %v24518_v37 }
0x1b18   :  { %17091 = vmatpush1.bf16.msra.mxu1 %v24519_v18 }
0x1b19   :  { %17093 = vmatprep.subr.bf16.mxu1 %v24520_v4 }
0x1b1c   :  { %17095 = vmatpush1.bf16.msra.mxu1 %v24521_v34 }
0x1b1d   :  { %17097 = vmatprep.subr.bf16.mxu1 %v24522_v23 }
0x1b20   :  { %17099 = vmatpush1.bf16.msra.mxu1 %v24523_v38 }
0x1b21   :  { %17101 = vmatprep.subr.bf16.mxu1 %v24524_v32 }
0x1b24   :  { %17103 = vmatpush1.bf16.msra.mxu1 %v24525_v16 }
0x1b25   :  { %17105 = vmatprep.subr.bf16.mxu1 %v24526_v36 }
0x1b28   :  { %17107 = vmatpush1.bf16.msra.mxu1 %v24527_v6 }
0x1b29   :  { %17109 = vmatprep.subr.bf16.mxu1 %v24528_v51 }
0x1b2c   :  { %17111 = vmatpush1.bf16.msra.mxu1 %v24529_v2 }
0x1b2d   :  { %17113 = vmatprep.subr.bf16.mxu1 %v24530_v12 }
0x1b30   :  { %17115 = vmatpush1.bf16.msra.mxu1 %v24531_v19 }
0x1b31   :  { %17117 = vmatprep.subr.bf16.mxu1 %v24532_v25 }
0x1ba6   :  { %v12221_v29 = vpop.f32.mrb[66].mxu0 }
0x1ba7   :  { %v12222_v27 = vpop.f32.mrb[67].mxu0 }
0x1ba8   :  { %v12223_v39 = vadd.f32 %v12222_v27, %v12221_v29 }
0x1bc6   :  { %v7476_v3 = vpop.f32.mrb[52].mxu1  ;;  %v7617_v22 = vpop.f32.mrb[68].mxu0 }
0x1bc7   :  { %v7621_v41 = vadd.f32 %v11161_v49, %v7476_v3  ;;  %v7618_v44 = vadd.f32 %v12223_v39, %v7617_v22  ;;  %v7478_v24 = vpop.f32.mrb[53].mxu1  ;;  %v13408_v47 = vpop.f32.mrb[69].mxu0  ;;  %v24533_v49 = vld [vmem:[#allocation24_spill] sm:$0xff] }
0x1bc8   :  { %v7622_v11 = vadd.f32 %v11162_v42, %v7478_v24  ;;  %v24534_v42 = vld [vmem:[#allocation26_spill] sm:$0xff]  ;;  %v24535_v3 = vld [vmem:[#allocation28_spill] sm:$0xff] }
0x1bc9   :  { %18696 = vtanh.f32 %v7621_v41  ;;  %v7623_v27 = vadd.f32 %v11163_v43, %v7618_v44  ;;  %v24536_v43 = vld [vmem:[#allocation30_spill] sm:$0xff]  ;;  %v24537_v22 = vld [vmem:[#allocation32_spill] sm:$0xff] }
0x1bca   :  { %18698 = vtanh.f32 %v7622_v11  ;;  %v24538_v41 = vld [vmem:[#allocation34_spill] sm:$0xff]  ;;  %v24539_v44 = vld [vmem:[#allocation36_spill] sm:$0xff] }
0x1bcb   :  { %18700 = vtanh.f32 %v7623_v27  ;;  %v24540_v24 = vld [vmem:[#allocation38_spill] sm:$0xff]  ;;  %v24541_v47 = vld [vmem:[#allocation40_spill] sm:$0xff]  ;;  %v24543_v27 = vld [vmem:[#allocation43_spill] sm:$0xff] }
0x1bcc   :  { %v24542_v11 = vld [vmem:[#allocation42_spill] sm:$0xff] }
0x1bd3   :  { %v22321_v29 = vpop.eup %18696 }
0x1bd4   :  { %v18699_v10 = vpop.eup %18698 }
0x1bd5   :  { %v22323_v31 = vpop.eup %18700  ;;  %7789 = vmatprep.mubr.f32.mxu1 %v18699_v10 }
0x1bd6   :  { %7644 = vrot.lane.b32.xlu1 %v22323_v31, %s18755_s13  ;;  %7790 = vmatmul.mubr.f32.vlgmr.msra.gmra.mrb[54].mxu1 %v22321_v29 }
0x1bd7   :  { %17119 = vmatpush1.bf16.msra.mxu1 %v18889_v35  ;;  %7860 = vmatprep.mubr.f32.mxu1 %v24161_v61 }
0x1bd8   :  { %17121 = vmatprep.subr.bf16.mxu1 %v18904_v40 }
0x1bdb   :  { %17123 = vmatpush1.bf16.msra.mxu1 %v18920_v45 }
0x1bdc   :  { %17125 = vmatprep.subr.bf16.mxu1 %v18934_v50 }
0x1bdf   :  { %17127 = vmatpush1.bf16.msra.mxu1 %v18952_v56 }
0x1be0   :  { %17129 = vmatprep.subr.bf16.mxu1 %v18964_v60 }
0x1be3   :  { %17131 = vmatpush1.bf16.msra.mxu1 %v18991_v7 }
0x1be4   :  { %17133 = vmatprep.subr.bf16.mxu1 %v24499_v46 }
0x1be7   :  { %17135 = vmatpush1.bf16.msra.mxu1 %v24500_v54 }
0x1be8   :  { %17137 = vmatprep.subr.bf16.mxu1 %v24501_v13 }
0x1beb   :  { %17139 = vmatpush1.bf16.msra.mxu1 %v24502_v53 }
0x1bec   :  { %17141 = vmatprep.subr.bf16.mxu1 %v24503_v57 }
0x1bef   :  { %17143 = vmatpush1.bf16.msra.mxu1 %v24504_v0 }
0x1bf0   :  { %17145 = vmatprep.subr.bf16.mxu1 %v24505_v1 }
0x1bf3   :  { %17147 = vmatpush1.bf16.msra.mxu1 %v24506_v59 }
0x1bf4   :  { %17221 = vmatprep.subr.bf16.mxu1 %v24513_v55 }
0x1bf6   :  { %7861 = vmatmul.mubr.f32.vlgmr.msra.gmra.mrb[54].mxu1 %v22323_v31 }
0x1bf7   :  { %17223 = vmatpush1.bf16.msra.mxu1 %v18810_v8 }
0x1bf8   :  { %17225 = vmatprep.subr.bf16.mxu1 %v18812_v9 }
0x1bfb   :  { %17227 = vmatpush1.bf16.msra.mxu1 %v18828_v14 }
0x1bfc   :  { %17229 = vmatprep.subr.bf16.mxu1 %v18831_v15 }
0x1bff   :  { %17231 = vmatpush1.bf16.msra.mxu1 %v18846_v20 }
0x1c00   :  { %17233 = vmatprep.subr.bf16.mxu1 %v18849_v21 }
0x1c03   :  { %17235 = vmatpush1.bf16.msra.mxu1 %v18870_v28 }
0x1c04   :  { %17237 = vmatprep.subr.bf16.mxu1 %v18884_v33 }
0x1c07   :  { %17239 = vmatpush1.bf16.msra.mxu1 %v24192_v52 }
0x1c08   :  { %17241 = vmatprep.subr.bf16.mxu1 %v18929_v48 }
0x1c0b   :  { %17243 = vmatpush1.bf16.msra.mxu1 %v18958_v58 }
0x1c0c   :  { %17245 = vmatprep.subr.bf16.mxu1 %v18973_v63 }
0x1c0f   :  { %17247 = vmatpush1.bf16.msra.mxu1 %v24193_v62 }
0x1c10   :  { %17249 = vmatprep.subr.bf16.mxu1 %v24514_v5 }
0x1c13   :  { %17251 = vmatpush1.bf16.msra.mxu1 %v24515_v26 }
0x1c14   :  { %17253 = vmatprep.subr.bf16.mxu1 %v24516_v30 }
0x1c17   :  { %17255 = vmatpush1.bf16.msra.mxu1 %v24517_v17 }
0x1c18   :  { %17257 = vmatprep.subr.bf16.mxu1 %v24518_v37 }
0x1c1b   :  { %17259 = vmatpush1.bf16.msra.mxu1 %v24519_v18 }
0x1c1c   :  { %17261 = vmatprep.subr.bf16.mxu1 %v24520_v4 }
0x1c1f   :  { %17263 = vmatpush1.bf16.msra.mxu1 %v24521_v34  ;;  %v11166_v34 = vld [vmem:[%s23607_s0 + $0x200] sm:$0xff] }
0x1c20   :  { %17265 = vmatprep.subr.bf16.mxu1 %v24522_v23  ;;  %v11165_v23 = vld [vmem:[%s23607_s0 + $0x1f8] sm:$0xff] }
0x1c23   :  { %17267 = vmatpush1.bf16.msra.mxu1 %v24523_v38  ;;  %v24556_v38 = vld [vmem:[#allocation55_spill] sm:$0xff] }
0x1c24   :  { %17269 = vmatprep.subr.bf16.mxu1 %v24524_v32  ;;  %v24555_v32 = vld [vmem:[#allocation54_spill] sm:$0xff] }
0x1c27   :  { %17271 = vmatpush1.bf16.msra.mxu1 %v24525_v16  ;;  %v24554_v16 = vld [vmem:[#allocation53_spill] sm:$0xff] }
0x1c28   :  { %17273 = vmatprep.subr.bf16.mxu1 %v24526_v36  ;;  %v24552_v36 = vld [vmem:[#allocation51_spill] sm:$0xff] }
0x1c2b   :  { %17275 = vmatpush1.bf16.msra.mxu1 %v24527_v6  ;;  %v24551_v6 = vld [vmem:[#allocation50_spill] sm:$0xff] }
0x1c2c   :  { %17277 = vmatprep.subr.bf16.mxu1 %v24528_v51  ;;  %v24550_v51 = vld [vmem:[#allocation49_spill] sm:$0xff] }
0x1c2f   :  { %17279 = vmatpush1.bf16.msra.mxu1 %v24529_v2  ;;  %v24549_v2 = vld [vmem:[#allocation48_spill] sm:$0xff] }
0x1c30   :  { %17281 = vmatprep.subr.bf16.mxu1 %v24530_v12  ;;  %v24548_v12 = vmov 0.0|0.0  }
0x1c33   :  { %17283 = vmatpush1.bf16.msra.mxu1 %v24531_v19  ;;  %v24547_v19 = vld [vmem:[#allocation47_spill] sm:$0xff] }
0x1c34   :  { %17285 = vmatprep.subr.bf16.mxu1 %v24532_v25  ;;  %v24546_v25 = vld [vmem:[#allocation46_spill] sm:$0xff] }
0x1c48   :  { %v7645_v39 = vpop.permute.xlu1 %7644 }
0x1c49   :  { %11164 = vmatmul.mubr.msk.f32.vlgmr.msra.gmra.mrb[12].mxu0 %vm1395_vm2, %v7645_v39  ;;  %v24545_v39 = vld [vmem:[#allocation45_spill] sm:$0xff] }
0x1c4a   :  { %17151 = vmatpush3.bf16.msra.mxu0 %v24533_v49  ;;  %7931 = vmatprep.mubr.f32.mxu0 %v18699_v10  ;;  %v24544_v10 = vld [vmem:[#allocation44_spill] sm:$0xff] }
0x1c4b   :  { %17153 = vmatprep.subr.bf16.mxu0 %v24534_v42 }
0x1c4e   :  { %17155 = vmatpush3.bf16.msra.mxu0 %v24535_v3 }
0x1c4f   :  { %17157 = vmatprep.subr.bf16.mxu0 %v24536_v43 }
0x1c52   :  { %17159 = vmatpush3.bf16.msra.mxu0 %v24537_v22 }
0x1c53   :  { %17161 = vmatprep.subr.bf16.mxu0 %v24538_v41 }
0x1c56   :  { %17163 = vmatpush3.bf16.msra.mxu0 %v24539_v44 }
0x1c57   :  { %17165 = vmatprep.subr.bf16.mxu0 %v24540_v24 }
0x1c5a   :  { %17167 = vmatpush3.bf16.msra.mxu0 %v24541_v47 }
0x1c5b   :  { %17169 = vmatprep.subr.bf16.mxu0 %v24542_v11 }
0x1c5e   :  { %17171 = vmatpush3.bf16.msra.mxu0 %v24543_v27 }
0x1c5f   :  { %17173 = vmatprep.subr.bf16.mxu0 %v24544_v10 }
0x1c62   :  { %17175 = vmatpush3.bf16.msra.mxu0 %v24545_v39 }
0x1c63   :  { %17177 = vmatprep.subr.bf16.mxu0 %v24546_v25 }
0x1c66   :  { %17179 = vmatpush3.bf16.msra.mxu0 %v24547_v19 }
0x1c67   :  { %17180 = vmatprep.subr.bf16.mxu0 %v24548_v12 }
0x1c69   :  { %7932 = vmatmul.mubr.f32.vlgmr.msra.gmra.mrb[70].mxu0 %v22321_v29  ;;  %v24553_v29 = vld [vmem:[#allocation52_spill] sm:$0xff] }
0x1c6a   :  { %17182 = vmatpush3.bf16.msra.mxu0 %v24549_v2  ;;  %13441 = vmatprep.mubr.msk.f32.mxu0 %vm18754_vm0, %v24161_v61 }
0x1c6b   :  { %17183 = vmatprep.subr.bf16.mxu0 %v24548_v12 }
0x1c6e   :  { %17185 = vmatpush3.bf16.msra.mxu0 %v24550_v51 }
0x1c6f   :  { %17186 = vmatprep.subr.bf16.mxu0 %v24548_v12 }
0x1c72   :  { %17188 = vmatpush3.bf16.msra.mxu0 %v24551_v6 }
0x1c73   :  { %17189 = vmatprep.subr.bf16.mxu0 %v24548_v12 }
0x1c76   :  { %17191 = vmatpush3.bf16.msra.mxu0 %v24552_v36 }
0x1c77   :  { %17192 = vmatprep.subr.bf16.mxu0 %v24548_v12 }
0x1c7a   :  { %17194 = vmatpush3.bf16.msra.mxu0 %v24553_v29 }
0x1c7b   :  { %17195 = vmatprep.subr.bf16.mxu0 %v24548_v12 }
0x1c7e   :  { %17197 = vmatpush3.bf16.msra.mxu0 %v24554_v16 }
0x1c7f   :  { %17198 = vmatprep.subr.bf16.mxu0 %v24548_v12 }
0x1c82   :  { %17200 = vmatpush3.bf16.msra.mxu0 %v24555_v32 }
0x1c83   :  { %17201 = vmatprep.subr.bf16.mxu0 %v24548_v12 }
0x1c86   :  { %17203 = vmatpush3.bf16.msra.mxu0 %v24556_v38 }
0x1c89   :  { %13442 = vmatmul.mubr.f32.vlgmr.msra.gmra.mrb[72].mxu0 %v22323_v31  ;;  %v8014_v31 = vld [vmem:[%s23608_s2 + $0x908] sm:$0xff] }
0x1c8a   :  { %8098 = vmatprep.mubr.f32.mxu0 %v24161_v61 }
0x1cc9   :  { %v7862_v4 = vpop.f32.mrb[54].mxu1 }
0x1cca   :  { %v8007_v18 = vadd.f32 %v11165_v23, %v7862_v4  ;;  %v7864_v37 = vpop.f32.mrb[55].mxu1  ;;  %v8015_v4 = vld [vmem:[%s23608_s2 + $0x910] sm:$0xff]  ;;  %v8020_v23 = vld [vmem:[%s23608_s2 + $0x938] sm:$0xff] }
0x1ccb   :  { %v8008_v17 = vadd.f32 %v11166_v34, %v7864_v37  ;;  %v8013_v37 = vld [vmem:[%s23608_s2 + $0x900] sm:$0xff]  ;;  %v8018_v34 = vld [vmem:[%s23608_s2 + $0x928] sm:$0xff] }
0x1ccd   :  { %18702 = vtanh.f32 %v8008_v17  ;;  %v8016_v17 = vld [vmem:[%s23608_s2 + $0x918] sm:$0xff] }
0x1cce   :  { %18704 = vtanh.f32 %v8007_v18  ;;  %v17204_v18 = vpack.c.bf16 %v8016_v17, %v8014_v31  ;;  %v8017_v31 = vld [vmem:[%s23608_s2 + $0x920] sm:$0xff]  ;;  %v8019_v17 = vld [vmem:[%s23608_s2 + $0x930] sm:$0xff] }
0x1cd0   :  { %17205 = vmatprep.subr.bf16.mxu0 %v17204_v18  ;;  %v8026_v18 = vld [vmem:[%s23608_s2 + $0x968] sm:$0xff] }
0x1cd7   :  { %v22421_v30 = vpop.eup %18702 }
0x1cd8   :  { %v22423_v26 = vpop.eup %18704  ;;  %8175 = vmatprep.mubr.f32.mxu1 %v22421_v30 }
0x1cd9   :  { %8176 = vmatmul.mubr.f32.vlgmr.msra.gmra.mrb[56].mxu1 %v22423_v26 }
0x1cda   :  { %17287 = vmatpush1.bf16.msra.mxu1 %v18889_v35  ;;  %8246 = vmatprep.mubr.f32.mxu1 %v24161_v61 }
0x1cdb   :  { %17289 = vmatprep.subr.bf16.mxu1 %v18904_v40 }
0x1cde   :  { %17291 = vmatpush1.bf16.msra.mxu1 %v18920_v45 }
0x1cdf   :  { %17293 = vmatprep.subr.bf16.mxu1 %v18934_v50 }
0x1ce2   :  { %17295 = vmatpush1.bf16.msra.mxu1 %v18952_v56 }
0x1ce3   :  { %17297 = vmatprep.subr.bf16.mxu1 %v18964_v60 }
0x1ce6   :  { %17299 = vmatpush1.bf16.msra.mxu1 %v18991_v7 }
0x1ce7   :  { %17301 = vmatprep.subr.bf16.mxu1 %v24499_v46  ;;  %v8022_v46 = vld [vmem:[%s23608_s2 + $0x948] sm:$0xff] }
0x1cea   :  { %17303 = vmatpush1.bf16.msra.mxu1 %v24500_v54  ;;  %v17208_v54 = vpack.c.bf16 %v8020_v23, %v8018_v34  ;;  %v8021_v23 = vld [vmem:[%s23608_s2 + $0x940] sm:$0xff] }
0x1ceb   :  { %17305 = vmatprep.subr.bf16.mxu1 %v24501_v13  ;;  %v17206_v13 = vpack.c.bf16 %v8015_v4, %v8013_v37  ;;  %v8024_v37 = vld [vmem:[%s23608_s2 + $0x958] sm:$0xff]  ;;  %v17210_v4 = vpack.c.bf16 %v8019_v17, %v8017_v31  ;;  %v8025_v31 = vld [vmem:[%s23608_s2 + $0x960] sm:$0xff]  ;;  %v8027_v17 = vld [vmem:[%s23608_s2 + $0x970] sm:$0xff] }
0x1cec   :  { %v17212_v34 = vpack.c.bf16 %v8024_v37, %v8022_v46  ;;  %v24557_v37 = vld [vmem:[#allocation22_spill] sm:$0xff] }
0x1ced   :  { %17207 = vmatpush1.bf16.msra.mxu0 %v17206_v13  ;;  %v8028_v13 = vld [vmem:[%s23608_s2 + $0x978] sm:$0xff] }
0x1cee   :  { %17307 = vmatpush1.bf16.msra.mxu1 %v24502_v53  ;;  %17209 = vmatprep.subr.bf16.mxu0 %v17208_v54  ;;  %v8023_v53 = vld [vmem:[%s23608_s2 + $0x950] sm:$0xff]  ;;  %v17216_v54 = vpack.c.bf16 %v8028_v13, %v8026_v18 }
0x1cef   :  { %17309 = vmatprep.subr.bf16.mxu1 %v24503_v57  ;;  %v17214_v46 = vpack.c.bf16 %v8023_v53, %v8021_v23  ;;  %v11167_v23 = vld [vmem:[%s23607_s0 + $0x208] sm:$0xff] }
0x1cf1   :  { %17211 = vmatpush1.bf16.msra.mxu0 %v17210_v4 }
0x1cf2   :  { %17311 = vmatpush1.bf16.msra.mxu1 %v24504_v0  ;;  %17213 = vmatprep.subr.bf16.mxu0 %v17212_v34  ;;  %v17218_v0 = vpack.c.bf16 %v8027_v17, %v8025_v31 }
0x1cf3   :  { %17313 = vmatprep.subr.bf16.mxu1 %v24505_v1 }
0x1cf5   :  { %17215 = vmatpush1.bf16.msra.mxu0 %v17214_v46 }
0x1cf6   :  { %17315 = vmatpush1.bf16.msra.mxu1 %v24506_v59  ;;  %17217 = vmatprep.subr.bf16.mxu0 %v17216_v54 }
0x1cf7   :  { %17485 = vmatprep.subr.bf16.mxu1 %v24557_v37 }
0x1cf9   :  { %17219 = vmatpush1.bf16.msra.mxu0 %v17218_v0  ;;  %v11170_v0 = vld [vmem:[%s23607_s0 + $0x218] sm:$0xff] }
0x1cfa   :  { %17317 = vmatprep.subr.bf16.mxu0 %v24557_v37 }
0x1d3c   :  { %v12273_v53 = vpop.f32.mrb[70].mxu0 }
0x1d3d   :  { %v12274_v4 = vpop.f32.mrb[71].mxu0 }
0x1d3e   :  { %v12275_v34 = vadd.f32 %v12274_v4, %v12273_v53  ;;  %v8402_v53 = vld [vmem:[%s23608_s2 + $0x998] sm:$0xff]  ;;  %v8399_v4 = vld [vmem:[%s23608_s2 + $0x980] sm:$0xff] }
0x1d5c   :  { %v8003_v18 = vpop.f32.mrb[72].mxu0 }
0x1d5d   :  { %v8004_v13 = vadd.f32 %v12275_v34, %v8003_v18  ;;  %v13443_v1 = vpop.f32.mrb[73].mxu0  ;;  %v8404_v18 = vld [vmem:[%s23608_s2 + $0x9a8] sm:$0xff] }
0x1d5e   :  { %v11169_v1 = vld [vmem:[%s23607_s0 + $0x210] sm:$0xff] }
0x1d5f   :  { %v8009_v57 = vadd.f32 %v11167_v23, %v8004_v13  ;;  %v8401_v23 = vld [vmem:[%s23608_s2 + $0x990] sm:$0xff]  ;;  %v8406_v13 = vld [vmem:[%s23608_s2 + $0x9b8] sm:$0xff] }
0x1d61   :  { %18706 = vtanh.f32 %v8009_v57 }
0x1d6b   :  { %v18707_v59 = vpop.eup %18706 }
0x1d6c   :  { %8030 = vrot.lane.b32.xlu0 %v18707_v59, %s18755_s13  ;;  %8247 = vmatmul.mubr.f32.vlgmr.msra.gmra.mrb[56].mxu1 %v18707_v59 }
0x1d6d   :  { %17487 = vmatpush3.bf16.msra.mxu1 %v24533_v49 }
0x1d6e   :  { %17489 = vmatprep.subr.bf16.mxu1 %v24534_v42 }
0x1d71   :  { %17491 = vmatpush3.bf16.msra.mxu1 %v24535_v3 }
0x1d72   :  { %17493 = vmatprep.subr.bf16.mxu1 %v24536_v43 }
0x1d75   :  { %17495 = vmatpush3.bf16.msra.mxu1 %v24537_v22 }
0x1d76   :  { %17497 = vmatprep.subr.bf16.mxu1 %v24538_v41 }
0x1d79   :  { %17499 = vmatpush3.bf16.msra.mxu1 %v24539_v44 }
0x1d7a   :  { %17501 = vmatprep.subr.bf16.mxu1 %v24540_v24 }
0x1d7d   :  { %17503 = vmatpush3.bf16.msra.mxu1 %v24541_v47 }
0x1d7e   :  { %17505 = vmatprep.subr.bf16.mxu1 %v24542_v11 }
0x1d81   :  { %17507 = vmatpush3.bf16.msra.mxu1 %v24543_v27 }
0x1d82   :  { %17509 = vmatprep.subr.bf16.mxu1 %v24544_v10 }
0x1d85   :  { %17511 = vmatpush3.bf16.msra.mxu1 %v24545_v39 }
0x1d86   :  { %17513 = vmatprep.subr.bf16.mxu1 %v24546_v25 }
0x1d89   :  { %17515 = vmatpush3.bf16.msra.mxu1 %v24547_v19 }
0x1d8a   :  { %17516 = vmatprep.subr.bf16.mxu1 %v24548_v12 }
0x1dde   :  { %v8031_v57 = vpop.permute.xlu0 %8030 }
0x1ddf   :  { %11168 = vmatmul.mubr.msk.f32.vlgmr.msra.gmra.mrb[12].mxu0 %vm1395_vm2, %v8031_v57  ;;  %v17374_v57 = vpack.c.bf16 %v8401_v23, %v8399_v4  ;;  %v8409_v4 = vld [vmem:[%s23608_s2 + $0x9d0] sm:$0xff]  ;;  %v8414_v23 = vld [vmem:[%s23608_s2 + $0x9f8] sm:$0xff] }
0x1de0   :  { %17319 = vmatpush3.bf16.msra.mxu0 %v24533_v49  ;;  %8317 = vmatprep.mubr.f32.mxu0 %v22421_v30 }
0x1de1   :  { %17321 = vmatprep.subr.bf16.mxu0 %v24534_v42 }
0x1de4   :  { %17323 = vmatpush3.bf16.msra.mxu0 %v24535_v3 }
0x1de5   :  { %17325 = vmatprep.subr.bf16.mxu0 %v24536_v43 }
0x1de8   :  { %17327 = vmatpush3.bf16.msra.mxu0 %v24537_v22 }
0x1de9   :  { %17329 = vmatprep.subr.bf16.mxu0 %v24538_v41 }
0x1dec   :  { %17331 = vmatpush3.bf16.msra.mxu0 %v24539_v44 }
0x1ded   :  { %17333 = vmatprep.subr.bf16.mxu0 %v24540_v24 }
0x1df0   :  { %17335 = vmatpush3.bf16.msra.mxu0 %v24541_v47 }
0x1df1   :  { %17337 = vmatprep.subr.bf16.mxu0 %v24542_v11 }
0x1df4   :  { %17339 = vmatpush3.bf16.msra.mxu0 %v24543_v27 }
0x1df5   :  { %17341 = vmatprep.subr.bf16.mxu0 %v24544_v10 }
0x1df8   :  { %17343 = vmatpush3.bf16.msra.mxu0 %v24545_v39 }
0x1df9   :  { %17345 = vmatprep.subr.bf16.mxu0 %v24546_v25 }
0x1dfc   :  { %17347 = vmatpush3.bf16.msra.mxu0 %v24547_v19 }
0x1dfd   :  { %17348 = vmatprep.subr.bf16.mxu0 %v24548_v12 }
0x1dff   :  { %8318 = vmatmul.mubr.f32.vlgmr.msra.gmra.mrb[74].mxu0 %v22423_v26 }
0x1e00   :  { %17350 = vmatpush3.bf16.msra.mxu0 %v24549_v2  ;;  %13476 = vmatprep.mubr.msk.f32.mxu0 %vm18754_vm0, %v24161_v61 }
0x1e01   :  { %17351 = vmatprep.subr.bf16.mxu0 %v24548_v12 }
0x1e04   :  { %17353 = vmatpush3.bf16.msra.mxu0 %v24550_v51 }
0x1e05   :  { %17354 = vmatprep.subr.bf16.mxu0 %v24548_v12 }
0x1e08   :  { %17356 = vmatpush3.bf16.msra.mxu0 %v24551_v6 }
0x1e09   :  { %17357 = vmatprep.subr.bf16.mxu0 %v24548_v12 }
0x1e0c   :  { %17359 = vmatpush3.bf16.msra.mxu0 %v24552_v36 }
0x1e0d   :  { %17360 = vmatprep.subr.bf16.mxu0 %v24548_v12 }
0x1e10   :  { %17362 = vmatpush3.bf16.msra.mxu0 %v24553_v29 }
0x1e11   :  { %17363 = vmatprep.subr.bf16.mxu0 %v24548_v12 }
0x1e14   :  { %17365 = vmatpush3.bf16.msra.mxu0 %v24554_v16 }
0x1e15   :  { %17366 = vmatprep.subr.bf16.mxu0 %v24548_v12 }
0x1e18   :  { %17368 = vmatpush3.bf16.msra.mxu0 %v24555_v32 }
0x1e19   :  { %17369 = vmatprep.subr.bf16.mxu0 %v24548_v12 }
0x1e1c   :  { %17371 = vmatpush3.bf16.msra.mxu0 %v24556_v38 }
0x1e1f   :  { %13477 = vmatmul.mubr.f32.vlgmr.msra.gmra.mrb[76].mxu0 %v18707_v59  ;;  %v8400_v59 = vld [vmem:[%s23608_s2 + $0x988] sm:$0xff] }
0x1e20   :  { %8484 = vmatprep.mubr.f32.mxu0 %v24161_v61  ;;  %v17372_v34 = vpack.c.bf16 %v8402_v53, %v8400_v59  ;;  %v8407_v53 = vld [vmem:[%s23608_s2 + $0x9c0] sm:$0xff] }
0x1e22   :  { %17373 = vmatprep.subr.bf16.mxu0 %v17372_v34  ;;  %v8412_v34 = vld [vmem:[%s23608_s2 + $0x9e8] sm:$0xff] }
0x1e23   :  { %17375 = vmatpush1.bf16.msra.mxu0 %v17374_v57  ;;  %v8411_v57 = vld [vmem:[%s23608_s2 + $0x9e0] sm:$0xff] }
0x1e3f   :  { %v8248_v26 = vpop.f32.mrb[56].mxu1 }
0x1e40   :  { %v8393_v30 = vadd.f32 %v11169_v1, %v8248_v26  ;;  %v8250_v46 = vpop.f32.mrb[57].mxu1  ;;  %v17376_v1 = vpack.c.bf16 %v8406_v13, %v8404_v18  ;;  %v8405_v26 = vld [vmem:[%s23608_s2 + $0x9b0] sm:$0xff]  ;;  %v17382_v18 = vpack.c.bf16 %v8409_v4, %v8407_v53  ;;  %v17384_v13 = vpack.c.bf16 %v8414_v23, %v8412_v34 }
0x1e41   :  { %v8394_v54 = vadd.f32 %v11170_v0, %v8250_v46  ;;  %v8403_v0 = vld [vmem:[%s23608_s2 + $0x9a0] sm:$0xff]  ;;  %v8410_v46 = vld [vmem:[%s23608_s2 + $0x9d8] sm:$0xff] }
0x1e42   :  { %17377 = vmatprep.subr.bf16.mxu0 %v17376_v1  ;;  %v8413_v1 = vld [vmem:[%s23608_s2 + $0x9f0] sm:$0xff] }
0x1e43   :  { %18708 = vtanh.f32 %v8394_v54  ;;  %v17378_v54 = vpack.c.bf16 %v8405_v26, %v8403_v0  ;;  %v17386_v0 = vpack.c.bf16 %v8413_v1, %v8411_v57 }
0x1e44   :  { %18710 = vtanh.f32 %v8393_v30  ;;  %v8408_v30 = vld [vmem:[%s23608_s2 + $0x9c8] sm:$0xff] }
0x1e45   :  { %v17380_v59 = vpack.c.bf16 %v8410_v46, %v8408_v30  ;;  %17379 = vmatpush1.bf16.msra.mxu0 %v17378_v54  ;;  %v11171_v54 = vld [vmem:[%s23607_s0 + $0x220] sm:$0xff] }
0x1e47   :  { %17381 = vmatprep.subr.bf16.mxu0 %v17380_v59 }
0x1e49   :  { %17383 = vmatpush1.bf16.msra.mxu0 %v17382_v18  ;;  %v24558_v18 = vld [vmem:[#allocation9_spill] sm:$0xff] }
0x1e4a   :  { %17385 = vmatprep.subr.bf16.mxu0 %v17384_v13  ;;  %v24559_v13 = vld [vmem:[#allocation11_spill] sm:$0xff] }
0x1e4d   :  { %v22556_v31 = vpop.eup %18708  ;;  %17387 = vmatpush1.bf16.msra.mxu0 %v17386_v0  ;;  %v24560_v0 = vld [vmem:[#allocation13_spill] sm:$0xff] }
0x1e4e   :  { %v22558_v17 = vpop.eup %18710  ;;  %8703 = vmatprep.mubr.f32.mxu1 %v22556_v31  ;;  %17389 = vmatprep.subr.bf16.mxu0 %v24513_v55 }
0x1e4f   :  { %8704 = vmatmul.mubr.f32.vlgmr.msra.gmra.mrb[58].mxu1 %v22558_v17 }
0x1e50   :  { %17518 = vmatpush3.bf16.msra.mxu1 %v24549_v2  ;;  %13511 = vmatprep.mubr.msk.f32.mxu1 %vm18754_vm0, %v24161_v61 }
0x1e51   :  { %17519 = vmatprep.subr.bf16.mxu1 %v24548_v12 }
0x1e54   :  { %17521 = vmatpush3.bf16.msra.mxu1 %v24550_v51 }
0x1e55   :  { %17522 = vmatprep.subr.bf16.mxu1 %v24548_v12 }
0x1e58   :  { %17524 = vmatpush3.bf16.msra.mxu1 %v24551_v6 }
0x1e59   :  { %17525 = vmatprep.subr.bf16.mxu1 %v24548_v12 }
0x1e5c   :  { %17527 = vmatpush3.bf16.msra.mxu1 %v24552_v36  ;;  %v24575_v36 = vld [vmem:[#allocation3_spill] sm:$0xff] }
0x1e5d   :  { %17528 = vmatprep.subr.bf16.mxu1 %v24548_v12 }
0x1e60   :  { %17530 = vmatpush3.bf16.msra.mxu1 %v24553_v29  ;;  %v24574_v29 = vld [vmem:[#allocation41_spill] sm:$0xff] }
0x1e61   :  { %17531 = vmatprep.subr.bf16.mxu1 %v24548_v12 }
0x1e64   :  { %17533 = vmatpush3.bf16.msra.mxu1 %v24554_v16  ;;  %v24573_v16 = vld [vmem:[#allocation39_spill] sm:$0xff] }
0x1e65   :  { %17534 = vmatprep.subr.bf16.mxu1 %v24548_v12 }
0x1e68   :  { %17536 = vmatpush3.bf16.msra.mxu1 %v24555_v32  ;;  %v24572_v32 = vld [vmem:[#allocation37_spill] sm:$0xff] }
0x1e69   :  { %17537 = vmatprep.subr.bf16.mxu1 %v24548_v12 }
0x1e6c   :  { %17539 = vmatpush3.bf16.msra.mxu1 %v24556_v38  ;;  %v24569_v38 = vld [vmem:[#allocation31_spill] sm:$0xff] }
0x1e6d   :  { %17557 = vmatprep.subr.bf16.mxu1 %v24513_v55  ;;  %v24568_v55 = vld [vmem:[#allocation29_spill] sm:$0xff] }
0x1ed2   :  { %v12325_v26 = vpop.f32.mrb[74].mxu0 }
0x1ed3   :  { %v12326_v30 = vpop.f32.mrb[75].mxu0 }
0x1ed4   :  { %v12327_v46 = vadd.f32 %v12326_v30, %v12325_v26  ;;  %v24561_v30 = vld [vmem:[#allocation15_spill] sm:$0xff] }
0x1ef2   :  { %v8389_v59 = vpop.f32.mrb[76].mxu0 }
0x1ef3   :  { %v8390_v53 = vadd.f32 %v12327_v46, %v8389_v59  ;;  %v13478_v4 = vpop.f32.mrb[77].mxu0  ;;  %v24562_v46 = vld [vmem:[#allocation17_spill] sm:$0xff] }
0x1ef4   :  { %v24564_v59 = vld [vmem:[#allocation21_spill] sm:$0xff] }
0x1ef5   :  { %v8395_v34 = vadd.f32 %v11171_v54, %v8390_v53  ;;  %v24563_v54 = vld [vmem:[#allocation19_spill] sm:$0xff]  ;;  %v24566_v4 = vld [vmem:[#allocation25_spill] sm:$0xff] }
0x1ef6   :  { %v24565_v53 = vld [vmem:[#allocation23_spill] sm:$0xff] }
0x1ef7   :  { %18712 = vtanh.f32 %v8395_v34  ;;  %v24567_v34 = vld [vmem:[#allocation27_spill] sm:$0xff] }
0x1f01   :  { %v22632_v23 = vpop.eup %18712 }
0x1f02   :  { %8416 = vrot.lane.b32.xlu1 %v22632_v23, %s18755_s13  ;;  %13512 = vmatmul.mubr.f32.vlgmr.msra.gmra.mrb[60].mxu1 %v22632_v23 }
0x1f03   :  { %17559 = vmatpush1.bf16.msra.mxu1 %v18810_v8 }
0x1f04   :  { %17561 = vmatprep.subr.bf16.mxu1 %v18812_v9 }
0x1f07   :  { %17563 = vmatpush1.bf16.msra.mxu1 %v18828_v14 }
0x1f08   :  { %17565 = vmatprep.subr.bf16.mxu1 %v18831_v15 }
0x1f0b   :  { %17567 = vmatpush1.bf16.msra.mxu1 %v18846_v20 }
0x1f0c   :  { %17569 = vmatprep.subr.bf16.mxu1 %v18849_v21 }
0x1f0f   :  { %17571 = vmatpush1.bf16.msra.mxu1 %v18870_v28 }
0x1f10   :  { %17573 = vmatprep.subr.bf16.mxu1 %v18884_v33 }
0x1f13   :  { %17575 = vmatpush1.bf16.msra.mxu1 %v24192_v52 }
0x1f14   :  { %17577 = vmatprep.subr.bf16.mxu1 %v18929_v48 }
0x1f17   :  { %17579 = vmatpush1.bf16.msra.mxu1 %v18958_v58 }
0x1f18   :  { %17581 = vmatprep.subr.bf16.mxu1 %v18973_v63 }
0x1f1b   :  { %17583 = vmatpush1.bf16.msra.mxu1 %v24193_v62 }
0x1f1c   :  { %17585 = vmatprep.subr.bf16.mxu1 %v24514_v5 }
0x1f1f   :  { %17587 = vmatpush1.bf16.msra.mxu1 %v24558_v18 }
0x1f20   :  { %17589 = vmatprep.subr.bf16.mxu1 %v24559_v13 }
0x1f22   :  { %v12377_v57 = vpop.f32.mrb[58].mxu1 }
0x1f23   :  { %v12378_v1 = vpop.f32.mrb[59].mxu1  ;;  %17591 = vmatpush1.bf16.msra.mxu1 %v24560_v0 }
0x1f24   :  { %v22654_v26 = vadd.f32 %v12378_v1, %v12377_v57  ;;  %17593 = vmatprep.subr.bf16.mxu1 %v24561_v30  ;;  %v24570_v57 = vld [vmem:[#allocation33_spill] sm:$0xff]  ;;  %v24571_v1 = vld [vmem:[#allocation35_spill] sm:$0xff] }
0x1f27   :  { %17595 = vmatpush1.bf16.msra.mxu1 %v24562_v46 }
0x1f28   :  { %17597 = vmatprep.subr.bf16.mxu1 %v24563_v54 }
0x1f2b   :  { %17599 = vmatpush1.bf16.msra.mxu1 %v24564_v59 }
0x1f2c   :  { %17601 = vmatprep.subr.bf16.mxu1 %v24565_v53 }
0x1f2f   :  { %17603 = vmatpush1.bf16.msra.mxu1 %v24566_v4 }
0x1f30   :  { %17605 = vmatprep.subr.bf16.mxu1 %v24567_v34 }
0x1f33   :  { %17607 = vmatpush1.bf16.msra.mxu1 %v24568_v55 }
0x1f34   :  { %17609 = vmatprep.subr.bf16.mxu1 %v24569_v38 }
0x1f37   :  { %17611 = vmatpush1.bf16.msra.mxu1 %v24570_v57 }
0x1f38   :  { %17613 = vmatprep.subr.bf16.mxu1 %v24571_v1 }
0x1f3b   :  { %17615 = vmatpush1.bf16.msra.mxu1 %v24572_v32 }
0x1f3c   :  { %17617 = vmatprep.subr.bf16.mxu1 %v24573_v16 }
0x1f3f   :  { %17619 = vmatpush1.bf16.msra.mxu1 %v24574_v29 }
0x1f40   :  { %17621 = vmatprep.subr.bf16.mxu1 %v24575_v36 }
0x1f74   :  { %v8417_v6 = vpop.permute.xlu1 %8416 }
0x1f75   :  { %11172 = vmatmul.mubr.msk.f32.vlgmr.msra.gmra.mrb[12].mxu0 %vm1395_vm2, %v8417_v6  ;;  %v24576_v6 = vld [vmem:[#allocation6_spill] sm:$0xff] }
0x1f76   :  { %17391 = vmatpush1.bf16.msra.mxu0 %v18810_v8  ;;  %8561 = vmatprep.mubr.f32.mxu0 %v22556_v31  ;;  %v24577_v31 = vld [vmem:[#allocation8_spill] sm:$0xff] }
0x1f77   :  { %17393 = vmatprep.subr.bf16.mxu0 %v18812_v9 }
0x1f7a   :  { %17395 = vmatpush1.bf16.msra.mxu0 %v18828_v14 }
0x1f7b   :  { %17397 = vmatprep.subr.bf16.mxu0 %v18831_v15 }
0x1f7e   :  { %17399 = vmatpush1.bf16.msra.mxu0 %v18846_v20 }
0x1f7f   :  { %17401 = vmatprep.subr.bf16.mxu0 %v18849_v21 }
0x1f82   :  { %17403 = vmatpush1.bf16.msra.mxu0 %v18870_v28 }
0x1f83   :  { %17405 = vmatprep.subr.bf16.mxu0 %v18884_v33 }
0x1f86   :  { %17407 = vmatpush1.bf16.msra.mxu0 %v24192_v52 }
0x1f87   :  { %17409 = vmatprep.subr.bf16.mxu0 %v18929_v48 }
0x1f8a   :  { %17411 = vmatpush1.bf16.msra.mxu0 %v18958_v58 }
0x1f8b   :  { %17413 = vmatprep.subr.bf16.mxu0 %v18973_v63 }
0x1f8e   :  { %17415 = vmatpush1.bf16.msra.mxu0 %v24193_v62 }
0x1f8f   :  { %17417 = vmatprep.subr.bf16.mxu0 %v24514_v5 }
0x1f92   :  { %17419 = vmatpush1.bf16.msra.mxu0 %v24558_v18  ;;  %v8793_v18 = vld [vmem:[%s23608_s2 + $0xa40] sm:$0xff] }
0x1f93   :  { %17421 = vmatprep.subr.bf16.mxu0 %v24559_v13 }
0x1f96   :  { %17423 = vmatpush1.bf16.msra.mxu0 %v24560_v0  ;;  %v8796_v0 = vld [vmem:[%s23608_s2 + $0xa58] sm:$0xff] }
0x1f97   :  { %17425 = vmatprep.subr.bf16.mxu0 %v24561_v30  ;;  %v8794_v30 = vld [vmem:[%s23608_s2 + $0xa48] sm:$0xff] }
0x1f98   :  { %v17548_v13 = vpack.c.bf16 %v8796_v0, %v8794_v30 }
0x1f9a   :  { %17427 = vmatpush1.bf16.msra.mxu0 %v24562_v46  ;;  %v8791_v46 = vld [vmem:[%s23608_s2 + $0xa30] sm:$0xff] }
0x1f9b   :  { %17429 = vmatprep.subr.bf16.mxu0 %v24563_v54 }
0x1f9e   :  { %17431 = vmatpush1.bf16.msra.mxu0 %v24564_v59  ;;  %v24583_v59 = vld [vmem:[#allocation20_spill] sm:$0xff] }
0x1f9f   :  { %17433 = vmatprep.subr.bf16.mxu0 %v24565_v53  ;;  %v8792_v53 = vld [vmem:[%s23608_s2 + $0xa38] sm:$0xff] }
0x1fa2   :  { %17435 = vmatpush1.bf16.msra.mxu0 %v24566_v4  ;;  %v8790_v4 = vld [vmem:[%s23608_s2 + $0xa28] sm:$0xff] }
0x1fa3   :  { %17437 = vmatprep.subr.bf16.mxu0 %v24567_v34  ;;  %v8787_v34 = vld [vmem:[%s23608_s2 + $0xa10] sm:$0xff] }
0x1fa6   :  { %17439 = vmatpush1.bf16.msra.mxu0 %v24568_v55  ;;  %v8785_v55 = vld [vmem:[%s23608_s2 + $0xa00] sm:$0xff] }
0x1fa7   :  { %17441 = vmatprep.subr.bf16.mxu0 %v24569_v38  ;;  %v17542_v54 = vpack.c.bf16 %v8787_v34, %v8785_v55 }
0x1faa   :  { %17443 = vmatpush1.bf16.msra.mxu0 %v24570_v57  ;;  %v24582_v57 = vld [vmem:[#allocation18_spill] sm:$0xff] }
0x1fab   :  { %17445 = vmatprep.subr.bf16.mxu0 %v24571_v1  ;;  %v24581_v1 = vld [vmem:[#allocation16_spill] sm:$0xff] }
0x1fae   :  { %17447 = vmatpush1.bf16.msra.mxu0 %v24572_v32  ;;  %v8788_v32 = vld [vmem:[%s23608_s2 + $0xa18] sm:$0xff] }
0x1faf   :  { %17449 = vmatprep.subr.bf16.mxu0 %v24573_v16  ;;  %v8786_v16 = vld [vmem:[%s23608_s2 + $0xa08] sm:$0xff] }
0x1fb0   :  { %v17540_v38 = vpack.c.bf16 %v8788_v32, %v8786_v16  ;;  %v17544_v16 = vpack.c.bf16 %v8792_v53, %v8790_v4  ;;  %v8789_v32 = vld [vmem:[%s23608_s2 + $0xa20] sm:$0xff] }
0x1fb1   :  { %v17546_v34 = vpack.c.bf16 %v8791_v46, %v8789_v32  ;;  %v8800_v46 = vld [vmem:[%s23608_s2 + $0xa78] sm:$0xff] }
0x1fb2   :  { %17451 = vmatpush1.bf16.msra.mxu0 %v24574_v29  ;;  %v24580_v29 = vld [vmem:[#allocation14_spill] sm:$0xff] }
0x1fb3   :  { %17453 = vmatprep.subr.bf16.mxu0 %v24575_v36  ;;  %v24579_v36 = vld [vmem:[#allocation12_spill] sm:$0xff] }
0x1fb5   :  { %8562 = vmatmul.mubr.f32.vlgmr.msra.gmra.mrb[78].mxu0 %v22558_v17  ;;  %v24578_v17 = vld [vmem:[#allocation10_spill] sm:$0xff] }
0x1fb6   :  { %17455 = vmatpush1.bf16.msra.mxu0 %v18889_v35  ;;  %8632 = vmatprep.mubr.f32.mxu0 %v24161_v61 }
0x1fb7   :  { %17457 = vmatprep.subr.bf16.mxu0 %v18904_v40 }
0x1fba   :  { %17459 = vmatpush1.bf16.msra.mxu0 %v18920_v45 }
0x1fbb   :  { %17461 = vmatprep.subr.bf16.mxu0 %v18934_v50 }
0x1fbe   :  { %17463 = vmatpush1.bf16.msra.mxu0 %v18952_v56 }
0x1fbf   :  { %17465 = vmatprep.subr.bf16.mxu0 %v18964_v60 }
0x1fc2   :  { %17467 = vmatpush1.bf16.msra.mxu0 %v18991_v7 }
0x1fc3   :  { %17469 = vmatprep.subr.bf16.mxu0 %v24576_v6 }
0x1fc6   :  { %17471 = vmatpush1.bf16.msra.mxu0 %v24577_v31 }
0x1fc7   :  { %17473 = vmatprep.subr.bf16.mxu0 %v24578_v17 }
0x1fca   :  { %17475 = vmatpush1.bf16.msra.mxu0 %v24579_v36 }
0x1fcb   :  { %17477 = vmatprep.subr.bf16.mxu0 %v24580_v29 }
0x1fce   :  { %17479 = vmatpush1.bf16.msra.mxu0 %v24581_v1 }
0x1fcf   :  { %17481 = vmatprep.subr.bf16.mxu0 %v24582_v57 }
0x1fd2   :  { %17483 = vmatpush1.bf16.msra.mxu0 %v24583_v59 }
0x1fd3   :  { %17541 = vmatprep.subr.bf16.mxu0 %v17540_v38  ;;  %v11175_v38 = vld [vmem:[%s23607_s0 + $0x238] sm:$0xff] }
0x1fd5   :  { %8633 = vmatmul.mubr.f32.vlgmr.msra.gmra.mrb[78].mxu0 %v22632_v23  ;;  %v8775_v55 = vpop.f32.mrb[60].mxu1  ;;  %v8795_v23 = vld [vmem:[%s23608_s2 + $0xa50] sm:$0xff] }
0x1fd6   :  { %v8776_v53 = vadd.f32 %v22654_v26, %v8775_v55  ;;  %v13513_v4 = vpop.f32.mrb[61].mxu1  ;;  %17543 = vmatpush1.bf16.msra.mxu0 %v17542_v54  ;;  %8870 = vmatprep.mubr.f32.mxu0 %v24161_v61  ;;  %v8798_v26 = vld [vmem:[%s23608_s2 + $0xa68] sm:$0xff]  ;;  %v17550_v0 = vpack.c.bf16 %v8795_v23, %v8793_v18  ;;  %v8797_v54 = vld [vmem:[%s23608_s2 + $0xa60] sm:$0xff] }
0x1fd7   :  { %17545 = vmatprep.subr.bf16.mxu0 %v17544_v16  ;;  %v17552_v30 = vpack.c.bf16 %v8800_v46, %v8798_v26  ;;  %v8799_v16 = vld [vmem:[%s23608_s2 + $0xa70] sm:$0xff]  ;;  %v11173_v18 = vld [vmem:[%s23607_s0 + $0x228] sm:$0xff]  ;;  %v24584_v46 = vld [vmem:[#allocation50_spill] sm:$0xff] }
0x1fd8   :  { %v8781_v5 = vadd.f32 %v11175_v38, %v8776_v53  ;;  %v17554_v32 = vpack.c.bf16 %v8799_v16, %v8797_v54  ;;  %v24587_v54 = vld [vmem:[#allocation53_spill] sm:$0xff]  ;;  %v24588_v16 = vld [vmem:[#allocation54_spill] sm:$0xff] }
0x1fda   :  { %18714 = vtanh.f32 %v8781_v5  ;;  %17547 = vmatpush1.bf16.msra.mxu0 %v17546_v34 }
0x1fdb   :  { %17549 = vmatprep.subr.bf16.mxu0 %v17548_v13  ;;  %v11174_v13 = vld [vmem:[%s23607_s0 + $0x230] sm:$0xff] }
0x1fde   :  { %17551 = vmatpush1.bf16.msra.mxu0 %v17550_v0  ;;  %v24585_v0 = vld [vmem:[#allocation51_spill] sm:$0xff] }
0x1fdf   :  { %17553 = vmatprep.subr.bf16.mxu0 %v17552_v30  ;;  %v24586_v30 = vld [vmem:[#allocation52_spill] sm:$0xff] }
0x1fe2   :  { %17555 = vmatpush1.bf16.msra.mxu0 %v17554_v32  ;;  %v24589_v32 = vld [vmem:[#allocation55_spill] sm:$0xff] }
0x1fe3   :  { %17653 = vmatprep.subr.bf16.mxu0 %v24557_v37 }
0x1fe4   :  { %v22777_v38 = vpop.eup %18714 }
0x1fe5   :  { %8802 = vrot.lane.b32.xlu0 %v22777_v38, %s18755_s13 }
0x2057   :  { %v8803_v5 = vpop.permute.xlu0 %8802 }
0x2058   :  { %11176 = vmatmul.mubr.msk.f32.vlgmr.msra.gmra.mrb[12].mxu0 %vm1395_vm2, %v8803_v5  ;;  %v24590_v5 = vld [vmem:[#allocation2_spill] sm:$0xff] }
0x2059   :  { %17655 = vmatpush3.bf16.msra.mxu0 %v24533_v49 }
0x205a   :  { %17657 = vmatprep.subr.bf16.mxu0 %v24534_v42 }
0x205d   :  { %17659 = vmatpush3.bf16.msra.mxu0 %v24535_v3  ;;  %v9186_v3 = vld [vmem:[%s23608_s2 + $0xaf8] sm:$0xff] }
0x205e   :  { %17661 = vmatprep.subr.bf16.mxu0 %v24536_v43  ;;  %v9182_v43 = vld [vmem:[%s23608_s2 + $0xad8] sm:$0xff] }
0x2061   :  { %17663 = vmatpush3.bf16.msra.mxu0 %v24537_v22  ;;  %v9175_v22 = vld [vmem:[%s23608_s2 + $0xaa0] sm:$0xff] }
0x2062   :  { %17665 = vmatprep.subr.bf16.mxu0 %v24538_v41 }
0x2065   :  { %17667 = vmatpush3.bf16.msra.mxu0 %v24539_v44 }
0x2066   :  { %17669 = vmatprep.subr.bf16.mxu0 %v24540_v24  ;;  %v9178_v24 = vld [vmem:[%s23608_s2 + $0xab8] sm:$0xff] }
0x2069   :  { %17671 = vmatpush3.bf16.msra.mxu0 %v24541_v47  ;;  %v9176_v47 = vld [vmem:[%s23608_s2 + $0xaa8] sm:$0xff] }
0x206a   :  { %17673 = vmatprep.subr.bf16.mxu0 %v24542_v11  ;;  %v9173_v11 = vld [vmem:[%s23608_s2 + $0xa90] sm:$0xff]  ;;  %v17712_v41 = vpack.c.bf16 %v9178_v24, %v9176_v47  ;;  %v9179_v47 = vld [vmem:[%s23608_s2 + $0xac0] sm:$0xff] }
0x206d   :  { %17675 = vmatpush3.bf16.msra.mxu0 %v24543_v27 }
0x206e   :  { %17677 = vmatprep.subr.bf16.mxu0 %v24544_v10  ;;  %v9171_v10 = vld [vmem:[%s23608_s2 + $0xa80] sm:$0xff] }
0x206f   :  { %v17710_v44 = vpack.c.bf16 %v9173_v11, %v9171_v10  ;;  %v9181_v10 = vld [vmem:[%s23608_s2 + $0xad0] sm:$0xff] }
0x2071   :  { %17679 = vmatpush3.bf16.msra.mxu0 %v24545_v39  ;;  %v9174_v39 = vld [vmem:[%s23608_s2 + $0xa98] sm:$0xff] }
0x2072   :  { %17681 = vmatprep.subr.bf16.mxu0 %v24546_v25  ;;  %v9172_v25 = vld [vmem:[%s23608_s2 + $0xa88] sm:$0xff] }
0x2073   :  { %v17708_v27 = vpack.c.bf16 %v9174_v39, %v9172_v25  ;;  %v9177_v25 = vld [vmem:[%s23608_s2 + $0xab0] sm:$0xff]  ;;  %v9180_v39 = vld [vmem:[%s23608_s2 + $0xac8] sm:$0xff] }
0x2074   :  { %v17714_v11 = vpack.c.bf16 %v9177_v25, %v9175_v22  ;;  %v17716_v24 = vpack.c.bf16 %v9182_v43, %v9180_v39  ;;  %v17718_v22 = vpack.c.bf16 %v9181_v10, %v9179_v47  ;;  %v11179_v10 = vld [vmem:[%s23607_s0 + $0x250] sm:$0xff] }
0x2075   :  { %17683 = vmatpush3.bf16.msra.mxu0 %v24547_v19  ;;  %v24609_v19 = vld [vmem:[#allocation3_spill] sm:$0xff] }
0x2076   :  { %17684 = vmatprep.subr.bf16.mxu0 %v24548_v12 }
0x20a8   :  { %v8634_v55 = vpop.f32.mrb[78].mxu0 }
0x20a9   :  { %v8779_v53 = vadd.f32 %v11173_v18, %v8634_v55  ;;  %v8636_v4 = vpop.f32.mrb[79].mxu0  ;;  %v24592_v18 = vld [vmem:[#allocation9_spill] sm:$0xff] }
0x20aa   :  { %v8780_v34 = vadd.f32 %v11174_v13, %v8636_v4  ;;  %v24593_v13 = vld [vmem:[#allocation11_spill] sm:$0xff]  ;;  %v24594_v55 = vld [vmem:[#allocation13_spill] sm:$0xff] }
0x20ab   :  { %v24596_v4 = vld [vmem:[#allocation17_spill] sm:$0xff] }
0x20ac   :  { %18716 = vtanh.f32 %v8780_v34  ;;  %v24597_v34 = vld [vmem:[#allocation19_spill] sm:$0xff] }
0x20ad   :  { %18718 = vtanh.f32 %v8779_v53  ;;  %v24595_v53 = vld [vmem:[#allocation15_spill] sm:$0xff] }
0x20b6   :  { %v18717_v23 = vpop.eup %18716 }
0x20b7   :  { %v18719_v26 = vpop.eup %18718  ;;  %8947 = vmatprep.mubr.f32.mxu1 %v18717_v23  ;;  %9089 = vmatprep.mubr.f32.mxu0 %v18717_v23  ;;  %v24598_v23 = vld [vmem:[#allocation21_spill] sm:$0xff] }
0x20b8   :  { %8948 = vmatmul.mubr.f32.vlgmr.msra.gmra.mrb[62].mxu1 %v18719_v26  ;;  %9090 = vmatmul.mubr.f32.vlgmr.msra.gmra.mrb[80].mxu0 %v18719_v26  ;;  %v24599_v26 = vld [vmem:[#allocation23_spill] sm:$0xff] }
0x20b9   :  { %17623 = vmatpush1.bf16.msra.mxu1 %v18889_v35  ;;  %17686 = vmatpush3.bf16.msra.mxu0 %v24549_v2  ;;  %v24607_v2 = vld [vmem:[#allocation39_spill] sm:$0xff] }
0x20ba   :  { %17625 = vmatprep.subr.bf16.mxu1 %v18904_v40  ;;  %17687 = vmatprep.subr.bf16.mxu0 %v24548_v12 }
0x20bb   :  { %9018 = vmatprep.mubr.f32.mxu1 %v24161_v61  ;;  %13546 = vmatprep.mubr.msk.f32.mxu0 %vm18754_vm0, %v24161_v61 }
0x20bd   :  { %17627 = vmatpush1.bf16.msra.mxu1 %v18920_v45  ;;  %17689 = vmatpush3.bf16.msra.mxu0 %v24550_v51  ;;  %v24606_v51 = vld [vmem:[#allocation37_spill] sm:$0xff] }
0x20be   :  { %17629 = vmatprep.subr.bf16.mxu1 %v18934_v50  ;;  %17690 = vmatprep.subr.bf16.mxu0 %v24548_v12 }
0x20c1   :  { %17631 = vmatpush1.bf16.msra.mxu1 %v18952_v56  ;;  %17692 = vmatpush3.bf16.msra.mxu0 %v24584_v46  ;;  %v24605_v46 = vld [vmem:[#allocation35_spill] sm:$0xff] }
0x20c2   :  { %17633 = vmatprep.subr.bf16.mxu1 %v18964_v60  ;;  %17693 = vmatprep.subr.bf16.mxu0 %v24548_v12 }
0x20c5   :  { %17635 = vmatpush1.bf16.msra.mxu1 %v18991_v7  ;;  %17695 = vmatpush3.bf16.msra.mxu0 %v24585_v0  ;;  %v24604_v0 = vld [vmem:[#allocation33_spill] sm:$0xff] }
0x20c6   :  { %17637 = vmatprep.subr.bf16.mxu1 %v24576_v6  ;;  %17696 = vmatprep.subr.bf16.mxu0 %v24548_v12 }
0x20c9   :  { %17639 = vmatpush1.bf16.msra.mxu1 %v24577_v31  ;;  %17698 = vmatpush3.bf16.msra.mxu0 %v24586_v30  ;;  %v24603_v30 = vld [vmem:[#allocation31_spill] sm:$0xff] }
0x20ca   :  { %17641 = vmatprep.subr.bf16.mxu1 %v24578_v17  ;;  %17699 = vmatprep.subr.bf16.mxu0 %v24548_v12 }
0x20cd   :  { %17643 = vmatpush1.bf16.msra.mxu1 %v24579_v36  ;;  %17701 = vmatpush3.bf16.msra.mxu0 %v24587_v54  ;;  %v24602_v54 = vld [vmem:[#allocation29_spill] sm:$0xff] }
0x20ce   :  { %17645 = vmatprep.subr.bf16.mxu1 %v24580_v29  ;;  %17702 = vmatprep.subr.bf16.mxu0 %v24548_v12 }
0x20d1   :  { %17647 = vmatpush1.bf16.msra.mxu1 %v24581_v1  ;;  %17704 = vmatpush3.bf16.msra.mxu0 %v24588_v16  ;;  %v24601_v16 = vld [vmem:[#allocation27_spill] sm:$0xff] }
0x20d2   :  { %17649 = vmatprep.subr.bf16.mxu1 %v24582_v57  ;;  %17705 = vmatprep.subr.bf16.mxu0 %v24548_v12  ;;  %v24608_v12 = vld [vmem:[#allocation41_spill] sm:$0xff] }
0x20d5   :  { %17651 = vmatpush1.bf16.msra.mxu1 %v24583_v59  ;;  %17707 = vmatpush3.bf16.msra.mxu0 %v24589_v32  ;;  %v24600_v32 = vld [vmem:[#allocation25_spill] sm:$0xff] }
0x20d6   :  { %17725 = vmatprep.subr.bf16.mxu1 %v24590_v5  ;;  %17709 = vmatprep.subr.bf16.mxu0 %v17708_v27  ;;  %v9184_v27 = vld [vmem:[%s23608_s2 + $0xae8] sm:$0xff] }
0x20d7   :  { %v17720_v43 = vpack.c.bf16 %v9186_v3, %v9184_v27  ;;  %v11177_v3 = vld [vmem:[%s23607_s0 + $0x240] sm:$0xff] }
0x20d8   :  { %9019 = vmatmul.mubr.f32.vlgmr.msra.gmra.mrb[62].mxu1 %v22777_v38  ;;  %13547 = vmatmul.mubr.f32.vlgmr.msra.gmra.mrb[82].mxu0 %v22777_v38  ;;  %v24591_v38 = vld [vmem:[#allocation7_spill] sm:$0xff] }
0x20d9   :  { %17727 = vmatpush1.bf16.msra.mxu1 %v18810_v8  ;;  %9256 = vmatprep.mubr.f32.mxu0 %v24161_v61 }
0x20da   :  { %17729 = vmatprep.subr.bf16.mxu1 %v18812_v9  ;;  %17711 = vmatpush1.bf16.msra.mxu0 %v17710_v44  ;;  %v9185_v44 = vld [vmem:[%s23608_s2 + $0xaf0] sm:$0xff] }
0x20db   :  { %17713 = vmatprep.subr.bf16.mxu0 %v17712_v41  ;;  %v9183_v41 = vld [vmem:[%s23608_s2 + $0xae0] sm:$0xff] }
0x20dc   :  { %v17722_v25 = vpack.c.bf16 %v9185_v44, %v9183_v41 }
0x20dd   :  { %17731 = vmatpush1.bf16.msra.mxu1 %v18828_v14 }
0x20de   :  { %17733 = vmatprep.subr.bf16.mxu1 %v18831_v15  ;;  %17715 = vmatpush1.bf16.msra.mxu0 %v17714_v11 }
0x20df   :  { %17717 = vmatprep.subr.bf16.mxu0 %v17716_v24  ;;  %v11178_v24 = vld [vmem:[%s23607_s0 + $0x248] sm:$0xff] }
0x20e1   :  { %17735 = vmatpush1.bf16.msra.mxu1 %v18846_v20 }
0x20e2   :  { %17737 = vmatprep.subr.bf16.mxu1 %v18849_v21  ;;  %17719 = vmatpush1.bf16.msra.mxu0 %v17718_v22 }
0x20e3   :  { %17721 = vmatprep.subr.bf16.mxu0 %v17720_v43 }
0x20e5   :  { %17739 = vmatpush1.bf16.msra.mxu1 %v18870_v28 }
0x20e6   :  { %17741 = vmatprep.subr.bf16.mxu1 %v18884_v33  ;;  %17723 = vmatpush1.bf16.msra.mxu0 %v17722_v25 }
0x20e7   :  { %17821 = vmatprep.subr.bf16.mxu0 %v24557_v37 }
0x20e9   :  { %17743 = vmatpush1.bf16.msra.mxu1 %v24192_v52 }
0x20ea   :  { %17745 = vmatprep.subr.bf16.mxu1 %v18929_v48 }
0x20ed   :  { %17747 = vmatpush1.bf16.msra.mxu1 %v18958_v58 }
0x20ee   :  { %17749 = vmatprep.subr.bf16.mxu1 %v18973_v63 }
0x20f1   :  { %17751 = vmatpush1.bf16.msra.mxu1 %v24193_v62 }
0x20f2   :  { %17753 = vmatprep.subr.bf16.mxu1 %v24591_v38 }
0x20f5   :  { %17755 = vmatpush1.bf16.msra.mxu1 %v24592_v18 }
0x20f6   :  { %17757 = vmatprep.subr.bf16.mxu1 %v24593_v13 }
0x20f9   :  { %17759 = vmatpush1.bf16.msra.mxu1 %v24594_v55 }
0x20fa   :  { %17761 = vmatprep.subr.bf16.mxu1 %v24595_v53 }
0x20fd   :  { %17763 = vmatpush1.bf16.msra.mxu1 %v24596_v4 }
0x20fe   :  { %17765 = vmatprep.subr.bf16.mxu1 %v24597_v34 }
0x2101   :  { %17767 = vmatpush1.bf16.msra.mxu1 %v24598_v23 }
0x2102   :  { %17769 = vmatprep.subr.bf16.mxu1 %v24599_v26 }
0x2105   :  { %17771 = vmatpush1.bf16.msra.mxu1 %v24600_v32 }
0x2106   :  { %17773 = vmatprep.subr.bf16.mxu1 %v24601_v16 }
0x2109   :  { %17775 = vmatpush1.bf16.msra.mxu1 %v24602_v54 }
0x210a   :  { %17777 = vmatprep.subr.bf16.mxu1 %v24603_v30 }
0x210d   :  { %17779 = vmatpush1.bf16.msra.mxu1 %v24604_v0 }
0x210e   :  { %17781 = vmatprep.subr.bf16.mxu1 %v24605_v46 }
0x2111   :  { %17783 = vmatpush1.bf16.msra.mxu1 %v24606_v51 }
0x2112   :  { %17785 = vmatprep.subr.bf16.mxu1 %v24607_v2 }
0x2115   :  { %17787 = vmatpush1.bf16.msra.mxu1 %v24608_v12 }
0x2116   :  { %17789 = vmatprep.subr.bf16.mxu1 %v24609_v19 }
0x218b   :  { %v12429_v39 = vpop.f32.mrb[80].mxu0 }
0x218c   :  { %v12430_v42 = vpop.f32.mrb[81].mxu0 }
0x218d   :  { %v12431_v11 = vadd.f32 %v12430_v42, %v12429_v39 }
0x21ab   :  { %v9020_v47 = vpop.f32.mrb[62].mxu1  ;;  %v9161_v27 = vpop.f32.mrb[82].mxu0 }
0x21ac   :  { %v9165_v22 = vadd.f32 %v11177_v3, %v9020_v47  ;;  %v9162_v43 = vadd.f32 %v12431_v11, %v9161_v27  ;;  %v9022_v41 = vpop.f32.mrb[63].mxu1  ;;  %v13548_v44 = vpop.f32.mrb[83].mxu0  ;;  %v24610_v3 = vld [vmem:[#allocation24_spill] sm:$0xff] }
0x21ad   :  { %v9166_v25 = vadd.f32 %v11178_v24, %v9022_v41  ;;  %v24611_v24 = vld [vmem:[#allocation26_spill] sm:$0xff]  ;;  %v24612_v47 = vld [vmem:[#allocation28_spill] sm:$0xff] }
0x21ae   :  { %18720 = vtanh.f32 %v9165_v22  ;;  %v9167_v42 = vadd.f32 %v11179_v10, %v9162_v43  ;;  %v24613_v10 = vld [vmem:[#allocation30_spill] sm:$0xff]  ;;  %v24614_v27 = vld [vmem:[#allocation32_spill] sm:$0xff] }
0x21af   :  { %18722 = vtanh.f32 %v9166_v25  ;;  %v24615_v22 = vld [vmem:[#allocation34_spill] sm:$0xff]  ;;  %v24616_v43 = vld [vmem:[#allocation36_spill] sm:$0xff] }
0x21b0   :  { %18724 = vtanh.f32 %v9167_v42  ;;  %v24617_v41 = vld [vmem:[#allocation38_spill] sm:$0xff]  ;;  %v24618_v44 = vld [vmem:[#allocation40_spill] sm:$0xff]  ;;  %v24620_v42 = vld [vmem:[#allocation43_spill] sm:$0xff] }
0x21b1   :  { %v24619_v25 = vld [vmem:[#allocation42_spill] sm:$0xff] }
0x21b8   :  { %v22931_v39 = vpop.eup %18720 }
0x21b9   :  { %v18723_v37 = vpop.eup %18722 }
0x21ba   :  { %v22933_v49 = vpop.eup %18724  ;;  %9333 = vmatprep.mubr.f32.mxu1 %v18723_v37 }
0x21bb   :  { %9188 = vrot.lane.b32.xlu1 %v22933_v49, %s18755_s13  ;;  %9334 = vmatmul.mubr.f32.vlgmr.msra.gmra.mrb[64].mxu1 %v22931_v39 }
0x21bc   :  { %17791 = vmatpush1.bf16.msra.mxu1 %v18889_v35  ;;  %9404 = vmatprep.mubr.f32.mxu1 %v24161_v61 }
0x21bd   :  { %17793 = vmatprep.subr.bf16.mxu1 %v18904_v40 }
0x21c0   :  { %17795 = vmatpush1.bf16.msra.mxu1 %v18920_v45 }
0x21c1   :  { %17797 = vmatprep.subr.bf16.mxu1 %v18934_v50 }
0x21c4   :  { %17799 = vmatpush1.bf16.msra.mxu1 %v18952_v56 }
0x21c5   :  { %17801 = vmatprep.subr.bf16.mxu1 %v18964_v60 }
0x21c8   :  { %17803 = vmatpush1.bf16.msra.mxu1 %v18991_v7 }
0x21c9   :  { %17805 = vmatprep.subr.bf16.mxu1 %v24576_v6 }
0x21cc   :  { %17807 = vmatpush1.bf16.msra.mxu1 %v24577_v31 }
0x21cd   :  { %17809 = vmatprep.subr.bf16.mxu1 %v24578_v17 }
0x21d0   :  { %17811 = vmatpush1.bf16.msra.mxu1 %v24579_v36 }
0x21d1   :  { %17813 = vmatprep.subr.bf16.mxu1 %v24580_v29 }
0x21d4   :  { %17815 = vmatpush1.bf16.msra.mxu1 %v24581_v1 }
0x21d5   :  { %17817 = vmatprep.subr.bf16.mxu1 %v24582_v57 }
0x21d8   :  { %17819 = vmatpush1.bf16.msra.mxu1 %v24583_v59 }
0x21d9   :  { %17893 = vmatprep.subr.bf16.mxu1 %v24590_v5 }
0x21db   :  { %9405 = vmatmul.mubr.f32.vlgmr.msra.gmra.mrb[64].mxu1 %v22933_v49 }
0x21dc   :  { %17895 = vmatpush1.bf16.msra.mxu1 %v18810_v8 }
0x21dd   :  { %17897 = vmatprep.subr.bf16.mxu1 %v18812_v9 }
0x21e0   :  { %17899 = vmatpush1.bf16.msra.mxu1 %v18828_v14 }
0x21e1   :  { %17901 = vmatprep.subr.bf16.mxu1 %v18831_v15 }
0x21e4   :  { %17903 = vmatpush1.bf16.msra.mxu1 %v18846_v20 }
0x21e5   :  { %17905 = vmatprep.subr.bf16.mxu1 %v18849_v21 }
0x21e8   :  { %17907 = vmatpush1.bf16.msra.mxu1 %v18870_v28 }
0x21e9   :  { %17909 = vmatprep.subr.bf16.mxu1 %v18884_v33 }
0x21ec   :  { %17911 = vmatpush1.bf16.msra.mxu1 %v24192_v52 }
0x21ed   :  { %17913 = vmatprep.subr.bf16.mxu1 %v18929_v48 }
0x21f0   :  { %17915 = vmatpush1.bf16.msra.mxu1 %v18958_v58 }
0x21f1   :  { %17917 = vmatprep.subr.bf16.mxu1 %v18973_v63 }
0x21f4   :  { %17919 = vmatpush1.bf16.msra.mxu1 %v24193_v62 }
0x21f5   :  { %17921 = vmatprep.subr.bf16.mxu1 %v24591_v38 }
0x21f8   :  { %17923 = vmatpush1.bf16.msra.mxu1 %v24592_v18 }
0x21f9   :  { %17925 = vmatprep.subr.bf16.mxu1 %v24593_v13 }
0x21fc   :  { %17927 = vmatpush1.bf16.msra.mxu1 %v24594_v55 }
0x21fd   :  { %17929 = vmatprep.subr.bf16.mxu1 %v24595_v53 }
0x2200   :  { %17931 = vmatpush1.bf16.msra.mxu1 %v24596_v4 }
0x2201   :  { %17933 = vmatprep.subr.bf16.mxu1 %v24597_v34 }
0x2204   :  { %17935 = vmatpush1.bf16.msra.mxu1 %v24598_v23  ;;  %v11182_v23 = vld [vmem:[%s23607_s0 + $0x260] sm:$0xff] }
0x2205   :  { %17937 = vmatprep.subr.bf16.mxu1 %v24599_v26  ;;  %v11181_v26 = vld [vmem:[%s23607_s0 + $0x258] sm:$0xff] }
0x2208   :  { %17939 = vmatpush1.bf16.msra.mxu1 %v24600_v32  ;;  %v24633_v32 = vld [vmem:[#allocation55_spill] sm:$0xff] }
0x2209   :  { %17941 = vmatprep.subr.bf16.mxu1 %v24601_v16  ;;  %v24632_v16 = vld [vmem:[#allocation54_spill] sm:$0xff] }
0x220c   :  { %17943 = vmatpush1.bf16.msra.mxu1 %v24602_v54  ;;  %v24631_v54 = vld [vmem:[#allocation53_spill] sm:$0xff] }
0x220d   :  { %17945 = vmatprep.subr.bf16.mxu1 %v24603_v30  ;;  %v24629_v30 = vld [vmem:[#allocation51_spill] sm:$0xff] }
0x2210   :  { %17947 = vmatpush1.bf16.msra.mxu1 %v24604_v0  ;;  %v24628_v0 = vld [vmem:[#allocation50_spill] sm:$0xff] }
0x2211   :  { %17949 = vmatprep.subr.bf16.mxu1 %v24605_v46  ;;  %v24627_v46 = vld [vmem:[#allocation49_spill] sm:$0xff] }
0x2214   :  { %17951 = vmatpush1.bf16.msra.mxu1 %v24606_v51  ;;  %v24626_v51 = vld [vmem:[#allocation48_spill] sm:$0xff] }
0x2215   :  { %17953 = vmatprep.subr.bf16.mxu1 %v24607_v2  ;;  %v24625_v2 = vmov 0.0|0.0  }
0x2218   :  { %17955 = vmatpush1.bf16.msra.mxu1 %v24608_v12  ;;  %v24624_v12 = vld [vmem:[#allocation47_spill] sm:$0xff] }
0x2219   :  { %17957 = vmatprep.subr.bf16.mxu1 %v24609_v19  ;;  %v24623_v19 = vld [vmem:[#allocation46_spill] sm:$0xff] }
0x222d   :  { %v9189_v11 = vpop.permute.xlu1 %9188 }
0x222e   :  { %11180 = vmatmul.mubr.msk.f32.vlgmr.msra.gmra.mrb[12].mxu0 %vm1395_vm2, %v9189_v11  ;;  %v24622_v11 = vld [vmem:[#allocation45_spill] sm:$0xff] }
0x222f   :  { %17823 = vmatpush3.bf16.msra.mxu0 %v24610_v3  ;;  %9475 = vmatprep.mubr.f32.mxu0 %v18723_v37  ;;  %v24621_v37 = vld [vmem:[#allocation44_spill] sm:$0xff] }
0x2230   :  { %17825 = vmatprep.subr.bf16.mxu0 %v24611_v24 }
0x2233   :  { %17827 = vmatpush3.bf16.msra.mxu0 %v24612_v47 }
0x2234   :  { %17829 = vmatprep.subr.bf16.mxu0 %v24613_v10 }
0x2237   :  { %17831 = vmatpush3.bf16.msra.mxu0 %v24614_v27 }
0x2238   :  { %17833 = vmatprep.subr.bf16.mxu0 %v24615_v22 }
0x223b   :  { %17835 = vmatpush3.bf16.msra.mxu0 %v24616_v43 }
0x223c   :  { %17837 = vmatprep.subr.bf16.mxu0 %v24617_v41 }
0x223f   :  { %17839 = vmatpush3.bf16.msra.mxu0 %v24618_v44 }
0x2240   :  { %17841 = vmatprep.subr.bf16.mxu0 %v24619_v25 }
0x2243   :  { %17843 = vmatpush3.bf16.msra.mxu0 %v24620_v42 }
0x2244   :  { %17845 = vmatprep.subr.bf16.mxu0 %v24621_v37 }
0x2247   :  { %17847 = vmatpush3.bf16.msra.mxu0 %v24622_v11 }
0x2248   :  { %17849 = vmatprep.subr.bf16.mxu0 %v24623_v19 }
0x224b   :  { %17851 = vmatpush3.bf16.msra.mxu0 %v24624_v12 }
0x224c   :  { %17852 = vmatprep.subr.bf16.mxu0 %v24625_v2 }
0x224e   :  { %9476 = vmatmul.mubr.f32.vlgmr.msra.gmra.mrb[84].mxu0 %v22931_v39  ;;  %v24630_v39 = vld [vmem:[#allocation52_spill] sm:$0xff] }
0x224f   :  { %17854 = vmatpush3.bf16.msra.mxu0 %v24626_v51  ;;  %13581 = vmatprep.mubr.msk.f32.mxu0 %vm18754_vm0, %v24161_v61 }
0x2250   :  { %17855 = vmatprep.subr.bf16.mxu0 %v24625_v2 }
0x2253   :  { %17857 = vmatpush3.bf16.msra.mxu0 %v24627_v46 }
0x2254   :  { %17858 = vmatprep.subr.bf16.mxu0 %v24625_v2 }
0x2257   :  { %17860 = vmatpush3.bf16.msra.mxu0 %v24628_v0 }
0x2258   :  { %17861 = vmatprep.subr.bf16.mxu0 %v24625_v2 }
0x225b   :  { %17863 = vmatpush3.bf16.msra.mxu0 %v24629_v30 }
0x225c   :  { %17864 = vmatprep.subr.bf16.mxu0 %v24625_v2 }
0x225f   :  { %17866 = vmatpush3.bf16.msra.mxu0 %v24630_v39 }
0x2260   :  { %17867 = vmatprep.subr.bf16.mxu0 %v24625_v2 }
0x2263   :  { %17869 = vmatpush3.bf16.msra.mxu0 %v24631_v54 }
0x2264   :  { %17870 = vmatprep.subr.bf16.mxu0 %v24625_v2 }
0x2267   :  { %17872 = vmatpush3.bf16.msra.mxu0 %v24632_v16 }
0x2268   :  { %17873 = vmatprep.subr.bf16.mxu0 %v24625_v2 }
0x226b   :  { %17875 = vmatpush3.bf16.msra.mxu0 %v24633_v32 }
0x226e   :  { %13582 = vmatmul.mubr.f32.vlgmr.msra.gmra.mrb[86].mxu0 %v22933_v49  ;;  %v9558_v49 = vld [vmem:[%s23608_s2 + $0xb08] sm:$0xff] }
0x226f   :  { %9642 = vmatprep.mubr.f32.mxu0 %v24161_v61 }
0x22ae   :  { %v9406_v34 = vpop.f32.mrb[64].mxu1 }
0x22af   :  { %v9551_v4 = vadd.f32 %v11181_v26, %v9406_v34  ;;  %v9408_v53 = vpop.f32.mrb[65].mxu1  ;;  %v9559_v34 = vld [vmem:[%s23608_s2 + $0xb10] sm:$0xff]  ;;  %v9564_v26 = vld [vmem:[%s23608_s2 + $0xb38] sm:$0xff] }
0x22b0   :  { %v9552_v55 = vadd.f32 %v11182_v23, %v9408_v53  ;;  %v9557_v53 = vld [vmem:[%s23608_s2 + $0xb00] sm:$0xff]  ;;  %v9562_v23 = vld [vmem:[%s23608_s2 + $0xb28] sm:$0xff] }
0x22b2   :  { %18726 = vtanh.f32 %v9552_v55  ;;  %v9560_v55 = vld [vmem:[%s23608_s2 + $0xb18] sm:$0xff] }
0x22b3   :  { %18728 = vtanh.f32 %v9551_v4  ;;  %v17876_v4 = vpack.c.bf16 %v9560_v55, %v9558_v49  ;;  %v9561_v49 = vld [vmem:[%s23608_s2 + $0xb20] sm:$0xff]  ;;  %v9563_v55 = vld [vmem:[%s23608_s2 + $0xb30] sm:$0xff] }
0x22b5   :  { %17877 = vmatprep.subr.bf16.mxu0 %v17876_v4  ;;  %v9570_v4 = vld [vmem:[%s23608_s2 + $0xb68] sm:$0xff] }
0x22bc   :  { %v23031_v13 = vpop.eup %18726 }
0x22bd   :  { %v23033_v18 = vpop.eup %18728  ;;  %9719 = vmatprep.mubr.f32.mxu1 %v23031_v13 }
0x22be   :  { %9720 = vmatmul.mubr.f32.vlgmr.msra.gmra.mrb[66].mxu1 %v23033_v18 }
0x22bf   :  { %17959 = vmatpush1.bf16.msra.mxu1 %v18889_v35  ;;  %9790 = vmatprep.mubr.f32.mxu1 %v24161_v61 }
0x22c0   :  { %17961 = vmatprep.subr.bf16.mxu1 %v18904_v40 }
0x22c3   :  { %17963 = vmatpush1.bf16.msra.mxu1 %v18920_v45 }
0x22c4   :  { %17965 = vmatprep.subr.bf16.mxu1 %v18934_v50 }
0x22c7   :  { %17967 = vmatpush1.bf16.msra.mxu1 %v18952_v56 }
0x22c8   :  { %17969 = vmatprep.subr.bf16.mxu1 %v18964_v60 }
0x22cb   :  { %17971 = vmatpush1.bf16.msra.mxu1 %v18991_v7 }
0x22cc   :  { %17973 = vmatprep.subr.bf16.mxu1 %v24576_v6  ;;  %v9566_v6 = vld [vmem:[%s23608_s2 + $0xb48] sm:$0xff] }
0x22cf   :  { %17975 = vmatpush1.bf16.msra.mxu1 %v24577_v31  ;;  %v17880_v31 = vpack.c.bf16 %v9564_v26, %v9562_v23  ;;  %v9565_v26 = vld [vmem:[%s23608_s2 + $0xb40] sm:$0xff] }
0x22d0   :  { %17977 = vmatprep.subr.bf16.mxu1 %v24578_v17  ;;  %v17878_v17 = vpack.c.bf16 %v9559_v34, %v9557_v53  ;;  %v9568_v53 = vld [vmem:[%s23608_s2 + $0xb58] sm:$0xff]  ;;  %v17882_v34 = vpack.c.bf16 %v9563_v55, %v9561_v49  ;;  %v9569_v49 = vld [vmem:[%s23608_s2 + $0xb60] sm:$0xff]  ;;  %v9571_v55 = vld [vmem:[%s23608_s2 + $0xb70] sm:$0xff] }
0x22d1   :  { %v17884_v23 = vpack.c.bf16 %v9568_v53, %v9566_v6  ;;  %v24634_v53 = vld [vmem:[#allocation22_spill] sm:$0xff] }
0x22d2   :  { %17879 = vmatpush1.bf16.msra.mxu0 %v17878_v17  ;;  %v9572_v17 = vld [vmem:[%s23608_s2 + $0xb78] sm:$0xff] }
0x22d3   :  { %17979 = vmatpush1.bf16.msra.mxu1 %v24579_v36  ;;  %17881 = vmatprep.subr.bf16.mxu0 %v17880_v31  ;;  %v9567_v36 = vld [vmem:[%s23608_s2 + $0xb50] sm:$0xff]  ;;  %v17888_v31 = vpack.c.bf16 %v9572_v17, %v9570_v4 }
0x22d4   :  { %17981 = vmatprep.subr.bf16.mxu1 %v24580_v29  ;;  %v17886_v6 = vpack.c.bf16 %v9567_v36, %v9565_v26  ;;  %v11183_v26 = vld [vmem:[%s23607_s0 + $0x268] sm:$0xff] }
0x22d6   :  { %17883 = vmatpush1.bf16.msra.mxu0 %v17882_v34 }
0x22d7   :  { %17983 = vmatpush1.bf16.msra.mxu1 %v24581_v1  ;;  %17885 = vmatprep.subr.bf16.mxu0 %v17884_v23  ;;  %v17890_v1 = vpack.c.bf16 %v9571_v55, %v9569_v49 }
0x22d8   :  { %17985 = vmatprep.subr.bf16.mxu1 %v24582_v57 }
0x22da   :  { %17887 = vmatpush1.bf16.msra.mxu0 %v17886_v6 }
0x22db   :  { %17987 = vmatpush1.bf16.msra.mxu1 %v24583_v59  ;;  %17889 = vmatprep.subr.bf16.mxu0 %v17888_v31 }
0x22dc   :  { %18157 = vmatprep.subr.bf16.mxu1 %v24634_v53 }
0x22de   :  { %17891 = vmatpush1.bf16.msra.mxu0 %v17890_v1  ;;  %v11186_v1 = vld [vmem:[%s23607_s0 + $0x278] sm:$0xff] }
0x22df   :  { %17989 = vmatprep.subr.bf16.mxu0 %v24634_v53 }
0x2321   :  { %v12481_v36 = vpop.f32.mrb[84].mxu0 }
0x2322   :  { %v12482_v34 = vpop.f32.mrb[85].mxu0 }
0x2323   :  { %v12483_v23 = vadd.f32 %v12482_v34, %v12481_v36  ;;  %v9946_v36 = vld [vmem:[%s23608_s2 + $0xb98] sm:$0xff]  ;;  %v9943_v34 = vld [vmem:[%s23608_s2 + $0xb80] sm:$0xff] }
0x2341   :  { %v9547_v4 = vpop.f32.mrb[86].mxu0 }
0x2342   :  { %v9548_v17 = vadd.f32 %v12483_v23, %v9547_v4  ;;  %v13583_v57 = vpop.f32.mrb[87].mxu0  ;;  %v9948_v4 = vld [vmem:[%s23608_s2 + $0xba8] sm:$0xff] }
0x2343   :  { %v11185_v57 = vld [vmem:[%s23607_s0 + $0x270] sm:$0xff] }
0x2344   :  { %v9553_v29 = vadd.f32 %v11183_v26, %v9548_v17  ;;  %v9945_v26 = vld [vmem:[%s23608_s2 + $0xb90] sm:$0xff]  ;;  %v9950_v17 = vld [vmem:[%s23608_s2 + $0xbb8] sm:$0xff] }
0x2346   :  { %18730 = vtanh.f32 %v9553_v29 }
0x2350   :  { %v18731_v59 = vpop.eup %18730 }
0x2351   :  { %9574 = vrot.lane.b32.xlu0 %v18731_v59, %s18755_s13  ;;  %9791 = vmatmul.mubr.f32.vlgmr.msra.gmra.mrb[66].mxu1 %v18731_v59 }
0x2352   :  { %18159 = vmatpush3.bf16.msra.mxu1 %v24610_v3 }
0x2353   :  { %18161 = vmatprep.subr.bf16.mxu1 %v24611_v24 }
0x2356   :  { %18163 = vmatpush3.bf16.msra.mxu1 %v24612_v47 }
0x2357   :  { %18165 = vmatprep.subr.bf16.mxu1 %v24613_v10 }
0x235a   :  { %18167 = vmatpush3.bf16.msra.mxu1 %v24614_v27 }
0x235b   :  { %18169 = vmatprep.subr.bf16.mxu1 %v24615_v22 }
0x235e   :  { %18171 = vmatpush3.bf16.msra.mxu1 %v24616_v43 }
0x235f   :  { %18173 = vmatprep.subr.bf16.mxu1 %v24617_v41 }
0x2362   :  { %18175 = vmatpush3.bf16.msra.mxu1 %v24618_v44 }
0x2363   :  { %18177 = vmatprep.subr.bf16.mxu1 %v24619_v25 }
0x2366   :  { %18179 = vmatpush3.bf16.msra.mxu1 %v24620_v42 }
0x2367   :  { %18181 = vmatprep.subr.bf16.mxu1 %v24621_v37 }
0x236a   :  { %18183 = vmatpush3.bf16.msra.mxu1 %v24622_v11 }
0x236b   :  { %18185 = vmatprep.subr.bf16.mxu1 %v24623_v19 }
0x236e   :  { %18187 = vmatpush3.bf16.msra.mxu1 %v24624_v12 }
0x236f   :  { %18188 = vmatprep.subr.bf16.mxu1 %v24625_v2 }
0x23c3   :  { %v9575_v29 = vpop.permute.xlu0 %9574 }
0x23c4   :  { %11184 = vmatmul.mubr.msk.f32.vlgmr.msra.gmra.mrb[12].mxu0 %vm1395_vm2, %v9575_v29  ;;  %v18046_v29 = vpack.c.bf16 %v9945_v26, %v9943_v34  ;;  %v9953_v34 = vld [vmem:[%s23608_s2 + $0xbd0] sm:$0xff]  ;;  %v9958_v26 = vld [vmem:[%s23608_s2 + $0xbf8] sm:$0xff] }
0x23c5   :  { %17991 = vmatpush3.bf16.msra.mxu0 %v24610_v3  ;;  %9861 = vmatprep.mubr.f32.mxu0 %v23031_v13 }
0x23c6   :  { %17993 = vmatprep.subr.bf16.mxu0 %v24611_v24 }
0x23c9   :  { %17995 = vmatpush3.bf16.msra.mxu0 %v24612_v47 }
0x23ca   :  { %17997 = vmatprep.subr.bf16.mxu0 %v24613_v10 }
0x23cd   :  { %17999 = vmatpush3.bf16.msra.mxu0 %v24614_v27 }
0x23ce   :  { %18001 = vmatprep.subr.bf16.mxu0 %v24615_v22 }
0x23d1   :  { %18003 = vmatpush3.bf16.msra.mxu0 %v24616_v43 }
0x23d2   :  { %18005 = vmatprep.subr.bf16.mxu0 %v24617_v41 }
0x23d5   :  { %18007 = vmatpush3.bf16.msra.mxu0 %v24618_v44 }
0x23d6   :  { %18009 = vmatprep.subr.bf16.mxu0 %v24619_v25 }
0x23d9   :  { %18011 = vmatpush3.bf16.msra.mxu0 %v24620_v42 }
0x23da   :  { %18013 = vmatprep.subr.bf16.mxu0 %v24621_v37 }
0x23dd   :  { %18015 = vmatpush3.bf16.msra.mxu0 %v24622_v11 }
0x23de   :  { %18017 = vmatprep.subr.bf16.mxu0 %v24623_v19 }
0x23e1   :  { %18019 = vmatpush3.bf16.msra.mxu0 %v24624_v12 }
0x23e2   :  { %18020 = vmatprep.subr.bf16.mxu0 %v24625_v2 }
0x23e4   :  { %9862 = vmatmul.mubr.f32.vlgmr.msra.gmra.mrb[88].mxu0 %v23033_v18 }
0x23e5   :  { %18022 = vmatpush3.bf16.msra.mxu0 %v24626_v51  ;;  %13616 = vmatprep.mubr.msk.f32.mxu0 %vm18754_vm0, %v24161_v61 }
0x23e6   :  { %18023 = vmatprep.subr.bf16.mxu0 %v24625_v2 }
0x23e9   :  { %18025 = vmatpush3.bf16.msra.mxu0 %v24627_v46 }
0x23ea   :  { %18026 = vmatprep.subr.bf16.mxu0 %v24625_v2 }
0x23ed   :  { %18028 = vmatpush3.bf16.msra.mxu0 %v24628_v0 }
0x23ee   :  { %18029 = vmatprep.subr.bf16.mxu0 %v24625_v2 }
0x23f1   :  { %18031 = vmatpush3.bf16.msra.mxu0 %v24629_v30 }
0x23f2   :  { %18032 = vmatprep.subr.bf16.mxu0 %v24625_v2 }
0x23f5   :  { %18034 = vmatpush3.bf16.msra.mxu0 %v24630_v39 }
0x23f6   :  { %18035 = vmatprep.subr.bf16.mxu0 %v24625_v2 }
0x23f9   :  { %18037 = vmatpush3.bf16.msra.mxu0 %v24631_v54 }
0x23fa   :  { %18038 = vmatprep.subr.bf16.mxu0 %v24625_v2 }
0x23fd   :  { %18040 = vmatpush3.bf16.msra.mxu0 %v24632_v16 }
0x23fe   :  { %18041 = vmatprep.subr.bf16.mxu0 %v24625_v2 }
0x2401   :  { %18043 = vmatpush3.bf16.msra.mxu0 %v24633_v32 }
0x2404   :  { %13617 = vmatmul.mubr.f32.vlgmr.msra.gmra.mrb[90].mxu0 %v18731_v59  ;;  %v9944_v59 = vld [vmem:[%s23608_s2 + $0xb88] sm:$0xff] }
0x2405   :  { %10028 = vmatprep.mubr.f32.mxu0 %v24161_v61  ;;  %v18044_v23 = vpack.c.bf16 %v9946_v36, %v9944_v59  ;;  %v9951_v36 = vld [vmem:[%s23608_s2 + $0xbc0] sm:$0xff] }
0x2407   :  { %18045 = vmatprep.subr.bf16.mxu0 %v18044_v23  ;;  %v9956_v23 = vld [vmem:[%s23608_s2 + $0xbe8] sm:$0xff] }
0x2408   :  { %18047 = vmatpush1.bf16.msra.mxu0 %v18046_v29  ;;  %v9955_v29 = vld [vmem:[%s23608_s2 + $0xbe0] sm:$0xff] }
0x2424   :  { %v9792_v18 = vpop.f32.mrb[66].mxu1 }
0x2425   :  { %v9937_v13 = vadd.f32 %v11185_v57, %v9792_v18  ;;  %v9794_v6 = vpop.f32.mrb[67].mxu1  ;;  %v18048_v57 = vpack.c.bf16 %v9950_v17, %v9948_v4  ;;  %v9949_v18 = vld [vmem:[%s23608_s2 + $0xbb0] sm:$0xff]  ;;  %v18054_v4 = vpack.c.bf16 %v9953_v34, %v9951_v36  ;;  %v18056_v17 = vpack.c.bf16 %v9958_v26, %v9956_v23 }
0x2426   :  { %v9938_v31 = vadd.f32 %v11186_v1, %v9794_v6  ;;  %v9947_v1 = vld [vmem:[%s23608_s2 + $0xba0] sm:$0xff]  ;;  %v9954_v6 = vld [vmem:[%s23608_s2 + $0xbd8] sm:$0xff] }
0x2427   :  { %18049 = vmatprep.subr.bf16.mxu0 %v18048_v57  ;;  %v9957_v57 = vld [vmem:[%s23608_s2 + $0xbf0] sm:$0xff] }
0x2428   :  { %18732 = vtanh.f32 %v9938_v31  ;;  %v18050_v31 = vpack.c.bf16 %v9949_v18, %v9947_v1  ;;  %v18058_v1 = vpack.c.bf16 %v9957_v57, %v9955_v29  ;;  %v24637_v57 = vld [vmem:[#allocation13_spill] sm:$0xff] }
0x2429   :  { %18734 = vtanh.f32 %v9937_v13  ;;  %v9952_v13 = vld [vmem:[%s23608_s2 + $0xbc8] sm:$0xff] }
0x242a   :  { %v18052_v59 = vpack.c.bf16 %v9954_v6, %v9952_v13  ;;  %18051 = vmatpush1.bf16.msra.mxu0 %v18050_v31  ;;  %v11187_v31 = vld [vmem:[%s23607_s0 + $0x280] sm:$0xff] }
0x242c   :  { %18053 = vmatprep.subr.bf16.mxu0 %v18052_v59 }
0x242e   :  { %18055 = vmatpush1.bf16.msra.mxu0 %v18054_v4  ;;  %v24636_v4 = vld [vmem:[#allocation11_spill] sm:$0xff] }
0x242f   :  { %18057 = vmatprep.subr.bf16.mxu0 %v18056_v17 }
0x2432   :  { %v23166_v49 = vpop.eup %18732  ;;  %18059 = vmatpush1.bf16.msra.mxu0 %v18058_v1 }
0x2433   :  { %v23168_v55 = vpop.eup %18734  ;;  %10247 = vmatprep.mubr.f32.mxu1 %v23166_v49  ;;  %18061 = vmatprep.subr.bf16.mxu0 %v24590_v5 }
0x2434   :  { %10248 = vmatmul.mubr.f32.vlgmr.msra.gmra.mrb[68].mxu1 %v23168_v55 }
0x2435   :  { %18190 = vmatpush3.bf16.msra.mxu1 %v24626_v51  ;;  %13651 = vmatprep.mubr.msk.f32.mxu1 %vm18754_vm0, %v24161_v61 }
0x2436   :  { %18191 = vmatprep.subr.bf16.mxu1 %v24625_v2 }
0x2439   :  { %18193 = vmatpush3.bf16.msra.mxu1 %v24627_v46 }
0x243a   :  { %18194 = vmatprep.subr.bf16.mxu1 %v24625_v2 }
0x243d   :  { %18196 = vmatpush3.bf16.msra.mxu1 %v24628_v0 }
0x243e   :  { %18197 = vmatprep.subr.bf16.mxu1 %v24625_v2 }
0x2441   :  { %18199 = vmatpush3.bf16.msra.mxu1 %v24629_v30  ;;  %v24652_v30 = vld [vmem:[#allocation3_spill] sm:$0xff] }
0x2442   :  { %18200 = vmatprep.subr.bf16.mxu1 %v24625_v2 }
0x2445   :  { %18202 = vmatpush3.bf16.msra.mxu1 %v24630_v39  ;;  %v24651_v39 = vld [vmem:[#allocation41_spill] sm:$0xff] }
0x2446   :  { %18203 = vmatprep.subr.bf16.mxu1 %v24625_v2 }
0x2449   :  { %18205 = vmatpush3.bf16.msra.mxu1 %v24631_v54  ;;  %v24650_v54 = vld [vmem:[#allocation39_spill] sm:$0xff] }
0x244a   :  { %18206 = vmatprep.subr.bf16.mxu1 %v24625_v2 }
0x244d   :  { %18208 = vmatpush3.bf16.msra.mxu1 %v24632_v16  ;;  %v24649_v16 = vld [vmem:[#allocation37_spill] sm:$0xff] }
0x244e   :  { %18209 = vmatprep.subr.bf16.mxu1 %v24625_v2 }
0x2451   :  { %18211 = vmatpush3.bf16.msra.mxu1 %v24633_v32  ;;  %v24646_v32 = vld [vmem:[#allocation31_spill] sm:$0xff] }
0x2452   :  { %18229 = vmatprep.subr.bf16.mxu1 %v24590_v5  ;;  %v24635_v5 = vld [vmem:[#allocation9_spill] sm:$0xff] }
0x24b7   :  { %v12533_v18 = vpop.f32.mrb[88].mxu0 }
0x24b8   :  { %v12534_v13 = vpop.f32.mrb[89].mxu0 }
0x24b9   :  { %v12535_v6 = vadd.f32 %v12534_v13, %v12533_v18  ;;  %v24638_v18 = vld [vmem:[#allocation15_spill] sm:$0xff]  ;;  %v24639_v13 = vld [vmem:[#allocation17_spill] sm:$0xff] }
0x24d7   :  { %v9933_v59 = vpop.f32.mrb[90].mxu0 }
0x24d8   :  { %v9934_v36 = vadd.f32 %v12535_v6, %v9933_v59  ;;  %v13618_v34 = vpop.f32.mrb[91].mxu0  ;;  %v24640_v6 = vld [vmem:[#allocation19_spill] sm:$0xff] }
0x24d9   :  { %v24642_v59 = vld [vmem:[#allocation23_spill] sm:$0xff] }
0x24da   :  { %v9939_v23 = vadd.f32 %v11187_v31, %v9934_v36  ;;  %v24641_v31 = vld [vmem:[#allocation21_spill] sm:$0xff]  ;;  %v24644_v34 = vld [vmem:[#allocation27_spill] sm:$0xff] }
0x24db   :  { %v24643_v36 = vld [vmem:[#allocation25_spill] sm:$0xff] }
0x24dc   :  { %18736 = vtanh.f32 %v9939_v23  ;;  %v24645_v23 = vld [vmem:[#allocation29_spill] sm:$0xff] }
0x24e6   :  { %v23242_v26 = vpop.eup %18736 }
0x24e7   :  { %9960 = vrot.lane.b32.xlu1 %v23242_v26, %s18755_s13  ;;  %13652 = vmatmul.mubr.f32.vlgmr.msra.gmra.mrb[70].mxu1 %v23242_v26 }
0x24e8   :  { %18231 = vmatpush1.bf16.msra.mxu1 %v18810_v8 }
0x24e9   :  { %18233 = vmatprep.subr.bf16.mxu1 %v18812_v9 }
0x24ec   :  { %18235 = vmatpush1.bf16.msra.mxu1 %v18828_v14 }
0x24ed   :  { %18237 = vmatprep.subr.bf16.mxu1 %v18831_v15 }
0x24f0   :  { %18239 = vmatpush1.bf16.msra.mxu1 %v18846_v20 }
0x24f1   :  { %18241 = vmatprep.subr.bf16.mxu1 %v18849_v21 }
0x24f4   :  { %18243 = vmatpush1.bf16.msra.mxu1 %v18870_v28 }
0x24f5   :  { %18245 = vmatprep.subr.bf16.mxu1 %v18884_v33 }
0x24f8   :  { %18247 = vmatpush1.bf16.msra.mxu1 %v24192_v52 }
0x24f9   :  { %18249 = vmatprep.subr.bf16.mxu1 %v18929_v48 }
0x24fc   :  { %18251 = vmatpush1.bf16.msra.mxu1 %v18958_v58 }
0x24fd   :  { %18253 = vmatprep.subr.bf16.mxu1 %v18973_v63 }
0x2500   :  { %18255 = vmatpush1.bf16.msra.mxu1 %v24193_v62 }
0x2501   :  { %18257 = vmatprep.subr.bf16.mxu1 %v24591_v38 }
0x2504   :  { %18259 = vmatpush1.bf16.msra.mxu1 %v24635_v5 }
0x2505   :  { %18261 = vmatprep.subr.bf16.mxu1 %v24636_v4 }
0x2507   :  { %v12585_v17 = vpop.f32.mrb[68].mxu1 }
0x2508   :  { %v12586_v29 = vpop.f32.mrb[69].mxu1  ;;  %18263 = vmatpush1.bf16.msra.mxu1 %v24637_v57 }
0x2509   :  { %v23264_v1 = vadd.f32 %v12586_v29, %v12585_v17  ;;  %18265 = vmatprep.subr.bf16.mxu1 %v24638_v18  ;;  %v24647_v17 = vld [vmem:[#allocation33_spill] sm:$0xff]  ;;  %v24648_v29 = vld [vmem:[#allocation35_spill] sm:$0xff] }
0x250c   :  { %18267 = vmatpush1.bf16.msra.mxu1 %v24639_v13 }
0x250d   :  { %18269 = vmatprep.subr.bf16.mxu1 %v24640_v6 }
0x2510   :  { %18271 = vmatpush1.bf16.msra.mxu1 %v24641_v31 }
0x2511   :  { %18273 = vmatprep.subr.bf16.mxu1 %v24642_v59 }
0x2514   :  { %18275 = vmatpush1.bf16.msra.mxu1 %v24643_v36 }
0x2515   :  { %18277 = vmatprep.subr.bf16.mxu1 %v24644_v34 }
0x2518   :  { %18279 = vmatpush1.bf16.msra.mxu1 %v24645_v23 }
0x2519   :  { %18281 = vmatprep.subr.bf16.mxu1 %v24646_v32 }
0x251c   :  { %18283 = vmatpush1.bf16.msra.mxu1 %v24647_v17 }
0x251d   :  { %18285 = vmatprep.subr.bf16.mxu1 %v24648_v29 }
0x2520   :  { %18287 = vmatpush1.bf16.msra.mxu1 %v24649_v16 }
0x2521   :  { %18289 = vmatprep.subr.bf16.mxu1 %v24650_v54 }
0x2524   :  { %18291 = vmatpush1.bf16.msra.mxu1 %v24651_v39 }
0x2525   :  { %18293 = vmatprep.subr.bf16.mxu1 %v24652_v30 }
0x2559   :  { %v9961_v0 = vpop.permute.xlu1 %9960 }
0x255a   :  { %11188 = vmatmul.mubr.msk.f32.vlgmr.msra.gmra.mrb[12].mxu0 %vm1395_vm2, %v9961_v0  ;;  %v10336_v0 = vld [vmem:[%s23608_s2 + $0xc38] sm:$0xff] }
0x255b   :  { %18063 = vmatpush1.bf16.msra.mxu0 %v18810_v8  ;;  %10105 = vmatprep.mubr.f32.mxu0 %v23166_v49  ;;  %v24653_v8 = vld [vmem:[#allocation6_spill] sm:$0xff]  ;;  %v10340_v49 = vld [vmem:[%s23608_s2 + $0xc58] sm:$0xff] }
0x255c   :  { %18065 = vmatprep.subr.bf16.mxu0 %v18812_v9  ;;  %v24654_v9 = vld [vmem:[#allocation8_spill] sm:$0xff] }
0x255f   :  { %18067 = vmatpush1.bf16.msra.mxu0 %v18828_v14  ;;  %v24655_v14 = vld [vmem:[#allocation10_spill] sm:$0xff] }
0x2560   :  { %18069 = vmatprep.subr.bf16.mxu0 %v18831_v15  ;;  %v24656_v15 = vld [vmem:[#allocation12_spill] sm:$0xff] }
0x2563   :  { %18071 = vmatpush1.bf16.msra.mxu0 %v18846_v20  ;;  %v24657_v20 = vld [vmem:[#allocation14_spill] sm:$0xff] }
0x2564   :  { %18073 = vmatprep.subr.bf16.mxu0 %v18849_v21  ;;  %v10330_v21 = vld [vmem:[%s23608_s2 + $0xc08] sm:$0xff] }
0x2567   :  { %18075 = vmatpush1.bf16.msra.mxu0 %v18870_v28  ;;  %v10332_v28 = vld [vmem:[%s23608_s2 + $0xc18] sm:$0xff] }
0x2568   :  { %18077 = vmatprep.subr.bf16.mxu0 %v18884_v33  ;;  %v24658_v33 = vld [vmem:[#allocation16_spill] sm:$0xff] }
0x256b   :  { %18079 = vmatpush1.bf16.msra.mxu0 %v24192_v52  ;;  %v10331_v52 = vld [vmem:[%s23608_s2 + $0xc10] sm:$0xff] }
0x256c   :  { %18081 = vmatprep.subr.bf16.mxu0 %v18929_v48  ;;  %v24659_v48 = vld [vmem:[#allocation18_spill] sm:$0xff] }
0x256f   :  { %18083 = vmatpush1.bf16.msra.mxu0 %v18958_v58  ;;  %v18212_v58 = vpack.c.bf16 %v10332_v28, %v10330_v21 }
0x2570   :  { %18085 = vmatprep.subr.bf16.mxu0 %v18973_v63  ;;  %v10329_v63 = vld [vmem:[%s23608_s2 + $0xc00] sm:$0xff] }
0x2573   :  { %18087 = vmatpush1.bf16.msra.mxu0 %v24193_v62  ;;  %v10334_v62 = vld [vmem:[%s23608_s2 + $0xc28] sm:$0xff] }
0x2574   :  { %18089 = vmatprep.subr.bf16.mxu0 %v24591_v38  ;;  %v10335_v38 = vld [vmem:[%s23608_s2 + $0xc30] sm:$0xff] }
0x2577   :  { %18091 = vmatpush1.bf16.msra.mxu0 %v24635_v5 }
0x2578   :  { %18093 = vmatprep.subr.bf16.mxu0 %v24636_v4 }
0x257b   :  { %18095 = vmatpush1.bf16.msra.mxu0 %v24637_v57 }
0x257c   :  { %18097 = vmatprep.subr.bf16.mxu0 %v24638_v18 }
0x257f   :  { %18099 = vmatpush1.bf16.msra.mxu0 %v24639_v13 }
0x2580   :  { %18101 = vmatprep.subr.bf16.mxu0 %v24640_v6  ;;  %v10337_v6 = vld [vmem:[%s23608_s2 + $0xc40] sm:$0xff] }
0x2583   :  { %18103 = vmatpush1.bf16.msra.mxu0 %v24641_v31 }
0x2584   :  { %18105 = vmatprep.subr.bf16.mxu0 %v24642_v59  ;;  %v10344_v59 = vld [vmem:[%s23608_s2 + $0xc78] sm:$0xff] }
0x2587   :  { %18107 = vmatpush1.bf16.msra.mxu0 %v24643_v36 }
0x2588   :  { %18109 = vmatprep.subr.bf16.mxu0 %v24644_v34 }
0x258b   :  { %18111 = vmatpush1.bf16.msra.mxu0 %v24645_v23  ;;  %v10341_v23 = vld [vmem:[%s23608_s2 + $0xc60] sm:$0xff] }
0x258c   :  { %18113 = vmatprep.subr.bf16.mxu0 %v24646_v32  ;;  %v10333_v32 = vld [vmem:[%s23608_s2 + $0xc20] sm:$0xff] }
0x258d   :  { %v18218_v18 = vpack.c.bf16 %v10335_v38, %v10333_v32 }
0x258f   :  { %18115 = vmatpush1.bf16.msra.mxu0 %v24647_v17  ;;  %v10343_v17 = vld [vmem:[%s23608_s2 + $0xc70] sm:$0xff] }
0x2590   :  { %18117 = vmatprep.subr.bf16.mxu0 %v24648_v29  ;;  %v18226_v29 = vpack.c.bf16 %v10343_v17, %v10341_v23 }
0x2593   :  { %18119 = vmatpush1.bf16.msra.mxu0 %v24649_v16  ;;  %v18216_v16 = vpack.c.bf16 %v10336_v0, %v10334_v62 }
0x2594   :  { %18121 = vmatprep.subr.bf16.mxu0 %v24650_v54  ;;  %v18214_v54 = vpack.c.bf16 %v10331_v52, %v10329_v63  ;;  %v11190_v63 = vld [vmem:[%s23607_s0 + $0x290] sm:$0xff] }
0x2597   :  { %18123 = vmatpush1.bf16.msra.mxu0 %v24651_v39  ;;  %v10338_v39 = vld [vmem:[%s23608_s2 + $0xc48] sm:$0xff] }
0x2598   :  { %18125 = vmatprep.subr.bf16.mxu0 %v24652_v30  ;;  %v24660_v30 = vld [vmem:[#allocation20_spill] sm:$0xff]  ;;  %v18220_v13 = vpack.c.bf16 %v10340_v49, %v10338_v39  ;;  %v11193_v49 = vld [vmem:[%s23607_s0 + $0x2a0] sm:$0xff] }
0x259a   :  { %10106 = vmatmul.mubr.f32.vlgmr.msra.gmra.mrb[92].mxu0 %v23168_v55  ;;  %v11191_v55 = vld [vmem:[%s23607_s0 + $0x298] sm:$0xff] }
0x259b   :  { %18127 = vmatpush1.bf16.msra.mxu0 %v18889_v35  ;;  %10176 = vmatprep.mubr.f32.mxu0 %v24161_v61 }
0x259c   :  { %18129 = vmatprep.subr.bf16.mxu0 %v18904_v40 }
0x259f   :  { %18131 = vmatpush1.bf16.msra.mxu0 %v18920_v45 }
0x25a0   :  { %18133 = vmatprep.subr.bf16.mxu0 %v18934_v50 }
0x25a3   :  { %18135 = vmatpush1.bf16.msra.mxu0 %v18952_v56 }
0x25a4   :  { %18137 = vmatprep.subr.bf16.mxu0 %v18964_v60 }
0x25a7   :  { %18139 = vmatpush1.bf16.msra.mxu0 %v18991_v7 }
0x25a8   :  { %18141 = vmatprep.subr.bf16.mxu0 %v24653_v8 }
0x25ab   :  { %18143 = vmatpush1.bf16.msra.mxu0 %v24654_v9 }
0x25ac   :  { %18145 = vmatprep.subr.bf16.mxu0 %v24655_v14 }
0x25af   :  { %18147 = vmatpush1.bf16.msra.mxu0 %v24656_v15 }
0x25b0   :  { %18149 = vmatprep.subr.bf16.mxu0 %v24657_v20 }
0x25b3   :  { %18151 = vmatpush1.bf16.msra.mxu0 %v24658_v33 }
0x25b4   :  { %18153 = vmatprep.subr.bf16.mxu0 %v24659_v48 }
0x25b7   :  { %18155 = vmatpush1.bf16.msra.mxu0 %v24660_v30 }
0x25b8   :  { %18213 = vmatprep.subr.bf16.mxu0 %v18212_v58  ;;  %v11189_v58 = vld [vmem:[%s23607_s0 + $0x288] sm:$0xff] }
0x25ba   :  { %10177 = vmatmul.mubr.f32.vlgmr.msra.gmra.mrb[92].mxu0 %v23242_v26  ;;  %v10319_v5 = vpop.f32.mrb[70].mxu1  ;;  %v10339_v26 = vld [vmem:[%s23608_s2 + $0xc50] sm:$0xff] }
0x25bb   :  { %v10320_v4 = vadd.f32 %v23264_v1, %v10319_v5  ;;  %v13653_v57 = vpop.f32.mrb[71].mxu1  ;;  %18215 = vmatpush1.bf16.msra.mxu0 %v18214_v54  ;;  %10414 = vmatprep.mubr.f32.mxu0 %v24161_v61  ;;  %v10342_v1 = vld [vmem:[%s23608_s2 + $0xc68] sm:$0xff]  ;;  %v18222_v36 = vpack.c.bf16 %v10339_v26, %v10337_v6 }
0x25bc   :  { %18217 = vmatprep.subr.bf16.mxu0 %v18216_v16  ;;  %v18224_v34 = vpack.c.bf16 %v10344_v59, %v10342_v1 }
0x25bd   :  { %v10325_v31 = vadd.f32 %v11191_v55, %v10320_v4  ;;  %v11194_v55 = vld [vmem:[%s23607_s0 + $0x2a8] sm:$0xff]  ;;  %v11195_v4 = vld [vmem:[%s23607_s0 + $0x2b0] sm:$0xff] }
0x25bf   :  { %18738 = vtanh.f32 %v10325_v31  ;;  %18219 = vmatpush1.bf16.msra.mxu0 %v18218_v18 }
0x25c0   :  { %18221 = vmatprep.subr.bf16.mxu0 %v18220_v13 }
0x25c3   :  { %18223 = vmatpush1.bf16.msra.mxu0 %v18222_v36 }
0x25c4   :  { %18225 = vmatprep.subr.bf16.mxu0 %v18224_v34 }
0x25c7   :  { %18227 = vmatpush1.bf16.msra.mxu0 %v18226_v29  ;;  %v10954_v29 = vld [vmem:[%s23608_s2 + $0xd08] sm:$0xff] }
0x25c8   :  { %18325 = vmatprep.subr.bf16.mxu0 %v24634_v53 }
0x25c9   :  { %v23387_v21 = vpop.eup %18738 }
0x25ca   :  { %10346 = vrot.lane.b32.xlu0 %v23387_v21, %s18755_s13 }
0x263c   :  { %v10347_v28 = vpop.permute.xlu0 %10346 }
0x263d   :  { %11192 = vmatmul.mubr.msk.f32.vlgmr.msra.gmra.mrb[12].mxu0 %vm1395_vm2, %v10347_v28 }
0x263e   :  { %18327 = vmatpush3.bf16.msra.mxu0 %v24610_v3 }
0x263f   :  { %18329 = vmatprep.subr.bf16.mxu0 %v24611_v24 }
0x2642   :  { %18331 = vmatpush3.bf16.msra.mxu0 %v24612_v47 }
0x2643   :  { %18333 = vmatprep.subr.bf16.mxu0 %v24613_v10 }
0x2646   :  { %18335 = vmatpush3.bf16.msra.mxu0 %v24614_v27 }
0x2647   :  { %18337 = vmatprep.subr.bf16.mxu0 %v24615_v22 }
0x264a   :  { %18339 = vmatpush3.bf16.msra.mxu0 %v24616_v43 }
0x264b   :  { %18341 = vmatprep.subr.bf16.mxu0 %v24617_v41 }
0x264e   :  { %18343 = vmatpush3.bf16.msra.mxu0 %v24618_v44 }
0x264f   :  { %18345 = vmatprep.subr.bf16.mxu0 %v24619_v25 }
0x2652   :  { %18347 = vmatpush3.bf16.msra.mxu0 %v24620_v42 }
0x2653   :  { %18349 = vmatprep.subr.bf16.mxu0 %v24621_v37 }
0x2656   :  { %18351 = vmatpush3.bf16.msra.mxu0 %v24622_v11 }
0x2657   :  { %18353 = vmatprep.subr.bf16.mxu0 %v24623_v19 }
0x265a   :  { %18355 = vmatpush3.bf16.msra.mxu0 %v24624_v12 }
0x265b   :  { %18356 = vmatprep.subr.bf16.mxu0 %v24625_v2 }
0x268d   :  { %v10178_v52 = vpop.f32.mrb[92].mxu0 }
0x268e   :  { %v10323_v62 = vadd.f32 %v11189_v58, %v10178_v52  ;;  %v10180_v0 = vpop.f32.mrb[93].mxu0  ;;  %v10958_v58 = vld [vmem:[%s23608_s2 + $0xd28] sm:$0xff] }
0x268f   :  { %v10324_v54 = vadd.f32 %v11190_v63, %v10180_v0  ;;  %v10960_v63 = vld [vmem:[%s23608_s2 + $0xd38] sm:$0xff]  ;;  %v10957_v0 = vld [vmem:[%s23608_s2 + $0xd20] sm:$0xff] }
0x2691   :  { %18740 = vtanh.f32 %v10324_v54  ;;  %v10959_v54 = vld [vmem:[%s23608_s2 + $0xd30] sm:$0xff] }
0x2692   :  { %18742 = vtanh.f32 %v10323_v62  ;;  %v18456_v62 = vpack.c.bf16 %v10960_v63, %v10958_v58 }
0x269b   :  { %v18741_v16 = vpop.eup %18740 }
0x269c   :  { %v18743_v32 = vpop.eup %18742  ;;  %10491 = vmatprep.mubr.f32.mxu1 %v18741_v16  ;;  %10633 = vmatprep.mubr.f32.mxu0 %v18741_v16  ;;  %v10962_v16 = vld [vmem:[%s23608_s2 + $0xd48] sm:$0xff] }
0x269d   :  { %10492 = vmatmul.mubr.f32.vlgmr.msra.gmra.mrb[72].mxu1 %v18743_v32  ;;  %10634 = vmatmul.mubr.f32.vlgmr.msra.gmra.mrb[94].mxu0 %v18743_v32  ;;  %v10964_v32 = vld [vmem:[%s23608_s2 + $0xd58] sm:$0xff] }
0x269e   :  { %18295 = vmatpush1.bf16.msra.mxu1 %v18889_v35  ;;  %18358 = vmatpush3.bf16.msra.mxu0 %v24626_v51  ;;  %v24661_v35 = vld [vmem:[#allocation50_spill] sm:$0xff] }
0x269f   :  { %18297 = vmatprep.subr.bf16.mxu1 %v18904_v40  ;;  %18359 = vmatprep.subr.bf16.mxu0 %v24625_v2  ;;  %v24662_v40 = vld [vmem:[#allocation51_spill] sm:$0xff] }
0x26a0   :  { %10562 = vmatprep.mubr.f32.mxu1 %v24161_v61  ;;  %13686 = vmatprep.mubr.msk.f32.mxu0 %vm18754_vm0, %v24161_v61 }
0x26a2   :  { %18299 = vmatpush1.bf16.msra.mxu1 %v18920_v45  ;;  %18361 = vmatpush3.bf16.msra.mxu0 %v24627_v46  ;;  %v24663_v45 = vld [vmem:[#allocation52_spill] sm:$0xff] }
0x26a3   :  { %18301 = vmatprep.subr.bf16.mxu1 %v18934_v50  ;;  %18362 = vmatprep.subr.bf16.mxu0 %v24625_v2  ;;  %v24664_v50 = vld [vmem:[#allocation53_spill] sm:$0xff] }
0x26a6   :  { %18303 = vmatpush1.bf16.msra.mxu1 %v18952_v56  ;;  %18364 = vmatpush3.bf16.msra.mxu0 %v24661_v35  ;;  %v24665_v56 = vld [vmem:[#allocation54_spill] sm:$0xff] }
0x26a7   :  { %18305 = vmatprep.subr.bf16.mxu1 %v18964_v60  ;;  %18365 = vmatprep.subr.bf16.mxu0 %v24625_v2  ;;  %v24666_v60 = vld [vmem:[#allocation55_spill] sm:$0xff] }
0x26aa   :  { %18307 = vmatpush1.bf16.msra.mxu1 %v18991_v7  ;;  %18367 = vmatpush3.bf16.msra.mxu0 %v24662_v40  ;;  %v10716_v7 = vld [vmem:[%s23608_s2 + $0xc88] sm:$0xff] }
0x26ab   :  { %18309 = vmatprep.subr.bf16.mxu1 %v24653_v8  ;;  %18368 = vmatprep.subr.bf16.mxu0 %v24625_v2  ;;  %v10728_v8 = vld [vmem:[%s23608_s2 + $0xce8] sm:$0xff] }
0x26ae   :  { %18311 = vmatpush1.bf16.msra.mxu1 %v24654_v9  ;;  %18370 = vmatpush3.bf16.msra.mxu0 %v24663_v45  ;;  %v10730_v9 = vld [vmem:[%s23608_s2 + $0xcf8] sm:$0xff] }
0x26af   :  { %18313 = vmatprep.subr.bf16.mxu1 %v24655_v14  ;;  %18371 = vmatprep.subr.bf16.mxu0 %v24625_v2 }
0x26b2   :  { %18315 = vmatpush1.bf16.msra.mxu1 %v24656_v15  ;;  %18373 = vmatpush3.bf16.msra.mxu0 %v24664_v50  ;;  %v18392_v15 = vpack.c.bf16 %v10730_v9, %v10728_v8 }
0x26b3   :  { %18317 = vmatprep.subr.bf16.mxu1 %v24657_v20  ;;  %18374 = vmatprep.subr.bf16.mxu0 %v24625_v2  ;;  %v10727_v20 = vld [vmem:[%s23608_s2 + $0xce0] sm:$0xff] }
0x26b6   :  { %18319 = vmatpush1.bf16.msra.mxu1 %v24658_v33  ;;  %18376 = vmatpush3.bf16.msra.mxu0 %v24665_v56  ;;  %v10729_v33 = vld [vmem:[%s23608_s2 + $0xcf0] sm:$0xff] }
0x26b7   :  { %18321 = vmatprep.subr.bf16.mxu1 %v24659_v48  ;;  %18377 = vmatprep.subr.bf16.mxu0 %v24625_v2  ;;  %v18394_v48 = vpack.c.bf16 %v10729_v33, %v10727_v20 }
0x26ba   :  { %18323 = vmatpush1.bf16.msra.mxu1 %v24660_v30  ;;  %18379 = vmatpush3.bf16.msra.mxu0 %v24666_v60 }
0x26bb   :  { %18397 = vmatprep.subr.bf16.mxu1 %v24634_v53  ;;  %v10725_v53 = vld [vmem:[%s23608_s2 + $0xcd0] sm:$0xff] }
0x26bd   :  { %10563 = vmatmul.mubr.f32.vlgmr.msra.gmra.mrb[72].mxu1 %v23387_v21  ;;  %13687 = vmatmul.mubr.f32.vlgmr.msra.gmra.mrb[96].mxu0 %v23387_v21  ;;  %v10956_v21 = vld [vmem:[%s23608_s2 + $0xd18] sm:$0xff] }
0x26be   :  { %18399 = vmatpush3.bf16.msra.mxu1 %v24610_v3  ;;  %10800 = vmatprep.mubr.f32.mxu0 %v24161_v61  ;;  %v10718_v3 = vld [vmem:[%s23608_s2 + $0xc98] sm:$0xff]  ;;  %v18452_v28 = vpack.c.bf16 %v10956_v21, %v10954_v29 }
0x26bf   :  { %18401 = vmatprep.subr.bf16.mxu1 %v24611_v24  ;;  %v10715_v24 = vld [vmem:[%s23608_s2 + $0xc80] sm:$0xff] }
0x26c2   :  { %18403 = vmatpush3.bf16.msra.mxu1 %v24612_v47  ;;  %v18380_v47 = vpack.c.bf16 %v10718_v3, %v10716_v7 }
0x26c3   :  { %18405 = vmatprep.subr.bf16.mxu1 %v24613_v10  ;;  %v10717_v10 = vld [vmem:[%s23608_s2 + $0xc90] sm:$0xff] }
0x26c4   :  { %18381 = vmatprep.subr.bf16.mxu0 %v18380_v47  ;;  %v10967_v47 = vld [vmem:[%s23608_s2 + $0xd70] sm:$0xff] }
0x26c6   :  { %18407 = vmatpush3.bf16.msra.mxu1 %v24614_v27  ;;  %v18382_v27 = vpack.c.bf16 %v10717_v10, %v10715_v24  ;;  %v10965_v24 = vld [vmem:[%s23608_s2 + $0xd60] sm:$0xff] }
0x26c7   :  { %18409 = vmatprep.subr.bf16.mxu1 %v24615_v22  ;;  %v18466_v10 = vpack.c.bf16 %v10967_v47, %v10965_v24 }
0x26c8   :  { %18383 = vmatpush1.bf16.msra.mxu0 %v18382_v27 }
0x26ca   :  { %18411 = vmatpush3.bf16.msra.mxu1 %v24616_v43  ;;  %v10719_v43 = vld [vmem:[%s23608_s2 + $0xca0] sm:$0xff] }
0x26cb   :  { %18413 = vmatprep.subr.bf16.mxu1 %v24617_v41  ;;  %v10721_v41 = vld [vmem:[%s23608_s2 + $0xcb0] sm:$0xff] }
0x26ce   :  { %18415 = vmatpush3.bf16.msra.mxu1 %v24618_v44  ;;  %v10724_v44 = vld [vmem:[%s23608_s2 + $0xcc8] sm:$0xff] }
0x26cf   :  { %18417 = vmatprep.subr.bf16.mxu1 %v24619_v25  ;;  %v10726_v25 = vld [vmem:[%s23608_s2 + $0xcd8] sm:$0xff] }
0x26d2   :  { %18419 = vmatpush3.bf16.msra.mxu1 %v24620_v42  ;;  %v18386_v42 = vpack.c.bf16 %v10721_v41, %v10719_v43  ;;  %v11200_v41 = vld [vmem:[%s23609_s4] ss:$0 sm:$0xff] }
0x26d3   :  { %18421 = vmatprep.subr.bf16.mxu1 %v24621_v37  ;;  %v18388_v37 = vpack.c.bf16 %v10726_v25, %v10724_v44 }
0x26d6   :  { %18423 = vmatpush3.bf16.msra.mxu1 %v24622_v11  ;;  %v10723_v11 = vld [vmem:[%s23608_s2 + $0xcc0] sm:$0xff] }
0x26d7   :  { %18425 = vmatprep.subr.bf16.mxu1 %v24623_v19  ;;  %v10720_v19 = vld [vmem:[%s23608_s2 + $0xca8] sm:$0xff]  ;;  %v18390_v14 = vpack.c.bf16 %v10725_v53, %v10723_v11 }
0x26da   :  { %18427 = vmatpush3.bf16.msra.mxu1 %v24624_v12  ;;  %v10722_v12 = vld [vmem:[%s23608_s2 + $0xcb8] sm:$0xff] }
0x26db   :  { %v18384_v22 = vpack.c.bf16 %v10722_v12, %v10720_v19  ;;  %v11197_v19 = vld [vmem:[%s23607_s0 + $0x2c8] sm:$0xff]  ;;  %s18757_s0 = smov 32  }
0x26dd   :  { %18385 = vmatprep.subr.bf16.mxu0 %v18384_v22 }
0x26de   :  { %18387 = vmatpush1.bf16.msra.mxu0 %v18386_v42 }
0x26df   :  { %18389 = vmatprep.subr.bf16.mxu0 %v18388_v37 }
0x26e2   :  { %18391 = vmatpush1.bf16.msra.mxu0 %v18390_v14 }
0x26e3   :  { %18393 = vmatprep.subr.bf16.mxu0 %v18392_v15  ;;  %v11199_v15 = vld [vmem:[%s23610_s3] ss:$0 sm:$0xff] }
0x26e6   :  { %18395 = vmatpush1.bf16.msra.mxu0 %v18394_v48 }
0x26e7   :  { %18428 = vmatprep.subr.bf16.mxu0 %v24625_v2 }
0x2770   :  { %v12637_v30 = vpop.f32.mrb[94].mxu0 }
0x2771   :  { %v12638_v38 = vpop.f32.mrb[95].mxu0 }
0x2772   :  { %v12639_v39 = vadd.f32 %v12638_v38, %v12637_v30 }
0x2790   :  { %v10564_v5 = vpop.f32.mrb[72].mxu1  ;;  %v10705_v57 = vpop.f32.mrb[96].mxu0 }
0x2791   :  { %v10709_v18 = vadd.f32 %v11193_v49, %v10564_v5  ;;  %v10706_v13 = vadd.f32 %v12639_v39, %v10705_v57  ;;  %v10566_v6 = vpop.f32.mrb[73].mxu1  ;;  %v13688_v26 = vpop.f32.mrb[97].mxu0 }
0x2792   :  { %v10710_v31 = vadd.f32 %v11194_v55, %v10566_v6 }
0x2793   :  { %18744 = vtanh.f32 %v10709_v18  ;;  %v10711_v1 = vadd.f32 %v11195_v4, %v10706_v13 }
0x2794   :  { %18746 = vtanh.f32 %v10710_v31 }
0x2795   :  { %18748 = vtanh.f32 %v10711_v1 }
0x279d   :  { %v18745_v59 = vpop.eup %18744 }
0x279e   :  { %v18747_v36 = vpop.eup %18746 }
0x279f   :  { %v18749_v34 = vpop.eup %18748  ;;  %10875 = vmatprep.mubr.f32.mxu1 %v18747_v36 }
0x27a0   :  { %10732 = vrot.lane.b32.xlu1 %v18749_v34, %s18755_s13  ;;  %10876 = vmatmul.mubr.f32.vlgmr.msra.gmra.mrb[74].mxu1 %v18745_v59 }
0x27a4   :  { %11062 = vrot.lane.b32.xlu1 %v11200_v41, %s18756_s15 }
0x2812   :  { %v10733_v23 = vpop.permute.xlu1 %10732 }
0x2813   :  { %11196 = vmatmul.mubr.msk.f32.vlgmr.msra.gmra.mrb[12].mxu0 %vm1395_vm2, %v10733_v23 }
0x2814   :  { %18430 = vmatpush3.bf16.msra.mxu0 %v24626_v51  ;;  %13721 = vmatprep.mubr.msk.f32.mxu0 %vm18754_vm0, %v24161_v61 }
0x2815   :  { %18431 = vmatprep.subr.bf16.mxu0 %v24625_v2 }
0x2816   :  { %v11063_v42 = vpop.permute.xlu1 %11062 }
0x2818   :  { %18433 = vmatpush3.bf16.msra.mxu0 %v24627_v46 }
0x2819   :  { %18434 = vmatprep.subr.bf16.mxu0 %v24625_v2 }
0x281c   :  { %18436 = vmatpush3.bf16.msra.mxu0 %v24661_v35  ;;  %v18458_v35 = vpack.c.bf16 %v10959_v54, %v10957_v0 }
0x281d   :  { %18437 = vmatprep.subr.bf16.mxu0 %v24625_v2 }
0x2820   :  { %18439 = vmatpush3.bf16.msra.mxu0 %v24662_v40  ;;  %v18460_v40 = vpack.c.bf16 %v10964_v32, %v10962_v16 }
0x2821   :  { %18440 = vmatprep.subr.bf16.mxu0 %v24625_v2 }
0x2824   :  { %18442 = vmatpush3.bf16.msra.mxu0 %v24663_v45  ;;  %v10961_v45 = vld [vmem:[%s23608_s2 + $0xd40] sm:$0xff] }
0x2825   :  { %18443 = vmatprep.subr.bf16.mxu0 %v24625_v2 }
0x2828   :  { %18445 = vmatpush3.bf16.msra.mxu0 %v24664_v50  ;;  %v10963_v50 = vld [vmem:[%s23608_s2 + $0xd50] sm:$0xff] }
0x2829   :  { %18446 = vmatprep.subr.bf16.mxu0 %v24625_v2  ;;  %v18462_v7 = vpack.c.bf16 %v10963_v50, %v10961_v45 }
0x282c   :  { %18448 = vmatpush3.bf16.msra.mxu0 %v24665_v56  ;;  %v10966_v56 = vld [vmem:[%s23608_s2 + $0xd68] sm:$0xff] }
0x282d   :  { %18449 = vmatprep.subr.bf16.mxu0 %v24625_v2  ;;  %v10953_v2 = vld [vmem:[%s23608_s2 + $0xd00] sm:$0xff] }
0x2830   :  { %18451 = vmatpush3.bf16.msra.mxu0 %v24666_v60  ;;  %v10968_v60 = vld [vmem:[%s23608_s2 + $0xd78] sm:$0xff] }
0x2831   :  { %18453 = vmatprep.subr.bf16.mxu0 %v18452_v28  ;;  %v18464_v3 = vpack.c.bf16 %v10968_v60, %v10966_v56 }
0x2833   :  { %13722 = vmatmul.mubr.f32.vlgmr.msra.gmra.mrb[98].mxu0 %v18749_v34 }
0x2834   :  { %11038 = vmatprep.mubr.f32.mxu0 %v24161_v61  ;;  %v10955_v61 = vld [vmem:[%s23608_s2 + $0xd10] sm:$0xff] }
0x2835   :  { %v18454_v52 = vpack.c.bf16 %v10955_v61, %v10953_v2 }
0x2837   :  { %18455 = vmatpush1.bf16.msra.mxu0 %v18454_v52 }
0x2838   :  { %18457 = vmatprep.subr.bf16.mxu0 %v18456_v62 }
0x283b   :  { %18459 = vmatpush1.bf16.msra.mxu0 %v18458_v35 }
0x283c   :  { %18461 = vmatprep.subr.bf16.mxu0 %v18460_v40 }
0x283f   :  { %18463 = vmatpush1.bf16.msra.mxu0 %v18462_v7 }
0x2840   :  { %18465 = vmatprep.subr.bf16.mxu0 %v18464_v3 }
0x2843   :  { %18467 = vmatpush1.bf16.msra.mxu0 %v18466_v10 }
0x2873   :  { %v12689_v51 = vpop.f32.mrb[74].mxu1 }
0x2874   :  { %v12690_v46 = vpop.f32.mrb[75].mxu1 }
0x2875   :  { %v12691_v17 = vadd.f32 %v12690_v46, %v12689_v51 }
0x2906   :  { %v10947_v12 = vpop.f32.mrb[98].mxu0 }
0x2907   :  { %v10948_v27 = vadd.f32 %v12691_v17, %v10947_v12  ;;  %v13723_v22 = vpop.f32.mrb[99].mxu0 }
0x2909   :  { %v10951_v43 = vadd.f32 %v11197_v19, %v10948_v27 }
0x290b   :  { %18750 = vtanh.f32 %v10951_v43 }
0x2915   :  { %v18751_v44 = vpop.eup %18750 }
0x2916   :  { %10970 = vrot.lane.b32.xlu0 %v18751_v44, %s18755_s13 }
0x2988   :  { %v10971_v25 = vpop.permute.xlu0 %10970 }
0x2989   :  { %11198 = vmatmul.mubr.msk.f32.vlgmr.msra.gmra.mrb[12].mxu0 %vm1395_vm2, %v10971_v25 }
0x2a5c   :  { %v11040_v37 = vpop.f32.mrb[12].mxu0 }
0x2a5d   :  { %v11065_v11 = vadd.f32 %v11063_v42, %v11040_v37  ;;  %v11042_v53 = vpop.f32.mrb[13].mxu0  ;;  %v11054_v20 = vadd.f32 %v11199_v15, %v11040_v37 }
0x2a5e   :  { %v11066_v8 = vadd.f32 %v11063_v42, %v11042_v53 }
0x2a5f   :  { %v11067_v9 = vmax.f32 %v11065_v11, 0.0  ;;  %v11055_v48 = vmax.f32 %v11054_v20, 0.0 }
0x2a60   :  { %v11068_v14 = vmax.f32 %v11066_v8, 0.0 }
0x2a61   :  { %11071 = vrot.lane.b32.xlu0 %v11067_v9, %s18757_s0 }
0x2a62   :  { %11073 = vrot.lane.b32.xlu1 %v11068_v14, %s18757_s0 }
0x2ad3   :  { %v11072_v33 = vpop.permute.xlu0 %11071 }
0x2ad4   :  { %v11074_v30 = vpop.permute.xlu1 %11073 }
0x2ad5   :  { %v11076_v38 = vsel %vm11075_vm3, %v11072_v33, %v11074_v30 }
0x2ad6   :  { %v11078_v39 = vadd.f32 %v11076_v38, %v11055_v48 }
0x2ad8   :  { %11080 = vst.msk [vmem:[%s23611_s5] sm:$0xff] %vm11079_vm4, %v11078_v39 }

</bundles_post_ra>
